<compile_context>
chip_gen: v5e
topology: v5e:2x2
jax: 0.10.0
libtpu: 0.0.40
codegen_flags: <defaults>
</compile_context>

<pallas_src>
import functools

import numpy as np

import jax
import jax.numpy as jnp
from jax.experimental import pallas as pl
from jax.experimental.pallas import tpu as pltpu


def _softplus_torch(x):
    # PyTorch nn.Softplus default: beta=1, threshold=20.
    return jnp.where(x > 20.0, x, jnp.log1p(jnp.exp(jnp.minimum(x, 20.0))))


def _round_up(v, m):
    return ((v + m - 1) // m) * m


def _club_nce_kernel(a_t_ref, b_ref, b2_ref,
                     lse_ref, rowsum_ref, diag_ref,
                     m_sc, l_sc, rs_sc, dg_sc,
                     *, n, n_pos, mask_last):
    """One (TI, TJ) tile of T1[i, j].

    a_t_ref : (Hp, TJ)  |w2|-scaled, sign-permuted x-activations, j on lanes
    b_ref   : (TI, Hp)  |w2|-scaled, sign-permuted y-activations (+ b1)
    b2_ref  : (1,)      second-layer bias (SMEM scalar)
    outputs : per-row logsumexp_j, sum_j, diagonal value  (all (TI, 1))
    """
    i = pl.program_id(0)
    j = pl.program_id(1)
    num_j = pl.num_programs(1)

    ti, hp = b_ref.shape
    tj = a_t_ref.shape[1]

    @pl.when(j == 0)
    def _init():
        m_sc[...] = jnp.full_like(m_sc, -jnp.inf)
        l_sc[...] = jnp.zeros_like(l_sc)
        rs_sc[...] = jnp.zeros_like(rs_sc)
        dg_sc[...] = jnp.zeros_like(dg_sc)

    # ---- H contraction on the VPU, one hidden unit at a time. ----------------
    # pre[r, c] = sum_{h<n_pos} relu(b[r,h] + a[h,c]) - sum_{h>=n_pos} relu(...)
    # (|w2| already folded into a/b; sign handled by the static loop split;
    #  padded tail rows of a/b are zero so they contribute exactly 0.)
    # Only (TI, TJ)-shaped temporaries are ever live -> stays in the vreg file.
    bv = b_ref[...]                                       # (TI, Hp), small
    acc = jnp.zeros((ti, tj), jnp.float32)
    for h in range(hp):                                   # static, fully unrolled
        s = jnp.maximum(bv[:, h:h + 1] + a_t_ref[pl.ds(h, 1), :], 0.0)
        acc = acc + s if h < n_pos else acc - s
    pre = acc + b2_ref[0]

    t1 = _softplus_torch(pre)                             # (TI, TJ)

    # ---- online logsumexp over j + running row sums. -------------------------
    def _update(t_lse, t_sum):
        m_prev = m_sc[...]
        m_new = jnp.maximum(m_prev, jnp.max(t_lse, axis=1, keepdims=True))
        alpha = jnp.exp(m_prev - m_new)                   # exp(-inf)=0 on 1st step
        l_sc[...] = alpha * l_sc[...] + jnp.sum(jnp.exp(t_lse - m_new),
                                                axis=1, keepdims=True)
        m_sc[...] = m_new
        rs_sc[...] = rs_sc[...] + jnp.sum(t_sum, axis=1, keepdims=True)

    if mask_last:
        # Column padding only exists on the last j-tile: mask there only.
        @pl.when(j != num_j - 1)
        def _interior():
            _update(t1, t1)

        @pl.when(j == num_j - 1)
        def _last():
            col = j * tj + jax.lax.broadcasted_iota(jnp.int32, (ti, tj), 1)
            valid = col < n
            _update(jnp.where(valid, t1, -jnp.inf), jnp.where(valid, t1, 0.0))
    else:
        _update(t1, t1)

    # ---- diagonal (T0) only on tiles that actually cross the diagonal. -------
    @pl.when((i * ti < (j + 1) * tj) & (j * tj < (i + 1) * ti))
    def _diag():
        row = i * ti + jax.lax.broadcasted_iota(jnp.int32, (ti, tj), 0)
        col = j * tj + jax.lax.broadcasted_iota(jnp.int32, (ti, tj), 1)
        dg_sc[...] = dg_sc[...] + jnp.sum(
            jnp.where(row == col, t1, 0.0), axis=1, keepdims=True)

    # ---- finalize this i-tile after the last j-tile. --------------------------
    @pl.when(j == num_j - 1)
    def _fin():
        lse_ref[...] = m_sc[...] + jnp.log(l_sc[...])
        rowsum_ref[...] = rs_sc[...]
        diag_ref[...] = dg_sc[...]


def club_nce_forward(x, y, w1, b1, w2, b2, *, ti=64, tj=256):
    """x, y: (N, D) f32.  w1: (2D, H), b1: (H,), w2: (H, 1), b2: scalar.

    Linear weights are stored (in_features, out_features): each layer computes
    u @ W + b (same function family as nn.Linear).

    Tiles: TI rows (multiple of 8) x TJ cols (multiple of 128).  VMEM use per
    grid step is only the double-buffered (Hp,TJ)/(TI,Hp) operand blocks plus
    (TI,1) scratch, so the defaults fit comfortably on v5e/v6e (128 MiB) and
    v7x (64 MiB); on v5e/v6e larger tj (512-1024) amortizes grid-step overhead
    further.
    """
    n, d = x.shape
    h = w1.shape[1]
    assert w1.shape[0] == 2 * d
    assert w2.shape[0] == h
    assert ti % 8 == 0 and tj % 128 == 0

    x = x.astype(jnp.float32)
    y = y.astype(jnp.float32)
    w1 = jnp.asarray(w1, jnp.float32)
    b1 = jnp.asarray(b1, jnp.float32)

    # Sign/magnitude split of w2 (host-side -> static loop split in the kernel).
    w2_np = np.asarray(jax.device_get(w2), np.float32).reshape(-1)
    pos_idx = np.nonzero(w2_np >= 0.0)[0]
    neg_idx = np.nonzero(w2_np < 0.0)[0]
    perm = np.concatenate([pos_idx, neg_idx]).astype(np.int32)
    n_pos = int(pos_idx.size)
    w2_abs = jnp.asarray(np.abs(w2_np)[perm])                          # (H,)

    # First Linear, split over the concatenated input (cheap O(N*D*H), XLA):
    #   cat([x_j, y_i]) @ W1 = x_j @ W1x + y_i @ W1y
    a = jnp.dot(x, w1[:d], preferred_element_type=jnp.float32)         # (N, H)
    b = jnp.dot(y, w1[d:], preferred_element_type=jnp.float32) + b1    # (N, H)
    # Fold |w2| into the operands, permute hidden units by sign(w2):
    a = a[:, perm] * w2_abs[None, :]
    b = b[:, perm] * w2_abs[None, :]

    hp = _round_up(h, 8)              # sublane-aligned hidden dim (NOT 128)
    ni = _round_up(n, ti)
    nj = _round_up(n, tj)

    a_t = jnp.pad(a.T, ((0, hp - h), (0, nj - n)))                     # (Hp, Nj)
    b_p = jnp.pad(b, ((0, ni - n), (0, hp - h)))                       # (Ni, Hp)
    b2_s = jnp.asarray(b2, jnp.float32).reshape(1)                     # (1,) SMEM

    grid = (ni // ti, nj // tj)
    mask_last = (n % tj) != 0
    kernel = functools.partial(_club_nce_kernel, n=n, n_pos=n_pos,
                               mask_last=mask_last)

    # NOTE: a_t j-tiles are re-fetched once per i-tile; the kernel is compute
    # bound by >10x so this redundant HBM traffic is left as-is.
    lse_rows, row_sums, diag = pl.pallas_call(
        kernel,
        out_shape=(
            jax.ShapeDtypeStruct((ni, 1), jnp.float32),
            jax.ShapeDtypeStruct((ni, 1), jnp.float32),
            jax.ShapeDtypeStruct((ni, 1), jnp.float32),
        ),
        grid_spec=pltpu.PrefetchScalarGridSpec(
            num_scalar_prefetch=0,
            grid=grid,
            in_specs=[
                pl.BlockSpec((hp, tj), lambda i, j: (0, j)),        # a_t: j-tiled
                pl.BlockSpec((ti, hp), lambda i, j: (i, 0)),        # b:   i-tiled
                pl.BlockSpec(memory_space=pltpu.MemorySpace.SMEM),  # b2 scalar
            ],
            out_specs=(
                pl.BlockSpec((ti, 1), lambda i, j: (i, 0)),         # per-row lse
                pl.BlockSpec((ti, 1), lambda i, j: (i, 0)),         # per-row sum
                pl.BlockSpec((ti, 1), lambda i, j: (i, 0)),         # diagonal
            ),
            scratch_shapes=[
                pltpu.VMEM((ti, 1), jnp.float32),   # running max
                pltpu.VMEM((ti, 1), jnp.float32),   # running sum of exp
                pltpu.VMEM((ti, 1), jnp.float32),   # running row sum
                pltpu.VMEM((ti, 1), jnp.float32),   # diagonal accumulator
            ],
        ),
        # On v7x, pltpu.CORE_PARALLEL on the i axis shards across the 2 TCs.
        compiler_params=pltpu.CompilerParams(
            dimension_semantics=("parallel", "arbitrary"),
        ),
    )(a_t, b_p, b2_s)

    n_f = jnp.float32(n)
    t0_mean = jnp.mean(diag[:n, 0])
    lse_mean = jnp.mean(lse_rows[:n, 0])
    t1_mean = jnp.sum(row_sums[:n, 0]) / (n_f * n_f)

    lower_bound = t0_mean - (lse_mean - jnp.log(n_f))
    upper_bound = t0_mean - t1_mean
    return lower_bound, upper_bound


def club_nce_reference(x, y, w1, b1, w2, b2):
    n = x.shape[0]

    def f_func(inp):
        hdn = jnp.maximum(inp @ w1 + b1, 0.0)
        return _softplus_torch(hdn @ w2 + b2)

    t0 = f_func(jnp.concatenate([x, y], axis=-1))                      # (N, 1)
    x_tile = jnp.broadcast_to(x[None, :, :], (n, n, x.shape[1]))
    y_tile = jnp.broadcast_to(y[:, None, :], (n, n, y.shape[1]))
    t1 = f_func(jnp.concatenate([x_tile, y_tile], axis=-1))            # (N, N, 1)
    lse = jax.scipy.special.logsumexp(t1[..., 0], axis=1)              # (N,)
    lb = t0.mean() - (lse.mean() - jnp.log(jnp.float32(n)))
    ub = t0.mean() - t1.mean()
    return lb, ub


if __name__ == "__main__":
    # emb_dim = 68 -> lstm_hidden_dim = 34
    #   F_func: Linear(136, 68) -> ReLU -> Linear(68, 1) -> Softplus
    # h_dim = 68 (not a multiple of 8) exercises the sublane padding of H.
    emb_dim = 68
    hid = emb_dim // 2              # 34
    in_dim = hid * 4                # 136 (concat of two emb_dim vectors)
    h_dim = hid * 2                 # 68
    n = 160                         # exercises i/j tiling, last-tile column
                                    # masking, multi-tile online logsumexp,
                                    # padded rows and diagonal gating

    key = jax.random.PRNGKey(0)
    kx, ky, kw1, kb1, kw2, kb2 = jax.random.split(key, 6)

    x = jax.random.normal(kx, (n, emb_dim), dtype=jnp.float32)
    y = jax.random.normal(ky, (n, emb_dim), dtype=jnp.float32)

    # Deterministic synthetic parameters (shapes match the nn.Linear layers,
    # stored (in_features, out_features)).
    w1 = jax.random.normal(kw1, (in_dim, h_dim), dtype=jnp.float32) * 0.1
    b1 = jax.random.normal(kb1, (h_dim,), dtype=jnp.float32) * 0.1
    w2 = jax.random.normal(kw2, (h_dim, 1), dtype=jnp.float32) * 0.1
    b2 = jax.random.normal(kb2, (), dtype=jnp.float32) * 0.1

    # tj=128 so the online-logsumexp accumulation runs across 2 j-tiles and the
    # last tile carries padded columns (160 % 128 != 0).
    lb, ub = club_nce_forward(x, y, w1, b1, w2, b2, ti=64, tj=128)
    jax.block_until_ready((lb, ub))

    lb_ref, ub_ref = club_nce_reference(x, y, w1, b1, w2, b2)
    assert jnp.allclose(lb, lb_ref, rtol=1e-4, atol=1e-4), (lb, lb_ref)
    assert jnp.allclose(ub, ub_ref, rtol=1e-4, atol=1e-4), (ub, ub_ref)

    print("KERNEL_OK")
</pallas_src>

<mosaic_0001>
module attributes {stable_mosaic.version = 11 : i64} {
  func.func @_club_nce_kernel(%arg0: i32, %arg1: i32, %arg2: memref<72x128xf32, #tpu.memory_space<vmem>>, %arg3: memref<64x72xf32, #tpu.memory_space<vmem>>, %arg4: memref<1xf32, #tpu.memory_space<smem>>, %arg5: memref<64x1xf32, #tpu.memory_space<vmem>>, %arg6: memref<64x1xf32, #tpu.memory_space<vmem>>, %arg7: memref<64x1xf32, #tpu.memory_space<vmem>>, %arg8: memref<64x1xf32, #tpu.memory_space<vmem>>, %arg9: memref<64x1xf32, #tpu.memory_space<vmem>>, %arg10: memref<64x1xf32, #tpu.memory_space<vmem>>, %arg11: memref<64x1xf32, #tpu.memory_space<vmem>>) attributes {dimension_semantics = [#tpu.dimension_semantics<parallel>, #tpu.dimension_semantics<arbitrary>], iteration_bounds = array<i64: 3, 2>, scalar_prefetch = 0 : i64, scratch_operands = 4 : i64, tpu.core_type = #tpu.core_type<tc>, window_params = [{transform_indices = @transform_0, window_bounds = array<i64: 72, 128>}, {transform_indices = @transform_1, window_bounds = array<i64: 64, 72>}, {transform_indices = @transform_2, window_bounds = array<i64: 1>}, {transform_indices = @transform_3, window_bounds = array<i64: 64, 1>}, {transform_indices = @transform_4, window_bounds = array<i64: 64, 1>}, {transform_indices = @transform_5, window_bounds = array<i64: 64, 1>}]} {
    %c0_i32 = arith.constant 0 : i32
    %0 = arith.cmpi eq, %arg1, %c0_i32 : i32
    %1 = arith.extui %0 : i1 to i32
    %c0_i32_0 = arith.constant 0 : i32
    %2 = arith.cmpi ne, %1, %c0_i32_0 : i32
    scf.if %2 {
      %cst_160 = arith.constant 0xFF800000 : f32
      %611 = vector.broadcast %cst_160 : f32 to vector<64x1xf32>
      %c0_161 = arith.constant 0 : index
      %c0_162 = arith.constant 0 : index
      %612 = vector.load %arg8[%c0_161, %c0_162] : memref<64x1xf32, #tpu.memory_space<vmem>>, vector<64x1xf32>
      tpu.vector_store %arg8[%c0_161, %c0_162], %611 {strides = array<i32>} : memref<64x1xf32, #tpu.memory_space<vmem>>, vector<64x1xf32>,
      %cst_163 = arith.constant 0.000000e+00 : f32
      %613 = vector.broadcast %cst_163 : f32 to vector<64x1xf32>
      %c0_164 = arith.constant 0 : index
      %c0_165 = arith.constant 0 : index
      %614 = vector.load %arg9[%c0_164, %c0_165] : memref<64x1xf32, #tpu.memory_space<vmem>>, vector<64x1xf32>
      tpu.vector_store %arg9[%c0_164, %c0_165], %613 {strides = array<i32>} : memref<64x1xf32, #tpu.memory_space<vmem>>, vector<64x1xf32>,
      %cst_166 = arith.constant 0.000000e+00 : f32
      %615 = vector.broadcast %cst_166 : f32 to vector<64x1xf32>
      %c0_167 = arith.constant 0 : index
      %c0_168 = arith.constant 0 : index
      %616 = vector.load %arg10[%c0_167, %c0_168] : memref<64x1xf32, #tpu.memory_space<vmem>>, vector<64x1xf32>
      tpu.vector_store %arg10[%c0_167, %c0_168], %615 {strides = array<i32>} : memref<64x1xf32, #tpu.memory_space<vmem>>, vector<64x1xf32>,
      %cst_169 = arith.constant 0.000000e+00 : f32
      %617 = vector.broadcast %cst_169 : f32 to vector<64x1xf32>
      %c0_170 = arith.constant 0 : index
      %c0_171 = arith.constant 0 : index
      %618 = vector.load %arg11[%c0_170, %c0_171] : memref<64x1xf32, #tpu.memory_space<vmem>>, vector<64x1xf32>
      tpu.vector_store %arg11[%c0_170, %c0_171], %617 {strides = array<i32>} : memref<64x1xf32, #tpu.memory_space<vmem>>, vector<64x1xf32>,
    } else {
    }
    %c0 = arith.constant 0 : index
    %c0_1 = arith.constant 0 : index
    %3 = vector.load %arg3[%c0, %c0_1] : memref<64x72xf32, #tpu.memory_space<vmem>>, vector<64x72xf32>
    %cst = arith.constant 0.000000e+00 : f32
    %4 = vector.broadcast %cst : f32 to vector<64x128xf32>
    %5 = vector.extract_strided_slice %3 {offsets = [0, 0], sizes = [64, 1], strides = [1, 1]} : vector<64x72xf32> to vector<64x1xf32>
    %c0_2 = arith.constant 0 : index
    %c0_3 = arith.constant 0 : index
    %6 = vector.load %arg2[%c0_2, %c0_3] : memref<72x128xf32, #tpu.memory_space<vmem>>, vector<1x128xf32>
    %7 = vector.broadcast %5 : vector<64x1xf32> to vector<64x128xf32>
    %8 = vector.broadcast %6 : vector<1x128xf32> to vector<64x128xf32>
    %9 = arith.addf %7, %8 : vector<64x128xf32>
    %cst_4 = arith.constant 0.000000e+00 : f32
    %10 = vector.broadcast %cst_4 : f32 to vector<64x128xf32>
    %11 = arith.maximumf %9, %10 : vector<64x128xf32>
    %12 = arith.addf %4, %11 : vector<64x128xf32>
    %13 = vector.extract_strided_slice %3 {offsets = [0, 1], sizes = [64, 1], strides = [1, 1]} : vector<64x72xf32> to vector<64x1xf32>
    %c1 = arith.constant 1 : index
    %c0_5 = arith.constant 0 : index
    %14 = vector.load %arg2[%c1, %c0_5] : memref<72x128xf32, #tpu.memory_space<vmem>>, vector<1x128xf32>
    %15 = vector.broadcast %13 : vector<64x1xf32> to vector<64x128xf32>
    %16 = vector.broadcast %14 : vector<1x128xf32> to vector<64x128xf32>
    %17 = arith.addf %15, %16 : vector<64x128xf32>
    %cst_6 = arith.constant 0.000000e+00 : f32
    %18 = vector.broadcast %cst_6 : f32 to vector<64x128xf32>
    %19 = arith.maximumf %17, %18 : vector<64x128xf32>
    %20 = arith.addf %12, %19 : vector<64x128xf32>
    %21 = vector.extract_strided_slice %3 {offsets = [0, 2], sizes = [64, 1], strides = [1, 1]} : vector<64x72xf32> to vector<64x1xf32>
    %c2 = arith.constant 2 : index
    %c0_7 = arith.constant 0 : index
    %22 = vector.load %arg2[%c2, %c0_7] : memref<72x128xf32, #tpu.memory_space<vmem>>, vector<1x128xf32>
    %23 = vector.broadcast %21 : vector<64x1xf32> to vector<64x128xf32>
    %24 = vector.broadcast %22 : vector<1x128xf32> to vector<64x128xf32>
    %25 = arith.addf %23, %24 : vector<64x128xf32>
    %cst_8 = arith.constant 0.000000e+00 : f32
    %26 = vector.broadcast %cst_8 : f32 to vector<64x128xf32>
    %27 = arith.maximumf %25, %26 : vector<64x128xf32>
    %28 = arith.addf %20, %27 : vector<64x128xf32>
    %29 = vector.extract_strided_slice %3 {offsets = [0, 3], sizes = [64, 1], strides = [1, 1]} : vector<64x72xf32> to vector<64x1xf32>
    %c3 = arith.constant 3 : index
    %c0_9 = arith.constant 0 : index
    %30 = vector.load %arg2[%c3, %c0_9] : memref<72x128xf32, #tpu.memory_space<vmem>>, vector<1x128xf32>
    %31 = vector.broadcast %29 : vector<64x1xf32> to vector<64x128xf32>
    %32 = vector.broadcast %30 : vector<1x128xf32> to vector<64x128xf32>
    %33 = arith.addf %31, %32 : vector<64x128xf32>
    %cst_10 = arith.constant 0.000000e+00 : f32
    %34 = vector.broadcast %cst_10 : f32 to vector<64x128xf32>
    %35 = arith.maximumf %33, %34 : vector<64x128xf32>
    %36 = arith.addf %28, %35 : vector<64x128xf32>
    %37 = vector.extract_strided_slice %3 {offsets = [0, 4], sizes = [64, 1], strides = [1, 1]} : vector<64x72xf32> to vector<64x1xf32>
    %c4 = arith.constant 4 : index
    %c0_11 = arith.constant 0 : index
    %38 = vector.load %arg2[%c4, %c0_11] : memref<72x128xf32, #tpu.memory_space<vmem>>, vector<1x128xf32>
    %39 = vector.broadcast %37 : vector<64x1xf32> to vector<64x128xf32>
    %40 = vector.broadcast %38 : vector<1x128xf32> to vector<64x128xf32>
    %41 = arith.addf %39, %40 : vector<64x128xf32>
    %cst_12 = arith.constant 0.000000e+00 : f32
    %42 = vector.broadcast %cst_12 : f32 to vector<64x128xf32>
    %43 = arith.maximumf %41, %42 : vector<64x128xf32>
    %44 = arith.addf %36, %43 : vector<64x128xf32>
    %45 = vector.extract_strided_slice %3 {offsets = [0, 5], sizes = [64, 1], strides = [1, 1]} : vector<64x72xf32> to vector<64x1xf32>
    %c5 = arith.constant 5 : index
    %c0_13 = arith.constant 0 : index
    %46 = vector.load %arg2[%c5, %c0_13] : memref<72x128xf32, #tpu.memory_space<vmem>>, vector<1x128xf32>
    %47 = vector.broadcast %45 : vector<64x1xf32> to vector<64x128xf32>
    %48 = vector.broadcast %46 : vector<1x128xf32> to vector<64x128xf32>
    %49 = arith.addf %47, %48 : vector<64x128xf32>
    %cst_14 = arith.constant 0.000000e+00 : f32
    %50 = vector.broadcast %cst_14 : f32 to vector<64x128xf32>
    %51 = arith.maximumf %49, %50 : vector<64x128xf32>
    %52 = arith.addf %44, %51 : vector<64x128xf32>
    %53 = vector.extract_strided_slice %3 {offsets = [0, 6], sizes = [64, 1], strides = [1, 1]} : vector<64x72xf32> to vector<64x1xf32>
    %c6 = arith.constant 6 : index
    %c0_15 = arith.constant 0 : index
    %54 = vector.load %arg2[%c6, %c0_15] : memref<72x128xf32, #tpu.memory_space<vmem>>, vector<1x128xf32>
    %55 = vector.broadcast %53 : vector<64x1xf32> to vector<64x128xf32>
    %56 = vector.broadcast %54 : vector<1x128xf32> to vector<64x128xf32>
    %57 = arith.addf %55, %56 : vector<64x128xf32>
    %cst_16 = arith.constant 0.000000e+00 : f32
    %58 = vector.broadcast %cst_16 : f32 to vector<64x128xf32>
    %59 = arith.maximumf %57, %58 : vector<64x128xf32>
    %60 = arith.addf %52, %59 : vector<64x128xf32>
    %61 = vector.extract_strided_slice %3 {offsets = [0, 7], sizes = [64, 1], strides = [1, 1]} : vector<64x72xf32> to vector<64x1xf32>
    %c7 = arith.constant 7 : index
    %c0_17 = arith.constant 0 : index
    %62 = vector.load %arg2[%c7, %c0_17] : memref<72x128xf32, #tpu.memory_space<vmem>>, vector<1x128xf32>
    %63 = vector.broadcast %61 : vector<64x1xf32> to vector<64x128xf32>
    %64 = vector.broadcast %62 : vector<1x128xf32> to vector<64x128xf32>
    %65 = arith.addf %63, %64 : vector<64x128xf32>
    %cst_18 = arith.constant 0.000000e+00 : f32
    %66 = vector.broadcast %cst_18 : f32 to vector<64x128xf32>
    %67 = arith.maximumf %65, %66 : vector<64x128xf32>
    %68 = arith.addf %60, %67 : vector<64x128xf32>
    %69 = vector.extract_strided_slice %3 {offsets = [0, 8], sizes = [64, 1], strides = [1, 1]} : vector<64x72xf32> to vector<64x1xf32>
    %c8 = arith.constant 8 : index
    %c0_19 = arith.constant 0 : index
    %70 = vector.load %arg2[%c8, %c0_19] : memref<72x128xf32, #tpu.memory_space<vmem>>, vector<1x128xf32>
    %71 = vector.broadcast %69 : vector<64x1xf32> to vector<64x128xf32>
    %72 = vector.broadcast %70 : vector<1x128xf32> to vector<64x128xf32>
    %73 = arith.addf %71, %72 : vector<64x128xf32>
    %cst_20 = arith.constant 0.000000e+00 : f32
    %74 = vector.broadcast %cst_20 : f32 to vector<64x128xf32>
    %75 = arith.maximumf %73, %74 : vector<64x128xf32>
    %76 = arith.addf %68, %75 : vector<64x128xf32>
    %77 = vector.extract_strided_slice %3 {offsets = [0, 9], sizes = [64, 1], strides = [1, 1]} : vector<64x72xf32> to vector<64x1xf32>
    %c9 = arith.constant 9 : index
    %c0_21 = arith.constant 0 : index
    %78 = vector.load %arg2[%c9, %c0_21] : memref<72x128xf32, #tpu.memory_space<vmem>>, vector<1x128xf32>
    %79 = vector.broadcast %77 : vector<64x1xf32> to vector<64x128xf32>
    %80 = vector.broadcast %78 : vector<1x128xf32> to vector<64x128xf32>
    %81 = arith.addf %79, %80 : vector<64x128xf32>
    %cst_22 = arith.constant 0.000000e+00 : f32
    %82 = vector.broadcast %cst_22 : f32 to vector<64x128xf32>
    %83 = arith.maximumf %81, %82 : vector<64x128xf32>
    %84 = arith.addf %76, %83 : vector<64x128xf32>
    %85 = vector.extract_strided_slice %3 {offsets = [0, 10], sizes = [64, 1], strides = [1, 1]} : vector<64x72xf32> to vector<64x1xf32>
    %c10 = arith.constant 10 : index
    %c0_23 = arith.constant 0 : index
    %86 = vector.load %arg2[%c10, %c0_23] : memref<72x128xf32, #tpu.memory_space<vmem>>, vector<1x128xf32>
    %87 = vector.broadcast %85 : vector<64x1xf32> to vector<64x128xf32>
    %88 = vector.broadcast %86 : vector<1x128xf32> to vector<64x128xf32>
    %89 = arith.addf %87, %88 : vector<64x128xf32>
    %cst_24 = arith.constant 0.000000e+00 : f32
    %90 = vector.broadcast %cst_24 : f32 to vector<64x128xf32>
    %91 = arith.maximumf %89, %90 : vector<64x128xf32>
    %92 = arith.addf %84, %91 : vector<64x128xf32>
    %93 = vector.extract_strided_slice %3 {offsets = [0, 11], sizes = [64, 1], strides = [1, 1]} : vector<64x72xf32> to vector<64x1xf32>
    %c11 = arith.constant 11 : index
    %c0_25 = arith.constant 0 : index
    %94 = vector.load %arg2[%c11, %c0_25] : memref<72x128xf32, #tpu.memory_space<vmem>>, vector<1x128xf32>
    %95 = vector.broadcast %93 : vector<64x1xf32> to vector<64x128xf32>
    %96 = vector.broadcast %94 : vector<1x128xf32> to vector<64x128xf32>
    %97 = arith.addf %95, %96 : vector<64x128xf32>
    %cst_26 = arith.constant 0.000000e+00 : f32
    %98 = vector.broadcast %cst_26 : f32 to vector<64x128xf32>
    %99 = arith.maximumf %97, %98 : vector<64x128xf32>
    %100 = arith.addf %92, %99 : vector<64x128xf32>
    %101 = vector.extract_strided_slice %3 {offsets = [0, 12], sizes = [64, 1], strides = [1, 1]} : vector<64x72xf32> to vector<64x1xf32>
    %c12 = arith.constant 12 : index
    %c0_27 = arith.constant 0 : index
    %102 = vector.load %arg2[%c12, %c0_27] : memref<72x128xf32, #tpu.memory_space<vmem>>, vector<1x128xf32>
    %103 = vector.broadcast %101 : vector<64x1xf32> to vector<64x128xf32>
    %104 = vector.broadcast %102 : vector<1x128xf32> to vector<64x128xf32>
    %105 = arith.addf %103, %104 : vector<64x128xf32>
    %cst_28 = arith.constant 0.000000e+00 : f32
    %106 = vector.broadcast %cst_28 : f32 to vector<64x128xf32>
    %107 = arith.maximumf %105, %106 : vector<64x128xf32>
    %108 = arith.addf %100, %107 : vector<64x128xf32>
    %109 = vector.extract_strided_slice %3 {offsets = [0, 13], sizes = [64, 1], strides = [1, 1]} : vector<64x72xf32> to vector<64x1xf32>
    %c13 = arith.constant 13 : index
    %c0_29 = arith.constant 0 : index
    %110 = vector.load %arg2[%c13, %c0_29] : memref<72x128xf32, #tpu.memory_space<vmem>>, vector<1x128xf32>
    %111 = vector.broadcast %109 : vector<64x1xf32> to vector<64x128xf32>
    %112 = vector.broadcast %110 : vector<1x128xf32> to vector<64x128xf32>
    %113 = arith.addf %111, %112 : vector<64x128xf32>
    %cst_30 = arith.constant 0.000000e+00 : f32
    %114 = vector.broadcast %cst_30 : f32 to vector<64x128xf32>
    %115 = arith.maximumf %113, %114 : vector<64x128xf32>
    %116 = arith.addf %108, %115 : vector<64x128xf32>
    %117 = vector.extract_strided_slice %3 {offsets = [0, 14], sizes = [64, 1], strides = [1, 1]} : vector<64x72xf32> to vector<64x1xf32>
    %c14 = arith.constant 14 : index
    %c0_31 = arith.constant 0 : index
    %118 = vector.load %arg2[%c14, %c0_31] : memref<72x128xf32, #tpu.memory_space<vmem>>, vector<1x128xf32>
    %119 = vector.broadcast %117 : vector<64x1xf32> to vector<64x128xf32>
    %120 = vector.broadcast %118 : vector<1x128xf32> to vector<64x128xf32>
    %121 = arith.addf %119, %120 : vector<64x128xf32>
    %cst_32 = arith.constant 0.000000e+00 : f32
    %122 = vector.broadcast %cst_32 : f32 to vector<64x128xf32>
    %123 = arith.maximumf %121, %122 : vector<64x128xf32>
    %124 = arith.addf %116, %123 : vector<64x128xf32>
    %125 = vector.extract_strided_slice %3 {offsets = [0, 15], sizes = [64, 1], strides = [1, 1]} : vector<64x72xf32> to vector<64x1xf32>
    %c15 = arith.constant 15 : index
    %c0_33 = arith.constant 0 : index
    %126 = vector.load %arg2[%c15, %c0_33] : memref<72x128xf32, #tpu.memory_space<vmem>>, vector<1x128xf32>
    %127 = vector.broadcast %125 : vector<64x1xf32> to vector<64x128xf32>
    %128 = vector.broadcast %126 : vector<1x128xf32> to vector<64x128xf32>
    %129 = arith.addf %127, %128 : vector<64x128xf32>
    %cst_34 = arith.constant 0.000000e+00 : f32
    %130 = vector.broadcast %cst_34 : f32 to vector<64x128xf32>
    %131 = arith.maximumf %129, %130 : vector<64x128xf32>
    %132 = arith.addf %124, %131 : vector<64x128xf32>
    %133 = vector.extract_strided_slice %3 {offsets = [0, 16], sizes = [64, 1], strides = [1, 1]} : vector<64x72xf32> to vector<64x1xf32>
    %c16 = arith.constant 16 : index
    %c0_35 = arith.constant 0 : index
    %134 = vector.load %arg2[%c16, %c0_35] : memref<72x128xf32, #tpu.memory_space<vmem>>, vector<1x128xf32>
    %135 = vector.broadcast %133 : vector<64x1xf32> to vector<64x128xf32>
    %136 = vector.broadcast %134 : vector<1x128xf32> to vector<64x128xf32>
    %137 = arith.addf %135, %136 : vector<64x128xf32>
    %cst_36 = arith.constant 0.000000e+00 : f32
    %138 = vector.broadcast %cst_36 : f32 to vector<64x128xf32>
    %139 = arith.maximumf %137, %138 : vector<64x128xf32>
    %140 = arith.addf %132, %139 : vector<64x128xf32>
    %141 = vector.extract_strided_slice %3 {offsets = [0, 17], sizes = [64, 1], strides = [1, 1]} : vector<64x72xf32> to vector<64x1xf32>
    %c17 = arith.constant 17 : index
    %c0_37 = arith.constant 0 : index
    %142 = vector.load %arg2[%c17, %c0_37] : memref<72x128xf32, #tpu.memory_space<vmem>>, vector<1x128xf32>
    %143 = vector.broadcast %141 : vector<64x1xf32> to vector<64x128xf32>
    %144 = vector.broadcast %142 : vector<1x128xf32> to vector<64x128xf32>
    %145 = arith.addf %143, %144 : vector<64x128xf32>
    %cst_38 = arith.constant 0.000000e+00 : f32
    %146 = vector.broadcast %cst_38 : f32 to vector<64x128xf32>
    %147 = arith.maximumf %145, %146 : vector<64x128xf32>
    %148 = arith.addf %140, %147 : vector<64x128xf32>
    %149 = vector.extract_strided_slice %3 {offsets = [0, 18], sizes = [64, 1], strides = [1, 1]} : vector<64x72xf32> to vector<64x1xf32>
    %c18 = arith.constant 18 : index
    %c0_39 = arith.constant 0 : index
    %150 = vector.load %arg2[%c18, %c0_39] : memref<72x128xf32, #tpu.memory_space<vmem>>, vector<1x128xf32>
    %151 = vector.broadcast %149 : vector<64x1xf32> to vector<64x128xf32>
    %152 = vector.broadcast %150 : vector<1x128xf32> to vector<64x128xf32>
    %153 = arith.addf %151, %152 : vector<64x128xf32>
    %cst_40 = arith.constant 0.000000e+00 : f32
    %154 = vector.broadcast %cst_40 : f32 to vector<64x128xf32>
    %155 = arith.maximumf %153, %154 : vector<64x128xf32>
    %156 = arith.addf %148, %155 : vector<64x128xf32>
    %157 = vector.extract_strided_slice %3 {offsets = [0, 19], sizes = [64, 1], strides = [1, 1]} : vector<64x72xf32> to vector<64x1xf32>
    %c19 = arith.constant 19 : index
    %c0_41 = arith.constant 0 : index
    %158 = vector.load %arg2[%c19, %c0_41] : memref<72x128xf32, #tpu.memory_space<vmem>>, vector<1x128xf32>
    %159 = vector.broadcast %157 : vector<64x1xf32> to vector<64x128xf32>
    %160 = vector.broadcast %158 : vector<1x128xf32> to vector<64x128xf32>
    %161 = arith.addf %159, %160 : vector<64x128xf32>
    %cst_42 = arith.constant 0.000000e+00 : f32
    %162 = vector.broadcast %cst_42 : f32 to vector<64x128xf32>
    %163 = arith.maximumf %161, %162 : vector<64x128xf32>
    %164 = arith.addf %156, %163 : vector<64x128xf32>
    %165 = vector.extract_strided_slice %3 {offsets = [0, 20], sizes = [64, 1], strides = [1, 1]} : vector<64x72xf32> to vector<64x1xf32>
    %c20 = arith.constant 20 : index
    %c0_43 = arith.constant 0 : index
    %166 = vector.load %arg2[%c20, %c0_43] : memref<72x128xf32, #tpu.memory_space<vmem>>, vector<1x128xf32>
    %167 = vector.broadcast %165 : vector<64x1xf32> to vector<64x128xf32>
    %168 = vector.broadcast %166 : vector<1x128xf32> to vector<64x128xf32>
    %169 = arith.addf %167, %168 : vector<64x128xf32>
    %cst_44 = arith.constant 0.000000e+00 : f32
    %170 = vector.broadcast %cst_44 : f32 to vector<64x128xf32>
    %171 = arith.maximumf %169, %170 : vector<64x128xf32>
    %172 = arith.addf %164, %171 : vector<64x128xf32>
    %173 = vector.extract_strided_slice %3 {offsets = [0, 21], sizes = [64, 1], strides = [1, 1]} : vector<64x72xf32> to vector<64x1xf32>
    %c21 = arith.constant 21 : index
    %c0_45 = arith.constant 0 : index
    %174 = vector.load %arg2[%c21, %c0_45] : memref<72x128xf32, #tpu.memory_space<vmem>>, vector<1x128xf32>
    %175 = vector.broadcast %173 : vector<64x1xf32> to vector<64x128xf32>
    %176 = vector.broadcast %174 : vector<1x128xf32> to vector<64x128xf32>
    %177 = arith.addf %175, %176 : vector<64x128xf32>
    %cst_46 = arith.constant 0.000000e+00 : f32
    %178 = vector.broadcast %cst_46 : f32 to vector<64x128xf32>
    %179 = arith.maximumf %177, %178 : vector<64x128xf32>
    %180 = arith.addf %172, %179 : vector<64x128xf32>
    %181 = vector.extract_strided_slice %3 {offsets = [0, 22], sizes = [64, 1], strides = [1, 1]} : vector<64x72xf32> to vector<64x1xf32>
    %c22 = arith.constant 22 : index
    %c0_47 = arith.constant 0 : index
    %182 = vector.load %arg2[%c22, %c0_47] : memref<72x128xf32, #tpu.memory_space<vmem>>, vector<1x128xf32>
    %183 = vector.broadcast %181 : vector<64x1xf32> to vector<64x128xf32>
    %184 = vector.broadcast %182 : vector<1x128xf32> to vector<64x128xf32>
    %185 = arith.addf %183, %184 : vector<64x128xf32>
    %cst_48 = arith.constant 0.000000e+00 : f32
    %186 = vector.broadcast %cst_48 : f32 to vector<64x128xf32>
    %187 = arith.maximumf %185, %186 : vector<64x128xf32>
    %188 = arith.addf %180, %187 : vector<64x128xf32>
    %189 = vector.extract_strided_slice %3 {offsets = [0, 23], sizes = [64, 1], strides = [1, 1]} : vector<64x72xf32> to vector<64x1xf32>
    %c23 = arith.constant 23 : index
    %c0_49 = arith.constant 0 : index
    %190 = vector.load %arg2[%c23, %c0_49] : memref<72x128xf32, #tpu.memory_space<vmem>>, vector<1x128xf32>
    %191 = vector.broadcast %189 : vector<64x1xf32> to vector<64x128xf32>
    %192 = vector.broadcast %190 : vector<1x128xf32> to vector<64x128xf32>
    %193 = arith.addf %191, %192 : vector<64x128xf32>
    %cst_50 = arith.constant 0.000000e+00 : f32
    %194 = vector.broadcast %cst_50 : f32 to vector<64x128xf32>
    %195 = arith.maximumf %193, %194 : vector<64x128xf32>
    %196 = arith.addf %188, %195 : vector<64x128xf32>
    %197 = vector.extract_strided_slice %3 {offsets = [0, 24], sizes = [64, 1], strides = [1, 1]} : vector<64x72xf32> to vector<64x1xf32>
    %c24 = arith.constant 24 : index
    %c0_51 = arith.constant 0 : index
    %198 = vector.load %arg2[%c24, %c0_51] : memref<72x128xf32, #tpu.memory_space<vmem>>, vector<1x128xf32>
    %199 = vector.broadcast %197 : vector<64x1xf32> to vector<64x128xf32>
    %200 = vector.broadcast %198 : vector<1x128xf32> to vector<64x128xf32>
    %201 = arith.addf %199, %200 : vector<64x128xf32>
    %cst_52 = arith.constant 0.000000e+00 : f32
    %202 = vector.broadcast %cst_52 : f32 to vector<64x128xf32>
    %203 = arith.maximumf %201, %202 : vector<64x128xf32>
    %204 = arith.addf %196, %203 : vector<64x128xf32>
    %205 = vector.extract_strided_slice %3 {offsets = [0, 25], sizes = [64, 1], strides = [1, 1]} : vector<64x72xf32> to vector<64x1xf32>
    %c25 = arith.constant 25 : index
    %c0_53 = arith.constant 0 : index
    %206 = vector.load %arg2[%c25, %c0_53] : memref<72x128xf32, #tpu.memory_space<vmem>>, vector<1x128xf32>
    %207 = vector.broadcast %205 : vector<64x1xf32> to vector<64x128xf32>
    %208 = vector.broadcast %206 : vector<1x128xf32> to vector<64x128xf32>
    %209 = arith.addf %207, %208 : vector<64x128xf32>
    %cst_54 = arith.constant 0.000000e+00 : f32
    %210 = vector.broadcast %cst_54 : f32 to vector<64x128xf32>
    %211 = arith.maximumf %209, %210 : vector<64x128xf32>
    %212 = arith.addf %204, %211 : vector<64x128xf32>
    %213 = vector.extract_strided_slice %3 {offsets = [0, 26], sizes = [64, 1], strides = [1, 1]} : vector<64x72xf32> to vector<64x1xf32>
    %c26 = arith.constant 26 : index
    %c0_55 = arith.constant 0 : index
    %214 = vector.load %arg2[%c26, %c0_55] : memref<72x128xf32, #tpu.memory_space<vmem>>, vector<1x128xf32>
    %215 = vector.broadcast %213 : vector<64x1xf32> to vector<64x128xf32>
    %216 = vector.broadcast %214 : vector<1x128xf32> to vector<64x128xf32>
    %217 = arith.addf %215, %216 : vector<64x128xf32>
    %cst_56 = arith.constant 0.000000e+00 : f32
    %218 = vector.broadcast %cst_56 : f32 to vector<64x128xf32>
    %219 = arith.maximumf %217, %218 : vector<64x128xf32>
    %220 = arith.addf %212, %219 : vector<64x128xf32>
    %221 = vector.extract_strided_slice %3 {offsets = [0, 27], sizes = [64, 1], strides = [1, 1]} : vector<64x72xf32> to vector<64x1xf32>
    %c27 = arith.constant 27 : index
    %c0_57 = arith.constant 0 : index
    %222 = vector.load %arg2[%c27, %c0_57] : memref<72x128xf32, #tpu.memory_space<vmem>>, vector<1x128xf32>
    %223 = vector.broadcast %221 : vector<64x1xf32> to vector<64x128xf32>
    %224 = vector.broadcast %222 : vector<1x128xf32> to vector<64x128xf32>
    %225 = arith.addf %223, %224 : vector<64x128xf32>
    %cst_58 = arith.constant 0.000000e+00 : f32
    %226 = vector.broadcast %cst_58 : f32 to vector<64x128xf32>
    %227 = arith.maximumf %225, %226 : vector<64x128xf32>
    %228 = arith.addf %220, %227 : vector<64x128xf32>
    %229 = vector.extract_strided_slice %3 {offsets = [0, 28], sizes = [64, 1], strides = [1, 1]} : vector<64x72xf32> to vector<64x1xf32>
    %c28 = arith.constant 28 : index
    %c0_59 = arith.constant 0 : index
    %230 = vector.load %arg2[%c28, %c0_59] : memref<72x128xf32, #tpu.memory_space<vmem>>, vector<1x128xf32>
    %231 = vector.broadcast %229 : vector<64x1xf32> to vector<64x128xf32>
    %232 = vector.broadcast %230 : vector<1x128xf32> to vector<64x128xf32>
    %233 = arith.addf %231, %232 : vector<64x128xf32>
    %cst_60 = arith.constant 0.000000e+00 : f32
    %234 = vector.broadcast %cst_60 : f32 to vector<64x128xf32>
    %235 = arith.maximumf %233, %234 : vector<64x128xf32>
    %236 = arith.addf %228, %235 : vector<64x128xf32>
    %237 = vector.extract_strided_slice %3 {offsets = [0, 29], sizes = [64, 1], strides = [1, 1]} : vector<64x72xf32> to vector<64x1xf32>
    %c29 = arith.constant 29 : index
    %c0_61 = arith.constant 0 : index
    %238 = vector.load %arg2[%c29, %c0_61] : memref<72x128xf32, #tpu.memory_space<vmem>>, vector<1x128xf32>
    %239 = vector.broadcast %237 : vector<64x1xf32> to vector<64x128xf32>
    %240 = vector.broadcast %238 : vector<1x128xf32> to vector<64x128xf32>
    %241 = arith.addf %239, %240 : vector<64x128xf32>
    %cst_62 = arith.constant 0.000000e+00 : f32
    %242 = vector.broadcast %cst_62 : f32 to vector<64x128xf32>
    %243 = arith.maximumf %241, %242 : vector<64x128xf32>
    %244 = arith.subf %236, %243 : vector<64x128xf32>
    %245 = vector.extract_strided_slice %3 {offsets = [0, 30], sizes = [64, 1], strides = [1, 1]} : vector<64x72xf32> to vector<64x1xf32>
    %c30 = arith.constant 30 : index
    %c0_63 = arith.constant 0 : index
    %246 = vector.load %arg2[%c30, %c0_63] : memref<72x128xf32, #tpu.memory_space<vmem>>, vector<1x128xf32>
    %247 = vector.broadcast %245 : vector<64x1xf32> to vector<64x128xf32>
    %248 = vector.broadcast %246 : vector<1x128xf32> to vector<64x128xf32>
    %249 = arith.addf %247, %248 : vector<64x128xf32>
    %cst_64 = arith.constant 0.000000e+00 : f32
    %250 = vector.broadcast %cst_64 : f32 to vector<64x128xf32>
    %251 = arith.maximumf %249, %250 : vector<64x128xf32>
    %252 = arith.subf %244, %251 : vector<64x128xf32>
    %253 = vector.extract_strided_slice %3 {offsets = [0, 31], sizes = [64, 1], strides = [1, 1]} : vector<64x72xf32> to vector<64x1xf32>
    %c31 = arith.constant 31 : index
    %c0_65 = arith.constant 0 : index
    %254 = vector.load %arg2[%c31, %c0_65] : memref<72x128xf32, #tpu.memory_space<vmem>>, vector<1x128xf32>
    %255 = vector.broadcast %253 : vector<64x1xf32> to vector<64x128xf32>
    %256 = vector.broadcast %254 : vector<1x128xf32> to vector<64x128xf32>
    %257 = arith.addf %255, %256 : vector<64x128xf32>
    %cst_66 = arith.constant 0.000000e+00 : f32
    %258 = vector.broadcast %cst_66 : f32 to vector<64x128xf32>
    %259 = arith.maximumf %257, %258 : vector<64x128xf32>
    %260 = arith.subf %252, %259 : vector<64x128xf32>
    %261 = vector.extract_strided_slice %3 {offsets = [0, 32], sizes = [64, 1], strides = [1, 1]} : vector<64x72xf32> to vector<64x1xf32>
    %c32 = arith.constant 32 : index
    %c0_67 = arith.constant 0 : index
    %262 = vector.load %arg2[%c32, %c0_67] : memref<72x128xf32, #tpu.memory_space<vmem>>, vector<1x128xf32>
    %263 = vector.broadcast %261 : vector<64x1xf32> to vector<64x128xf32>
    %264 = vector.broadcast %262 : vector<1x128xf32> to vector<64x128xf32>
    %265 = arith.addf %263, %264 : vector<64x128xf32>
    %cst_68 = arith.constant 0.000000e+00 : f32
    %266 = vector.broadcast %cst_68 : f32 to vector<64x128xf32>
    %267 = arith.maximumf %265, %266 : vector<64x128xf32>
    %268 = arith.subf %260, %267 : vector<64x128xf32>
    %269 = vector.extract_strided_slice %3 {offsets = [0, 33], sizes = [64, 1], strides = [1, 1]} : vector<64x72xf32> to vector<64x1xf32>
    %c33 = arith.constant 33 : index
    %c0_69 = arith.constant 0 : index
    %270 = vector.load %arg2[%c33, %c0_69] : memref<72x128xf32, #tpu.memory_space<vmem>>, vector<1x128xf32>
    %271 = vector.broadcast %269 : vector<64x1xf32> to vector<64x128xf32>
    %272 = vector.broadcast %270 : vector<1x128xf32> to vector<64x128xf32>
    %273 = arith.addf %271, %272 : vector<64x128xf32>
    %cst_70 = arith.constant 0.000000e+00 : f32
    %274 = vector.broadcast %cst_70 : f32 to vector<64x128xf32>
    %275 = arith.maximumf %273, %274 : vector<64x128xf32>
    %276 = arith.subf %268, %275 : vector<64x128xf32>
    %277 = vector.extract_strided_slice %3 {offsets = [0, 34], sizes = [64, 1], strides = [1, 1]} : vector<64x72xf32> to vector<64x1xf32>
    %c34 = arith.constant 34 : index
    %c0_71 = arith.constant 0 : index
    %278 = vector.load %arg2[%c34, %c0_71] : memref<72x128xf32, #tpu.memory_space<vmem>>, vector<1x128xf32>
    %279 = vector.broadcast %277 : vector<64x1xf32> to vector<64x128xf32>
    %280 = vector.broadcast %278 : vector<1x128xf32> to vector<64x128xf32>
    %281 = arith.addf %279, %280 : vector<64x128xf32>
    %cst_72 = arith.constant 0.000000e+00 : f32
    %282 = vector.broadcast %cst_72 : f32 to vector<64x128xf32>
    %283 = arith.maximumf %281, %282 : vector<64x128xf32>
    %284 = arith.subf %276, %283 : vector<64x128xf32>
    %285 = vector.extract_strided_slice %3 {offsets = [0, 35], sizes = [64, 1], strides = [1, 1]} : vector<64x72xf32> to vector<64x1xf32>
    %c35 = arith.constant 35 : index
    %c0_73 = arith.constant 0 : index
    %286 = vector.load %arg2[%c35, %c0_73] : memref<72x128xf32, #tpu.memory_space<vmem>>, vector<1x128xf32>
    %287 = vector.broadcast %285 : vector<64x1xf32> to vector<64x128xf32>
    %288 = vector.broadcast %286 : vector<1x128xf32> to vector<64x128xf32>
    %289 = arith.addf %287, %288 : vector<64x128xf32>
    %cst_74 = arith.constant 0.000000e+00 : f32
    %290 = vector.broadcast %cst_74 : f32 to vector<64x128xf32>
    %291 = arith.maximumf %289, %290 : vector<64x128xf32>
    %292 = arith.subf %284, %291 : vector<64x128xf32>
    %293 = vector.extract_strided_slice %3 {offsets = [0, 36], sizes = [64, 1], strides = [1, 1]} : vector<64x72xf32> to vector<64x1xf32>
    %c36 = arith.constant 36 : index
    %c0_75 = arith.constant 0 : index
    %294 = vector.load %arg2[%c36, %c0_75] : memref<72x128xf32, #tpu.memory_space<vmem>>, vector<1x128xf32>
    %295 = vector.broadcast %293 : vector<64x1xf32> to vector<64x128xf32>
    %296 = vector.broadcast %294 : vector<1x128xf32> to vector<64x128xf32>
    %297 = arith.addf %295, %296 : vector<64x128xf32>
    %cst_76 = arith.constant 0.000000e+00 : f32
    %298 = vector.broadcast %cst_76 : f32 to vector<64x128xf32>
    %299 = arith.maximumf %297, %298 : vector<64x128xf32>
    %300 = arith.subf %292, %299 : vector<64x128xf32>
    %301 = vector.extract_strided_slice %3 {offsets = [0, 37], sizes = [64, 1], strides = [1, 1]} : vector<64x72xf32> to vector<64x1xf32>
    %c37 = arith.constant 37 : index
    %c0_77 = arith.constant 0 : index
    %302 = vector.load %arg2[%c37, %c0_77] : memref<72x128xf32, #tpu.memory_space<vmem>>, vector<1x128xf32>
    %303 = vector.broadcast %301 : vector<64x1xf32> to vector<64x128xf32>
    %304 = vector.broadcast %302 : vector<1x128xf32> to vector<64x128xf32>
    %305 = arith.addf %303, %304 : vector<64x128xf32>
    %cst_78 = arith.constant 0.000000e+00 : f32
    %306 = vector.broadcast %cst_78 : f32 to vector<64x128xf32>
    %307 = arith.maximumf %305, %306 : vector<64x128xf32>
    %308 = arith.subf %300, %307 : vector<64x128xf32>
    %309 = vector.extract_strided_slice %3 {offsets = [0, 38], sizes = [64, 1], strides = [1, 1]} : vector<64x72xf32> to vector<64x1xf32>
    %c38 = arith.constant 38 : index
    %c0_79 = arith.constant 0 : index
    %310 = vector.load %arg2[%c38, %c0_79] : memref<72x128xf32, #tpu.memory_space<vmem>>, vector<1x128xf32>
    %311 = vector.broadcast %309 : vector<64x1xf32> to vector<64x128xf32>
    %312 = vector.broadcast %310 : vector<1x128xf32> to vector<64x128xf32>
    %313 = arith.addf %311, %312 : vector<64x128xf32>
    %cst_80 = arith.constant 0.000000e+00 : f32
    %314 = vector.broadcast %cst_80 : f32 to vector<64x128xf32>
    %315 = arith.maximumf %313, %314 : vector<64x128xf32>
    %316 = arith.subf %308, %315 : vector<64x128xf32>
    %317 = vector.extract_strided_slice %3 {offsets = [0, 39], sizes = [64, 1], strides = [1, 1]} : vector<64x72xf32> to vector<64x1xf32>
    %c39 = arith.constant 39 : index
    %c0_81 = arith.constant 0 : index
    %318 = vector.load %arg2[%c39, %c0_81] : memref<72x128xf32, #tpu.memory_space<vmem>>, vector<1x128xf32>
    %319 = vector.broadcast %317 : vector<64x1xf32> to vector<64x128xf32>
    %320 = vector.broadcast %318 : vector<1x128xf32> to vector<64x128xf32>
    %321 = arith.addf %319, %320 : vector<64x128xf32>
    %cst_82 = arith.constant 0.000000e+00 : f32
    %322 = vector.broadcast %cst_82 : f32 to vector<64x128xf32>
    %323 = arith.maximumf %321, %322 : vector<64x128xf32>
    %324 = arith.subf %316, %323 : vector<64x128xf32>
    %325 = vector.extract_strided_slice %3 {offsets = [0, 40], sizes = [64, 1], strides = [1, 1]} : vector<64x72xf32> to vector<64x1xf32>
    %c40 = arith.constant 40 : index
    %c0_83 = arith.constant 0 : index
    %326 = vector.load %arg2[%c40, %c0_83] : memref<72x128xf32, #tpu.memory_space<vmem>>, vector<1x128xf32>
    %327 = vector.broadcast %325 : vector<64x1xf32> to vector<64x128xf32>
    %328 = vector.broadcast %326 : vector<1x128xf32> to vector<64x128xf32>
    %329 = arith.addf %327, %328 : vector<64x128xf32>
    %cst_84 = arith.constant 0.000000e+00 : f32
    %330 = vector.broadcast %cst_84 : f32 to vector<64x128xf32>
    %331 = arith.maximumf %329, %330 : vector<64x128xf32>
    %332 = arith.subf %324, %331 : vector<64x128xf32>
    %333 = vector.extract_strided_slice %3 {offsets = [0, 41], sizes = [64, 1], strides = [1, 1]} : vector<64x72xf32> to vector<64x1xf32>
    %c41 = arith.constant 41 : index
    %c0_85 = arith.constant 0 : index
    %334 = vector.load %arg2[%c41, %c0_85] : memref<72x128xf32, #tpu.memory_space<vmem>>, vector<1x128xf32>
    %335 = vector.broadcast %333 : vector<64x1xf32> to vector<64x128xf32>
    %336 = vector.broadcast %334 : vector<1x128xf32> to vector<64x128xf32>
    %337 = arith.addf %335, %336 : vector<64x128xf32>
    %cst_86 = arith.constant 0.000000e+00 : f32
    %338 = vector.broadcast %cst_86 : f32 to vector<64x128xf32>
    %339 = arith.maximumf %337, %338 : vector<64x128xf32>
    %340 = arith.subf %332, %339 : vector<64x128xf32>
    %341 = vector.extract_strided_slice %3 {offsets = [0, 42], sizes = [64, 1], strides = [1, 1]} : vector<64x72xf32> to vector<64x1xf32>
    %c42 = arith.constant 42 : index
    %c0_87 = arith.constant 0 : index
    %342 = vector.load %arg2[%c42, %c0_87] : memref<72x128xf32, #tpu.memory_space<vmem>>, vector<1x128xf32>
    %343 = vector.broadcast %341 : vector<64x1xf32> to vector<64x128xf32>
    %344 = vector.broadcast %342 : vector<1x128xf32> to vector<64x128xf32>
    %345 = arith.addf %343, %344 : vector<64x128xf32>
    %cst_88 = arith.constant 0.000000e+00 : f32
    %346 = vector.broadcast %cst_88 : f32 to vector<64x128xf32>
    %347 = arith.maximumf %345, %346 : vector<64x128xf32>
    %348 = arith.subf %340, %347 : vector<64x128xf32>
    %349 = vector.extract_strided_slice %3 {offsets = [0, 43], sizes = [64, 1], strides = [1, 1]} : vector<64x72xf32> to vector<64x1xf32>
    %c43 = arith.constant 43 : index
    %c0_89 = arith.constant 0 : index
    %350 = vector.load %arg2[%c43, %c0_89] : memref<72x128xf32, #tpu.memory_space<vmem>>, vector<1x128xf32>
    %351 = vector.broadcast %349 : vector<64x1xf32> to vector<64x128xf32>
    %352 = vector.broadcast %350 : vector<1x128xf32> to vector<64x128xf32>
    %353 = arith.addf %351, %352 : vector<64x128xf32>
    %cst_90 = arith.constant 0.000000e+00 : f32
    %354 = vector.broadcast %cst_90 : f32 to vector<64x128xf32>
    %355 = arith.maximumf %353, %354 : vector<64x128xf32>
    %356 = arith.subf %348, %355 : vector<64x128xf32>
    %357 = vector.extract_strided_slice %3 {offsets = [0, 44], sizes = [64, 1], strides = [1, 1]} : vector<64x72xf32> to vector<64x1xf32>
    %c44 = arith.constant 44 : index
    %c0_91 = arith.constant 0 : index
    %358 = vector.load %arg2[%c44, %c0_91] : memref<72x128xf32, #tpu.memory_space<vmem>>, vector<1x128xf32>
    %359 = vector.broadcast %357 : vector<64x1xf32> to vector<64x128xf32>
    %360 = vector.broadcast %358 : vector<1x128xf32> to vector<64x128xf32>
    %361 = arith.addf %359, %360 : vector<64x128xf32>
    %cst_92 = arith.constant 0.000000e+00 : f32
    %362 = vector.broadcast %cst_92 : f32 to vector<64x128xf32>
    %363 = arith.maximumf %361, %362 : vector<64x128xf32>
    %364 = arith.subf %356, %363 : vector<64x128xf32>
    %365 = vector.extract_strided_slice %3 {offsets = [0, 45], sizes = [64, 1], strides = [1, 1]} : vector<64x72xf32> to vector<64x1xf32>
    %c45 = arith.constant 45 : index
    %c0_93 = arith.constant 0 : index
    %366 = vector.load %arg2[%c45, %c0_93] : memref<72x128xf32, #tpu.memory_space<vmem>>, vector<1x128xf32>
    %367 = vector.broadcast %365 : vector<64x1xf32> to vector<64x128xf32>
    %368 = vector.broadcast %366 : vector<1x128xf32> to vector<64x128xf32>
    %369 = arith.addf %367, %368 : vector<64x128xf32>
    %cst_94 = arith.constant 0.000000e+00 : f32
    %370 = vector.broadcast %cst_94 : f32 to vector<64x128xf32>
    %371 = arith.maximumf %369, %370 : vector<64x128xf32>
    %372 = arith.subf %364, %371 : vector<64x128xf32>
    %373 = vector.extract_strided_slice %3 {offsets = [0, 46], sizes = [64, 1], strides = [1, 1]} : vector<64x72xf32> to vector<64x1xf32>
    %c46 = arith.constant 46 : index
    %c0_95 = arith.constant 0 : index
    %374 = vector.load %arg2[%c46, %c0_95] : memref<72x128xf32, #tpu.memory_space<vmem>>, vector<1x128xf32>
    %375 = vector.broadcast %373 : vector<64x1xf32> to vector<64x128xf32>
    %376 = vector.broadcast %374 : vector<1x128xf32> to vector<64x128xf32>
    %377 = arith.addf %375, %376 : vector<64x128xf32>
    %cst_96 = arith.constant 0.000000e+00 : f32
    %378 = vector.broadcast %cst_96 : f32 to vector<64x128xf32>
    %379 = arith.maximumf %377, %378 : vector<64x128xf32>
    %380 = arith.subf %372, %379 : vector<64x128xf32>
    %381 = vector.extract_strided_slice %3 {offsets = [0, 47], sizes = [64, 1], strides = [1, 1]} : vector<64x72xf32> to vector<64x1xf32>
    %c47 = arith.constant 47 : index
    %c0_97 = arith.constant 0 : index
    %382 = vector.load %arg2[%c47, %c0_97] : memref<72x128xf32, #tpu.memory_space<vmem>>, vector<1x128xf32>
    %383 = vector.broadcast %381 : vector<64x1xf32> to vector<64x128xf32>
    %384 = vector.broadcast %382 : vector<1x128xf32> to vector<64x128xf32>
    %385 = arith.addf %383, %384 : vector<64x128xf32>
    %cst_98 = arith.constant 0.000000e+00 : f32
    %386 = vector.broadcast %cst_98 : f32 to vector<64x128xf32>
    %387 = arith.maximumf %385, %386 : vector<64x128xf32>
    %388 = arith.subf %380, %387 : vector<64x128xf32>
    %389 = vector.extract_strided_slice %3 {offsets = [0, 48], sizes = [64, 1], strides = [1, 1]} : vector<64x72xf32> to vector<64x1xf32>
    %c48 = arith.constant 48 : index
    %c0_99 = arith.constant 0 : index
    %390 = vector.load %arg2[%c48, %c0_99] : memref<72x128xf32, #tpu.memory_space<vmem>>, vector<1x128xf32>
    %391 = vector.broadcast %389 : vector<64x1xf32> to vector<64x128xf32>
    %392 = vector.broadcast %390 : vector<1x128xf32> to vector<64x128xf32>
    %393 = arith.addf %391, %392 : vector<64x128xf32>
    %cst_100 = arith.constant 0.000000e+00 : f32
    %394 = vector.broadcast %cst_100 : f32 to vector<64x128xf32>
    %395 = arith.maximumf %393, %394 : vector<64x128xf32>
    %396 = arith.subf %388, %395 : vector<64x128xf32>
    %397 = vector.extract_strided_slice %3 {offsets = [0, 49], sizes = [64, 1], strides = [1, 1]} : vector<64x72xf32> to vector<64x1xf32>
    %c49 = arith.constant 49 : index
    %c0_101 = arith.constant 0 : index
    %398 = vector.load %arg2[%c49, %c0_101] : memref<72x128xf32, #tpu.memory_space<vmem>>, vector<1x128xf32>
    %399 = vector.broadcast %397 : vector<64x1xf32> to vector<64x128xf32>
    %400 = vector.broadcast %398 : vector<1x128xf32> to vector<64x128xf32>
    %401 = arith.addf %399, %400 : vector<64x128xf32>
    %cst_102 = arith.constant 0.000000e+00 : f32
    %402 = vector.broadcast %cst_102 : f32 to vector<64x128xf32>
    %403 = arith.maximumf %401, %402 : vector<64x128xf32>
    %404 = arith.subf %396, %403 : vector<64x128xf32>
    %405 = vector.extract_strided_slice %3 {offsets = [0, 50], sizes = [64, 1], strides = [1, 1]} : vector<64x72xf32> to vector<64x1xf32>
    %c50 = arith.constant 50 : index
    %c0_103 = arith.constant 0 : index
    %406 = vector.load %arg2[%c50, %c0_103] : memref<72x128xf32, #tpu.memory_space<vmem>>, vector<1x128xf32>
    %407 = vector.broadcast %405 : vector<64x1xf32> to vector<64x128xf32>
    %408 = vector.broadcast %406 : vector<1x128xf32> to vector<64x128xf32>
    %409 = arith.addf %407, %408 : vector<64x128xf32>
    %cst_104 = arith.constant 0.000000e+00 : f32
    %410 = vector.broadcast %cst_104 : f32 to vector<64x128xf32>
    %411 = arith.maximumf %409, %410 : vector<64x128xf32>
    %412 = arith.subf %404, %411 : vector<64x128xf32>
    %413 = vector.extract_strided_slice %3 {offsets = [0, 51], sizes = [64, 1], strides = [1, 1]} : vector<64x72xf32> to vector<64x1xf32>
    %c51 = arith.constant 51 : index
    %c0_105 = arith.constant 0 : index
    %414 = vector.load %arg2[%c51, %c0_105] : memref<72x128xf32, #tpu.memory_space<vmem>>, vector<1x128xf32>
    %415 = vector.broadcast %413 : vector<64x1xf32> to vector<64x128xf32>
    %416 = vector.broadcast %414 : vector<1x128xf32> to vector<64x128xf32>
    %417 = arith.addf %415, %416 : vector<64x128xf32>
    %cst_106 = arith.constant 0.000000e+00 : f32
    %418 = vector.broadcast %cst_106 : f32 to vector<64x128xf32>
    %419 = arith.maximumf %417, %418 : vector<64x128xf32>
    %420 = arith.subf %412, %419 : vector<64x128xf32>
    %421 = vector.extract_strided_slice %3 {offsets = [0, 52], sizes = [64, 1], strides = [1, 1]} : vector<64x72xf32> to vector<64x1xf32>
    %c52 = arith.constant 52 : index
    %c0_107 = arith.constant 0 : index
    %422 = vector.load %arg2[%c52, %c0_107] : memref<72x128xf32, #tpu.memory_space<vmem>>, vector<1x128xf32>
    %423 = vector.broadcast %421 : vector<64x1xf32> to vector<64x128xf32>
    %424 = vector.broadcast %422 : vector<1x128xf32> to vector<64x128xf32>
    %425 = arith.addf %423, %424 : vector<64x128xf32>
    %cst_108 = arith.constant 0.000000e+00 : f32
    %426 = vector.broadcast %cst_108 : f32 to vector<64x128xf32>
    %427 = arith.maximumf %425, %426 : vector<64x128xf32>
    %428 = arith.subf %420, %427 : vector<64x128xf32>
    %429 = vector.extract_strided_slice %3 {offsets = [0, 53], sizes = [64, 1], strides = [1, 1]} : vector<64x72xf32> to vector<64x1xf32>
    %c53 = arith.constant 53 : index
    %c0_109 = arith.constant 0 : index
    %430 = vector.load %arg2[%c53, %c0_109] : memref<72x128xf32, #tpu.memory_space<vmem>>, vector<1x128xf32>
    %431 = vector.broadcast %429 : vector<64x1xf32> to vector<64x128xf32>
    %432 = vector.broadcast %430 : vector<1x128xf32> to vector<64x128xf32>
    %433 = arith.addf %431, %432 : vector<64x128xf32>
    %cst_110 = arith.constant 0.000000e+00 : f32
    %434 = vector.broadcast %cst_110 : f32 to vector<64x128xf32>
    %435 = arith.maximumf %433, %434 : vector<64x128xf32>
    %436 = arith.subf %428, %435 : vector<64x128xf32>
    %437 = vector.extract_strided_slice %3 {offsets = [0, 54], sizes = [64, 1], strides = [1, 1]} : vector<64x72xf32> to vector<64x1xf32>
    %c54 = arith.constant 54 : index
    %c0_111 = arith.constant 0 : index
    %438 = vector.load %arg2[%c54, %c0_111] : memref<72x128xf32, #tpu.memory_space<vmem>>, vector<1x128xf32>
    %439 = vector.broadcast %437 : vector<64x1xf32> to vector<64x128xf32>
    %440 = vector.broadcast %438 : vector<1x128xf32> to vector<64x128xf32>
    %441 = arith.addf %439, %440 : vector<64x128xf32>
    %cst_112 = arith.constant 0.000000e+00 : f32
    %442 = vector.broadcast %cst_112 : f32 to vector<64x128xf32>
    %443 = arith.maximumf %441, %442 : vector<64x128xf32>
    %444 = arith.subf %436, %443 : vector<64x128xf32>
    %445 = vector.extract_strided_slice %3 {offsets = [0, 55], sizes = [64, 1], strides = [1, 1]} : vector<64x72xf32> to vector<64x1xf32>
    %c55 = arith.constant 55 : index
    %c0_113 = arith.constant 0 : index
    %446 = vector.load %arg2[%c55, %c0_113] : memref<72x128xf32, #tpu.memory_space<vmem>>, vector<1x128xf32>
    %447 = vector.broadcast %445 : vector<64x1xf32> to vector<64x128xf32>
    %448 = vector.broadcast %446 : vector<1x128xf32> to vector<64x128xf32>
    %449 = arith.addf %447, %448 : vector<64x128xf32>
    %cst_114 = arith.constant 0.000000e+00 : f32
    %450 = vector.broadcast %cst_114 : f32 to vector<64x128xf32>
    %451 = arith.maximumf %449, %450 : vector<64x128xf32>
    %452 = arith.subf %444, %451 : vector<64x128xf32>
    %453 = vector.extract_strided_slice %3 {offsets = [0, 56], sizes = [64, 1], strides = [1, 1]} : vector<64x72xf32> to vector<64x1xf32>
    %c56 = arith.constant 56 : index
    %c0_115 = arith.constant 0 : index
    %454 = vector.load %arg2[%c56, %c0_115] : memref<72x128xf32, #tpu.memory_space<vmem>>, vector<1x128xf32>
    %455 = vector.broadcast %453 : vector<64x1xf32> to vector<64x128xf32>
    %456 = vector.broadcast %454 : vector<1x128xf32> to vector<64x128xf32>
    %457 = arith.addf %455, %456 : vector<64x128xf32>
    %cst_116 = arith.constant 0.000000e+00 : f32
    %458 = vector.broadcast %cst_116 : f32 to vector<64x128xf32>
    %459 = arith.maximumf %457, %458 : vector<64x128xf32>
    %460 = arith.subf %452, %459 : vector<64x128xf32>
    %461 = vector.extract_strided_slice %3 {offsets = [0, 57], sizes = [64, 1], strides = [1, 1]} : vector<64x72xf32> to vector<64x1xf32>
    %c57 = arith.constant 57 : index
    %c0_117 = arith.constant 0 : index
    %462 = vector.load %arg2[%c57, %c0_117] : memref<72x128xf32, #tpu.memory_space<vmem>>, vector<1x128xf32>
    %463 = vector.broadcast %461 : vector<64x1xf32> to vector<64x128xf32>
    %464 = vector.broadcast %462 : vector<1x128xf32> to vector<64x128xf32>
    %465 = arith.addf %463, %464 : vector<64x128xf32>
    %cst_118 = arith.constant 0.000000e+00 : f32
    %466 = vector.broadcast %cst_118 : f32 to vector<64x128xf32>
    %467 = arith.maximumf %465, %466 : vector<64x128xf32>
    %468 = arith.subf %460, %467 : vector<64x128xf32>
    %469 = vector.extract_strided_slice %3 {offsets = [0, 58], sizes = [64, 1], strides = [1, 1]} : vector<64x72xf32> to vector<64x1xf32>
    %c58 = arith.constant 58 : index
    %c0_119 = arith.constant 0 : index
    %470 = vector.load %arg2[%c58, %c0_119] : memref<72x128xf32, #tpu.memory_space<vmem>>, vector<1x128xf32>
    %471 = vector.broadcast %469 : vector<64x1xf32> to vector<64x128xf32>
    %472 = vector.broadcast %470 : vector<1x128xf32> to vector<64x128xf32>
    %473 = arith.addf %471, %472 : vector<64x128xf32>
    %cst_120 = arith.constant 0.000000e+00 : f32
    %474 = vector.broadcast %cst_120 : f32 to vector<64x128xf32>
    %475 = arith.maximumf %473, %474 : vector<64x128xf32>
    %476 = arith.subf %468, %475 : vector<64x128xf32>
    %477 = vector.extract_strided_slice %3 {offsets = [0, 59], sizes = [64, 1], strides = [1, 1]} : vector<64x72xf32> to vector<64x1xf32>
    %c59 = arith.constant 59 : index
    %c0_121 = arith.constant 0 : index
    %478 = vector.load %arg2[%c59, %c0_121] : memref<72x128xf32, #tpu.memory_space<vmem>>, vector<1x128xf32>
    %479 = vector.broadcast %477 : vector<64x1xf32> to vector<64x128xf32>
    %480 = vector.broadcast %478 : vector<1x128xf32> to vector<64x128xf32>
    %481 = arith.addf %479, %480 : vector<64x128xf32>
    %cst_122 = arith.constant 0.000000e+00 : f32
    %482 = vector.broadcast %cst_122 : f32 to vector<64x128xf32>
    %483 = arith.maximumf %481, %482 : vector<64x128xf32>
    %484 = arith.subf %476, %483 : vector<64x128xf32>
    %485 = vector.extract_strided_slice %3 {offsets = [0, 60], sizes = [64, 1], strides = [1, 1]} : vector<64x72xf32> to vector<64x1xf32>
    %c60 = arith.constant 60 : index
    %c0_123 = arith.constant 0 : index
    %486 = vector.load %arg2[%c60, %c0_123] : memref<72x128xf32, #tpu.memory_space<vmem>>, vector<1x128xf32>
    %487 = vector.broadcast %485 : vector<64x1xf32> to vector<64x128xf32>
    %488 = vector.broadcast %486 : vector<1x128xf32> to vector<64x128xf32>
    %489 = arith.addf %487, %488 : vector<64x128xf32>
    %cst_124 = arith.constant 0.000000e+00 : f32
    %490 = vector.broadcast %cst_124 : f32 to vector<64x128xf32>
    %491 = arith.maximumf %489, %490 : vector<64x128xf32>
    %492 = arith.subf %484, %491 : vector<64x128xf32>
    %493 = vector.extract_strided_slice %3 {offsets = [0, 61], sizes = [64, 1], strides = [1, 1]} : vector<64x72xf32> to vector<64x1xf32>
    %c61 = arith.constant 61 : index
    %c0_125 = arith.constant 0 : index
    %494 = vector.load %arg2[%c61, %c0_125] : memref<72x128xf32, #tpu.memory_space<vmem>>, vector<1x128xf32>
    %495 = vector.broadcast %493 : vector<64x1xf32> to vector<64x128xf32>
    %496 = vector.broadcast %494 : vector<1x128xf32> to vector<64x128xf32>
    %497 = arith.addf %495, %496 : vector<64x128xf32>
    %cst_126 = arith.constant 0.000000e+00 : f32
    %498 = vector.broadcast %cst_126 : f32 to vector<64x128xf32>
    %499 = arith.maximumf %497, %498 : vector<64x128xf32>
    %500 = arith.subf %492, %499 : vector<64x128xf32>
    %501 = vector.extract_strided_slice %3 {offsets = [0, 62], sizes = [64, 1], strides = [1, 1]} : vector<64x72xf32> to vector<64x1xf32>
    %c62 = arith.constant 62 : index
    %c0_127 = arith.constant 0 : index
    %502 = vector.load %arg2[%c62, %c0_127] : memref<72x128xf32, #tpu.memory_space<vmem>>, vector<1x128xf32>
    %503 = vector.broadcast %501 : vector<64x1xf32> to vector<64x128xf32>
    %504 = vector.broadcast %502 : vector<1x128xf32> to vector<64x128xf32>
    %505 = arith.addf %503, %504 : vector<64x128xf32>
    %cst_128 = arith.constant 0.000000e+00 : f32
    %506 = vector.broadcast %cst_128 : f32 to vector<64x128xf32>
    %507 = arith.maximumf %505, %506 : vector<64x128xf32>
    %508 = arith.subf %500, %507 : vector<64x128xf32>
    %509 = vector.extract_strided_slice %3 {offsets = [0, 63], sizes = [64, 1], strides = [1, 1]} : vector<64x72xf32> to vector<64x1xf32>
    %c63 = arith.constant 63 : index
    %c0_129 = arith.constant 0 : index
    %510 = vector.load %arg2[%c63, %c0_129] : memref<72x128xf32, #tpu.memory_space<vmem>>, vector<1x128xf32>
    %511 = vector.broadcast %509 : vector<64x1xf32> to vector<64x128xf32>
    %512 = vector.broadcast %510 : vector<1x128xf32> to vector<64x128xf32>
    %513 = arith.addf %511, %512 : vector<64x128xf32>
    %cst_130 = arith.constant 0.000000e+00 : f32
    %514 = vector.broadcast %cst_130 : f32 to vector<64x128xf32>
    %515 = arith.maximumf %513, %514 : vector<64x128xf32>
    %516 = arith.subf %508, %515 : vector<64x128xf32>
    %517 = vector.extract_strided_slice %3 {offsets = [0, 64], sizes = [64, 1], strides = [1, 1]} : vector<64x72xf32> to vector<64x1xf32>
    %c64 = arith.constant 64 : index
    %c0_131 = arith.constant 0 : index
    %518 = vector.load %arg2[%c64, %c0_131] : memref<72x128xf32, #tpu.memory_space<vmem>>, vector<1x128xf32>
    %519 = vector.broadcast %517 : vector<64x1xf32> to vector<64x128xf32>
    %520 = vector.broadcast %518 : vector<1x128xf32> to vector<64x128xf32>
    %521 = arith.addf %519, %520 : vector<64x128xf32>
    %cst_132 = arith.constant 0.000000e+00 : f32
    %522 = vector.broadcast %cst_132 : f32 to vector<64x128xf32>
    %523 = arith.maximumf %521, %522 : vector<64x128xf32>
    %524 = arith.subf %516, %523 : vector<64x128xf32>
    %525 = vector.extract_strided_slice %3 {offsets = [0, 65], sizes = [64, 1], strides = [1, 1]} : vector<64x72xf32> to vector<64x1xf32>
    %c65 = arith.constant 65 : index
    %c0_133 = arith.constant 0 : index
    %526 = vector.load %arg2[%c65, %c0_133] : memref<72x128xf32, #tpu.memory_space<vmem>>, vector<1x128xf32>
    %527 = vector.broadcast %525 : vector<64x1xf32> to vector<64x128xf32>
    %528 = vector.broadcast %526 : vector<1x128xf32> to vector<64x128xf32>
    %529 = arith.addf %527, %528 : vector<64x128xf32>
    %cst_134 = arith.constant 0.000000e+00 : f32
    %530 = vector.broadcast %cst_134 : f32 to vector<64x128xf32>
    %531 = arith.maximumf %529, %530 : vector<64x128xf32>
    %532 = arith.subf %524, %531 : vector<64x128xf32>
    %533 = vector.extract_strided_slice %3 {offsets = [0, 66], sizes = [64, 1], strides = [1, 1]} : vector<64x72xf32> to vector<64x1xf32>
    %c66 = arith.constant 66 : index
    %c0_135 = arith.constant 0 : index
    %534 = vector.load %arg2[%c66, %c0_135] : memref<72x128xf32, #tpu.memory_space<vmem>>, vector<1x128xf32>
    %535 = vector.broadcast %533 : vector<64x1xf32> to vector<64x128xf32>
    %536 = vector.broadcast %534 : vector<1x128xf32> to vector<64x128xf32>
    %537 = arith.addf %535, %536 : vector<64x128xf32>
    %cst_136 = arith.constant 0.000000e+00 : f32
    %538 = vector.broadcast %cst_136 : f32 to vector<64x128xf32>
    %539 = arith.maximumf %537, %538 : vector<64x128xf32>
    %540 = arith.subf %532, %539 : vector<64x128xf32>
    %541 = vector.extract_strided_slice %3 {offsets = [0, 67], sizes = [64, 1], strides = [1, 1]} : vector<64x72xf32> to vector<64x1xf32>
    %c67 = arith.constant 67 : index
    %c0_137 = arith.constant 0 : index
    %542 = vector.load %arg2[%c67, %c0_137] : memref<72x128xf32, #tpu.memory_space<vmem>>, vector<1x128xf32>
    %543 = vector.broadcast %541 : vector<64x1xf32> to vector<64x128xf32>
    %544 = vector.broadcast %542 : vector<1x128xf32> to vector<64x128xf32>
    %545 = arith.addf %543, %544 : vector<64x128xf32>
    %cst_138 = arith.constant 0.000000e+00 : f32
    %546 = vector.broadcast %cst_138 : f32 to vector<64x128xf32>
    %547 = arith.maximumf %545, %546 : vector<64x128xf32>
    %548 = arith.subf %540, %547 : vector<64x128xf32>
    %549 = vector.extract_strided_slice %3 {offsets = [0, 68], sizes = [64, 1], strides = [1, 1]} : vector<64x72xf32> to vector<64x1xf32>
    %c68 = arith.constant 68 : index
    %c0_139 = arith.constant 0 : index
    %550 = vector.load %arg2[%c68, %c0_139] : memref<72x128xf32, #tpu.memory_space<vmem>>, vector<1x128xf32>
    %551 = vector.broadcast %549 : vector<64x1xf32> to vector<64x128xf32>
    %552 = vector.broadcast %550 : vector<1x128xf32> to vector<64x128xf32>
    %553 = arith.addf %551, %552 : vector<64x128xf32>
    %cst_140 = arith.constant 0.000000e+00 : f32
    %554 = vector.broadcast %cst_140 : f32 to vector<64x128xf32>
    %555 = arith.maximumf %553, %554 : vector<64x128xf32>
    %556 = arith.subf %548, %555 : vector<64x128xf32>
    %557 = vector.extract_strided_slice %3 {offsets = [0, 69], sizes = [64, 1], strides = [1, 1]} : vector<64x72xf32> to vector<64x1xf32>
    %c69 = arith.constant 69 : index
    %c0_141 = arith.constant 0 : index
    %558 = vector.load %arg2[%c69, %c0_141] : memref<72x128xf32, #tpu.memory_space<vmem>>, vector<1x128xf32>
    %559 = vector.broadcast %557 : vector<64x1xf32> to vector<64x128xf32>
    %560 = vector.broadcast %558 : vector<1x128xf32> to vector<64x128xf32>
    %561 = arith.addf %559, %560 : vector<64x128xf32>
    %cst_142 = arith.constant 0.000000e+00 : f32
    %562 = vector.broadcast %cst_142 : f32 to vector<64x128xf32>
    %563 = arith.maximumf %561, %562 : vector<64x128xf32>
    %564 = arith.subf %556, %563 : vector<64x128xf32>
    %565 = vector.extract_strided_slice %3 {offsets = [0, 70], sizes = [64, 1], strides = [1, 1]} : vector<64x72xf32> to vector<64x1xf32>
    %c70 = arith.constant 70 : index
    %c0_143 = arith.constant 0 : index
    %566 = vector.load %arg2[%c70, %c0_143] : memref<72x128xf32, #tpu.memory_space<vmem>>, vector<1x128xf32>
    %567 = vector.broadcast %565 : vector<64x1xf32> to vector<64x128xf32>
    %568 = vector.broadcast %566 : vector<1x128xf32> to vector<64x128xf32>
    %569 = arith.addf %567, %568 : vector<64x128xf32>
    %cst_144 = arith.constant 0.000000e+00 : f32
    %570 = vector.broadcast %cst_144 : f32 to vector<64x128xf32>
    %571 = arith.maximumf %569, %570 : vector<64x128xf32>
    %572 = arith.subf %564, %571 : vector<64x128xf32>
    %573 = vector.extract_strided_slice %3 {offsets = [0, 71], sizes = [64, 1], strides = [1, 1]} : vector<64x72xf32> to vector<64x1xf32>
    %c71 = arith.constant 71 : index
    %c0_145 = arith.constant 0 : index
    %574 = vector.load %arg2[%c71, %c0_145] : memref<72x128xf32, #tpu.memory_space<vmem>>, vector<1x128xf32>
    %575 = vector.broadcast %573 : vector<64x1xf32> to vector<64x128xf32>
    %576 = vector.broadcast %574 : vector<1x128xf32> to vector<64x128xf32>
    %577 = arith.addf %575, %576 : vector<64x128xf32>
    %cst_146 = arith.constant 0.000000e+00 : f32
    %578 = vector.broadcast %cst_146 : f32 to vector<64x128xf32>
    %579 = arith.maximumf %577, %578 : vector<64x128xf32>
    %580 = arith.subf %572, %579 : vector<64x128xf32>
    %c0_147 = arith.constant 0 : index
    %581 = memref.load %arg4[%c0_147] : memref<1xf32, #tpu.memory_space<smem>>
    %582 = vector.broadcast %581 : f32 to vector<64x128xf32>
    %583 = arith.addf %580, %582 : vector<64x128xf32>
    %cst_148 = arith.constant 2.000000e+01 : f32
    %584 = vector.broadcast %cst_148 : f32 to vector<64x128xf32>
    %585 = arith.cmpf ogt, %583, %584 : vector<64x128xf32>
    %cst_149 = arith.constant 2.000000e+01 : f32
    %586 = vector.broadcast %cst_149 : f32 to vector<64x128xf32>
    %587 = arith.minimumf %583, %586 : vector<64x128xf32>
    %588 = math.exp %587 : vector<64x128xf32>
    %589 = math.log1p %588 : vector<64x128xf32>
    %590 = arith.select %585, %583, %589 : vector<64x128xi1>, vector<64x128xf32>
    %c1_i32 = arith.constant 1 : i32
    %591 = arith.cmpi ne, %arg1, %c1_i32 : i32
    %592 = arith.extui %591 : i1 to i32
    %c0_i32_150 = arith.constant 0 : i32
    %593 = arith.cmpi ne, %592, %c0_i32_150 : i32
    scf.if %593 {
      %c0_160 = arith.constant 0 : index
      %c0_161 = arith.constant 0 : index
      %611 = vector.load %arg8[%c0_160, %c0_161] : memref<64x1xf32, #tpu.memory_space<vmem>>, vector<64x1xf32>
      %cst_162 = arith.constant dense<0xFF800000> : vector<64xf32>
      %612 = vector.multi_reduction <maximumf>, %590, %cst_162 [1] : vector<64x128xf32> to vector<64xf32>
      %613 = vector.shape_cast %612 : vector<64xf32> to vector<64x1xf32>
      %614 = arith.maximumf %611, %613 : vector<64x1xf32>
      %615 = arith.subf %611, %614 : vector<64x1xf32>
      %616 = math.exp %615 : vector<64x1xf32>
      %c0_163 = arith.constant 0 : index
      %c0_164 = arith.constant 0 : index
      %617 = vector.load %arg9[%c0_163, %c0_164] : memref<64x1xf32, #tpu.memory_space<vmem>>, vector<64x1xf32>
      %618 = arith.mulf %616, %617 : vector<64x1xf32>
      %619 = vector.broadcast %614 : vector<64x1xf32> to vector<64x128xf32>
      %620 = arith.subf %590, %619 : vector<64x128xf32>
      %621 = math.exp %620 : vector<64x128xf32>
      %cst_165 = arith.constant dense<0.000000e+00> : vector<64xf32>
      %622 = vector.multi_reduction <add>, %621, %cst_165 [1] : vector<64x128xf32> to vector<64xf32>
      %623 = vector.shape_cast %622 : vector<64xf32> to vector<64x1xf32>
      %624 = arith.addf %618, %623 : vector<64x1xf32>
      %c0_166 = arith.constant 0 : index
      %c0_167 = arith.constant 0 : index
      %625 = vector.load %arg9[%c0_166, %c0_167] : memref<64x1xf32, #tpu.memory_space<vmem>>, vector<64x1xf32>
      tpu.vector_store %arg9[%c0_166, %c0_167], %624 {strides = array<i32>} : memref<64x1xf32, #tpu.memory_space<vmem>>, vector<64x1xf32>,
      %c0_168 = arith.constant 0 : index
      %c0_169 = arith.constant 0 : index
      %626 = vector.load %arg8[%c0_168, %c0_169] : memref<64x1xf32, #tpu.memory_space<vmem>>, vector<64x1xf32>
      tpu.vector_store %arg8[%c0_168, %c0_169], %614 {strides = array<i32>} : memref<64x1xf32, #tpu.memory_space<vmem>>, vector<64x1xf32>,
      %c0_170 = arith.constant 0 : index
      %c0_171 = arith.constant 0 : index
      %627 = vector.load %arg10[%c0_170, %c0_171] : memref<64x1xf32, #tpu.memory_space<vmem>>, vector<64x1xf32>
      %cst_172 = arith.constant dense<0.000000e+00> : vector<64xf32>
      %628 = vector.multi_reduction <add>, %590, %cst_172 [1] : vector<64x128xf32> to vector<64xf32>
      %629 = vector.shape_cast %628 : vector<64xf32> to vector<64x1xf32>
      %630 = arith.addf %627, %629 : vector<64x1xf32>
      %c0_173 = arith.constant 0 : index
      %c0_174 = arith.constant 0 : index
      %631 = vector.load %arg10[%c0_173, %c0_174] : memref<64x1xf32, #tpu.memory_space<vmem>>, vector<64x1xf32>
      tpu.vector_store %arg10[%c0_173, %c0_174], %630 {strides = array<i32>} : memref<64x1xf32, #tpu.memory_space<vmem>>, vector<64x1xf32>,
    } else {
    }
    %c1_i32_151 = arith.constant 1 : i32
    %594 = arith.cmpi eq, %arg1, %c1_i32_151 : i32
    %595 = arith.extui %594 : i1 to i32
    %c0_i32_152 = arith.constant 0 : i32
    %596 = arith.cmpi ne, %595, %c0_i32_152 : i32
    scf.if %596 {
      %c128_i32_160 = arith.constant 128 : i32
      %611 = arith.muli %arg1, %c128_i32_160 : i32
      %612 = tpu.iota {dimensions = array<i32: 1>} : vector<64x128xi32>
      %613 = vector.broadcast %611 : i32 to vector<64x128xi32>
      %614 = arith.addi %613, %612 : vector<64x128xi32>
      %c160_i32 = arith.constant 160 : i32
      %615 = vector.broadcast %c160_i32 : i32 to vector<64x128xi32>
      %616 = arith.cmpi slt, %614, %615 : vector<64x128xi32>
      %cst_161 = arith.constant 0xFF800000 : f32
      %617 = vector.broadcast %cst_161 : f32 to vector<64x128xf32>
      %618 = arith.select %616, %590, %617 : vector<64x128xi1>, vector<64x128xf32>
      %cst_162 = arith.constant 0.000000e+00 : f32
      %619 = vector.broadcast %cst_162 : f32 to vector<64x128xf32>
      %620 = arith.select %616, %590, %619 : vector<64x128xi1>, vector<64x128xf32>
      %c0_163 = arith.constant 0 : index
      %c0_164 = arith.constant 0 : index
      %621 = vector.load %arg8[%c0_163, %c0_164] : memref<64x1xf32, #tpu.memory_space<vmem>>, vector<64x1xf32>
      %cst_165 = arith.constant dense<0xFF800000> : vector<64xf32>
      %622 = vector.multi_reduction <maximumf>, %618, %cst_165 [1] : vector<64x128xf32> to vector<64xf32>
      %623 = vector.shape_cast %622 : vector<64xf32> to vector<64x1xf32>
      %624 = arith.maximumf %621, %623 : vector<64x1xf32>
      %625 = arith.subf %621, %624 : vector<64x1xf32>
      %626 = math.exp %625 : vector<64x1xf32>
      %c0_166 = arith.constant 0 : index
      %c0_167 = arith.constant 0 : index
      %627 = vector.load %arg9[%c0_166, %c0_167] : memref<64x1xf32, #tpu.memory_space<vmem>>, vector<64x1xf32>
      %628 = arith.mulf %626, %627 : vector<64x1xf32>
      %629 = vector.broadcast %624 : vector<64x1xf32> to vector<64x128xf32>
      %630 = arith.subf %618, %629 : vector<64x128xf32>
      %631 = math.exp %630 : vector<64x128xf32>
      %cst_168 = arith.constant dense<0.000000e+00> : vector<64xf32>
      %632 = vector.multi_reduction <add>, %631, %cst_168 [1] : vector<64x128xf32> to vector<64xf32>
      %633 = vector.shape_cast %632 : vector<64xf32> to vector<64x1xf32>
      %634 = arith.addf %628, %633 : vector<64x1xf32>
      %c0_169 = arith.constant 0 : index
      %c0_170 = arith.constant 0 : index
      %635 = vector.load %arg9[%c0_169, %c0_170] : memref<64x1xf32, #tpu.memory_space<vmem>>, vector<64x1xf32>
      tpu.vector_store %arg9[%c0_169, %c0_170], %634 {strides = array<i32>} : memref<64x1xf32, #tpu.memory_space<vmem>>, vector<64x1xf32>,
      %c0_171 = arith.constant 0 : index
      %c0_172 = arith.constant 0 : index
      %636 = vector.load %arg8[%c0_171, %c0_172] : memref<64x1xf32, #tpu.memory_space<vmem>>, vector<64x1xf32>
      tpu.vector_store %arg8[%c0_171, %c0_172], %624 {strides = array<i32>} : memref<64x1xf32, #tpu.memory_space<vmem>>, vector<64x1xf32>,
      %c0_173 = arith.constant 0 : index
      %c0_174 = arith.constant 0 : index
      %637 = vector.load %arg10[%c0_173, %c0_174] : memref<64x1xf32, #tpu.memory_space<vmem>>, vector<64x1xf32>
      %cst_175 = arith.constant dense<0.000000e+00> : vector<64xf32>
      %638 = vector.multi_reduction <add>, %620, %cst_175 [1] : vector<64x128xf32> to vector<64xf32>
      %639 = vector.shape_cast %638 : vector<64xf32> to vector<64x1xf32>
      %640 = arith.addf %637, %639 : vector<64x1xf32>
      %c0_176 = arith.constant 0 : index
      %c0_177 = arith.constant 0 : index
      %641 = vector.load %arg10[%c0_176, %c0_177] : memref<64x1xf32, #tpu.memory_space<vmem>>, vector<64x1xf32>
      tpu.vector_store %arg10[%c0_176, %c0_177], %640 {strides = array<i32>} : memref<64x1xf32, #tpu.memory_space<vmem>>, vector<64x1xf32>,
    } else {
    }
    %c64_i32 = arith.constant 64 : i32
    %597 = arith.muli %arg0, %c64_i32 : i32
    %c1_i32_153 = arith.constant 1 : i32
    %598 = arith.addi %arg1, %c1_i32_153 : i32
    %c128_i32 = arith.constant 128 : i32
    %599 = arith.muli %598, %c128_i32 : i32
    %600 = arith.cmpi slt, %597, %599 : i32
    %c128_i32_154 = arith.constant 128 : i32
    %601 = arith.muli %arg1, %c128_i32_154 : i32
    %c1_i32_155 = arith.constant 1 : i32
    %602 = arith.addi %arg0, %c1_i32_155 : i32
    %c64_i32_156 = arith.constant 64 : i32
    %603 = arith.muli %602, %c64_i32_156 : i32
    %604 = arith.cmpi slt, %601, %603 : i32
    %605 = arith.andi %600, %604 : i1
    %606 = arith.extui %605 : i1 to i32
    %c0_i32_157 = arith.constant 0 : i32
    %607 = arith.cmpi ne, %606, %c0_i32_157 : i32
    scf.if %607 {
      %c64_i32_160 = arith.constant 64 : i32
      %611 = arith.muli %arg0, %c64_i32_160 : i32
      %612 = tpu.iota {dimensions = array<i32: 0>} : vector<64x128xi32>
      %613 = vector.broadcast %611 : i32 to vector<64x128xi32>
      %614 = arith.addi %613, %612 : vector<64x128xi32>
      %c128_i32_161 = arith.constant 128 : i32
      %615 = arith.muli %arg1, %c128_i32_161 : i32
      %616 = tpu.iota {dimensions = array<i32: 1>} : vector<64x128xi32>
      %617 = vector.broadcast %615 : i32 to vector<64x128xi32>
      %618 = arith.addi %617, %616 : vector<64x128xi32>
      %c0_162 = arith.constant 0 : index
      %c0_163 = arith.constant 0 : index
      %619 = vector.load %arg11[%c0_162, %c0_163] : memref<64x1xf32, #tpu.memory_space<vmem>>, vector<64x1xf32>
      %620 = arith.cmpi eq, %614, %618 : vector<64x128xi32>
      %cst_164 = arith.constant 0.000000e+00 : f32
      %621 = vector.broadcast %cst_164 : f32 to vector<64x128xf32>
      %622 = arith.select %620, %590, %621 : vector<64x128xi1>, vector<64x128xf32>
      %cst_165 = arith.constant dense<0.000000e+00> : vector<64xf32>
      %623 = vector.multi_reduction <add>, %622, %cst_165 [1] : vector<64x128xf32> to vector<64xf32>
      %624 = vector.shape_cast %623 : vector<64xf32> to vector<64x1xf32>
      %625 = arith.addf %619, %624 : vector<64x1xf32>
      %c0_166 = arith.constant 0 : index
      %c0_167 = arith.constant 0 : index
      %626 = vector.load %arg11[%c0_166, %c0_167] : memref<64x1xf32, #tpu.memory_space<vmem>>, vector<64x1xf32>
      tpu.vector_store %arg11[%c0_166, %c0_167], %625 {strides = array<i32>} : memref<64x1xf32, #tpu.memory_space<vmem>>, vector<64x1xf32>,
    } else {
    }
    %c1_i32_158 = arith.constant 1 : i32
    %608 = arith.cmpi eq, %arg1, %c1_i32_158 : i32
    %609 = arith.extui %608 : i1 to i32
    %c0_i32_159 = arith.constant 0 : i32
    %610 = arith.cmpi ne, %609, %c0_i32_159 : i32
    scf.if %610 {
      %c0_160 = arith.constant 0 : index
      %c0_161 = arith.constant 0 : index
      %611 = vector.load %arg8[%c0_160, %c0_161] : memref<64x1xf32, #tpu.memory_space<vmem>>, vector<64x1xf32>
      %c0_162 = arith.constant 0 : index
      %c0_163 = arith.constant 0 : index
      %612 = vector.load %arg9[%c0_162, %c0_163] : memref<64x1xf32, #tpu.memory_space<vmem>>, vector<64x1xf32>
      %613 = math.log %612 : vector<64x1xf32>
      %614 = arith.addf %611, %613 : vector<64x1xf32>
      %c0_164 = arith.constant 0 : index
      %c0_165 = arith.constant 0 : index
      %615 = vector.load %arg5[%c0_164, %c0_165] : memref<64x1xf32, #tpu.memory_space<vmem>>, vector<64x1xf32>
      tpu.vector_store %arg5[%c0_164, %c0_165], %614 {strides = array<i32>} : memref<64x1xf32, #tpu.memory_space<vmem>>, vector<64x1xf32>,
      %c0_166 = arith.constant 0 : index
      %c0_167 = arith.constant 0 : index
      %616 = vector.load %arg10[%c0_166, %c0_167] : memref<64x1xf32, #tpu.memory_space<vmem>>, vector<64x1xf32>
      %c0_168 = arith.constant 0 : index
      %c0_169 = arith.constant 0 : index
      %617 = vector.load %arg6[%c0_168, %c0_169] : memref<64x1xf32, #tpu.memory_space<vmem>>, vector<64x1xf32>
      tpu.vector_store %arg6[%c0_168, %c0_169], %616 {strides = array<i32>} : memref<64x1xf32, #tpu.memory_space<vmem>>, vector<64x1xf32>,
      %c0_170 = arith.constant 0 : index
      %c0_171 = arith.constant 0 : index
      %618 = vector.load %arg11[%c0_170, %c0_171] : memref<64x1xf32, #tpu.memory_space<vmem>>, vector<64x1xf32>
      %c0_172 = arith.constant 0 : index
      %c0_173 = arith.constant 0 : index
      %619 = vector.load %arg7[%c0_172, %c0_173] : memref<64x1xf32, #tpu.memory_space<vmem>>, vector<64x1xf32>
      tpu.vector_store %arg7[%c0_172, %c0_173], %618 {strides = array<i32>} : memref<64x1xf32, #tpu.memory_space<vmem>>, vector<64x1xf32>,
    } else {
    }
    return
  }
  func.func @transform_0(%arg0: i32, %arg1: i32) -> (i32, i32) {
    %c0_i32 = arith.constant 0 : i32
    %c0_i32_0 = arith.constant 0 : i32
    return %c0_i32, %arg1 : i32, i32
  }
  func.func @transform_1(%arg0: i32, %arg1: i32) -> (i32, i32) {
    %c0_i32 = arith.constant 0 : i32
    %c0_i32_0 = arith.constant 0 : i32
    return %arg0, %c0_i32 : i32, i32
  }
  func.func @transform_2(%arg0: i32, %arg1: i32) -> i32 {
    %c0_i32 = arith.constant 0 : i32
    %c0_i32_0 = arith.constant 0 : i32
    return %c0_i32 : i32
  }
  func.func @transform_3(%arg0: i32, %arg1: i32) -> (i32, i32) {
    %c0_i32 = arith.constant 0 : i32
    %c0_i32_0 = arith.constant 0 : i32
    return %arg0, %c0_i32 : i32, i32
  }
  func.func @transform_4(%arg0: i32, %arg1: i32) -> (i32, i32) {
    %c0_i32 = arith.constant 0 : i32
    %c0_i32_0 = arith.constant 0 : i32
    return %arg0, %c0_i32 : i32, i32
  }
  func.func @transform_5(%arg0: i32, %arg1: i32) -> (i32, i32) {
    %c0_i32 = arith.constant 0 : i32
    %c0_i32_0 = arith.constant 0 : i32
    return %arg0, %c0_i32 : i32, i32
  }
}

</mosaic_0001>

<bundles_post_ra>
// kernel: tpu_custom_call.1
= control target key start
LH: loop header
LB: loop body
LE: loop exit
PB: predicated region body
PF: predicated region fallthrough
CT: control target
= control target key end

     0   :  { %s9522_s0 = inlined_call_operand.vmem [shape: f32[72,256], index: 0, kind: input, shape index: {}]   ;;  %s9523_s1 = inlined_call_operand.vmem [shape: f32[192,72], index: 1, kind: input, shape index: {}]   ;;  %s9524_s2 = inlined_call_operand.<no memory space> [shape: f32[1], index: 2, kind: input, shape index: {}]   ;;  %s9525_s3 = inlined_call_operand.vmem [shape: f32[192,1], index: 3, kind: output, shape index: {0}]   ;;  %s9526_s4 = inlined_call_operand.vmem [shape: f32[192,1], index: 4, kind: output, shape index: {1}]   ;;  %s9527_s5 = inlined_call_operand.vmem [shape: f32[192,1], index: 5, kind: output, shape index: {2}]  }
   0x1   :  { %11 = sst [smem:[#allocation6]] %s9524_s2 }
   0x2   :  { %s6340_s20 = smov 0   ;;  %s6342_s21 = smov 0  }
   0x3   :  { %s6344_s22 = smov 0   ;;  %s6346_s23 = smov 0  }
   0x4   :  { %s6348_s24 = smov 0   ;;  %s6350_s25 = smov 0  }
   0x5   :  { %s6352_s26 = smov 0  }
   0x6 LB: > { %s26_s2 = sadd.s32 1, %s6221_s24  ;;  %s29_s27 = sadd.s32 1, %s6225_s25  ;;  %s6229_s26 = sphi %s6352_s26, %s17_s26   ;;  %s6225_s25 = sphi %s6350_s25, %s10412_s25   ;;  %s6221_s24 = sphi %s6348_s24, %s10411_s24   ;;  %s6217_s23 = sphi %s6346_s23, %s10410_s23   ;;  %s6213_s22 = sphi %s6344_s22, %s10409_s22   ;;  %s6209_s21 = sphi %s6342_s21, %s10408_s21   ;;  %s6205_s20 = sphi %s6340_s20, %s10407_s20  }
   0x7   : > { %p27_p0 = scmp.ge.s32.totalorder %s26_s2, 2  ;;  %s36_s28 = sadd.s32 1, %s6209_s21 }
   0x8   : > { %p43_p1 = scmp.ne.s32.totalorder %s6209_s21, %s6205_s20  ;;  %p44_p2 = scmp.eq.s32.totalorder %s6229_s26, 0 }
   0x9   : > { %s10414_s2 = smov (%p27_p0, %s26_s2), 0  ;;  %s10416_s27 = smov (!%p27_p0, %s29_s27), %s6225_s25 }
   0xa   : > { %s33_s29 = ssub.s32 %s6221_s24, %s10414_s2  ;;  %p45_p3 = por %p44_p2, %p43_p1 }
   0xb   : > { %p31_p4 = scmp.ge.s32.totalorder %s10416_s27, 3  ;;  %p34_p5 = scmp.eq.s32.totalorder %s33_s29, 0 }
   0xc   : > { %p5502_p6 = scmp.ge.s32.totalorder %s6229_s26, 6 }
   0xd   : > { %s10418_s27 = smov (%p31_p4, %s10416_s27), 0 }
   0xe   : > { %s6389_s30 = scalar_select %p34_p5, %s6209_s21, %s36_s28  }
   0xf   : > { %197 = sbr.rel (%p5502_p6) target bundleno = 33 (0x21), region = 20 }
  0x14   : > { %200 = sbr.rel (!%p45_p3) target bundleno = 33 (0x21), region = 24  ;;  %s202_s6 = sand.u32 (%p45_p3), 1, %s6209_s21  }
  0x15   : > { %s5503_s7 = sshll.u32 (%p45_p3), %s6221_s24, 3  ;;  %s5528_s8 = smul.u32 (%p45_p3), 72, %s202_s6 }
  0x16   : > { %s206_s11 = scalar_lea.vmem (%p45_p3), %s9522_s0, %s5503_s7 }
  0x17   : > { %v251_v0 = vld [vmem:[%s206_s11] sm:$0xff] (%p45_p3)  ;;  %v253_v1 = vld [vmem:[%s206_s11 + $0x10] sm:$0xff] (%p45_p3)  ;;  %s204_s12 = scalar_lea.vmem (%p45_p3), [#allocation7], %s5528_s8 }
  0x18   : > { %v255_v2 = vld [vmem:[%s206_s11 + $0x20] sm:$0xff] (%p45_p3)  ;;  %252 = vst [vmem:[%s204_s12] sm:$0xff] (%p45_p3), %v251_v0  ;;  %v257_v3 = vld [vmem:[%s206_s11 + $0x30] sm:$0xff] (%p45_p3) }
  0x19   : > { %254 = vst [vmem:[%s204_s12 + $0x8] sm:$0xff] %v253_v1  ;;  %v259_v4 = vld [vmem:[%s206_s11 + $0x40] sm:$0xff]  ;;  %v261_v5 = vld [vmem:[%s206_s11 + $0x50] sm:$0xff] }
  0x1a   : > { %256 = vst [vmem:[%s204_s12 + $0x10] sm:$0xff] %v255_v2  ;;  %v263_v6 = vld [vmem:[%s206_s11 + $0x60] sm:$0xff]  ;;  %v265_v7 = vld [vmem:[%s206_s11 + $0x70] sm:$0xff] }
  0x1b   : > { %258 = vst [vmem:[%s204_s12 + $0x18] sm:$0xff] %v257_v3  ;;  %v267_v8 = vld [vmem:[%s206_s11 + $0x80] sm:$0xff] }
  0x1c   : > { %260 = vst [vmem:[%s204_s12 + $0x20] sm:$0xff] %v259_v4 }
  0x1d   : > { %262 = vst [vmem:[%s204_s12 + $0x28] sm:$0xff] %v261_v5 }
  0x1e   : > { %264 = vst [vmem:[%s204_s12 + $0x30] sm:$0xff] %v263_v6 }
  0x1f   : > { %266 = vst [vmem:[%s204_s12 + $0x38] sm:$0xff] %v265_v7 }
  0x20   : > { %268 = vst [vmem:[%s204_s12 + $0x40] sm:$0xff] %v267_v8 }
  0x21 PF: > { %p5504_p7 = scmp.ge.s32.totalorder %s6229_s26, 1  ;;  %p282_p8 = scmp.lt.s32.totalorder %s6229_s26, 7 }
  0x23   : > { %p283_p9 = pnand %p5504_p7, %p282_p8 }
  0x25   : > { %286 = sbr.rel (%p283_p9) target bundleno = 3020 (0xbcc), region = 66 }
  0x2a   : > { %s289_s13 = sand.u32 1, %s6205_s20   ;;  %s5505_s14 = sshll.u32 %s6217_s23, 3 }
  0x2b   : > { %s5529_s15 = smul.u32 72, %s289_s13  ;;  %p332_p10 = scmp.lt.s32.totalorder %s5505_s14, 23 }
  0x2c   : > { %p5513_p11 = scmp.ne.s32.totalorder %s6213_s22, 0 }
  0x2d   : > { %s10420_s14 = smov (!%p332_p10, %s5505_s14), 23  ;;  %s6421_s12 = scalar_lea.vmem [#allocation7], %s5529_s15 }
  0x2e   : > { %s5506_s16 = sshll.u32 %s10420_s14, 3  ;;  %358 = sbr.rel (%p5513_p11) target bundleno = 84 (0x54), region = 74 }
  0x2f   : > { %s6404_s19 = scalar_lea.vmem %s9523_s1, %s5506_s16  ;;  %s6409_s6 = scalar_lea.vmem %s9525_s3, %s5506_s16 }
  0x30   : > { %s6414_s9 = scalar_lea.vmem %s9526_s4, %s5506_s16  ;;  %s6419_s11 = scalar_lea.vmem %s9527_s5, %s5506_s16 }
  0x33   : > { %vm359_vm0 = vcmask 7168   ;;  %v6231_v9 = vmov -inf   ;;  %v6232_v10 = vmov 0.0  }
  0x34   : > { %360 = vst.msk [vmem:[#allocation2] sm:$0xff] %vm359_vm0, %v6231_v9 }
  0x35   : > { %361 = vst.msk [vmem:[#allocation2 + $0x8] sm:$0xff] %vm359_vm0, %v6231_v9 }
  0x36   : > { %362 = vst.msk [vmem:[#allocation2 + $0x10] sm:$0xff] %vm359_vm0, %v6231_v9 }
  0x37   : > { %363 = vst.msk [vmem:[#allocation2 + $0x18] sm:$0xff] %vm359_vm0, %v6231_v9 }
  0x38   : > { %364 = vst.msk [vmem:[#allocation2 + $0x20] sm:$0xff] %vm359_vm0, %v6231_v9 }
  0x39   : > { %365 = vst.msk [vmem:[#allocation2 + $0x28] sm:$0xff] %vm359_vm0, %v6231_v9 }
  0x3a   : > { %366 = vst.msk [vmem:[#allocation2 + $0x30] sm:$0xff] %vm359_vm0, %v6231_v9 }
  0x3b   : > { %367 = vst.msk [vmem:[#allocation2 + $0x38] sm:$0xff] %vm359_vm0, %v6231_v9 }
  0x3c   : > { %368 = vst.msk [vmem:[#allocation3] sm:$0xff] %vm359_vm0, %v6232_v10 }
  0x3d   : > { %369 = vst.msk [vmem:[#allocation3 + $0x8] sm:$0xff] %vm359_vm0, %v6232_v10 }
  0x3e   : > { %370 = vst.msk [vmem:[#allocation3 + $0x10] sm:$0xff] %vm359_vm0, %v6232_v10 }
  0x3f   : > { %371 = vst.msk [vmem:[#allocation3 + $0x18] sm:$0xff] %vm359_vm0, %v6232_v10 }
  0x40   : > { %372 = vst.msk [vmem:[#allocation3 + $0x20] sm:$0xff] %vm359_vm0, %v6232_v10 }
  0x41   : > { %373 = vst.msk [vmem:[#allocation3 + $0x28] sm:$0xff] %vm359_vm0, %v6232_v10 }
  0x42   : > { %374 = vst.msk [vmem:[#allocation3 + $0x30] sm:$0xff] %vm359_vm0, %v6232_v10 }
  0x43   : > { %375 = vst.msk [vmem:[#allocation3 + $0x38] sm:$0xff] %vm359_vm0, %v6232_v10 }
  0x44   : > { %376 = vst.msk [vmem:[#allocation4] sm:$0xff] %vm359_vm0, %v6232_v10 }
  0x45   : > { %377 = vst.msk [vmem:[#allocation4 + $0x8] sm:$0xff] %vm359_vm0, %v6232_v10 }
  0x46   : > { %378 = vst.msk [vmem:[#allocation4 + $0x10] sm:$0xff] %vm359_vm0, %v6232_v10 }
  0x47   : > { %379 = vst.msk [vmem:[#allocation4 + $0x18] sm:$0xff] %vm359_vm0, %v6232_v10 }
  0x48   : > { %380 = vst.msk [vmem:[#allocation4 + $0x20] sm:$0xff] %vm359_vm0, %v6232_v10 }
  0x49   : > { %381 = vst.msk [vmem:[#allocation4 + $0x28] sm:$0xff] %vm359_vm0, %v6232_v10 }
  0x4a   : > { %382 = vst.msk [vmem:[#allocation4 + $0x30] sm:$0xff] %vm359_vm0, %v6232_v10 }
  0x4b   : > { %383 = vst.msk [vmem:[#allocation4 + $0x38] sm:$0xff] %vm359_vm0, %v6232_v10 }
  0x4c   : > { %384 = vst.msk [vmem:[#allocation5] sm:$0xff] %vm359_vm0, %v6232_v10 }
  0x4d   : > { %385 = vst.msk [vmem:[#allocation5 + $0x8] sm:$0xff] %vm359_vm0, %v6232_v10 }
  0x4e   : > { %386 = vst.msk [vmem:[#allocation5 + $0x10] sm:$0xff] %vm359_vm0, %v6232_v10 }
  0x4f   : > { %387 = vst.msk [vmem:[#allocation5 + $0x18] sm:$0xff] %vm359_vm0, %v6232_v10 }
  0x50   : > { %388 = vst.msk [vmem:[#allocation5 + $0x20] sm:$0xff] %vm359_vm0, %v6232_v10 }
  0x51   : > { %389 = vst.msk [vmem:[#allocation5 + $0x28] sm:$0xff] %vm359_vm0, %v6232_v10 }
  0x52   : > { %390 = vst.msk [vmem:[#allocation5 + $0x30] sm:$0xff] %vm359_vm0, %v6232_v10 }
  0x53   : > { %391 = vst.msk [vmem:[#allocation5 + $0x38] sm:$0xff] %vm359_vm0, %v6232_v10 }
  0x54 PF: > { %v6457_v11 = vld [vmem:[%s6404_s19 + $0x20] sm:$0xff]  ;;  %v6460_v12 = vld [vmem:[%s6404_s19 + $0x10] sm:$0xff]  ;;  %v6233_v14 = vmov 0   ;;  %v6469_v15 = vld [vmem:[%s6404_s19 + $0x28] sm:$0xff]  ;;  %v6234_v20 = vmov 1   ;;  %v6235_v21 = vmov 2  }
  0x55   : > { %v6463_v13 = vld [vmem:[%s6404_s19] sm:$0xff]  ;;  %5664 = vset.pattern.permute.xlu2 %v6233_v14  ;;  %5663 = vset.pattern.permute.xlu1 %v6233_v14  ;;  %v6472_v16 = vld [vmem:[%s6404_s19 + $0x18] sm:$0xff]  ;;  %v6475_v17 = vld [vmem:[%s6404_s19 + $0x8] sm:$0xff]  ;;  %v6236_v22 = vmov 3   ;;  %v6237_v23 = vmov 4   ;;  %v6238_v25 = vmov 5  }
  0x56   : > { %5662 = vset.pattern.permute.xlu0 %v6233_v14  ;;  %423 = vperm.xlu2 %5664, %v6457_v11   ;;  %v6481_v18 = vld [vmem:[%s6404_s19 + $0x38] sm:$0xff]  ;;  %v6484_v19 = vld [vmem:[%s6404_s19 + $0x30] sm:$0xff]  ;;  %v6239_v28 = vmov 6   ;;  %v6240_v34 = vmov 7   ;;  %v6241_v41 = vmov 8   ;;  %v6242_v49 = vmov 9  }
  0x57   : > { %413 = vperm.xlu1 %5663, %v6460_v12   ;;  %403 = vperm.xlu0 %5662, %v6463_v13   ;;  %v6243_v56 = vmov 10   ;;  %v9532_v63 = vmov 11   ;;  %v9530_v6 = vmov 12   ;;  %s8232_s13 = sld [smem:[#allocation6]]  ;;  %p5514_p12 = scmp.eq.s32.totalorder %s6213_s22, 1 }
  0x5e   : > { %428 = vperm.xlu2 %5664, %v6469_v15  }
  0x5f   : > { %418 = vperm.xlu1 %5663, %v6472_v16   ;;  %408 = vperm.xlu0 %5662, %v6475_v17  }
  0x66   : > { %5665 = vset.pattern.permute.xlu2 %v6234_v20 }
  0x67   : > { %438 = vperm.xlu1 %5663, %v6481_v18   ;;  %433 = vperm.xlu0 %5662, %v6484_v19  }
  0x68   : > { %468 = vperm.xlu2 %5665, %v6463_v13  }
  0x6f   : > { %5667 = vset.pattern.permute.xlu1 %v6234_v20  ;;  %5666 = vset.pattern.permute.xlu0 %v6234_v20 }
  0x70   : > { %476 = vperm.xlu1 %5667, %v6460_v12   ;;  %480 = vperm.xlu2 %5665, %v6472_v16  }
  0x71   : > { %472 = vperm.xlu0 %5666, %v6475_v17  }
  0x78   : > { %484 = vperm.xlu1 %5667, %v6457_v11   ;;  %488 = vperm.xlu2 %5665, %v6469_v15  }
  0x79   : > { %492 = vperm.xlu0 %5666, %v6484_v19  }
  0x80   : > { %496 = vperm.xlu1 %5667, %v6481_v18   ;;  %5668 = vset.pattern.permute.xlu2 %v6235_v21 }
  0x81   : > { %5669 = vset.pattern.permute.xlu0 %v6235_v21  ;;  %526 = vperm.xlu2 %5668, %v6463_v13  }
  0x82   : > { %530 = vperm.xlu0 %5669, %v6475_v17  }
  0x88   : > { %5670 = vset.pattern.permute.xlu1 %v6235_v21  ;;  %v9528_v21 = vmov 13  }
  0x89   : > { %534 = vperm.xlu1 %5670, %v6460_v12   ;;  %538 = vperm.xlu2 %5668, %v6472_v16  }
  0x8a   : > { %550 = vperm.xlu0 %5669, %v6484_v19  }
  0x91   : > { %542 = vperm.xlu1 %5670, %v6457_v11   ;;  %546 = vperm.xlu2 %5668, %v6469_v15  }
  0x92   : > { %5672 = vset.pattern.permute.xlu0 %v6236_v22 }
  0x93   : > { %588 = vperm.xlu0 %5672, %v6475_v17  }
  0x99   : > { %554 = vperm.xlu1 %5670, %v6481_v18   ;;  %5671 = vset.pattern.permute.xlu2 %v6236_v22 }
  0x9a   : > { %584 = vperm.xlu2 %5671, %v6463_v13  }
  0x9b   : > { %608 = vperm.xlu0 %5672, %v6484_v19  }
  0xa1   : > { %5673 = vset.pattern.permute.xlu1 %v6236_v22 }
  0xa2   : > { %592 = vperm.xlu1 %5673, %v6460_v12   ;;  %596 = vperm.xlu2 %5671, %v6472_v16  }
  0xa3   : > { %5675 = vset.pattern.permute.xlu0 %v6237_v23 }
  0xa4   : > { %646 = vperm.xlu0 %5675, %v6475_v17  }
  0xaa   : > { %600 = vperm.xlu1 %5673, %v6457_v11   ;;  %604 = vperm.xlu2 %5671, %v6469_v15  }
  0xac   : > { %666 = vperm.xlu0 %5675, %v6484_v19  }
  0xb0   : > { %v6513_v24 = vpop.permute.xlu2 %423 }
  0xb1   : > { %9656 = vst [vmem:[#allocation8_spill] sm:$0xff] %v6513_v24 }
  0xb2   : > { %612 = vperm.xlu1 %5673, %v6481_v18   ;;  %5674 = vset.pattern.permute.xlu2 %v6237_v23 }
  0xb3   : > { %642 = vperm.xlu2 %5674, %v6463_v13  }
  0xb4   : > { %5678 = vset.pattern.permute.xlu0 %v6238_v25 }
  0xb5   : > { %704 = vperm.xlu0 %5678, %v6475_v17  }
  0xb8   : > { %v6518_v26 = vpop.permute.xlu2 %428 }
  0xb9   : > { %9657 = vst [vmem:[#allocation9_spill] sm:$0xff] %v6518_v26  ;;  %v9785_v26 = vmov 22  }
  0xba   : > { %5676 = vset.pattern.permute.xlu1 %v6237_v23 }
  0xbb   : > { %650 = vperm.xlu1 %5676, %v6460_v12   ;;  %654 = vperm.xlu2 %5674, %v6472_v16  }
  0xbd   : > { %724 = vperm.xlu0 %5678, %v6484_v19  }
  0xc2   : > { %v6523_v27 = vpop.permute.xlu2 %468 }
  0xc3   : > { %9658 = vst [vmem:[#allocation10_spill] sm:$0xff] %v6523_v27  ;;  %658 = vperm.xlu1 %5676, %v6457_v11   ;;  %662 = vperm.xlu2 %5674, %v6469_v15  }
  0xc5   : > { %5681 = vset.pattern.permute.xlu0 %v6239_v28 }
  0xc6   : > { %762 = vperm.xlu0 %5681, %v6475_v17  }
  0xc9   : > { %v6528_v29 = vpop.permute.xlu1 %413  ;;  %v6535_v31 = vpop.permute.xlu0 %403 }
  0xca   : > { %9659 = vst [vmem:[#allocation11_spill] sm:$0xff] %v6528_v29  ;;  %v6530_v30 = vpop.permute.xlu2 %480 }
  0xcb   : > { %9660 = vst [vmem:[#allocation12_spill] sm:$0xff] %v6530_v30  ;;  %670 = vperm.xlu1 %5676, %v6481_v18   ;;  %5677 = vset.pattern.permute.xlu2 %v6238_v25 }
  0xcc   : > { %700 = vperm.xlu2 %5677, %v6463_v13   ;;  %9661 = vst [vmem:[#allocation13_spill] sm:$0xff] %v6535_v31 }
  0xce   : > { %782 = vperm.xlu0 %5681, %v6484_v19  }
  0xd1   : > { %v6537_v32 = vpop.permute.xlu1 %418  ;;  %v6544_v35 = vpop.permute.xlu0 %408 }
  0xd2   : > { %9662 = vst [vmem:[#allocation14_spill] sm:$0xff] %v6537_v32  ;;  %v6539_v33 = vpop.permute.xlu2 %488  ;;  %v7033_v32 = vld [vmem:[%s6404_s19 + $0x20] sm:$0xff] }
  0xd3   : > { %9663 = vst [vmem:[#allocation15_spill] sm:$0xff] %v6539_v33  ;;  %5679 = vset.pattern.permute.xlu1 %v6238_v25 }
  0xd4   : > { %708 = vperm.xlu1 %5679, %v6460_v12   ;;  %712 = vperm.xlu2 %5677, %v6472_v16  }
  0xd6   : > { %5684 = vset.pattern.permute.xlu0 %v6240_v34 }
  0xd7   : > { %820 = vperm.xlu0 %5684, %v6475_v17  }
  0xd9   : > { %v6546_v36 = vpop.permute.xlu1 %438  ;;  %v6553_v38 = vpop.permute.xlu0 %433 }
  0xda   : > { %9664 = vst [vmem:[#allocation16_spill] sm:$0xff] %v6546_v36 }
  0xdb   : > { %v6548_v37 = vpop.permute.xlu2 %526 }
  0xdc   : > { %9665 = vst [vmem:[#allocation17_spill] sm:$0xff] %v6548_v37  ;;  %716 = vperm.xlu1 %5679, %v6457_v11   ;;  %720 = vperm.xlu2 %5677, %v6469_v15  }
  0xdf   : > { %840 = vperm.xlu0 %5684, %v6484_v19  }
  0xe2   : > { %v6555_v39 = vpop.permute.xlu1 %476 }
  0xe3   : > { %9666 = vst [vmem:[#allocation18_spill] sm:$0xff] %v6555_v39  ;;  %v6557_v40 = vpop.permute.xlu2 %538  ;;  %v6561_v42 = vpop.permute.xlu0 %472  ;;  %v9560_v39 = vmov 27  }
  0xe4   : > { %9667 = vst [vmem:[#allocation19_spill] sm:$0xff] %v6557_v40  ;;  %728 = vperm.xlu1 %5679, %v6481_v18   ;;  %5680 = vset.pattern.permute.xlu2 %v6239_v28 }
  0xe5   : > { %758 = vperm.xlu2 %5680, %v6463_v13  }
  0xe7   : > { %5687 = vset.pattern.permute.xlu0 %v6241_v41 }
  0xe8   : > { %878 = vperm.xlu0 %5687, %v6475_v17  }
  0xea   : > { %v6564_v43 = vpop.permute.xlu1 %484 }
  0xeb   : > { %9668 = vst [vmem:[#allocation20_spill] sm:$0xff] %v6564_v43  ;;  %v6566_v44 = vpop.permute.xlu2 %546  ;;  %v6570_v45 = vpop.permute.xlu0 %492  ;;  %v9558_v43 = vmov 26  }
  0xec   : > { %9669 = vst [vmem:[#allocation21_spill] sm:$0xff] %v6566_v44  ;;  %5682 = vset.pattern.permute.xlu1 %v6239_v28 }
  0xed   : > { %766 = vperm.xlu1 %5682, %v6460_v12   ;;  %770 = vperm.xlu2 %5680, %v6472_v16  }
  0xf0   : > { %898 = vperm.xlu0 %5687, %v6484_v19  }
  0xf2   : > { %v6573_v46 = vpop.permute.xlu1 %496 }
  0xf3   : > { %9670 = vst [vmem:[#allocation22_spill] sm:$0xff] %v6573_v46  ;;  %v9556_v46 = vmov 25  }
  0xf4   : > { %v6575_v47 = vpop.permute.xlu2 %584  ;;  %v6579_v48 = vpop.permute.xlu0 %530 }
  0xf5   : > { %9671 = vst [vmem:[#allocation23_spill] sm:$0xff] %v6575_v47  ;;  %774 = vperm.xlu1 %5682, %v6457_v11   ;;  %778 = vperm.xlu2 %5680, %v6469_v15  }
  0xf8   : > { %5690 = vset.pattern.permute.xlu0 %v6242_v49 }
  0xf9   : > { %936 = vperm.xlu0 %5690, %v6475_v17  }
  0xfb   : > { %v6582_v50 = vpop.permute.xlu1 %534 }
  0xfc   : > { %9672 = vst [vmem:[#allocation24_spill] sm:$0xff] %v6582_v50  ;;  %v6584_v51 = vpop.permute.xlu2 %596  ;;  %v6588_v52 = vpop.permute.xlu0 %550 }
  0xfd   : > { %9673 = vst [vmem:[#allocation25_spill] sm:$0xff] %v6584_v51  ;;  %786 = vperm.xlu1 %5682, %v6481_v18   ;;  %5683 = vset.pattern.permute.xlu2 %v6240_v34  ;;  %v9552_v51 = vmov 23  }
  0xfe   : > { %816 = vperm.xlu2 %5683, %v6463_v13  }
 0x101   : > { %956 = vperm.xlu0 %5690, %v6484_v19  }
 0x103   : > { %v6591_v53 = vpop.permute.xlu1 %542 }
 0x104   : > { %9674 = vst [vmem:[#allocation26_spill] sm:$0xff] %v6591_v53  ;;  %v6593_v54 = vpop.permute.xlu2 %604 }
 0x105   : > { %9675 = vst [vmem:[#allocation27_spill] sm:$0xff] %v6593_v54  ;;  %5685 = vset.pattern.permute.xlu1 %v6240_v34  ;;  %v6597_v55 = vpop.permute.xlu0 %588 }
 0x106   : > { %824 = vperm.xlu1 %5685, %v6460_v12   ;;  %828 = vperm.xlu2 %5683, %v6472_v16  }
 0x109   : > { %5693 = vset.pattern.permute.xlu0 %v6243_v56 }
 0x10a   : > { %994 = vperm.xlu0 %5693, %v6475_v17  }
 0x10b   : > { %v6601_v57 = vpop.permute.xlu1 %554 }
 0x10c   : > { %9676 = vst [vmem:[#allocation28_spill] sm:$0xff] %v6601_v57 }
 0x10d   : > { %v6603_v58 = vpop.permute.xlu2 %642  ;;  %v6607_v59 = vpop.permute.xlu0 %608 }
 0x10e   : > { %9677 = vst [vmem:[#allocation29_spill] sm:$0xff] %v6603_v58  ;;  %832 = vperm.xlu1 %5685, %v6457_v11   ;;  %836 = vperm.xlu2 %5683, %v6469_v15  }
 0x112   : > { %1014 = vperm.xlu0 %5693, %v6484_v19  }
 0x114   : > { %v6610_v60 = vpop.permute.xlu1 %592 }
 0x115   : > { %9678 = vst [vmem:[#allocation30_spill] sm:$0xff] %v6610_v60  ;;  %v6612_v61 = vpop.permute.xlu2 %654 }
 0x116   : > { %9679 = vst [vmem:[#allocation31_spill] sm:$0xff] %v6612_v61  ;;  %844 = vperm.xlu1 %5685, %v6481_v18   ;;  %5686 = vset.pattern.permute.xlu2 %v6241_v41  ;;  %v6616_v62 = vpop.permute.xlu0 %646 }
 0x117   : > { %874 = vperm.xlu2 %5686, %v6463_v13  }
 0x11a   : > { %5696 = vset.pattern.permute.xlu0 %v9532_v63 }
 0x11b   : > { %1052 = vperm.xlu0 %5696, %v6475_v17  }
 0x11c   : > { %v6620_v0 = vpop.permute.xlu1 %600 }
 0x11d   : > { %9680 = vst [vmem:[#allocation32_spill] sm:$0xff] %v6620_v0  ;;  %v6622_v1 = vpop.permute.xlu2 %662  ;;  %v9546_v0 = vmov 20  }
 0x11e   : > { %9681 = vst [vmem:[#allocation33_spill] sm:$0xff] %v6622_v1  ;;  %5688 = vset.pattern.permute.xlu1 %v6241_v41  ;;  %v6626_v2 = vpop.permute.xlu0 %666 }
 0x11f   : > { %882 = vperm.xlu1 %5688, %v6460_v12   ;;  %886 = vperm.xlu2 %5686, %v6472_v16  }
 0x123   : > { %1072 = vperm.xlu0 %5696, %v6484_v19  }
 0x124   : > { %v6629_v3 = vpop.permute.xlu1 %612 }
 0x125   : > { %9682 = vst [vmem:[#allocation34_spill] sm:$0xff] %v6629_v3 }
 0x126   : > { %v6631_v4 = vpop.permute.xlu2 %700 }
 0x127   : > { %9683 = vst [vmem:[#allocation35_spill] sm:$0xff] %v6631_v4  ;;  %890 = vperm.xlu1 %5688, %v6457_v11   ;;  %894 = vperm.xlu2 %5686, %v6469_v15   ;;  %v6635_v5 = vpop.permute.xlu0 %704 }
 0x12b   : > { %5699 = vset.pattern.permute.xlu0 %v9530_v6 }
 0x12c   : > { %1110 = vperm.xlu0 %5699, %v6475_v17  }
 0x12d   : > { %v6639_v7 = vpop.permute.xlu1 %650 }
 0x12e   : > { %9684 = vst [vmem:[#allocation36_spill] sm:$0xff] %v6639_v7  ;;  %v6641_v8 = vpop.permute.xlu2 %712 }
 0x12f   : > { %9685 = vst [vmem:[#allocation37_spill] sm:$0xff] %v6641_v8  ;;  %902 = vperm.xlu1 %5688, %v6481_v18   ;;  %5689 = vset.pattern.permute.xlu2 %v6242_v49  ;;  %v6644_v9 = vpop.permute.xlu0 %724 }
 0x130   : > { %932 = vperm.xlu2 %5689, %v6463_v13  }
 0x134   : > { %1130 = vperm.xlu0 %5699, %v6484_v19  }
 0x135   : > { %v6648_v10 = vpop.permute.xlu1 %658 }
 0x136   : > { %9686 = vst [vmem:[#allocation38_spill] sm:$0xff] %v6648_v10  ;;  %v6650_v14 = vpop.permute.xlu2 %720 }
 0x137   : > { %9687 = vst [vmem:[#allocation39_spill] sm:$0xff] %v6650_v14  ;;  %5691 = vset.pattern.permute.xlu1 %v6242_v49  ;;  %v9534_v49 = vmov 14  }
 0x138   : > { %940 = vperm.xlu1 %5691, %v6460_v12   ;;  %944 = vperm.xlu2 %5689, %v6472_v16   ;;  %v6654_v20 = vpop.permute.xlu0 %762 }
 0x13c   : > { %5702 = vset.pattern.permute.xlu0 %v9528_v21 }
 0x13d   : > { %1168 = vperm.xlu0 %5702, %v6475_v17   ;;  %v6658_v22 = vpop.permute.xlu1 %670 }
 0x13e   : > { %9688 = vst [vmem:[#allocation40_spill] sm:$0xff] %v6658_v22 }
 0x13f   : > { %v6660_v23 = vpop.permute.xlu2 %758 }
 0x140   : > { %9689 = vst [vmem:[#allocation41_spill] sm:$0xff] %v6660_v23  ;;  %948 = vperm.xlu1 %5691, %v6457_v11   ;;  %952 = vperm.xlu2 %5689, %v6469_v15   ;;  %v6664_v25 = vpop.permute.xlu0 %782 }
 0x145   : > { %1188 = vperm.xlu0 %5702, %v6484_v19  }
 0x146   : > { %v6667_v28 = vpop.permute.xlu1 %708 }
 0x147   : > { %9690 = vst [vmem:[#allocation42_spill] sm:$0xff] %v6667_v28  ;;  %v6669_v34 = vpop.permute.xlu2 %770 }
 0x148   : > { %9691 = vst [vmem:[#allocation43_spill] sm:$0xff] %v6669_v34  ;;  %960 = vperm.xlu1 %5691, %v6481_v18   ;;  %5692 = vset.pattern.permute.xlu2 %v6243_v56 }
 0x149   : > { %990 = vperm.xlu2 %5692, %v6463_v13   ;;  %v6674_v41 = vpop.permute.xlu0 %820 }
 0x14d   : > { %5705 = vset.pattern.permute.xlu0 %v9534_v49 }
 0x14e   : > { %1226 = vperm.xlu0 %5705, %v6475_v17   ;;  %v6678_v21 = vpop.permute.xlu1 %716 }
 0x14f   : > { %9692 = vst [vmem:[#allocation44_spill] sm:$0xff] %v6678_v21  ;;  %v6680_v6 = vpop.permute.xlu2 %778 }
 0x150   : > { %9693 = vst [vmem:[#allocation45_spill] sm:$0xff] %v6680_v6  ;;  %5694 = vset.pattern.permute.xlu1 %v6243_v56  ;;  %v9536_v6 = vmov 15  }
 0x151   : > { %998 = vperm.xlu1 %5694, %v6460_v12   ;;  %1002 = vperm.xlu2 %5692, %v6472_v16   ;;  %v6685_v63 = vpop.permute.xlu0 %840 }
 0x156   : > { %1246 = vperm.xlu0 %5705, %v6484_v19   ;;  %v6688_v34 = vpop.permute.xlu1 %728 }
 0x157   : > { %9694 = vst [vmem:[#allocation46_spill] sm:$0xff] %v6688_v34  ;;  %v9698_v34 = vmov 11  }
 0x158   : > { %v6690_v28 = vpop.permute.xlu2 %816 }
 0x159   : > { %9695 = vst [vmem:[#allocation47_spill] sm:$0xff] %v6690_v28  ;;  %1006 = vperm.xlu1 %5694, %v6457_v11   ;;  %1010 = vperm.xlu2 %5692, %v6469_v15  }
 0x15a   : > { %v6694_v49 = vpop.permute.xlu0 %878 }
 0x15e   : > { %5708 = vset.pattern.permute.xlu0 %v9536_v6 }
 0x15f   : > { %1284 = vperm.xlu0 %5708, %v6475_v17   ;;  %v6698_v56 = vpop.permute.xlu1 %766 }
 0x160   : > { %9696 = vst [vmem:[#allocation48_spill] sm:$0xff] %v6698_v56  ;;  %v6700_v21 = vpop.permute.xlu2 %828 }
 0x161   : > { %9697 = vst [vmem:[#allocation49_spill] sm:$0xff] %v6700_v21  ;;  %1018 = vperm.xlu1 %5694, %v6481_v18   ;;  %5695 = vset.pattern.permute.xlu2 %v9698_v34  ;;  %v9538_v21 = vmov 16  }
 0x162   : > { %1048 = vperm.xlu2 %5695, %v6463_v13   ;;  %v6705_v28 = vpop.permute.xlu0 %898 }
 0x167   : > { %1304 = vperm.xlu0 %5708, %v6484_v19   ;;  %v6708_v23 = vpop.permute.xlu1 %774 }
 0x168   : > { %9699 = vst [vmem:[#allocation50_spill] sm:$0xff] %v6708_v23  ;;  %v6710_v22 = vpop.permute.xlu2 %836 }
 0x169   : > { %9700 = vst [vmem:[#allocation51_spill] sm:$0xff] %v6710_v22  ;;  %5697 = vset.pattern.permute.xlu1 %v9698_v34 }
 0x16a   : > { %1056 = vperm.xlu1 %5697, %v6460_v12   ;;  %1060 = vperm.xlu2 %5695, %v6472_v16  }
 0x16b   : > { %v6715_v6 = vpop.permute.xlu0 %936 }
 0x16f   : > { %5711 = vset.pattern.permute.xlu0 %v9538_v21  ;;  %v6718_v56 = vpop.permute.xlu1 %786  ;;  %v9705_v21 = vmov 12  }
 0x170   : > { %9701 = vst [vmem:[#allocation52_spill] sm:$0xff] %v6718_v56  ;;  %1342 = vperm.xlu0 %5711, %v6475_v17  }
 0x171   : > { %v6721_v14 = vpop.permute.xlu2 %874 }
 0x172   : > { %9702 = vst [vmem:[#allocation53_spill] sm:$0xff] %v6721_v14  ;;  %1064 = vperm.xlu1 %5697, %v6457_v11   ;;  %1068 = vperm.xlu2 %5695, %v6469_v15   ;;  %v9540_v14 = vmov 17  }
 0x173   : > { %v6725_v34 = vpop.permute.xlu0 %956 }
 0x178   : > { %1362 = vperm.xlu0 %5711, %v6484_v19   ;;  %v6728_v22 = vpop.permute.xlu1 %824 }
 0x179   : > { %9703 = vst [vmem:[#allocation54_spill] sm:$0xff] %v6728_v22  ;;  %v6730_v23 = vpop.permute.xlu2 %886 }
 0x17a   : > { %9704 = vst [vmem:[#allocation55_spill] sm:$0xff] %v6730_v23  ;;  %1076 = vperm.xlu1 %5697, %v6481_v18   ;;  %5698 = vset.pattern.permute.xlu2 %v9705_v21 }
 0x17b   : > { %1106 = vperm.xlu2 %5698, %v6463_v13  }
 0x17c   : > { %v6735_v56 = vpop.permute.xlu0 %994 }
 0x180   : > { %5714 = vset.pattern.permute.xlu0 %v9540_v14  ;;  %v6738_v10 = vpop.permute.xlu1 %832 }
 0x181   : > { %9706 = vst [vmem:[#allocation56_spill] sm:$0xff] %v6738_v10  ;;  %1400 = vperm.xlu0 %5714, %v6475_v17   ;;  %v6741_v8 = vpop.permute.xlu2 %894 }
 0x182   : > { %9707 = vst [vmem:[#allocation57_spill] sm:$0xff] %v6741_v8  ;;  %5700 = vset.pattern.permute.xlu1 %v9705_v21  ;;  %v9542_v8 = vmov 18  }
 0x183   : > { %1114 = vperm.xlu1 %5700, %v6460_v12   ;;  %1118 = vperm.xlu2 %5698, %v6472_v16  }
 0x184   : > { %v6746_v23 = vpop.permute.xlu0 %1014 }
 0x188   : > { %v6748_v22 = vpop.permute.xlu1 %844 }
 0x189   : > { %9708 = vst [vmem:[#allocation58_spill] sm:$0xff] %v6748_v22  ;;  %1420 = vperm.xlu0 %5714, %v6484_v19   ;;  %v9712_v22 = vmov 13  }
 0x18a   : > { %v6751_v7 = vpop.permute.xlu2 %932 }
 0x18b   : > { %9709 = vst [vmem:[#allocation59_spill] sm:$0xff] %v6751_v7  ;;  %1122 = vperm.xlu1 %5700, %v6457_v11   ;;  %1126 = vperm.xlu2 %5698, %v6469_v15  }
 0x18d   : > { %v6755_v14 = vpop.permute.xlu0 %1052 }
 0x191   : > { %5717 = vset.pattern.permute.xlu0 %v9542_v8  ;;  %v6758_v21 = vpop.permute.xlu1 %882 }
 0x192   : > { %9710 = vst [vmem:[#allocation60_spill] sm:$0xff] %v6758_v21  ;;  %1458 = vperm.xlu0 %5717, %v6475_v17   ;;  %v6761_v10 = vpop.permute.xlu2 %944  ;;  %v9544_v21 = vmov 19  }
 0x193   : > { %9711 = vst [vmem:[#allocation61_spill] sm:$0xff] %v6761_v10  ;;  %1134 = vperm.xlu1 %5700, %v6481_v18   ;;  %5701 = vset.pattern.permute.xlu2 %v9712_v22 }
 0x194   : > { %1164 = vperm.xlu2 %5701, %v6463_v13  }
 0x195   : > { %v6766_v7 = vpop.permute.xlu0 %1072 }
 0x199   : > { %v6768_v4 = vpop.permute.xlu1 %890 }
 0x19a   : > { %9713 = vst [vmem:[#allocation62_spill] sm:$0xff] %v6768_v4  ;;  %1478 = vperm.xlu0 %5717, %v6484_v19   ;;  %v6771_v3 = vpop.permute.xlu2 %952 }
 0x19b   : > { %9714 = vst [vmem:[#allocation63_spill] sm:$0xff] %v6771_v3  ;;  %5703 = vset.pattern.permute.xlu1 %v9712_v22 }
 0x19c   : > { %1172 = vperm.xlu1 %5703, %v6460_v12   ;;  %1176 = vperm.xlu2 %5701, %v6472_v16  }
 0x19e   : > { %v6776_v8 = vpop.permute.xlu0 %1110 }
 0x1a1   : > { %v6778_v10 = vpop.permute.xlu1 %902 }
 0x1a2   : > { %9715 = vst [vmem:[#allocation64_spill] sm:$0xff] %v6778_v10  ;;  %5720 = vset.pattern.permute.xlu0 %v9544_v21  ;;  %v9719_v10 = vmov 14  }
 0x1a3   : > { %1516 = vperm.xlu0 %5720, %v6475_v17   ;;  %v6782_v4 = vpop.permute.xlu2 %990 }
 0x1a4   : > { %9716 = vst [vmem:[#allocation65_spill] sm:$0xff] %v6782_v4  ;;  %1180 = vperm.xlu1 %5703, %v6457_v11   ;;  %1184 = vperm.xlu2 %5701, %v6469_v15  }
 0x1a6   : > { %v6786_v22 = vpop.permute.xlu0 %1130 }
 0x1aa   : > { %v6788_v3 = vpop.permute.xlu1 %940 }
 0x1ab   : > { %9717 = vst [vmem:[#allocation66_spill] sm:$0xff] %v6788_v3  ;;  %1536 = vperm.xlu0 %5720, %v6484_v19   ;;  %v6791_v1 = vpop.permute.xlu2 %1002 }
 0x1ac   : > { %9718 = vst [vmem:[#allocation67_spill] sm:$0xff] %v6791_v1  ;;  %1192 = vperm.xlu1 %5703, %v6481_v18   ;;  %5704 = vset.pattern.permute.xlu2 %v9719_v10 }
 0x1ad   : > { %1222 = vperm.xlu2 %5704, %v6463_v13  }
 0x1af   : > { %v6796_v21 = vpop.permute.xlu0 %1168 }
 0x1b2   : > { %v6798_v4 = vpop.permute.xlu1 %948 }
 0x1b3   : > { %9720 = vst [vmem:[#allocation68_spill] sm:$0xff] %v6798_v4  ;;  %5723 = vset.pattern.permute.xlu0 %v9546_v0  ;;  %v6801_v61 = vpop.permute.xlu2 %1010 }
 0x1b4   : > { %9721 = vst [vmem:[#allocation69_spill] sm:$0xff] %v6801_v61  ;;  %1574 = vperm.xlu0 %5723, %v6475_v17   ;;  %5706 = vset.pattern.permute.xlu1 %v9719_v10  ;;  %v9548_v10 = vmov 21  }
 0x1b5   : > { %1230 = vperm.xlu1 %5706, %v6460_v12   ;;  %1234 = vperm.xlu2 %5704, %v6472_v16  }
 0x1b7   : > { %v6807_v1 = vpop.permute.xlu0 %1188 }
 0x1ba   : > { %v6809_v3 = vpop.permute.xlu1 %960 }
 0x1bb   : > { %9722 = vst [vmem:[#allocation70_spill] sm:$0xff] %v6809_v3  ;;  %v9726_v3 = vmov 15  }
 0x1bc   : > { %1594 = vperm.xlu0 %5723, %v6484_v19   ;;  %v6812_v4 = vpop.permute.xlu2 %1048 }
 0x1bd   : > { %9723 = vst [vmem:[#allocation71_spill] sm:$0xff] %v6812_v4  ;;  %1238 = vperm.xlu1 %5706, %v6457_v11   ;;  %1242 = vperm.xlu2 %5704, %v6469_v15  }
 0x1c0   : > { %v6816_v0 = vpop.permute.xlu0 %1226 }
 0x1c3   : > { %v6818_v61 = vpop.permute.xlu1 %998 }
 0x1c4   : > { %9724 = vst [vmem:[#allocation72_spill] sm:$0xff] %v6818_v61  ;;  %5726 = vset.pattern.permute.xlu0 %v9548_v10  ;;  %v6821_v60 = vpop.permute.xlu2 %1060  ;;  %v9550_v61 = vmov 22  }
 0x1c5   : > { %9725 = vst [vmem:[#allocation73_spill] sm:$0xff] %v6821_v60  ;;  %1632 = vperm.xlu0 %5726, %v6475_v17   ;;  %1250 = vperm.xlu1 %5706, %v6481_v18  }
 0x1c6   : > { %5707 = vset.pattern.permute.xlu2 %v9726_v3 }
 0x1c7   : > { %1280 = vperm.xlu2 %5707, %v6463_v13  }
 0x1c8   : > { %v6827_v4 = vpop.permute.xlu0 %1246 }
 0x1cb   : > { %v6829_v58 = vpop.permute.xlu1 %1006 }
 0x1cc   : > { %9727 = vst [vmem:[#allocation74_spill] sm:$0xff] %v6829_v58  ;;  %v6831_v57 = vpop.permute.xlu2 %1068 }
 0x1cd   : > { %9728 = vst [vmem:[#allocation75_spill] sm:$0xff] %v6831_v57  ;;  %1652 = vperm.xlu0 %5726, %v6484_v19   ;;  %5709 = vset.pattern.permute.xlu1 %v9726_v3 }
 0x1ce   : > { %1288 = vperm.xlu1 %5709, %v6460_v12  }
 0x1cf   : > { %1292 = vperm.xlu2 %5707, %v6472_v16  }
 0x1d1   : > { %v6837_v10 = vpop.permute.xlu0 %1284 }
 0x1d3   : > { %v6839_v60 = vpop.permute.xlu1 %1018 }
 0x1d4   : > { %9729 = vst [vmem:[#allocation76_spill] sm:$0xff] %v6839_v60  ;;  %v9733_v60 = vmov 16  }
 0x1d5   : > { %5729 = vset.pattern.permute.xlu0 %v9550_v61  ;;  %v6842_v54 = vpop.permute.xlu2 %1106 }
 0x1d6   : > { %9730 = vst [vmem:[#allocation77_spill] sm:$0xff] %v6842_v54  ;;  %1690 = vperm.xlu0 %5729, %v6475_v17   ;;  %1296 = vperm.xlu1 %5709, %v6457_v11  }
 0x1d7   : > { %1300 = vperm.xlu2 %5707, %v6469_v15  }
 0x1d9   : > { %v6847_v3 = vpop.permute.xlu0 %1304 }
 0x1dc   : > { %v6849_v57 = vpop.permute.xlu1 %1056 }
 0x1dd   : > { %9731 = vst [vmem:[#allocation78_spill] sm:$0xff] %v6849_v57  ;;  %v6851_v58 = vpop.permute.xlu2 %1118 }
 0x1de   : > { %9732 = vst [vmem:[#allocation79_spill] sm:$0xff] %v6851_v58  ;;  %1710 = vperm.xlu0 %5729, %v6484_v19   ;;  %1308 = vperm.xlu1 %5709, %v6481_v18  }
 0x1df   : > { %5710 = vset.pattern.permute.xlu2 %v9733_v60 }
 0x1e0   : > { %1338 = vperm.xlu2 %5710, %v6463_v13  }
 0x1e2   : > { %v6857_v61 = vpop.permute.xlu0 %1342 }
 0x1e4   : > { %v6859_v54 = vpop.permute.xlu1 %1064 }
 0x1e5   : > { %9734 = vst [vmem:[#allocation80_spill] sm:$0xff] %v6859_v54  ;;  %v6861_v53 = vpop.permute.xlu2 %1126  ;;  %v9554_v54 = vmov 24  }
 0x1e6   : > { %9735 = vst [vmem:[#allocation81_spill] sm:$0xff] %v6861_v53  ;;  %5732 = vset.pattern.permute.xlu0 %v9552_v51  ;;  %5712 = vset.pattern.permute.xlu1 %v9733_v60 }
 0x1e7   : > { %1748 = vperm.xlu0 %5732, %v6475_v17   ;;  %1346 = vperm.xlu1 %5712, %v6460_v12  }
 0x1e8   : > { %1350 = vperm.xlu2 %5710, %v6472_v16  }
 0x1ea   : > { %v6868_v58 = vpop.permute.xlu0 %1362 }
 0x1ec   : > { %v6870_v57 = vpop.permute.xlu1 %1076 }
 0x1ed   : > { %9736 = vst [vmem:[#allocation82_spill] sm:$0xff] %v6870_v57  ;;  %v9740_v57 = vmov 17  }
 0x1ee   : > { %v6872_v50 = vpop.permute.xlu2 %1164 }
 0x1ef   : > { %9737 = vst [vmem:[#allocation83_spill] sm:$0xff] %v6872_v50  ;;  %1768 = vperm.xlu0 %5732, %v6484_v19   ;;  %1354 = vperm.xlu1 %5712, %v6457_v11  }
 0x1f0   : > { %1358 = vperm.xlu2 %5710, %v6469_v15  }
 0x1f3   : > { %v6877_v51 = vpop.permute.xlu0 %1400 }
 0x1f5   : > { %v6879_v60 = vpop.permute.xlu1 %1114 }
 0x1f6   : > { %9738 = vst [vmem:[#allocation84_spill] sm:$0xff] %v6879_v60  ;;  %v6881_v53 = vpop.permute.xlu2 %1176 }
 0x1f7   : > { %9739 = vst [vmem:[#allocation85_spill] sm:$0xff] %v6881_v53  ;;  %5735 = vset.pattern.permute.xlu0 %v9554_v54  ;;  %1366 = vperm.xlu1 %5712, %v6481_v18  }
 0x1f8   : > { %5713 = vset.pattern.permute.xlu2 %v9740_v57  ;;  %1806 = vperm.xlu0 %5735, %v6475_v17  }
 0x1f9   : > { %1396 = vperm.xlu2 %5713, %v6463_v13  }
 0x1fb   : > { %v6888_v50 = vpop.permute.xlu0 %1420 }
 0x1fd   : > { %v6890_v36 = vpop.permute.xlu1 %1122 }
 0x1fe   : > { %9741 = vst [vmem:[#allocation86_spill] sm:$0xff] %v6890_v36  ;;  %v6892_v47 = vpop.permute.xlu2 %1184 }
 0x1ff   : > { %9742 = vst [vmem:[#allocation87_spill] sm:$0xff] %v6892_v47  ;;  %5715 = vset.pattern.permute.xlu1 %v9740_v57 }
 0x200   : > { %1826 = vperm.xlu0 %5735, %v6484_v19   ;;  %1404 = vperm.xlu1 %5715, %v6460_v12  }
 0x201   : > { %1408 = vperm.xlu2 %5713, %v6472_v16  }
 0x204   : > { %v6898_v54 = vpop.permute.xlu0 %1458 }
 0x205   : > { %v6900_v53 = vpop.permute.xlu1 %1134 }
 0x206   : > { %9743 = vst [vmem:[#allocation88_spill] sm:$0xff] %v6900_v53  ;;  %v9747_v53 = vmov 18  }
 0x207   : > { %v6902_v60 = vpop.permute.xlu2 %1222 }
 0x208   : > { %9744 = vst [vmem:[#allocation89_spill] sm:$0xff] %v6902_v60  ;;  %5738 = vset.pattern.permute.xlu0 %v9556_v46  ;;  %1412 = vperm.xlu1 %5715, %v6457_v11  }
 0x209   : > { %1416 = vperm.xlu2 %5713, %v6469_v15   ;;  %1864 = vperm.xlu0 %5738, %v6475_v17  }
 0x20c   : > { %v6908_v57 = vpop.permute.xlu0 %1478 }
 0x20e   : > { %v6910_v47 = vpop.permute.xlu1 %1172 }
 0x20f   : > { %9745 = vst [vmem:[#allocation90_spill] sm:$0xff] %v6910_v47  ;;  %v6912_v36 = vpop.permute.xlu2 %1234 }
 0x210   : > { %9746 = vst [vmem:[#allocation91_spill] sm:$0xff] %v6912_v36  ;;  %1424 = vperm.xlu1 %5715, %v6481_v18  }
 0x211   : > { %5716 = vset.pattern.permute.xlu2 %v9747_v53  ;;  %1884 = vperm.xlu0 %5738, %v6484_v19  }
 0x212   : > { %1454 = vperm.xlu2 %5716, %v6463_v13  }
 0x215   : > { %v6918_v46 = vpop.permute.xlu0 %1516 }
 0x216   : > { %9748 = vst [vmem:[#allocation92_spill] sm:$0xff] %v6918_v46  ;;  %v6920_v60 = vpop.permute.xlu1 %1180  ;;  %v9598_v46 = vmov 46  }
 0x217   : > { %9749 = vst [vmem:[#allocation93_spill] sm:$0xff] %v6920_v60  ;;  %v6922_v44 = vpop.permute.xlu2 %1242  ;;  %v9756_v60 = vmov 19  }
 0x218   : > { %9750 = vst [vmem:[#allocation94_spill] sm:$0xff] %v6922_v44  ;;  %5718 = vset.pattern.permute.xlu1 %v9747_v53 }
 0x219   : > { %5741 = vset.pattern.permute.xlu0 %v9558_v43  ;;  %1462 = vperm.xlu1 %5718, %v6460_v12  }
 0x21a   : > { %1466 = vperm.xlu2 %5716, %v6472_v16   ;;  %1922 = vperm.xlu0 %5741, %v6475_v17  }
 0x21d   : > { %v6929_v36 = vpop.permute.xlu0 %1536 }
 0x21e   : > { %v6931_v47 = vpop.permute.xlu1 %1192 }
 0x21f   : > { %9751 = vst [vmem:[#allocation95_spill] sm:$0xff] %v6931_v47 }
 0x221   : > { %v6933_v40 = vpop.permute.xlu2 %1280  ;;  %1470 = vperm.xlu1 %5718, %v6457_v11  }
 0x222   : > { %9752 = vst [vmem:[#allocation96_spill] sm:$0xff] %v6933_v40  ;;  %1474 = vperm.xlu2 %5716, %v6469_v15   ;;  %1942 = vperm.xlu0 %5741, %v6484_v19  }
 0x226   : > { %v6938_v53 = vpop.permute.xlu0 %1574 }
 0x227   : > { %9753 = vst [vmem:[#allocation97_spill] sm:$0xff] %v6938_v53  ;;  %v6940_v43 = vpop.permute.xlu1 %1230 }
 0x228   : > { %9754 = vst [vmem:[#allocation98_spill] sm:$0xff] %v6940_v43 }
 0x229   : > { %v6942_v44 = vpop.permute.xlu2 %1292  ;;  %1482 = vperm.xlu1 %5718, %v6481_v18  }
 0x22a   : > { %9755 = vst [vmem:[#allocation99_spill] sm:$0xff] %v6942_v44  ;;  %5719 = vset.pattern.permute.xlu2 %v9756_v60  ;;  %5744 = vset.pattern.permute.xlu0 %v9560_v39 }
 0x22b   : > { %1512 = vperm.xlu2 %5719, %v6463_v13   ;;  %1980 = vperm.xlu0 %5744, %v6475_v17  }
 0x22e   : > { %v6949_v40 = vpop.permute.xlu0 %1594 }
 0x22f   : > { %v6951_v47 = vpop.permute.xlu1 %1238 }
 0x230   : > { %9757 = vst [vmem:[#allocation100_spill] sm:$0xff] %v6951_v47  ;;  %v9562_v47 = vmov 28  }
 0x231   : > { %v6953_v37 = vpop.permute.xlu2 %1300  ;;  %5721 = vset.pattern.permute.xlu1 %v9756_v60 }
 0x232   : > { %9758 = vst [vmem:[#allocation101_spill] sm:$0xff] %v6953_v37  ;;  %1520 = vperm.xlu1 %5721, %v6460_v12  }
 0x233   : > { %1524 = vperm.xlu2 %5719, %v6472_v16   ;;  %2000 = vperm.xlu0 %5744, %v6484_v19  }
 0x237   : > { %v6959_v44 = vpop.permute.xlu1 %1250  ;;  %v6961_v39 = vpop.permute.xlu0 %1632 }
 0x238   : > { %9759 = vst [vmem:[#allocation102_spill] sm:$0xff] %v6959_v44  ;;  %v9765_v44 = vmov 20  }
 0x239   : > { %9760 = vst [vmem:[#allocation103_spill] sm:$0xff] %v6961_v39 }
 0x23a   : > { %v6963_v43 = vpop.permute.xlu2 %1338  ;;  %1528 = vperm.xlu1 %5721, %v6457_v11  }
 0x23b   : > { %9761 = vst [vmem:[#allocation104_spill] sm:$0xff] %v6963_v43  ;;  %1532 = vperm.xlu2 %5719, %v6469_v15   ;;  %5747 = vset.pattern.permute.xlu0 %v9562_v47 }
 0x23c   : > { %2038 = vperm.xlu0 %5747, %v6475_v17  }
 0x23f   : > { %v6969_v60 = vpop.permute.xlu0 %1652 }
 0x240   : > { %9762 = vst [vmem:[#allocation105_spill] sm:$0xff] %v6969_v60  ;;  %v6971_v37 = vpop.permute.xlu1 %1288 }
 0x241   : > { %9763 = vst [vmem:[#allocation106_spill] sm:$0xff] %v6971_v37 }
 0x242   : > { %v6973_v33 = vpop.permute.xlu2 %1350  ;;  %1540 = vperm.xlu1 %5721, %v6481_v18  }
 0x243   : > { %9764 = vst [vmem:[#allocation107_spill] sm:$0xff] %v6973_v33  ;;  %5722 = vset.pattern.permute.xlu2 %v9765_v44  ;;  %v9564_v33 = vmov 29  }
 0x244   : > { %1570 = vperm.xlu2 %5722, %v6463_v13   ;;  %2058 = vperm.xlu0 %5747, %v6484_v19  }
 0x248   : > { %v6979_v43 = vpop.permute.xlu1 %1296  ;;  %v6981_v29 = vpop.permute.xlu0 %1690 }
 0x249   : > { %9766 = vst [vmem:[#allocation108_spill] sm:$0xff] %v6979_v43 }
 0x24a   : > { %9767 = vst [vmem:[#allocation109_spill] sm:$0xff] %v6981_v29  ;;  %v6983_v47 = vpop.permute.xlu2 %1358  ;;  %5724 = vset.pattern.permute.xlu1 %v9765_v44 }
 0x24b   : > { %9768 = vst [vmem:[#allocation110_spill] sm:$0xff] %v6983_v47  ;;  %1578 = vperm.xlu1 %5724, %v6460_v12   ;;  %v7008_v47 = vld [vmem:[%s6404_s19] sm:$0xff] }
 0x24c   : > { %1582 = vperm.xlu2 %5722, %v6472_v16   ;;  %5750 = vset.pattern.permute.xlu0 %v9564_v33 }
 0x24d   : > { %2096 = vperm.xlu0 %5750, %v6475_v17  }
 0x250   : > { %v6990_v13 = vpop.permute.xlu1 %1308  ;;  %v6992_v37 = vpop.permute.xlu0 %1710 }
 0x251   : > { %9769 = vst [vmem:[#allocation111_spill] sm:$0xff] %v6990_v13  ;;  %v9775_v13 = vmov 21  }
 0x252   : > { %9770 = vst [vmem:[#allocation112_spill] sm:$0xff] %v6992_v37 }
 0x253   : > { %v6994_v43 = vpop.permute.xlu2 %1396  ;;  %1586 = vperm.xlu1 %5724, %v6457_v11   ;;  %v9566_v11 = vmov 30  }
 0x254   : > { %9771 = vst [vmem:[#allocation113_spill] sm:$0xff] %v6994_v43  ;;  %1590 = vperm.xlu2 %5722, %v6469_v15   ;;  %v7021_v43 = vld [vmem:[%s6404_s19 + $0x10] sm:$0xff] }
 0x255   : > { %2116 = vperm.xlu0 %5750, %v6484_v19  }
 0x259   : > { %v6999_v12 = vpop.permute.xlu1 %1346  ;;  %v7001_v44 = vpop.permute.xlu0 %1748 }
 0x25a   : > { %9772 = vst [vmem:[#allocation114_spill] sm:$0xff] %v6999_v12 }
 0x25b   : > { %9773 = vst [vmem:[#allocation115_spill] sm:$0xff] %v7001_v44  ;;  %v7003_v33 = vpop.permute.xlu2 %1408  ;;  %1598 = vperm.xlu1 %5724, %v6481_v18  }
 0x25c   : > { %9774 = vst [vmem:[#allocation116_spill] sm:$0xff] %v7003_v33  ;;  %5725 = vset.pattern.permute.xlu2 %v9775_v13 }
 0x25d   : > { %1628 = vperm.xlu2 %5725, %v7008_v47   ;;  %5753 = vset.pattern.permute.xlu0 %v9566_v11 }
 0x25e   : > { %2154 = vperm.xlu0 %5753, %v6475_v17  }
 0x261   : > { %v7013_v15 = vpop.permute.xlu1 %1354  ;;  %v7015_v12 = vpop.permute.xlu0 %1768 }
 0x262   : > { %9776 = vst [vmem:[#allocation117_spill] sm:$0xff] %v7013_v15 }
 0x263   : > { %9777 = vst [vmem:[#allocation118_spill] sm:$0xff] %v7015_v12  ;;  %v7017_v33 = vpop.permute.xlu2 %1416  ;;  %5727 = vset.pattern.permute.xlu1 %v9775_v13  ;;  %v9568_v13 = vmov 31   ;;  %v5881_v12 = vld [vmem:[%s6421_s12 + $0x3] ss:$0 sm:$0xff] }
 0x264   : > { %9778 = vst [vmem:[#allocation119_spill] sm:$0xff] %v7017_v33  ;;  %1636 = vperm.xlu1 %5727, %v7021_v43   ;;  %v7037_v33 = vld [vmem:[%s6404_s19 + $0x28] sm:$0xff] }
 0x265   : > { %1640 = vperm.xlu2 %5725, %v6472_v16   ;;  %v7042_v16 = vld [vmem:[%s6404_s19 + $0x8] sm:$0xff] }
 0x266   : > { %2174 = vperm.xlu0 %5753, %v6484_v19  }
 0x269   : > { %v7026_v11 = vpop.permute.xlu1 %1366 }
 0x26a   : > { %9779 = vst [vmem:[#allocation120_spill] sm:$0xff] %v7026_v11  ;;  %v7028_v17 = vpop.permute.xlu0 %1806 }
 0x26b   : > { %9780 = vst [vmem:[#allocation121_spill] sm:$0xff] %v7028_v17 }
 0x26c   : > { %v7030_v15 = vpop.permute.xlu2 %1454  ;;  %1644 = vperm.xlu1 %5727, %v7033_v32  }
 0x26d   : > { %9781 = vst [vmem:[#allocation122_spill] sm:$0xff] %v7030_v15  ;;  %1648 = vperm.xlu2 %5725, %v7037_v33  }
 0x26e   : > { %5756 = vset.pattern.permute.xlu0 %v9568_v13 }
 0x26f   : > { %2212 = vperm.xlu0 %5756, %v7042_v16  }
 0x272   : > { %v7045_v11 = vpop.permute.xlu1 %1404  ;;  %v7047_v30 = vpop.permute.xlu0 %1826 }
 0x273   : > { %9782 = vst [vmem:[#allocation123_spill] sm:$0xff] %v7045_v11 }
 0x274   : > { %9783 = vst [vmem:[#allocation124_spill] sm:$0xff] %v7047_v30  ;;  %v7049_v15 = vpop.permute.xlu2 %1466  ;;  %1656 = vperm.xlu1 %5727, %v6481_v18   ;;  %v9570_v18 = vmov 32  }
 0x275   : > { %9784 = vst [vmem:[#allocation125_spill] sm:$0xff] %v7049_v15  ;;  %5728 = vset.pattern.permute.xlu2 %v9785_v26  ;;  %v7064_v15 = vld [vmem:[%s6404_s19 + $0x18] sm:$0xff] }
 0x276   : > { %1686 = vperm.xlu2 %5728, %v7008_v47  }
 0x277   : > { %2232 = vperm.xlu0 %5756, %v6484_v19  }
 0x27a   : > { %v7055_v24 = vpop.permute.xlu1 %1412 }
 0x27b   : > { %9786 = vst [vmem:[#allocation126_spill] sm:$0xff] %v7055_v24  ;;  %v7057_v13 = vpop.permute.xlu0 %1864 }
 0x27c   : > { %9787 = vst [vmem:[#allocation127_spill] sm:$0xff] %v7057_v13  ;;  %v7059_v31 = vpop.permute.xlu2 %1474  ;;  %5730 = vset.pattern.permute.xlu1 %v9785_v26  ;;  %v7085_v13 = vld [vmem:[%s6404_s19 + $0x38] sm:$0xff] }
 0x27d   : > { %9788 = vst [vmem:[#allocation128_spill] sm:$0xff] %v7059_v31  ;;  %1694 = vperm.xlu1 %5730, %v7021_v43  }
 0x27e   : > { %1698 = vperm.xlu2 %5728, %v7064_v15  }
 0x27f   : > { %5759 = vset.pattern.permute.xlu0 %v9570_v18 }
 0x280   : > { %2270 = vperm.xlu0 %5759, %v7042_v16  }
 0x282   : > { %v7069_v11 = vpop.permute.xlu1 %1424 }
 0x283   : > { %9789 = vst [vmem:[#allocation129_spill] sm:$0xff] %v7069_v11  ;;  %v7071_v24 = vpop.permute.xlu0 %1884  ;;  %v9795_v11 = vmov 23  }
 0x284   : > { %9790 = vst [vmem:[#allocation130_spill] sm:$0xff] %v7071_v24 }
 0x285   : > { %v7073_v27 = vpop.permute.xlu2 %1512  ;;  %1702 = vperm.xlu1 %5730, %v7033_v32  }
 0x286   : > { %9791 = vst [vmem:[#allocation131_spill] sm:$0xff] %v7073_v27  ;;  %1706 = vperm.xlu2 %5728, %v7037_v33   ;;  %v9572_v27 = vmov 33  }
 0x288   : > { %2290 = vperm.xlu0 %5759, %v6484_v19  }
 0x28b   : > { %v7078_v26 = vpop.permute.xlu1 %1462 }
 0x28c   : > { %9792 = vst [vmem:[#allocation132_spill] sm:$0xff] %v7078_v26  ;;  %v7080_v31 = vpop.permute.xlu0 %1922 }
 0x28d   : > { %9793 = vst [vmem:[#allocation133_spill] sm:$0xff] %v7080_v31  ;;  %v7082_v18 = vpop.permute.xlu2 %1524  ;;  %1714 = vperm.xlu1 %5730, %v7085_v13  }
 0x28e   : > { %9794 = vst [vmem:[#allocation134_spill] sm:$0xff] %v7082_v18  ;;  %5731 = vset.pattern.permute.xlu2 %v9795_v11  ;;  %v7102_v18 = vld [vmem:[%s6404_s19 + $0x30] sm:$0xff] }
 0x28f   : > { %1744 = vperm.xlu2 %5731, %v7008_v47  }
 0x290   : > { %5762 = vset.pattern.permute.xlu0 %v9572_v27 }
 0x291   : > { %2328 = vperm.xlu0 %5762, %v7042_v16  }
 0x293   : > { %v7092_v19 = vpop.permute.xlu1 %1470 }
 0x294   : > { %9796 = vst [vmem:[#allocation135_spill] sm:$0xff] %v7092_v19  ;;  %v7094_v26 = vpop.permute.xlu0 %1942 }
 0x295   : > { %9797 = vst [vmem:[#allocation136_spill] sm:$0xff] %v7094_v26  ;;  %v7096_v31 = vpop.permute.xlu2 %1532  ;;  %5733 = vset.pattern.permute.xlu1 %v9795_v11 }
 0x296   : > { %9798 = vst [vmem:[#allocation137_spill] sm:$0xff] %v7096_v31  ;;  %1752 = vperm.xlu1 %5733, %v7021_v43   ;;  %v9574_v31 = vmov 34  }
 0x297   : > { %1756 = vperm.xlu2 %5731, %v7064_v15  }
 0x299   : > { %2348 = vperm.xlu0 %5762, %v7102_v18  }
 0x29b   : > { %v7105_v17 = vpop.permute.xlu1 %1482 }
 0x29c   : > { %9799 = vst [vmem:[#allocation138_spill] sm:$0xff] %v7105_v17  ;;  %v9805_v17 = vmov 24  }
 0x29d   : > { %v7107_v27 = vpop.permute.xlu0 %1980 }
 0x29e   : > { %9800 = vst [vmem:[#allocation139_spill] sm:$0xff] %v7107_v27  ;;  %v7109_v24 = vpop.permute.xlu2 %1570  ;;  %1760 = vperm.xlu1 %5733, %v7033_v32  }
 0x29f   : > { %9801 = vst [vmem:[#allocation140_spill] sm:$0xff] %v7109_v24  ;;  %1764 = vperm.xlu2 %5731, %v7037_v33  }
 0x2a1   : > { %5765 = vset.pattern.permute.xlu0 %v9574_v31 }
 0x2a2   : > { %2386 = vperm.xlu0 %5765, %v7042_v16  }
 0x2a4   : > { %v7115_v11 = vpop.permute.xlu1 %1520 }
 0x2a5   : > { %9802 = vst [vmem:[#allocation141_spill] sm:$0xff] %v7115_v11  ;;  %v7117_v19 = vpop.permute.xlu0 %2000 }
 0x2a6   : > { %9803 = vst [vmem:[#allocation142_spill] sm:$0xff] %v7117_v19  ;;  %v7119_v26 = vpop.permute.xlu2 %1582  ;;  %1772 = vperm.xlu1 %5733, %v7085_v13  }
 0x2a7   : > { %9804 = vst [vmem:[#allocation143_spill] sm:$0xff] %v7119_v26  ;;  %5734 = vset.pattern.permute.xlu2 %v9805_v17  ;;  %v9576_v26 = vmov 35  }
 0x2a8   : > { %1802 = vperm.xlu2 %5734, %v7008_v47  }
 0x2aa   : > { %2406 = vperm.xlu0 %5765, %v7102_v18  }
 0x2ac   : > { %v7125_v24 = vpop.permute.xlu1 %1528 }
 0x2ad   : > { %9806 = vst [vmem:[#allocation144_spill] sm:$0xff] %v7125_v24 }
 0x2ae   : > { %v7127_v27 = vpop.permute.xlu2 %1590  ;;  %5736 = vset.pattern.permute.xlu1 %v9805_v17  ;;  %v7130_v31 = vpop.permute.xlu0 %2038 }
 0x2af   : > { %9807 = vst [vmem:[#allocation145_spill] sm:$0xff] %v7127_v27  ;;  %1810 = vperm.xlu1 %5736, %v7021_v43  }
 0x2b0   : > { %9808 = vst [vmem:[#allocation146_spill] sm:$0xff] %v7130_v31  ;;  %1814 = vperm.xlu2 %5734, %v7064_v15   ;;  %v9815_v31 = vmov 25  }
 0x2b2   : > { %5768 = vset.pattern.permute.xlu0 %v9576_v26 }
 0x2b3   : > { %2444 = vperm.xlu0 %5768, %v7042_v16  }
 0x2b4   : > { %v7136_v11 = vpop.permute.xlu1 %1540 }
 0x2b5   : > { %9809 = vst [vmem:[#allocation147_spill] sm:$0xff] %v7136_v11  ;;  %v9578_v11 = vmov 36  }
 0x2b6   : > { %v7138_v19 = vpop.permute.xlu0 %2058 }
 0x2b7   : > { %9810 = vst [vmem:[#allocation148_spill] sm:$0xff] %v7138_v19  ;;  %v7140_v24 = vpop.permute.xlu2 %1628  ;;  %1818 = vperm.xlu1 %5736, %v7033_v32  }
 0x2b8   : > { %9811 = vst [vmem:[#allocation149_spill] sm:$0xff] %v7140_v24  ;;  %1822 = vperm.xlu2 %5734, %v7037_v33  }
 0x2bb   : > { %2464 = vperm.xlu0 %5768, %v7102_v18  }
 0x2bd   : > { %v7145_v17 = vpop.permute.xlu1 %1578 }
 0x2be   : > { %9812 = vst [vmem:[#allocation150_spill] sm:$0xff] %v7145_v17 }
 0x2bf   : > { %v7147_v27 = vpop.permute.xlu2 %1640  ;;  %1830 = vperm.xlu1 %5736, %v7085_v13   ;;  %v7150_v26 = vpop.permute.xlu0 %2096 }
 0x2c0   : > { %9813 = vst [vmem:[#allocation151_spill] sm:$0xff] %v7147_v27  ;;  %5737 = vset.pattern.permute.xlu2 %v9815_v31 }
 0x2c1   : > { %9814 = vst [vmem:[#allocation152_spill] sm:$0xff] %v7150_v26  ;;  %1860 = vperm.xlu2 %5737, %v7008_v47  }
 0x2c3   : > { %5771 = vset.pattern.permute.xlu0 %v9578_v11 }
 0x2c4   : > { %2502 = vperm.xlu0 %5771, %v7042_v16  }
 0x2c5   : > { %v7156_v24 = vpop.permute.xlu1 %1586 }
 0x2c6   : > { %9816 = vst [vmem:[#allocation153_spill] sm:$0xff] %v7156_v24 }
 0x2c7   : > { %v7158_v19 = vpop.permute.xlu2 %1648  ;;  %5739 = vset.pattern.permute.xlu1 %v9815_v31  ;;  %v7161_v27 = vpop.permute.xlu0 %2116 }
 0x2c8   : > { %9817 = vst [vmem:[#allocation154_spill] sm:$0xff] %v7158_v19  ;;  %1868 = vperm.xlu1 %5739, %v7021_v43   ;;  %v9580_v19 = vmov 37  }
 0x2c9   : > { %9818 = vst [vmem:[#allocation155_spill] sm:$0xff] %v7161_v27  ;;  %1872 = vperm.xlu2 %5737, %v7064_v15  }
 0x2cc   : > { %2522 = vperm.xlu0 %5771, %v7102_v18  }
 0x2cd   : > { %v7166_v17 = vpop.permute.xlu1 %1598 }
 0x2ce   : > { %9819 = vst [vmem:[#allocation156_spill] sm:$0xff] %v7166_v17 }
 0x2d0   : > { %v7168_v26 = vpop.permute.xlu2 %1686  ;;  %1876 = vperm.xlu1 %5739, %v7033_v32   ;;  %v7171_v11 = vpop.permute.xlu0 %2154 }
 0x2d1   : > { %9820 = vst [vmem:[#allocation157_spill] sm:$0xff] %v7168_v26  ;;  %1880 = vperm.xlu2 %5737, %v7037_v33   ;;  %v9825_v26 = vmov 26  }
 0x2d2   : > { %9821 = vst [vmem:[#allocation158_spill] sm:$0xff] %v7171_v11 }
 0x2d4   : > { %5774 = vset.pattern.permute.xlu0 %v9580_v19 }
 0x2d5   : > { %2560 = vperm.xlu0 %5774, %v7042_v16  }
 0x2d6   : > { %v7176_v31 = vpop.permute.xlu1 %1636 }
 0x2d7   : > { %9822 = vst [vmem:[#allocation159_spill] sm:$0xff] %v7176_v31 }
 0x2d8   : > { %v7178_v24 = vpop.permute.xlu2 %1698  ;;  %1888 = vperm.xlu1 %5739, %v7085_v13   ;;  %v7181_v17 = vpop.permute.xlu0 %2174 }
 0x2d9   : > { %9823 = vst [vmem:[#allocation160_spill] sm:$0xff] %v7178_v24  ;;  %5740 = vset.pattern.permute.xlu2 %v9825_v26  ;;  %v9582_v24 = vmov 38  }
 0x2da   : > { %9824 = vst [vmem:[#allocation161_spill] sm:$0xff] %v7181_v17  ;;  %1918 = vperm.xlu2 %5740, %v7008_v47  }
 0x2dd   : > { %2580 = vperm.xlu0 %5774, %v7102_v18  }
 0x2de   : > { %v7186_v11 = vpop.permute.xlu1 %1644 }
 0x2df   : > { %9826 = vst [vmem:[#allocation162_spill] sm:$0xff] %v7186_v11 }
 0x2e0   : > { %v7188_v27 = vpop.permute.xlu2 %1706  ;;  %5742 = vset.pattern.permute.xlu1 %v9825_v26 }
 0x2e1   : > { %9827 = vst [vmem:[#allocation163_spill] sm:$0xff] %v7188_v27  ;;  %1926 = vperm.xlu1 %5742, %v7021_v43   ;;  %v7192_v19 = vpop.permute.xlu0 %2212 }
 0x2e2   : > { %9828 = vst [vmem:[#allocation164_spill] sm:$0xff] %v7192_v19  ;;  %1930 = vperm.xlu2 %5740, %v7064_v15  }
 0x2e5   : > { %5777 = vset.pattern.permute.xlu0 %v9582_v24  ;;  %v9834_v24 = vmov 27  }
 0x2e6   : > { %2618 = vperm.xlu0 %5777, %v7042_v16   ;;  %v7197_v31 = vpop.permute.xlu1 %1656 }
 0x2e7   : > { %9829 = vst [vmem:[#allocation165_spill] sm:$0xff] %v7197_v31 }
 0x2e9   : > { %v7199_v17 = vpop.permute.xlu2 %1744  ;;  %1934 = vperm.xlu1 %5742, %v7033_v32   ;;  %v7202_v27 = vpop.permute.xlu0 %2232 }
 0x2ea   : > { %9830 = vst [vmem:[#allocation166_spill] sm:$0xff] %v7199_v17  ;;  %1938 = vperm.xlu2 %5740, %v7037_v33   ;;  %v9584_v17 = vmov 39  }
 0x2eb   : > { %9831 = vst [vmem:[#allocation167_spill] sm:$0xff] %v7202_v27 }
 0x2ee   : > { %2638 = vperm.xlu0 %5777, %v7102_v18  }
 0x2ef   : > { %v7206_v26 = vpop.permute.xlu1 %1694 }
 0x2f0   : > { %9832 = vst [vmem:[#allocation168_spill] sm:$0xff] %v7206_v26 }
 0x2f1   : > { %v7208_v11 = vpop.permute.xlu2 %1756  ;;  %1946 = vperm.xlu1 %5742, %v7085_v13  }
 0x2f2   : > { %9833 = vst [vmem:[#allocation169_spill] sm:$0xff] %v7208_v11  ;;  %5743 = vset.pattern.permute.xlu2 %v9834_v24  ;;  %v7212_v19 = vpop.permute.xlu0 %2270 }
 0x2f3   : > { %9835 = vst [vmem:[#allocation170_spill] sm:$0xff] %v7212_v19  ;;  %1976 = vperm.xlu2 %5743, %v7008_v47  }
 0x2f6   : > { %5780 = vset.pattern.permute.xlu0 %v9584_v17 }
 0x2f7   : > { %2676 = vperm.xlu0 %5780, %v7042_v16   ;;  %v7217_v31 = vpop.permute.xlu1 %1702 }
 0x2f8   : > { %9836 = vst [vmem:[#allocation171_spill] sm:$0xff] %v7217_v31 }
 0x2f9   : > { %v7219_v27 = vpop.permute.xlu2 %1764  ;;  %5745 = vset.pattern.permute.xlu1 %v9834_v24 }
 0x2fa   : > { %9837 = vst [vmem:[#allocation172_spill] sm:$0xff] %v7219_v27  ;;  %1984 = vperm.xlu1 %5745, %v7021_v43   ;;  %v7223_v11 = vpop.permute.xlu0 %2290  ;;  %v9586_v27 = vmov 40  }
 0x2fb   : > { %9838 = vst [vmem:[#allocation173_spill] sm:$0xff] %v7223_v11  ;;  %1988 = vperm.xlu2 %5743, %v7064_v15  }
 0x2ff   : > { %2696 = vperm.xlu0 %5780, %v7102_v18   ;;  %v7227_v26 = vpop.permute.xlu1 %1714 }
 0x300   : > { %9839 = vst [vmem:[#allocation174_spill] sm:$0xff] %v7227_v26  ;;  %v9844_v26 = vmov 28  }
 0x302   : > { %v7229_v19 = vpop.permute.xlu2 %1802  ;;  %1992 = vperm.xlu1 %5745, %v7033_v32  }
 0x303   : > { %9840 = vst [vmem:[#allocation175_spill] sm:$0xff] %v7229_v19  ;;  %1996 = vperm.xlu2 %5743, %v7037_v33   ;;  %v7233_v17 = vpop.permute.xlu0 %2328 }
 0x304   : > { %9841 = vst [vmem:[#allocation176_spill] sm:$0xff] %v7233_v17 }
 0x307   : > { %5783 = vset.pattern.permute.xlu0 %v9586_v27 }
 0x308   : > { %2734 = vperm.xlu0 %5783, %v7042_v16   ;;  %v7237_v24 = vpop.permute.xlu1 %1752 }
 0x309   : > { %9842 = vst [vmem:[#allocation177_spill] sm:$0xff] %v7237_v24 }
 0x30a   : > { %v7239_v31 = vpop.permute.xlu2 %1814  ;;  %2004 = vperm.xlu1 %5745, %v7085_v13  }
 0x30b   : > { %9843 = vst [vmem:[#allocation178_spill] sm:$0xff] %v7239_v31  ;;  %5746 = vset.pattern.permute.xlu2 %v9844_v26  ;;  %v7243_v19 = vpop.permute.xlu0 %2348  ;;  %v9588_v31 = vmov 41  }
 0x30c   : > { %9845 = vst [vmem:[#allocation179_spill] sm:$0xff] %v7243_v19  ;;  %2034 = vperm.xlu2 %5746, %v7008_v47  }
 0x310   : > { %2754 = vperm.xlu0 %5783, %v7102_v18   ;;  %v7247_v17 = vpop.permute.xlu1 %1760 }
 0x311   : > { %9846 = vst [vmem:[#allocation180_spill] sm:$0xff] %v7247_v17 }
 0x312   : > { %v7249_v11 = vpop.permute.xlu2 %1822  ;;  %5748 = vset.pattern.permute.xlu1 %v9844_v26 }
 0x313   : > { %9847 = vst [vmem:[#allocation181_spill] sm:$0xff] %v7249_v11  ;;  %2042 = vperm.xlu1 %5748, %v7021_v43  }
 0x314   : > { %2046 = vperm.xlu2 %5746, %v7064_v15   ;;  %v7254_v27 = vpop.permute.xlu0 %2386 }
 0x315   : > { %9848 = vst [vmem:[#allocation182_spill] sm:$0xff] %v7254_v27 }
 0x318   : > { %5786 = vset.pattern.permute.xlu0 %v9588_v31  ;;  %v7257_v24 = vpop.permute.xlu1 %1772  ;;  %v9854_v31 = vmov 29  }
 0x319   : > { %9849 = vst [vmem:[#allocation183_spill] sm:$0xff] %v7257_v24  ;;  %2792 = vperm.xlu0 %5786, %v7042_v16  }
 0x31b   : > { %v7260_v19 = vpop.permute.xlu2 %1860  ;;  %2050 = vperm.xlu1 %5748, %v7033_v32  }
 0x31c   : > { %9850 = vst [vmem:[#allocation184_spill] sm:$0xff] %v7260_v19  ;;  %2054 = vperm.xlu2 %5746, %v7037_v33   ;;  %v7264_v26 = vpop.permute.xlu0 %2406  ;;  %v9590_v19 = vmov 42  }
 0x31d   : > { %9851 = vst [vmem:[#allocation185_spill] sm:$0xff] %v7264_v26 }
 0x321   : > { %2812 = vperm.xlu0 %5786, %v7102_v18   ;;  %v7267_v11 = vpop.permute.xlu1 %1810 }
 0x322   : > { %9852 = vst [vmem:[#allocation186_spill] sm:$0xff] %v7267_v11 }
 0x323   : > { %v7269_v17 = vpop.permute.xlu2 %1872  ;;  %2062 = vperm.xlu1 %5748, %v7085_v13  }
 0x324   : > { %9853 = vst [vmem:[#allocation187_spill] sm:$0xff] %v7269_v17  ;;  %5749 = vset.pattern.permute.xlu2 %v9854_v31 }
 0x325   : > { %2092 = vperm.xlu2 %5749, %v7008_v47   ;;  %v7274_v24 = vpop.permute.xlu0 %2444 }
 0x326   : > { %9855 = vst [vmem:[#allocation188_spill] sm:$0xff] %v7274_v24 }
 0x329   : > { %5789 = vset.pattern.permute.xlu0 %v9590_v19  ;;  %v7277_v27 = vpop.permute.xlu1 %1818 }
 0x32a   : > { %9856 = vst [vmem:[#allocation189_spill] sm:$0xff] %v7277_v27  ;;  %2850 = vperm.xlu0 %5789, %v7042_v16  }
 0x32b   : > { %v7280_v26 = vpop.permute.xlu2 %1880  ;;  %5751 = vset.pattern.permute.xlu1 %v9854_v31 }
 0x32c   : > { %9857 = vst [vmem:[#allocation190_spill] sm:$0xff] %v7280_v26  ;;  %2100 = vperm.xlu1 %5751, %v7021_v43   ;;  %v9592_v26 = vmov 43  }
 0x32d   : > { %2104 = vperm.xlu2 %5749, %v7064_v15   ;;  %v7285_v17 = vpop.permute.xlu0 %2464 }
 0x32e   : > { %9858 = vst [vmem:[#allocation191_spill] sm:$0xff] %v7285_v17 }
 0x331   : > { %v7287_v11 = vpop.permute.xlu1 %1830 }
 0x332   : > { %9859 = vst [vmem:[#allocation192_spill] sm:$0xff] %v7287_v11  ;;  %2870 = vperm.xlu0 %5789, %v7102_v18   ;;  %v9864_v11 = vmov 30  }
 0x334   : > { %v7290_v24 = vpop.permute.xlu2 %1918  ;;  %2108 = vperm.xlu1 %5751, %v7033_v32  }
 0x335   : > { %9860 = vst [vmem:[#allocation193_spill] sm:$0xff] %v7290_v24  ;;  %2112 = vperm.xlu2 %5749, %v7037_v33  }
 0x336   : > { %v7294_v19 = vpop.permute.xlu0 %2502 }
 0x337   : > { %9861 = vst [vmem:[#allocation194_spill] sm:$0xff] %v7294_v19 }
 0x33a   : > { %5792 = vset.pattern.permute.xlu0 %v9592_v26  ;;  %v7297_v31 = vpop.permute.xlu1 %1868 }
 0x33b   : > { %9862 = vst [vmem:[#allocation195_spill] sm:$0xff] %v7297_v31  ;;  %2908 = vperm.xlu0 %5792, %v7042_v16   ;;  %v9594_v31 = vmov 44  }
 0x33c   : > { %v7300_v27 = vpop.permute.xlu2 %1930  ;;  %2120 = vperm.xlu1 %5751, %v7085_v13  }
 0x33d   : > { %9863 = vst [vmem:[#allocation196_spill] sm:$0xff] %v7300_v27  ;;  %5752 = vset.pattern.permute.xlu2 %v9864_v11 }
 0x33e   : > { %2150 = vperm.xlu2 %5752, %v7008_v47   ;;  %v7305_v24 = vpop.permute.xlu0 %2522 }
 0x33f   : > { %9865 = vst [vmem:[#allocation197_spill] sm:$0xff] %v7305_v24  ;;  %v5878_v24 = vld [vmem:[%s6421_s12] ss:$0 sm:$0xff] }
 0x342   : > { %v7307_v17 = vpop.permute.xlu1 %1876 }
 0x343   : > { %9866 = vst [vmem:[#allocation198_spill] sm:$0xff] %v7307_v17  ;;  %2928 = vperm.xlu0 %5792, %v7102_v18  }
 0x344   : > { %v7310_v19 = vpop.permute.xlu2 %1938  ;;  %5754 = vset.pattern.permute.xlu1 %v9864_v11 }
 0x345   : > { %9867 = vst [vmem:[#allocation199_spill] sm:$0xff] %v7310_v19  ;;  %2158 = vperm.xlu1 %5754, %v7021_v43  }
 0x346   : > { %2162 = vperm.xlu2 %5752, %v7064_v15  }
 0x347   : > { %v7315_v26 = vpop.permute.xlu0 %2560 }
 0x348   : > { %9868 = vst [vmem:[#allocation200_spill] sm:$0xff] %v7315_v26 }
 0x34a   : > { %v7317_v27 = vpop.permute.xlu1 %1888 }
 0x34b   : > { %9869 = vst [vmem:[#allocation201_spill] sm:$0xff] %v7317_v27  ;;  %5795 = vset.pattern.permute.xlu0 %v9594_v31  ;;  %v9874_v31 = vmov 31  }
 0x34c   : > { %2966 = vperm.xlu0 %5795, %v7042_v16  }
 0x34d   : > { %v7321_v17 = vpop.permute.xlu2 %1976  ;;  %2166 = vperm.xlu1 %5754, %v7033_v32  }
 0x34e   : > { %9870 = vst [vmem:[#allocation202_spill] sm:$0xff] %v7321_v17  ;;  %2170 = vperm.xlu2 %5752, %v7037_v33  }
 0x34f   : > { %v7325_v11 = vpop.permute.xlu0 %2580 }
 0x350   : > { %9871 = vst [vmem:[#allocation203_spill] sm:$0xff] %v7325_v11  ;;  %v9596_v11 = vmov 45  }
 0x353   : > { %v7327_v19 = vpop.permute.xlu1 %1926 }
 0x354   : > { %9872 = vst [vmem:[#allocation204_spill] sm:$0xff] %v7327_v19  ;;  %2986 = vperm.xlu0 %5795, %v7102_v18  }
 0x355   : > { %v7330_v27 = vpop.permute.xlu2 %1988  ;;  %2178 = vperm.xlu1 %5754, %v7085_v13  }
 0x356   : > { %9873 = vst [vmem:[#allocation205_spill] sm:$0xff] %v7330_v27  ;;  %5755 = vset.pattern.permute.xlu2 %v9874_v31 }
 0x357   : > { %2208 = vperm.xlu2 %5755, %v7008_v47  }
 0x358   : > { %v7335_v17 = vpop.permute.xlu0 %2618 }
 0x359   : > { %9875 = vst [vmem:[#allocation206_spill] sm:$0xff] %v7335_v17  ;;  %v5879_v17 = vld [vmem:[%s6421_s12 + $0x1] ss:$0 sm:$0xff] }
 0x35a   : > { %v506_v44 = vadd.f32 %v5879_v17, %v6570_v45  ;;  %v501_v45 = vadd.f32 %v5879_v17, %v6561_v42  ;;  %v617_v17 = vadd.f32 %v5881_v12, %v6597_v55 }
 0x35b   : > { %v7337_v26 = vpop.permute.xlu1 %1934 }
 0x35c   : > { %9876 = vst [vmem:[#allocation207_spill] sm:$0xff] %v7337_v26  ;;  %5798 = vset.pattern.permute.xlu0 %v9596_v11  ;;  %v448_v26 = vadd.f32 %v5878_v24, %v6553_v38  ;;  %v514_v29 = vmax.f32 %v506_v44, 0.0  ;;  %v443_v38 = vadd.f32 %v5878_v24, %v6544_v35  ;;  %v509_v60 = vmax.f32 %v501_v45, 0.0  ;;  %v5883_v24 = vld [vmem:[%s6421_s12 + $0x5] ss:$0 sm:$0xff] }
 0x35d   : > { %v7340_v19 = vpop.permute.xlu2 %1996  ;;  %3024 = vperm.xlu0 %5798, %v7042_v16   ;;  %5757 = vset.pattern.permute.xlu1 %v9874_v31 }
 0x35e   : > { %9877 = vst [vmem:[#allocation208_spill] sm:$0xff] %v7340_v19  ;;  %2216 = vperm.xlu1 %5757, %v7021_v43   ;;  %v5880_v19 = vld [vmem:[%s6421_s12 + $0x2] ss:$0 sm:$0xff]  ;;  %v456_v31 = vmax.f32 %v448_v26, 0.0  ;;  %v451_v53 = vmax.f32 %v443_v38, 0.0 }
 0x35f   : > { %2220 = vperm.xlu2 %5755, %v7064_v15   ;;  %v559_v26 = vadd.f32 %v5880_v19, %v6579_v48 }
 0x360   : > { %v7346_v27 = vpop.permute.xlu0 %2638  ;;  %v522_v39 = vadd.f32 %v514_v29, %v456_v31  ;;  %v517_v48 = vadd.f32 %v509_v60, %v451_v53  ;;  %v5884_v53 = vld [vmem:[%s6421_s12 + $0x6] ss:$0 sm:$0xff] }
 0x361   : > { %9878 = vst [vmem:[#allocation209_spill] sm:$0xff] %v7346_v27  ;;  %v564_v27 = vadd.f32 %v5880_v19, %v6588_v52  ;;  %v5882_v52 = vld [vmem:[%s6421_s12 + $0x4] ss:$0 sm:$0xff]  ;;  %v567_v19 = vmax.f32 %v559_v26, 0.0  ;;  %v796_v26 = vadd.f32 %v5884_v53, %v6664_v25  ;;  %v791_v25 = vadd.f32 %v5884_v53, %v6654_v20  ;;  %v5887_v53 = vld [vmem:[%s6421_s12 + $0x9] ss:$0 sm:$0xff] }
 0x362   : > { %v680_v42 = vadd.f32 %v5882_v52, %v6626_v2 }
 0x363   : > { %v7352_v11 = vpop.permute.xlu1 %1946  ;;  %v572_v37 = vmax.f32 %v564_v27, 0.0 }
 0x364   : > { %9879 = vst [vmem:[#allocation210_spill] sm:$0xff] %v7352_v11  ;;  %v688_v45 = vmax.f32 %v680_v42, 0.0 }
 0x365   : > { %3044 = vperm.xlu0 %5798, %v7102_v18   ;;  %v580_v27 = vadd.f32 %v572_v37, %v522_v39  ;;  %v575_v37 = vadd.f32 %v567_v19, %v517_v48  ;;  %v675_v39 = vadd.f32 %v5882_v52, %v6616_v62  ;;  %v733_v62 = vadd.f32 %v5883_v24, %v6635_v5  ;;  %v5885_v52 = vld [vmem:[%s6421_s12 + $0x7] ss:$0 sm:$0xff] }
 0x366   : > { %v7356_v30 = vpop.permute.xlu2 %2034  ;;  %2224 = vperm.xlu1 %5757, %v7033_v32   ;;  %v804_v48 = vmax.f32 %v796_v26, 0.0  ;;  %v849_v20 = vadd.f32 %v5885_v52, %v6674_v41 }
 0x367   : > { %9880 = vst [vmem:[#allocation211_spill] sm:$0xff] %v7356_v30  ;;  %2228 = vperm.xlu2 %5755, %v7037_v33   ;;  %v622_v30 = vadd.f32 %v5881_v12, %v6607_v59  ;;  %v9881_v59 = vmov 32  }
 0x369   : > { %v7364_v11 = vpop.permute.xlu0 %2676  ;;  %v630_v29 = vmax.f32 %v622_v30, 0.0  ;;  %v625_v30 = vmax.f32 %v617_v17, 0.0 }
 0x36b   : > { %v638_v38 = vadd.f32 %v630_v29, %v580_v27  ;;  %v683_v27 = vmax.f32 %v675_v39, 0.0  ;;  %v799_v39 = vmax.f32 %v791_v25, 0.0  ;;  %v965_v25 = vadd.f32 %v5887_v53, %v6715_v6 }
 0x36c   : > { %v7368_v44 = vpop.permute.xlu1 %1984 }
 0x36d   : > { %5801 = vset.pattern.permute.xlu0 %v9598_v46  ;;  %v738_v46 = vadd.f32 %v5883_v24, %v6644_v9  ;;  %v696_v55 = vadd.f32 %v688_v45, %v638_v38  ;;  %v633_v9 = vadd.f32 %v625_v30, %v575_v37  ;;  %v5886_v38 = vld [vmem:[%s6421_s12 + $0x8] ss:$0 sm:$0xff]  ;;  %v9610_v45 = vmov 47  }
 0x36e   : > { %v7372_v35 = vpop.permute.xlu2 %2046  ;;  %3082 = vperm.xlu0 %5801, %v7042_v16   ;;  %2236 = vperm.xlu1 %5757, %v7085_v13   ;;  %v912_v37 = vadd.f32 %v5886_v38, %v6705_v28  ;;  %v970_v28 = vadd.f32 %v5887_v53, %v6725_v34 }
 0x36f   : > { %5758 = vset.pattern.permute.xlu2 %v9881_v59  ;;  %v746_v12 = vmax.f32 %v738_v46, 0.0  ;;  %v691_v19 = vadd.f32 %v683_v27, %v633_v9  ;;  %v741_v46 = vmax.f32 %v733_v62, 0.0  ;;  %v857_v27 = vmax.f32 %v849_v20, 0.0 }
 0x370   : > { %2266 = vperm.xlu2 %5758, %v7008_v47   ;;  %v920_v26 = vmax.f32 %v912_v37, 0.0  ;;  %v907_v62 = vadd.f32 %v5886_v38, %v6694_v49  ;;  %v5889_v49 = vld [vmem:[%s6421_s12 + $0xb] ss:$0 sm:$0xff] }
 0x371   : > { %v7381_v31 = vpop.permute.xlu0 %2696  ;;  %v754_v42 = vadd.f32 %v746_v12, %v696_v55 }
 0x373   : > { %v812_v5 = vadd.f32 %v804_v48, %v754_v42  ;;  %v5888_v42 = vld [vmem:[%s6421_s12 + $0xa] ss:$0 sm:$0xff] }
 0x374   : > { %v7385_v2 = vpop.permute.xlu1 %1992  ;;  %v1028_v41 = vadd.f32 %v5888_v42, %v6746_v23  ;;  %v1086_v23 = vadd.f32 %v5889_v49, %v6766_v7  ;;  %v1023_v20 = vadd.f32 %v5888_v42, %v6735_v56  ;;  %v5891_v56 = vld [vmem:[%s6421_s12 + $0xd] ss:$0 sm:$0xff] }
 0x376   : > { %v7388_v60 = vpop.permute.xlu2 %2054  ;;  %3102 = vperm.xlu0 %5801, %v7102_v18   ;;  %5760 = vset.pattern.permute.xlu1 %v9881_v59  ;;  %v854_v59 = vadd.f32 %v5885_v52, %v6685_v63  ;;  %v749_v63 = vadd.f32 %v741_v46, %v691_v19  ;;  %v978_v19 = vmax.f32 %v970_v28, 0.0  ;;  %v915_v46 = vmax.f32 %v907_v62, 0.0 }
 0x377   : > { %2274 = vperm.xlu1 %5760, %v7021_v43   ;;  %v1094_v53 = vmax.f32 %v1086_v23, 0.0  ;;  %v1031_v62 = vmax.f32 %v1023_v20, 0.0  ;;  %v5893_v20 = vld [vmem:[%s6421_s12 + $0xf] ss:$0 sm:$0xff] }
 0x378   : > { %2278 = vperm.xlu2 %5758, %v7064_v15   ;;  %v862_v24 = vmax.f32 %v854_v59, 0.0  ;;  %v807_v9 = vadd.f32 %v799_v39, %v749_v63  ;;  %v973_v39 = vmax.f32 %v965_v25, 0.0 }
 0x37a   : > { %v7397_v29 = vpop.permute.xlu0 %2734  ;;  %v870_v12 = vadd.f32 %v862_v24, %v812_v5  ;;  %v865_v34 = vadd.f32 %v857_v27, %v807_v9  ;;  %v9882_v5 = vmov 33   ;;  %v1036_v24 = vmax.f32 %v1028_v41, 0.0 }
 0x37b   : > { %v9604_v27 = vmov 48  }
 0x37c   : > { %v7401_v17 = vpop.permute.xlu1 %2004  ;;  %v928_v59 = vadd.f32 %v920_v26, %v870_v12  ;;  %v923_v63 = vadd.f32 %v915_v46, %v865_v34  ;;  %v5890_v12 = vld [vmem:[%s6421_s12 + $0xc] ss:$0 sm:$0xff] }
 0x37d   : > { %v1144_v28 = vadd.f32 %v5890_v12, %v6786_v22  ;;  %v1139_v25 = vadd.f32 %v5890_v12, %v6776_v8 }
 0x37e   : > { %5804 = vset.pattern.permute.xlu0 %v9610_v45  ;;  %v986_v38 = vadd.f32 %v978_v19, %v928_v59  ;;  %v981_v7 = vadd.f32 %v973_v39, %v923_v63  ;;  %v1081_v59 = vadd.f32 %v5889_v49, %v6755_v14  ;;  %v1202_v19 = vadd.f32 %v5891_v56, %v6807_v1 }
 0x37f   : > { %v7406_v30 = vpop.permute.xlu2 %2092  ;;  %3140 = vperm.xlu0 %5804, %v7042_v16   ;;  %2282 = vperm.xlu1 %5760, %v7033_v32   ;;  %v1152_v42 = vmax.f32 %v1144_v28, 0.0  ;;  %v1147_v63 = vmax.f32 %v1139_v25, 0.0  ;;  %v1197_v39 = vadd.f32 %v5891_v56, %v6796_v21  ;;  %v5894_v21 = vld [vmem:[%s6421_s12 + $0x10] ss:$0 sm:$0xff]  ;;  %v9886_v25 = vmov 34  }
 0x380   : > { %2286 = vperm.xlu2 %5758, %v7037_v33   ;;  %v1044_v6 = vadd.f32 %v1036_v24, %v986_v38  ;;  %v1039_v34 = vadd.f32 %v1031_v62, %v981_v7  ;;  %v1089_v46 = vmax.f32 %v1081_v59, 0.0  ;;  %v1210_v38 = vmax.f32 %v1202_v19, 0.0 }
 0x382   : > { %v7413_v55 = vpop.permute.xlu0 %2754  ;;  %v1102_v22 = vadd.f32 %v1094_v53, %v1044_v6  ;;  %v1097_v23 = vadd.f32 %v1089_v46, %v1039_v34  ;;  %v1318_v6 = vadd.f32 %v5893_v20, %v6847_v3  ;;  %v1313_v34 = vadd.f32 %v5893_v20, %v6837_v10 }
 0x383   : > { %v9602_v46 = vmov 49  }
 0x384   : > { %v1160_v49 = vadd.f32 %v1152_v42, %v1102_v22  ;;  %v1155_v53 = vadd.f32 %v1147_v63, %v1097_v23  ;;  %v1326_v56 = vmax.f32 %v1318_v6, 0.0  ;;  %v1376_v22 = vadd.f32 %v5894_v21, %v6868_v58  ;;  %v5896_v63 = vld [vmem:[%s6421_s12 + $0x12] ss:$0 sm:$0xff] }
 0x385   : > { %v7418_v48 = vpop.permute.xlu1 %2042 }
 0x386   : > { %v1218_v8 = vadd.f32 %v1210_v38, %v1160_v49  ;;  %v1321_v38 = vmax.f32 %v1313_v34, 0.0 }
 0x387   : > { %v7421_v52 = vpop.permute.xlu2 %2104  ;;  %3160 = vperm.xlu0 %5804, %v7102_v18   ;;  %2294 = vperm.xlu1 %5760, %v7085_v13  }
 0x388   : > { %5761 = vset.pattern.permute.xlu2 %v9882_v5 }
 0x389   : > { %2324 = vperm.xlu2 %5761, %v7008_v47  }
 0x38b   : > { %v7430_v37 = vpop.permute.xlu0 %2792 }
 0x38d   : > { %v7434_v26 = vpop.permute.xlu1 %2050 }
 0x38f   : > { %v7437_v9 = vpop.permute.xlu2 %2112  ;;  %5807 = vset.pattern.permute.xlu0 %v9604_v27  ;;  %5763 = vset.pattern.permute.xlu1 %v9882_v5  ;;  %v5892_v5 = vld [vmem:[%s6421_s12 + $0xe] ss:$0 sm:$0xff]  ;;  %v5903_v27 = vld [vmem:[%s6421_s12 + $0x19] ss:$0 sm:$0xff] }
 0x390   : > { %3198 = vperm.xlu0 %5807, %v7042_v16   ;;  %2332 = vperm.xlu1 %5763, %v7021_v43   ;;  %v1260_v24 = vadd.f32 %v5892_v5, %v6827_v4  ;;  %v1205_v4 = vmax.f32 %v1197_v39, 0.0  ;;  %v1255_v28 = vadd.f32 %v5892_v5, %v6816_v0  ;;  %v5895_v0 = vld [vmem:[%s6421_s12 + $0x11] ss:$0 sm:$0xff]  ;;  %v1384_v5 = vmax.f32 %v1376_v22, 0.0  ;;  %v5898_v22 = vld [vmem:[%s6421_s12 + $0x14] ss:$0 sm:$0xff] }
 0x391   : > { %2336 = vperm.xlu2 %5761, %v7064_v15   ;;  %v1434_v10 = vadd.f32 %v5895_v0, %v6888_v50  ;;  %v5897_v50 = vld [vmem:[%s6421_s12 + $0x13] ss:$0 sm:$0xff] }
 0x392   : > { %v1268_v12 = vmax.f32 %v1260_v24, 0.0  ;;  %v1213_v42 = vadd.f32 %v1205_v4, %v1155_v53  ;;  %v1263_v19 = vmax.f32 %v1255_v28, 0.0  ;;  %v1371_v24 = vadd.f32 %v5894_v21, %v6857_v61 }
 0x393   : > { %v7447_v41 = vpop.permute.xlu0 %2812  ;;  %v1429_v4 = vadd.f32 %v5895_v0, %v6877_v51  ;;  %v1487_v51 = vadd.f32 %v5896_v63, %v6898_v54 }
 0x394   : > { %v1276_v59 = vadd.f32 %v1268_v12, %v1218_v8  ;;  %v1271_v49 = vadd.f32 %v1263_v19, %v1213_v42  ;;  %v1442_v8 = vmax.f32 %v1434_v10, 0.0  ;;  %v1492_v12 = vadd.f32 %v5896_v63, %v6908_v57  ;;  %v9890_v10 = vld [vmem:[#allocation92_spill] sm:$0xff]  ;;  %v9892_v63 = vld [vmem:[#allocation105_spill] sm:$0xff] }
 0x395   : > { %v7451_v14 = vpop.permute.xlu1 %2062  ;;  %v1379_v53 = vmax.f32 %v1371_v24, 0.0  ;;  %v1550_v57 = vadd.f32 %v5897_v50, %v6929_v36  ;;  %v9600_v24 = vmov 50  }
 0x396   : > { %v1334_v58 = vadd.f32 %v1326_v56, %v1276_v59  ;;  %v1329_v6 = vadd.f32 %v1321_v38, %v1271_v49  ;;  %v1500_v21 = vmax.f32 %v1492_v12, 0.0  ;;  %v1437_v56 = vmax.f32 %v1429_v4, 0.0  ;;  %v5899_v38 = vld [vmem:[%s6421_s12 + $0x15] ss:$0 sm:$0xff]  ;;  %v5900_v4 = vld [vmem:[%s6421_s12 + $0x16] ss:$0 sm:$0xff] }
 0x397   : > { %v1558_v0 = vmax.f32 %v1550_v57, 0.0  ;;  %v1545_v49 = vadd.f32 %v5897_v50, %v9890_v10  ;;  %v9894_v57 = vld [vmem:[#allocation112_spill] sm:$0xff] }
 0x398   : > { %v7455_v1 = vpop.permute.xlu2 %2150  ;;  %3218 = vperm.xlu0 %5807, %v7102_v18   ;;  %2340 = vperm.xlu1 %5763, %v7033_v32   ;;  %v1392_v20 = vadd.f32 %v1384_v5, %v1334_v58  ;;  %v1387_v59 = vadd.f32 %v1379_v53, %v1329_v6  ;;  %v1495_v5 = vmax.f32 %v1487_v51, 0.0  ;;  %v9893_v6 = vld [vmem:[#allocation97_spill] sm:$0xff] }
 0x399   : > { %9883 = vst [vmem:[#allocation212_spill] sm:$0xff] %v7455_v1  ;;  %2344 = vperm.xlu2 %5761, %v7037_v33   ;;  %v1553_v12 = vmax.f32 %v1545_v49, 0.0  ;;  %v1603_v53 = vadd.f32 %v5898_v22, %v9893_v6  ;;  %v9899_v49 = vld [vmem:[#allocation118_spill] sm:$0xff]  ;;  %v10125_v1 = vld [vmem:[#allocation77_spill] sm:$0xff] }
 0x39a   : > { %v1450_v61 = vadd.f32 %v1442_v8, %v1392_v20  ;;  %v1445_v58 = vadd.f32 %v1437_v56, %v1387_v59  ;;  %v1666_v20 = vadd.f32 %v5899_v38, %v9892_v63  ;;  %v1724_v59 = vadd.f32 %v5900_v4, %v9894_v57 }
 0x39b   : > { %v1611_v10 = vmax.f32 %v1603_v53, 0.0 }
 0x39c   : > { %v7463_v7 = vpop.permute.xlu0 %2850  ;;  %v1508_v34 = vadd.f32 %v1500_v21, %v1450_v61  ;;  %v1503_v8 = vadd.f32 %v1495_v5, %v1445_v58  ;;  %v1674_v21 = vmax.f32 %v1666_v20, 0.0  ;;  %v1732_v5 = vmax.f32 %v1724_v59, 0.0  ;;  %v9903_v59 = vld [vmem:[#allocation115_spill] sm:$0xff] }
 0x39e   : > { %v7466_v62 = vpop.permute.xlu1 %2100  ;;  %v1566_v54 = vadd.f32 %v1558_v0, %v1508_v34  ;;  %v1561_v51 = vadd.f32 %v1553_v12, %v1503_v8  ;;  %v9896_v34 = vld [vmem:[#allocation103_spill] sm:$0xff]  ;;  %v9900_v8 = vld [vmem:[#allocation109_spill] sm:$0xff] }
 0x39f   : > { %9884 = vst [vmem:[#allocation213_spill] sm:$0xff] %v7466_v62  ;;  %v1661_v0 = vadd.f32 %v5899_v38, %v9896_v34  ;;  %v1719_v38 = vadd.f32 %v5900_v4, %v9900_v8  ;;  %v5902_v12 = vld [vmem:[%s6421_s12 + $0x18] ss:$0 sm:$0xff]  ;;  %v9901_v34 = vld [vmem:[#allocation124_spill] sm:$0xff]  ;;  %v9608_v4 = vmov 51  }
 0x3a0   : > { %v7470_v3 = vpop.permute.xlu2 %2162  ;;  %5810 = vset.pattern.permute.xlu0 %v9602_v46  ;;  %2352 = vperm.xlu1 %5763, %v7085_v13   ;;  %v5921_v62 = vld [vmem:[%s6421_s12 + $0x2b] ss:$0 sm:$0xff] }
 0x3a1   : > { %9885 = vst [vmem:[#allocation214_spill] sm:$0xff] %v7470_v3  ;;  %5764 = vset.pattern.permute.xlu2 %v9886_v25  ;;  %3256 = vperm.xlu0 %5810, %v7042_v16   ;;  %v1669_v20 = vmax.f32 %v1661_v0, 0.0  ;;  %v9905_v0 = vld [vmem:[#allocation130_spill] sm:$0xff] }
 0x3a2   : > { %2382 = vperm.xlu2 %5764, %v7008_v47   ;;  %v9948_v3 = vld [vmem:[#allocation206_spill] sm:$0xff] }
 0x3a4   : > { %v7480_v23 = vpop.permute.xlu0 %2870 }
 0x3a6   : > { %v7483_v39 = vpop.permute.xlu1 %2108 }
 0x3a7   : > { %9887 = vst [vmem:[#allocation215_spill] sm:$0xff] %v7483_v39  ;;  %v9943_v39 = vld [vmem:[#allocation209_spill] sm:$0xff] }
 0x3a8   : > { %v7487_v28 = vpop.permute.xlu2 %2170  ;;  %5766 = vset.pattern.permute.xlu1 %v9886_v25  ;;  %v1608_v25 = vadd.f32 %v5898_v22, %v6949_v40  ;;  %v9898_v22 = vmov 35  }
 0x3a9   : > { %9888 = vst [vmem:[#allocation216_spill] sm:$0xff] %v7487_v28  ;;  %3276 = vperm.xlu0 %5810, %v7102_v18   ;;  %2390 = vperm.xlu1 %5766, %v7021_v43  }
 0x3aa   : > { %2394 = vperm.xlu2 %5764, %v7064_v15   ;;  %v1616_v40 = vmax.f32 %v1608_v25, 0.0  ;;  %v5901_v25 = vld [vmem:[%s6421_s12 + $0x17] ss:$0 sm:$0xff] }
 0x3ac   : > { %v1624_v61 = vadd.f32 %v1616_v40, %v1566_v54  ;;  %v1782_v54 = vadd.f32 %v5901_v25, %v9899_v49  ;;  %v1619_v40 = vadd.f32 %v1611_v10, %v1561_v51  ;;  %v1777_v49 = vadd.f32 %v5901_v25, %v9903_v59 }
 0x3ad   : > { %v7497_v42 = vpop.permute.xlu0 %2908 }
 0x3ae   : > { %v7499_v19 = vpop.permute.xlu1 %2120  ;;  %v1682_v58 = vadd.f32 %v1674_v21, %v1624_v61  ;;  %v1790_v57 = vmax.f32 %v1782_v54, 0.0  ;;  %v1677_v61 = vadd.f32 %v1669_v20, %v1619_v40  ;;  %v1727_v21 = vmax.f32 %v1719_v38, 0.0  ;;  %v9906_v40 = vld [vmem:[#allocation121_spill] sm:$0xff] }
 0x3af   : > { %9889 = vst [vmem:[#allocation217_spill] sm:$0xff] %v7499_v19  ;;  %v1785_v54 = vmax.f32 %v1777_v49, 0.0 }
 0x3b0   : > { %v1740_v53 = vadd.f32 %v1732_v5, %v1682_v58  ;;  %v1898_v58 = vadd.f32 %v5903_v27, %v9905_v0  ;;  %v5904_v5 = vld [vmem:[%s6421_s12 + $0x1a] ss:$0 sm:$0xff]  ;;  %v1735_v25 = vadd.f32 %v1727_v21, %v1677_v61  ;;  %v9909_v0 = vld [vmem:[#allocation127_spill] sm:$0xff] }
 0x3b1   : > { %v7504_v36 = vpop.permute.xlu2 %2208  ;;  %5813 = vset.pattern.permute.xlu0 %v9600_v24  ;;  %2398 = vperm.xlu1 %5766, %v7033_v32   ;;  %v1840_v24 = vadd.f32 %v5902_v12, %v9901_v34  ;;  %v9907_v34 = vld [vmem:[#allocation136_spill] sm:$0xff]  ;;  %v9911_v21 = vld [vmem:[#allocation142_spill] sm:$0xff] }
 0x3b2   : > { %9891 = vst [vmem:[#allocation92_spill] sm:$0xff] %v7504_v36  ;;  %2402 = vperm.xlu2 %5764, %v7037_v33   ;;  %3314 = vperm.xlu0 %5813, %v7042_v16   ;;  %v1798_v51 = vadd.f32 %v1790_v57, %v1740_v53  ;;  %v1906_v38 = vmax.f32 %v1898_v58, 0.0  ;;  %v5905_v53 = vld [vmem:[%s6421_s12 + $0x1b] ss:$0 sm:$0xff]  ;;  %v1793_v57 = vadd.f32 %v1785_v54, %v1735_v25 }
 0x3b3   : > { %v1848_v10 = vmax.f32 %v1840_v24, 0.0  ;;  %v2014_v49 = vadd.f32 %v5905_v53, %v9911_v21  ;;  %v9912_v25 = vld [vmem:[#allocation133_spill] sm:$0xff] }
 0x3b4   : > { %v1951_v54 = vadd.f32 %v5904_v5, %v9912_v25  ;;  %v9919_v25 = vld [vmem:[#allocation146_spill] sm:$0xff] }
 0x3b5   : > { %v7513_v50 = vpop.permute.xlu0 %2928  ;;  %v1856_v8 = vadd.f32 %v1848_v10, %v1798_v51  ;;  %v5906_v51 = vld [vmem:[%s6421_s12 + $0x1c] ss:$0 sm:$0xff] }
 0x3b7   : > { %v7516_v56 = vpop.permute.xlu1 %2158  ;;  %v1914_v61 = vadd.f32 %v1906_v38, %v1856_v8  ;;  %v1959_v38 = vmax.f32 %v1951_v54, 0.0  ;;  %v2067_v54 = vadd.f32 %v5906_v51, %v9919_v25 }
 0x3b8   : > { %9895 = vst [vmem:[#allocation105_spill] sm:$0xff] %v7516_v56 }
 0x3b9   : > { %v7520_v63 = vpop.permute.xlu2 %2220  ;;  %2410 = vperm.xlu1 %5766, %v7085_v13  }
 0x3ba   : > { %9897 = vst [vmem:[#allocation97_spill] sm:$0xff] %v7520_v63  ;;  %5767 = vset.pattern.permute.xlu2 %v9898_v22  ;;  %3334 = vperm.xlu0 %5813, %v7102_v18   ;;  %v5914_v63 = vld [vmem:[%s6421_s12 + $0x24] ss:$0 sm:$0xff] }
 0x3bb   : > { %2440 = vperm.xlu2 %5767, %v7008_v47  }
 0x3be   : > { %v7529_v6 = vpop.permute.xlu0 %2966 }
 0x3bf   : > { %v7532_v46 = vpop.permute.xlu1 %2166 }
 0x3c0   : > { %9902 = vst [vmem:[#allocation112_spill] sm:$0xff] %v7532_v46 }
 0x3c1   : > { %v7536_v47 = vpop.permute.xlu2 %2228  ;;  %5769 = vset.pattern.permute.xlu1 %v9898_v22  ;;  %v1835_v22 = vadd.f32 %v5902_v12, %v9906_v40 }
 0x3c2   : > { %9904 = vst [vmem:[#allocation103_spill] sm:$0xff] %v7536_v47  ;;  %5816 = vset.pattern.permute.xlu0 %v9608_v4  ;;  %2448 = vperm.xlu1 %5769, %v7021_v43   ;;  %v1956_v43 = vadd.f32 %v5904_v5, %v9907_v34 }
 0x3c3   : > { %2452 = vperm.xlu2 %5767, %v7064_v15   ;;  %3372 = vperm.xlu0 %5816, %v7042_v16   ;;  %v1843_v59 = vmax.f32 %v1835_v22, 0.0  ;;  %v1893_v15 = vadd.f32 %v5903_v27, %v9909_v0  ;;  %v2022_v27 = vmax.f32 %v2014_v49, 0.0  ;;  %v9913_v22 = vld [vmem:[#allocation148_spill] sm:$0xff]  ;;  %v5907_v0 = vld [vmem:[%s6421_s12 + $0x1d] ss:$0 sm:$0xff]  ;;  %v9918_v49 = vmov 36  }
 0x3c4   : > { %v1964_v12 = vmax.f32 %v1956_v43, 0.0  ;;  %v2072_v34 = vadd.f32 %v5906_v51, %v9913_v22  ;;  %v9914_v43 = vld [vmem:[#allocation139_spill] sm:$0xff]  ;;  %v7577_v22 = vld [vmem:[%s6404_s19] sm:$0xff]  ;;  %v2075_v51 = vmax.f32 %v2067_v54, 0.0 }
 0x3c5   : > { %v1851_v10 = vadd.f32 %v1843_v59, %v1793_v57  ;;  %v1901_v58 = vmax.f32 %v1893_v15, 0.0  ;;  %v2009_v21 = vadd.f32 %v5905_v53, %v9914_v43  ;;  %v9917_v15 = vld [vmem:[#allocation155_spill] sm:$0xff]  ;;  %v9925_v54 = vld [vmem:[#allocation158_spill] sm:$0xff] }
 0x3c6   : > { %v7546_v20 = vpop.permute.xlu0 %2986  ;;  %v1972_v40 = vadd.f32 %v1964_v12, %v1914_v61  ;;  %v2080_v59 = vmax.f32 %v2072_v34, 0.0  ;;  %v2130_v61 = vadd.f32 %v5907_v0, %v9917_v15  ;;  %v5908_v12 = vld [vmem:[%s6421_s12 + $0x1e] ss:$0 sm:$0xff]  ;;  %v5909_v15 = vld [vmem:[%s6421_s12 + $0x1f] ss:$0 sm:$0xff] }
 0x3c7   : > { %v7550_v24 = vpop.permute.xlu1 %2178  ;;  %v1909_v8 = vadd.f32 %v1901_v58, %v1851_v10  ;;  %v9606_v10 = vmov 52   ;;  %v2017_v53 = vmax.f32 %v2009_v21, 0.0  ;;  %v9920_v34 = vld [vmem:[#allocation161_spill] sm:$0xff] }
 0x3c8   : > { %9908 = vst [vmem:[#allocation118_spill] sm:$0xff] %v7550_v24  ;;  %v2030_v5 = vadd.f32 %v2022_v27, %v1972_v40  ;;  %v2138_v27 = vmax.f32 %v2130_v61, 0.0  ;;  %v2188_v43 = vadd.f32 %v5908_v12, %v9920_v34  ;;  %v5910_v34 = vld [vmem:[%s6421_s12 + $0x20] ss:$0 sm:$0xff] }
 0x3c9   : > { %v1967_v58 = vadd.f32 %v1959_v38, %v1909_v8  ;;  %v9921_v38 = vld [vmem:[#allocation152_spill] sm:$0xff] }
 0x3ca   : > { %v7553_v16 = vpop.permute.xlu2 %2266  ;;  %2456 = vperm.xlu1 %5769, %v7033_v32   ;;  %v2088_v40 = vadd.f32 %v2080_v59, %v2030_v5  ;;  %v2125_v21 = vadd.f32 %v5907_v0, %v9921_v38  ;;  %v2196_v5 = vmax.f32 %v2188_v43, 0.0  ;;  %v9924_v59 = vld [vmem:[#allocation167_spill] sm:$0xff]  ;;  %v2183_v0 = vadd.f32 %v5908_v12, %v9925_v54  ;;  %v7602_v38 = vld [vmem:[%s6404_s19 + $0x18] sm:$0xff] }
 0x3cb   : > { %9910 = vst [vmem:[#allocation109_spill] sm:$0xff] %v7553_v16  ;;  %2460 = vperm.xlu2 %5767, %v7037_v33   ;;  %3392 = vperm.xlu0 %5816, %v7102_v18   ;;  %v2025_v8 = vadd.f32 %v2017_v53, %v1967_v58  ;;  %v2246_v61 = vadd.f32 %v5909_v15, %v9924_v59  ;;  %v5911_v59 = vld [vmem:[%s6421_s12 + $0x21] ss:$0 sm:$0xff] }
 0x3cc   : > { %v2146_v45 = vsub.f32 %v2088_v40, %v2138_v27  ;;  %v2133_v53 = vmax.f32 %v2125_v21, 0.0  ;;  %v9926_v27 = vld [vmem:[#allocation173_spill] sm:$0xff]  ;;  %v9929_v16 = vld [vmem:[#allocation179_spill] sm:$0xff] }
 0x3cd   : > { %v2083_v58 = vadd.f32 %v2075_v51, %v2025_v8  ;;  %v2254_v40 = vmax.f32 %v2246_v61, 0.0  ;;  %v2304_v43 = vadd.f32 %v5910_v34, %v9926_v27  ;;  %v9927_v8 = vld [vmem:[#allocation164_spill] sm:$0xff]  ;;  %v2362_v24 = vadd.f32 %v5911_v59, %v9929_v16  ;;  %v9932_v27 = vld [vmem:[#allocation185_spill] sm:$0xff] }
 0x3ce   : > { %v2241_v51 = vadd.f32 %v5909_v15, %v9927_v8  ;;  %v5913_v8 = vld [vmem:[%s6421_s12 + $0x23] ss:$0 sm:$0xff] }
 0x3cf   : > { %v7563_v32 = vpop.permute.xlu0 %3024 }
 0x3d0   : > { %v7566_v33 = vpop.permute.xlu1 %2216 }
 0x3d1   : > { %9915 = vst [vmem:[#allocation124_spill] sm:$0xff] %v7566_v33  ;;  %v2312_v33 = vmax.f32 %v2304_v43, 0.0 }
 0x3d2   : > { %v7568_v57 = vpop.permute.xlu2 %2278  ;;  %2468 = vperm.xlu1 %5769, %v7085_v13   ;;  %v7581_v13 = vld [vmem:[%s6404_s19 + $0x8] sm:$0xff] }
 0x3d3   : > { %9916 = vst [vmem:[#allocation115_spill] sm:$0xff] %v7568_v57  ;;  %5770 = vset.pattern.permute.xlu2 %v9918_v49  ;;  %5819 = vset.pattern.permute.xlu0 %v9606_v10  ;;  %v7597_v57 = vld [vmem:[%s6404_s19 + $0x10] sm:$0xff] }
 0x3d4   : > { %2498 = vperm.xlu2 %5770, %v7577_v22   ;;  %3430 = vperm.xlu0 %5819, %v7581_v13  }
 0x3d7   : > { %v7586_v10 = vpop.permute.xlu0 %3044 }
 0x3d8   : > { %v7589_v25 = vpop.permute.xlu1 %2224 }
 0x3d9   : > { %9922 = vst [vmem:[#allocation130_spill] sm:$0xff] %v7589_v25  ;;  %v2191_v25 = vmax.f32 %v2183_v0, 0.0  ;;  %v7623_v0 = vld [vmem:[%s6404_s19 + $0x28] sm:$0xff] }
 0x3da   : > { %v7591_v4 = vpop.permute.xlu2 %2286  ;;  %5772 = vset.pattern.permute.xlu1 %v9918_v49  ;;  %v2204_v49 = vsub.f32 %v2146_v45, %v2196_v5  ;;  %v7618_v5 = vld [vmem:[%s6404_s19 + $0x20] sm:$0xff] }
 0x3db   : > { %9923 = vst [vmem:[#allocation121_spill] sm:$0xff] %v7591_v4  ;;  %2506 = vperm.xlu1 %5772, %v7597_v57   ;;  %v2141_v4 = vsub.f32 %v2083_v58, %v2133_v53  ;;  %v2249_v58 = vmax.f32 %v2241_v51, 0.0  ;;  %v9931_v53 = vld [vmem:[#allocation170_spill] sm:$0xff]  ;;  %v9933_v51 = vld [vmem:[#allocation176_spill] sm:$0xff] }
 0x3dc   : > { %2510 = vperm.xlu2 %5770, %v7602_v38   ;;  %3450 = vperm.xlu0 %5819, %v7102_v18   ;;  %v2262_v54 = vsub.f32 %v2204_v49, %v2254_v40  ;;  %v5912_v18 = vld [vmem:[%s6421_s12 + $0x22] ss:$0 sm:$0xff]  ;;  %v2299_v15 = vadd.f32 %v5910_v34, %v9931_v53  ;;  %v9612_v49 = vmov 53   ;;  %v2370_v40 = vmax.f32 %v2362_v24, 0.0  ;;  %v7640_v24 = vld [vmem:[%s6404_s19 + $0x38] sm:$0xff] }
 0x3dd   : > { %v2199_v61 = vsub.f32 %v2141_v4, %v2191_v25  ;;  %v2420_v43 = vadd.f32 %v5912_v18, %v9932_v27  ;;  %v2357_v34 = vadd.f32 %v5911_v59, %v9933_v51  ;;  %v9937_v59 = vld [vmem:[#allocation182_spill] sm:$0xff]  ;;  %v9939_v27 = vld [vmem:[#allocation197_spill] sm:$0xff] }
 0x3de   : > { %v2320_v16 = vsub.f32 %v2262_v54, %v2312_v33  ;;  %v2307_v25 = vmax.f32 %v2299_v15, 0.0  ;;  %v9938_v15 = vmov 37   ;;  %v5915_v51 = vld [vmem:[%s6421_s12 + $0x25] ss:$0 sm:$0xff] }
 0x3df   : > { %v2257_v4 = vsub.f32 %v2199_v61, %v2249_v58  ;;  %v2428_v47 = vmax.f32 %v2420_v43, 0.0  ;;  %v2365_v61 = vmax.f32 %v2357_v34, 0.0  ;;  %v2415_v58 = vadd.f32 %v5912_v18, %v9937_v59  ;;  %v9941_v34 = vld [vmem:[#allocation203_spill] sm:$0xff] }
 0x3e0   : > { %v7609_v21 = vpop.permute.xlu0 %3082  ;;  %v7611_v12 = vpop.permute.xlu1 %2236  ;;  %v2536_v43 = vadd.f32 %v5914_v63, %v9939_v27  ;;  %v2594_v18 = vadd.f32 %v5915_v51, %v9941_v34  ;;  %v5916_v59 = vld [vmem:[%s6421_s12 + $0x26] ss:$0 sm:$0xff] }
 0x3e1   : > { %9928 = vst [vmem:[#allocation136_spill] sm:$0xff] %v7611_v12  ;;  %v2378_v12 = vsub.f32 %v2320_v16, %v2370_v40  ;;  %v2315_v54 = vsub.f32 %v2257_v4, %v2307_v25  ;;  %v7647_v16 = vld [vmem:[%s6404_s19 + $0x30] sm:$0xff] }
 0x3e2   : > { %v9940_v4 = vld [vmem:[#allocation188_spill] sm:$0xff]  ;;  %v2544_v28 = vmax.f32 %v2536_v43, 0.0  ;;  %v2602_v27 = vmax.f32 %v2594_v18, 0.0 }
 0x3e3   : > { %v7615_v45 = vpop.permute.xlu2 %2324  ;;  %2514 = vperm.xlu1 %5772, %v7618_v5   ;;  %v2473_v25 = vadd.f32 %v5913_v8, %v9940_v4 }
 0x3e4   : > { %9930 = vst [vmem:[#allocation127_spill] sm:$0xff] %v7615_v45  ;;  %2518 = vperm.xlu2 %5770, %v7623_v0   ;;  %5822 = vset.pattern.permute.xlu0 %v9612_v49  ;;  %v9935_v49 = vld [vmem:[#allocation191_spill] sm:$0xff] }
 0x3e5   : > { %3488 = vperm.xlu0 %5822, %v7581_v13   ;;  %v2478_v46 = vadd.f32 %v5913_v8, %v9935_v49  ;;  %v2436_v49 = vsub.f32 %v2378_v12, %v2428_v47  ;;  %v2652_v47 = vadd.f32 %v5916_v59, %v9943_v39  ;;  %v2481_v8 = vmax.f32 %v2473_v25, 0.0  ;;  %v9946_v25 = vld [vmem:[#allocation200_spill] sm:$0xff] }
 0x3e6   : > { %v9614_v39 = vmov 54   ;;  %v2589_v34 = vadd.f32 %v5915_v51, %v9946_v25 }
 0x3e7   : > { %v2486_v40 = vmax.f32 %v2478_v46, 0.0  ;;  %v5917_v46 = vld [vmem:[%s6421_s12 + $0x27] ss:$0 sm:$0xff] }
 0x3e8   : > { %v7631_v53 = vpop.permute.xlu0 %3102  ;;  %v2710_v4 = vadd.f32 %v5917_v46, %v7381_v31  ;;  %v2705_v51 = vadd.f32 %v5917_v46, %v7364_v11  ;;  %v5923_v46 = vld [vmem:[%s6421_s12 + $0x2d] ss:$0 sm:$0xff] }
 0x3e9   : > { %v7633_v45 = vpop.permute.xlu1 %2274  ;;  %v2494_v19 = vsub.f32 %v2436_v49, %v2486_v40  ;;  %v5918_v49 = vld [vmem:[%s6421_s12 + $0x28] ss:$0 sm:$0xff] }
 0x3ea   : > { %9934 = vst [vmem:[#allocation142_spill] sm:$0xff] %v7633_v45  ;;  %v2423_v45 = vmax.f32 %v2415_v58, 0.0  ;;  %v2718_v18 = vmax.f32 %v2710_v4, 0.0  ;;  %v2942_v4 = vadd.f32 %v5921_v62, %v7513_v50 }
 0x3eb   : > { %v7637_v33 = vpop.permute.xlu2 %2336  ;;  %2526 = vperm.xlu1 %5772, %v7640_v24   ;;  %v2552_v40 = vsub.f32 %v2494_v19, %v2544_v28  ;;  %v2647_v28 = vadd.f32 %v5916_v59, %v9948_v3  ;;  %v5922_v3 = vld [vmem:[%s6421_s12 + $0x2c] ss:$0 sm:$0xff] }
 0x3ec   : > { %9936 = vst [vmem:[#allocation133_spill] sm:$0xff] %v7637_v33  ;;  %5773 = vset.pattern.permute.xlu2 %v9938_v15  ;;  %v2373_v33 = vsub.f32 %v2315_v54, %v2365_v61  ;;  %v9945_v61 = vld [vmem:[#allocation194_spill] sm:$0xff]  ;;  %v3000_v11 = vadd.f32 %v5922_v3, %v7546_v20  ;;  %v2950_v25 = vmax.f32 %v2942_v4, 0.0  ;;  %v2995_v4 = vadd.f32 %v5922_v3, %v7529_v6 }
 0x3ed   : > { %2556 = vperm.xlu2 %5773, %v7577_v22   ;;  %3508 = vperm.xlu0 %5822, %v7647_v16   ;;  %v2531_v58 = vadd.f32 %v5914_v63, %v9945_v61  ;;  %v5919_v63 = vld [vmem:[%s6421_s12 + $0x29] ss:$0 sm:$0xff]  ;;  %v2610_v31 = vsub.f32 %v2552_v40, %v2602_v27  ;;  %v2655_v59 = vmax.f32 %v2647_v28, 0.0 }
 0x3ee   : > { %v2431_v54 = vsub.f32 %v2373_v33, %v2423_v45  ;;  %v2768_v45 = vadd.f32 %v5918_v49, %v7413_v55  ;;  %v2826_v61 = vadd.f32 %v5919_v63, %v7447_v41  ;;  %v3008_v20 = vmax.f32 %v3000_v11, 0.0  ;;  %v5926_v11 = vld [vmem:[%s6421_s12 + $0x30] ss:$0 sm:$0xff] }
 0x3ef   : > { %v2539_v43 = vmax.f32 %v2531_v58, 0.0 }
 0x3f0   : > { %v2489_v33 = vsub.f32 %v2431_v54, %v2481_v8  ;;  %v2597_v8 = vmax.f32 %v2589_v34, 0.0  ;;  %v2834_v27 = vmax.f32 %v2826_v61, 0.0  ;;  %v3058_v34 = vadd.f32 %v5923_v46, %v7586_v10 }
 0x3f1   : > { %v7655_v56 = vpop.permute.xlu0 %3140  ;;  %v7657_v36 = vpop.permute.xlu1 %2282 }
 0x3f2   : > { %9942 = vst [vmem:[#allocation148_spill] sm:$0xff] %v7657_v36  ;;  %v2547_v54 = vsub.f32 %v2489_v33, %v2539_v43  ;;  %v2713_v33 = vmax.f32 %v2705_v51, 0.0  ;;  %v2821_v43 = vadd.f32 %v5919_v63, %v7430_v37  ;;  %v2937_v37 = vadd.f32 %v5921_v62, %v7497_v42 }
 0x3f3   : > { %v7661_v12 = vpop.permute.xlu2 %2344  ;;  %5775 = vset.pattern.permute.xlu1 %v9938_v15  ;;  %v2660_v15 = vmax.f32 %v2652_v47, 0.0  ;;  %v2776_v47 = vmax.f32 %v2768_v45, 0.0  ;;  %v3066_v51 = vmax.f32 %v3058_v34, 0.0 }
 0x3f4   : > { %9944 = vst [vmem:[#allocation139_spill] sm:$0xff] %v7661_v12  ;;  %2564 = vperm.xlu1 %5775, %v7597_v57   ;;  %v5920_v12 = vld [vmem:[%s6421_s12 + $0x2a] ss:$0 sm:$0xff]  ;;  %v2605_v45 = vsub.f32 %v2547_v54, %v2597_v8  ;;  %v2829_v8 = vmax.f32 %v2821_v43, 0.0 }
 0x3f5   : > { %2568 = vperm.xlu2 %5773, %v7602_v38   ;;  %5825 = vset.pattern.permute.xlu0 %v9614_v39  ;;  %v2668_v19 = vsub.f32 %v2610_v31, %v2660_v15  ;;  %v2884_v55 = vadd.f32 %v5920_v12, %v7480_v23  ;;  %v2763_v23 = vadd.f32 %v5918_v49, %v7397_v29  ;;  %v5924_v31 = vld [vmem:[%s6421_s12 + $0x2e] ss:$0 sm:$0xff] }
 0x3f6   : > { %3546 = vperm.xlu0 %5825, %v7581_v13   ;;  %v2879_v29 = vadd.f32 %v5920_v12, %v7463_v7  ;;  %v9952_v7 = vmov 38   ;;  %v3111_v6 = vadd.f32 %v5924_v31, %v7609_v21 }
 0x3f7   : > { %v2726_v41 = vsub.f32 %v2668_v19, %v2718_v18  ;;  %v2892_v15 = vmax.f32 %v2884_v55, 0.0  ;;  %v2663_v18 = vsub.f32 %v2605_v45, %v2655_v59  ;;  %v2771_v61 = vmax.f32 %v2763_v23, 0.0  ;;  %v5925_v55 = vld [vmem:[%s6421_s12 + $0x2f] ss:$0 sm:$0xff] }
 0x3f8   : > { %v2945_v23 = vmax.f32 %v2937_v37, 0.0  ;;  %v3119_v21 = vmax.f32 %v3111_v6, 0.0 }
 0x3f9   : > { %v3161_v36 = vpop.permute.xlu0 %3160  ;;  %v7676_v39 = vpop.permute.xlu1 %2294  ;;  %v2784_v40 = vsub.f32 %v2726_v41, %v2776_v47  ;;  %v3116_v47 = vadd.f32 %v5924_v31, %v7631_v53  ;;  %v2721_v54 = vsub.f32 %v2663_v18, %v2713_v33  ;;  %v9628_v53 = vmov 55  }
 0x3fa   : > { %9947 = vst [vmem:[#allocation155_spill] sm:$0xff] %v7676_v39  ;;  %v3174_v41 = vadd.f32 %v5925_v55, %v3161_v36  ;;  %v3053_v36 = vadd.f32 %v5923_v46, %v7563_v32  ;;  %v3003_v33 = vmax.f32 %v2995_v4, 0.0 }
 0x3fb   : > { %v2842_v50 = vsub.f32 %v2784_v40, %v2834_v27  ;;  %v2779_v12 = vsub.f32 %v2721_v54, %v2771_v61  ;;  %v2887_v27 = vmax.f32 %v2879_v29, 0.0  ;;  %v3124_v42 = vmax.f32 %v3116_v47, 0.0 }
 0x3fc   : > { %v7682_v58 = vpop.permute.xlu2 %2382  ;;  %2572 = vperm.xlu1 %5775, %v7618_v5   ;;  %v3061_v18 = vmax.f32 %v3053_v36, 0.0  ;;  %v3169_v61 = vadd.f32 %v5925_v55, %v7655_v56 }
 0x3fd   : > { %9949 = vst [vmem:[#allocation146_spill] sm:$0xff] %v7682_v58  ;;  %2576 = vperm.xlu2 %5773, %v7623_v0   ;;  %v2900_v19 = vsub.f32 %v2842_v50, %v2892_v15  ;;  %v2837_v59 = vsub.f32 %v2779_v12, %v2829_v8  ;;  %v3182_v15 = vmax.f32 %v3174_v41, 0.0  ;;  %v5927_v8 = vld [vmem:[%s6421_s12 + $0x31] ss:$0 sm:$0xff] }
 0x3fe   : > { %3566 = vperm.xlu0 %5825, %v7647_v16   ;;  %v3177_v54 = vmax.f32 %v3169_v61, 0.0 }
 0x3ff   : > { %v2958_v10 = vsub.f32 %v2900_v19, %v2950_v25  ;;  %v2895_v45 = vsub.f32 %v2837_v59, %v2887_v27  ;;  %v9626_v27 = vmov 56  }
 0x401   : > { %v3016_v62 = vsub.f32 %v2958_v10, %v3008_v20  ;;  %v2953_v34 = vsub.f32 %v2895_v45, %v2945_v23 }
 0x402   : > { %v3199_v49 = vpop.permute.xlu0 %3198  ;;  %v7696_v28 = vpop.permute.xlu1 %2332 }
 0x403   : > { %9950 = vst [vmem:[#allocation161_spill] sm:$0xff] %v7696_v28  ;;  %v3074_v40 = vsub.f32 %v3016_v62, %v3066_v51  ;;  %v3011_v19 = vsub.f32 %v2953_v34, %v3003_v33  ;;  %v3227_v31 = vadd.f32 %v5926_v11, %v3199_v49  ;;  %v10086_v28 = vld [vmem:[#allocation45_spill] sm:$0xff] }
 0x404   : > { %v7701_v63 = vpop.permute.xlu2 %2394  ;;  %2584 = vperm.xlu1 %5775, %v7640_v24  }
 0x405   : > { %9951 = vst [vmem:[#allocation152_spill] sm:$0xff] %v7701_v63  ;;  %5776 = vset.pattern.permute.xlu2 %v9952_v7  ;;  %v3132_v50 = vsub.f32 %v3074_v40, %v3124_v42  ;;  %v3069_v47 = vsub.f32 %v3011_v19, %v3061_v18  ;;  %v3235_v55 = vmax.f32 %v3227_v31, 0.0  ;;  %v9959_v40 = vmov 39   ;;  %v5929_v31 = vld [vmem:[%s6421_s12 + $0x33] ss:$0 sm:$0xff] }
 0x406   : > { %2614 = vperm.xlu2 %5776, %v7577_v22   ;;  %5828 = vset.pattern.permute.xlu0 %v9628_v53 }
 0x407   : > { %3604 = vperm.xlu0 %5828, %v7581_v13   ;;  %v3190_v32 = vsub.f32 %v3132_v50, %v3182_v15  ;;  %v3127_v56 = vsub.f32 %v3069_v47, %v3119_v21 }
 0x409   : > { %v3185_v51 = vsub.f32 %v3127_v56, %v3177_v54  ;;  %v9966_v56 = vmov 40  }
 0x40a   : > { %v3219_v3 = vpop.permute.xlu0 %3218  ;;  %v7712_v43 = vpop.permute.xlu1 %2340 }
 0x40b   : > { %9953 = vst [vmem:[#allocation167_spill] sm:$0xff] %v7712_v43  ;;  %v3232_v25 = vadd.f32 %v5926_v11, %v3219_v3  ;;  %v3243_v49 = vsub.f32 %v3185_v51, %v3235_v55  ;;  %v5928_v11 = vld [vmem:[%s6421_s12 + $0x32] ss:$0 sm:$0xff] }
 0x40c   : > { %v7715_v29 = vpop.permute.xlu2 %2402  ;;  %5778 = vset.pattern.permute.xlu1 %v9952_v7 }
 0x40d   : > { %9954 = vst [vmem:[#allocation158_spill] sm:$0xff] %v7715_v29  ;;  %v3240_v46 = vmax.f32 %v3232_v25, 0.0  ;;  %2622 = vperm.xlu1 %5778, %v7597_v57   ;;  %v9624_v25 = vmov 57   ;;  %v10067_v29 = vld [vmem:[#allocation29_spill] sm:$0xff] }
 0x40e   : > { %2626 = vperm.xlu2 %5776, %v7602_v38  }
 0x40f   : > { %v3248_v20 = vsub.f32 %v3190_v32, %v3240_v46  ;;  %3624 = vperm.xlu0 %5828, %v7647_v16  }
 0x412   : > { %v7722_v37 = vpop.permute.xlu1 %2352 }
 0x413   : > { %9955 = vst [vmem:[#allocation173_spill] sm:$0xff] %v7722_v37  ;;  %v3257_v10 = vpop.permute.xlu0 %3256 }
 0x414   : > { %v3285_v41 = vadd.f32 %v5927_v8, %v3257_v10  ;;  %v9620_v10 = vmov 58  }
 0x415   : > { %v7724_v7 = vpop.permute.xlu2 %2440  ;;  %2630 = vperm.xlu1 %5778, %v7618_v5  }
 0x416   : > { %9956 = vst [vmem:[#allocation164_spill] sm:$0xff] %v7724_v7  ;;  %v3293_v12 = vmax.f32 %v3285_v41, 0.0  ;;  %2634 = vperm.xlu2 %5776, %v7623_v0  }
 0x417   : > { %5831 = vset.pattern.permute.xlu0 %v9626_v27 }
 0x418   : > { %v3301_v4 = vsub.f32 %v3243_v49, %v3293_v12  ;;  %3662 = vperm.xlu0 %5831, %v7581_v13  }
 0x41b   : > { %v3277_v62 = vpop.permute.xlu0 %3276  ;;  %v7730_v42 = vpop.permute.xlu1 %2390 }
 0x41c   : > { %9957 = vst [vmem:[#allocation179_spill] sm:$0xff] %v7730_v42  ;;  %v3290_v59 = vadd.f32 %v5927_v8, %v3277_v62  ;;  %v10065_v42 = vld [vmem:[#allocation27_spill] sm:$0xff] }
 0x41d   : > { %v7732_v23 = vpop.permute.xlu2 %2452  ;;  %2642 = vperm.xlu1 %5778, %v7640_v24  }
 0x41e   : > { %9958 = vst [vmem:[#allocation170_spill] sm:$0xff] %v7732_v23  ;;  %v3298_v36 = vmax.f32 %v3290_v59, 0.0  ;;  %5779 = vset.pattern.permute.xlu2 %v9959_v40 }
 0x41f   : > { %2672 = vperm.xlu2 %5779, %v7577_v22  }
 0x420   : > { %v3306_v15 = vsub.f32 %v3248_v20, %v3298_v36  ;;  %3682 = vperm.xlu0 %5831, %v7647_v16   ;;  %v5930_v36 = vld [vmem:[%s6421_s12 + $0x34] ss:$0 sm:$0xff] }
 0x423   : > { %v7739_v45 = vpop.permute.xlu1 %2398 }
 0x424   : > { %9960 = vst [vmem:[#allocation185_spill] sm:$0xff] %v7739_v45  ;;  %v3315_v33 = vpop.permute.xlu0 %3314 }
 0x425   : > { %v3343_v6 = vadd.f32 %v5928_v11, %v3315_v33  ;;  %v7741_v3 = vpop.permute.xlu2 %2460  ;;  %5781 = vset.pattern.permute.xlu1 %v9959_v40 }
 0x426   : > { %9961 = vst [vmem:[#allocation176_spill] sm:$0xff] %v7741_v3  ;;  %2680 = vperm.xlu1 %5781, %v7597_v57   ;;  %v10058_v3 = vld [vmem:[#allocation22_spill] sm:$0xff] }
 0x427   : > { %v3351_v50 = vmax.f32 %v3343_v6, 0.0  ;;  %2684 = vperm.xlu2 %5779, %v7602_v38  }
 0x428   : > { %5834 = vset.pattern.permute.xlu0 %v9624_v25 }
 0x429   : > { %v3359_v34 = vsub.f32 %v3301_v4, %v3351_v50  ;;  %3720 = vperm.xlu0 %5834, %v7581_v13   ;;  %v9618_v50 = vmov 59  }
 0x42b   : > { %v7748_v18 = vpop.permute.xlu1 %2410 }
 0x42c   : > { %9962 = vst [vmem:[#allocation191_spill] sm:$0xff] %v7748_v18  ;;  %v3335_v61 = vpop.permute.xlu0 %3334 }
 0x42d   : > { %v3348_v32 = vadd.f32 %v5928_v11, %v3335_v61 }
 0x42e   : > { %v7750_v46 = vpop.permute.xlu2 %2498  ;;  %2688 = vperm.xlu1 %5781, %v7618_v5  }
 0x42f   : > { %9963 = vst [vmem:[#allocation182_spill] sm:$0xff] %v7750_v46  ;;  %v3356_v19 = vmax.f32 %v3348_v32, 0.0  ;;  %2692 = vperm.xlu2 %5779, %v7623_v0  }
 0x431   : > { %v3364_v21 = vsub.f32 %v3306_v15, %v3356_v19  ;;  %3740 = vperm.xlu0 %5834, %v7647_v16  }
 0x434   : > { %v7756_v20 = vpop.permute.xlu1 %2448 }
 0x435   : > { %9964 = vst [vmem:[#allocation197_spill] sm:$0xff] %v7756_v20  ;;  %v3373_v47 = vpop.permute.xlu0 %3372  ;;  %v10057_v20 = vld [vmem:[#allocation21_spill] sm:$0xff] }
 0x436   : > { %v3401_v54 = vadd.f32 %v5929_v31, %v3373_v47  ;;  %v7758_v8 = vpop.permute.xlu2 %2510  ;;  %2700 = vperm.xlu1 %5781, %v7640_v24  }
 0x437   : > { %9965 = vst [vmem:[#allocation188_spill] sm:$0xff] %v7758_v8  ;;  %5782 = vset.pattern.permute.xlu2 %v9966_v56  ;;  %v10056_v8 = vld [vmem:[#allocation20_spill] sm:$0xff] }
 0x438   : > { %v3409_v55 = vmax.f32 %v3401_v54, 0.0  ;;  %2730 = vperm.xlu2 %5782, %v7577_v22  }
 0x439   : > { %5837 = vset.pattern.permute.xlu0 %v9620_v10 }
 0x43a   : > { %v3417_v51 = vsub.f32 %v3359_v34, %v3409_v55  ;;  %3778 = vperm.xlu0 %5837, %v7581_v13  }
 0x43c   : > { %v7765_v41 = vpop.permute.xlu1 %2456 }
 0x43d   : > { %9967 = vst [vmem:[#allocation203_spill] sm:$0xff] %v7765_v41  ;;  %v3393_v49 = vpop.permute.xlu0 %3392 }
 0x43e   : > { %v3406_v12 = vadd.f32 %v5929_v31, %v3393_v49  ;;  %v7767_v4 = vpop.permute.xlu2 %2518  ;;  %5784 = vset.pattern.permute.xlu1 %v9966_v56  ;;  %v9973_v31 = vmov 41   ;;  %v5931_v56 = vld [vmem:[%s6421_s12 + $0x35] ss:$0 sm:$0xff] }
 0x43f   : > { %9968 = vst [vmem:[#allocation209_spill] sm:$0xff] %v7767_v4  ;;  %2738 = vperm.xlu1 %5784, %v7597_v57   ;;  %v10054_v4 = vld [vmem:[#allocation19_spill] sm:$0xff] }
 0x440   : > { %v3414_v62 = vmax.f32 %v3406_v12, 0.0  ;;  %2742 = vperm.xlu2 %5782, %v7602_v38  }
 0x442   : > { %v3422_v59 = vsub.f32 %v3364_v21, %v3414_v62  ;;  %3798 = vperm.xlu0 %5837, %v7647_v16  }
 0x444   : > { %v7774_v40 = vpop.permute.xlu1 %2468 }
 0x445   : > { %9969 = vst [vmem:[#allocation194_spill] sm:$0xff] %v7774_v40 }
 0x446   : > { %v3431_v15 = vpop.permute.xlu0 %3430 }
 0x447   : > { %v3459_v11 = vadd.f32 %v5930_v36, %v3431_v15  ;;  %v7776_v33 = vpop.permute.xlu2 %2556  ;;  %2746 = vperm.xlu1 %5784, %v7618_v5  }
 0x448   : > { %9970 = vst [vmem:[#allocation200_spill] sm:$0xff] %v7776_v33  ;;  %2750 = vperm.xlu2 %5782, %v7623_v0   ;;  %v10053_v33 = vld [vmem:[#allocation18_spill] sm:$0xff] }
 0x449   : > { %v3467_v6 = vmax.f32 %v3459_v11, 0.0 }
 0x44a   : > { %5840 = vset.pattern.permute.xlu0 %v9618_v50 }
 0x44b   : > { %v3475_v34 = vsub.f32 %v3417_v51, %v3467_v6  ;;  %3836 = vperm.xlu0 %5840, %v7581_v13  }
 0x44d   : > { %v7782_v61 = vpop.permute.xlu1 %2506 }
 0x44e   : > { %9971 = vst [vmem:[#allocation206_spill] sm:$0xff] %v7782_v61  ;;  %v3451_v32 = vpop.permute.xlu0 %3450 }
 0x44f   : > { %v3464_v19 = vadd.f32 %v5930_v36, %v3451_v32  ;;  %v7784_v21 = vpop.permute.xlu2 %2568  ;;  %2758 = vperm.xlu1 %5784, %v7640_v24   ;;  %v9616_v36 = vmov 60  }
 0x450   : > { %9972 = vst [vmem:[#allocation218_spill] sm:$0xff] %v7784_v21  ;;  %5785 = vset.pattern.permute.xlu2 %v9973_v31 }
 0x451   : > { %v3472_v47 = vmax.f32 %v3464_v19, 0.0  ;;  %2788 = vperm.xlu2 %5785, %v7577_v22  }
 0x453   : > { %v3480_v54 = vsub.f32 %v3422_v59, %v3472_v47  ;;  %3856 = vperm.xlu0 %5840, %v7647_v16   ;;  %v5932_v47 = vld [vmem:[%s6421_s12 + $0x36] ss:$0 sm:$0xff] }
 0x455   : > { %v7791_v55 = vpop.permute.xlu1 %2514 }
 0x456   : > { %9974 = vst [vmem:[#allocation219_spill] sm:$0xff] %v7791_v55 }
 0x457   : > { %v7793_v51 = vpop.permute.xlu2 %2576  ;;  %v3489_v49 = vpop.permute.xlu0 %3488  ;;  %5787 = vset.pattern.permute.xlu1 %v9973_v31 }
 0x458   : > { %9975 = vst [vmem:[#allocation220_spill] sm:$0xff] %v7793_v51  ;;  %v3517_v12 = vadd.f32 %v5931_v56, %v3489_v49  ;;  %2796 = vperm.xlu1 %5787, %v7597_v57  }
 0x459   : > { %2800 = vperm.xlu2 %5785, %v7602_v38  }
 0x45a   : > { %v3525_v62 = vmax.f32 %v3517_v12, 0.0 }
 0x45b   : > { %5843 = vset.pattern.permute.xlu0 %v9616_v36  ;;  %v9622_v36 = vmov 61  }
 0x45c   : > { %v3533_v59 = vsub.f32 %v3475_v34, %v3525_v62  ;;  %3894 = vperm.xlu0 %5843, %v7581_v13  }
 0x45d   : > { %v7800_v15 = vpop.permute.xlu1 %2526 }
 0x45e   : > { %9976 = vst [vmem:[#allocation221_spill] sm:$0xff] %v7800_v15 }
 0x45f   : > { %v3509_v11 = vpop.permute.xlu0 %3508 }
 0x460   : > { %v3522_v6 = vadd.f32 %v5931_v56, %v3509_v11  ;;  %v7802_v32 = vpop.permute.xlu2 %2614  ;;  %2804 = vperm.xlu1 %5787, %v7618_v5   ;;  %v9980_v56 = vmov 42  }
 0x461   : > { %9977 = vst [vmem:[#allocation222_spill] sm:$0xff] %v7802_v32  ;;  %2808 = vperm.xlu2 %5785, %v7623_v0   ;;  %v10050_v32 = vld [vmem:[#allocation11_spill] sm:$0xff] }
 0x462   : > { %v3530_v19 = vmax.f32 %v3522_v6, 0.0 }
 0x464   : > { %v3538_v31 = vsub.f32 %v3480_v54, %v3530_v19  ;;  %3914 = vperm.xlu0 %5843, %v7647_v16  }
 0x466   : > { %v7808_v49 = vpop.permute.xlu1 %2564 }
 0x467   : > { %9978 = vst [vmem:[#allocation223_spill] sm:$0xff] %v7808_v49 }
 0x468   : > { %v7810_v34 = vpop.permute.xlu2 %2626  ;;  %v3547_v12 = vpop.permute.xlu0 %3546  ;;  %2816 = vperm.xlu1 %5787, %v7640_v24  }
 0x469   : > { %9979 = vst [vmem:[#allocation224_spill] sm:$0xff] %v7810_v34  ;;  %v3575_v62 = vadd.f32 %v5932_v47, %v3547_v12  ;;  %5788 = vset.pattern.permute.xlu2 %v9980_v56  ;;  %v10049_v34 = vld [vmem:[#allocation14_spill] sm:$0xff] }
 0x46a   : > { %2846 = vperm.xlu2 %5788, %v7577_v22  }
 0x46b   : > { %v3583_v11 = vmax.f32 %v3575_v62, 0.0 }
 0x46c   : > { %5846 = vset.pattern.permute.xlu0 %v9622_v36 }
 0x46d   : > { %v3591_v54 = vsub.f32 %v3533_v59, %v3583_v11  ;;  %3952 = vperm.xlu0 %5846, %v7581_v13   ;;  %v5933_v59 = vld [vmem:[%s6421_s12 + $0x37] ss:$0 sm:$0xff] }
 0x46e   : > { %v7817_v6 = vpop.permute.xlu1 %2572 }
 0x46f   : > { %9981 = vst [vmem:[#allocation225_spill] sm:$0xff] %v7817_v6  ;;  %v10047_v6 = vld [vmem:[#allocation9_spill] sm:$0xff] }
 0x470   : > { %v7819_v19 = vpop.permute.xlu2 %2634  ;;  %v3567_v50 = vpop.permute.xlu0 %3566  ;;  %5790 = vset.pattern.permute.xlu1 %v9980_v56 }
 0x471   : > { %9982 = vst [vmem:[#allocation226_spill] sm:$0xff] %v7819_v19  ;;  %v3580_v12 = vadd.f32 %v5932_v47, %v3567_v50  ;;  %2854 = vperm.xlu1 %5790, %v7597_v57   ;;  %v9630_v47 = vmov 62   ;;  %v10046_v19 = vld [vmem:[#allocation8_spill] sm:$0xff] }
 0x472   : > { %2858 = vperm.xlu2 %5788, %v7602_v38  }
 0x473   : > { %v3588_v62 = vmax.f32 %v3580_v12, 0.0 }
 0x475   : > { %v3596_v10 = vsub.f32 %v3538_v31, %v3588_v62  ;;  %3972 = vperm.xlu0 %5846, %v7647_v16  }
 0x476   : > { %v7825_v36 = vpop.permute.xlu1 %2584 }
 0x477   : > { %9983 = vst [vmem:[#allocation227_spill] sm:$0xff] %v7825_v36 }
 0x479   : > { %v7828_v11 = vpop.permute.xlu2 %2672  ;;  %v3605_v25 = vpop.permute.xlu0 %3604  ;;  %2862 = vperm.xlu1 %5790, %v7618_v5  }
 0x47a   : > { %9984 = vst [vmem:[#allocation228_spill] sm:$0xff] %v7828_v11  ;;  %v3633_v27 = vadd.f32 %v5933_v59, %v3605_v25  ;;  %2866 = vperm.xlu2 %5788, %v7623_v0   ;;  %v9987_v11 = vmov 43  }
 0x47c   : > { %v3641_v50 = vmax.f32 %v3633_v27, 0.0 }
 0x47d   : > { %5849 = vset.pattern.permute.xlu0 %v9630_v47 }
 0x47e   : > { %v3649_v56 = vsub.f32 %v3591_v54, %v3641_v50  ;;  %4010 = vperm.xlu0 %5849, %v7581_v13   ;;  %v5934_v54 = vld [vmem:[%s6421_s12 + $0x38] ss:$0 sm:$0xff] }
 0x47f   : > { %v7834_v31 = vpop.permute.xlu1 %2622 }
 0x480   : > { %9985 = vst [vmem:[#allocation229_spill] sm:$0xff] %v7834_v31 }
 0x481   : > { %v7836_v12 = vpop.permute.xlu2 %2684  ;;  %v3625_v62 = vpop.permute.xlu0 %3624  ;;  %2874 = vperm.xlu1 %5790, %v7640_v24  }
 0x482   : > { %9986 = vst [vmem:[#allocation230_spill] sm:$0xff] %v7836_v12  ;;  %v3638_v53 = vadd.f32 %v5933_v59, %v3625_v62  ;;  %5791 = vset.pattern.permute.xlu2 %v9987_v11  ;;  %v9632_v62 = vmov 63  }
 0x483   : > { %2904 = vperm.xlu2 %5791, %v7577_v22  }
 0x484   : > { %v3646_v27 = vmax.f32 %v3638_v53, 0.0 }
 0x486   : > { %v3654_v25 = vsub.f32 %v3596_v10, %v3646_v27  ;;  %4030 = vperm.xlu0 %5849, %v7647_v16  }
 0x487   : > { %v7842_v47 = vpop.permute.xlu1 %2630 }
 0x488   : > { %9988 = vst [vmem:[#allocation231_spill] sm:$0xff] %v7842_v47 }
 0x489   : > { %v7845_v50 = vpop.permute.xlu2 %2692  ;;  %5793 = vset.pattern.permute.xlu1 %v9987_v11 }
 0x48a   : > { %9989 = vst [vmem:[#allocation232_spill] sm:$0xff] %v7845_v50  ;;  %v3663_v12 = vpop.permute.xlu0 %3662  ;;  %2912 = vperm.xlu1 %5793, %v7597_v57  }
 0x48b   : > { %v3691_v31 = vadd.f32 %v5934_v54, %v3663_v12  ;;  %2916 = vperm.xlu2 %5791, %v7602_v38  }
 0x48d   : > { %v3699_v59 = vmax.f32 %v3691_v31, 0.0 }
 0x48e   : > { %5852 = vset.pattern.permute.xlu0 %v9632_v62  ;;  %v5935_v62 = vld [vmem:[%s6421_s12 + $0x39] ss:$0 sm:$0xff] }
 0x48f   : > { %v3707_v53 = vsub.f32 %v3649_v56, %v3699_v59  ;;  %4068 = vperm.xlu0 %5852, %v7581_v13   ;;  %v7852_v10 = vpop.permute.xlu1 %2642  ;;  %v9994_v59 = vmov 44  }
 0x490   : > { %9990 = vst [vmem:[#allocation233_spill] sm:$0xff] %v7852_v10 }
 0x492   : > { %v7854_v27 = vpop.permute.xlu2 %2730  ;;  %v3683_v50 = vpop.permute.xlu0 %3682  ;;  %2920 = vperm.xlu1 %5793, %v7618_v5  }
 0x493   : > { %9991 = vst [vmem:[#allocation234_spill] sm:$0xff] %v7854_v27  ;;  %v3696_v11 = vadd.f32 %v5934_v54, %v3683_v50  ;;  %2924 = vperm.xlu2 %5791, %v7623_v0   ;;  %v9634_v50 = vmov 64  }
 0x495   : > { %v3704_v12 = vmax.f32 %v3696_v11, 0.0 }
 0x497   : > { %v3712_v47 = vsub.f32 %v3654_v25, %v3704_v12  ;;  %4088 = vperm.xlu0 %5852, %v7647_v16  }
 0x498   : > { %v7859_v31 = vpop.permute.xlu1 %2680 }
 0x499   : > { %9992 = vst [vmem:[#allocation235_spill] sm:$0xff] %v7859_v31 }
 0x49a   : > { %v7862_v56 = vpop.permute.xlu2 %2742  ;;  %2932 = vperm.xlu1 %5793, %v7640_v24  }
 0x49b   : > { %9993 = vst [vmem:[#allocation236_spill] sm:$0xff] %v7862_v56  ;;  %5794 = vset.pattern.permute.xlu2 %v9994_v59  ;;  %v3721_v27 = vpop.permute.xlu0 %3720 }
 0x49c   : > { %v3749_v10 = vadd.f32 %v5935_v62, %v3721_v27  ;;  %2962 = vperm.xlu2 %5794, %v7577_v22  }
 0x49e   : > { %v3757_v54 = vmax.f32 %v3749_v10, 0.0 }
 0x49f   : > { %5855 = vset.pattern.permute.xlu0 %v9634_v50 }
 0x4a0   : > { %v3765_v25 = vsub.f32 %v3707_v53, %v3757_v54  ;;  %4126 = vperm.xlu0 %5855, %v7581_v13   ;;  %v7869_v11 = vpop.permute.xlu1 %2688  ;;  %v5936_v53 = vld [vmem:[%s6421_s12 + $0x3a] ss:$0 sm:$0xff] }
 0x4a1   : > { %9995 = vst [vmem:[#allocation237_spill] sm:$0xff] %v7869_v11 }
 0x4a2   : > { %v7871_v12 = vpop.permute.xlu2 %2750  ;;  %5796 = vset.pattern.permute.xlu1 %v9994_v59 }
 0x4a3   : > { %9996 = vst [vmem:[#allocation238_spill] sm:$0xff] %v7871_v12  ;;  %v3741_v56 = vpop.permute.xlu0 %3740  ;;  %2970 = vperm.xlu1 %5796, %v7597_v57  }
 0x4a4   : > { %v3754_v27 = vadd.f32 %v5935_v62, %v3741_v56  ;;  %2974 = vperm.xlu2 %5794, %v7602_v38   ;;  %v9636_v62 = vmov 65  }
 0x4a6   : > { %v3762_v10 = vmax.f32 %v3754_v27, 0.0 }
 0x4a8   : > { %v3770_v31 = vsub.f32 %v3712_v47, %v3762_v10  ;;  %4146 = vperm.xlu0 %5855, %v7647_v16   ;;  %v7877_v50 = vpop.permute.xlu1 %2700  ;;  %v10001_v10 = vmov 45  }
 0x4a9   : > { %9997 = vst [vmem:[#allocation239_spill] sm:$0xff] %v7877_v50 }
 0x4ab   : > { %v7880_v54 = vpop.permute.xlu2 %2788  ;;  %2978 = vperm.xlu1 %5796, %v7618_v5  }
 0x4ac   : > { %9998 = vst [vmem:[#allocation240_spill] sm:$0xff] %v7880_v54  ;;  %2982 = vperm.xlu2 %5794, %v7623_v0   ;;  %v3779_v59 = vpop.permute.xlu0 %3778 }
 0x4ad   : > { %v3807_v12 = vadd.f32 %v5936_v53, %v3779_v59 }
 0x4af   : > { %v3815_v11 = vmax.f32 %v3807_v12, 0.0 }
 0x4b0   : > { %5858 = vset.pattern.permute.xlu0 %v9636_v62 }
 0x4b1   : > { %v3823_v56 = vsub.f32 %v3765_v25, %v3815_v11  ;;  %4184 = vperm.xlu0 %5858, %v7581_v13   ;;  %v7886_v47 = vpop.permute.xlu1 %2738  ;;  %v5937_v25 = vld [vmem:[%s6421_s12 + $0x3b] ss:$0 sm:$0xff] }
 0x4b2   : > { %9999 = vst [vmem:[#allocation241_spill] sm:$0xff] %v7886_v47 }
 0x4b3   : > { %v7888_v27 = vpop.permute.xlu2 %2800  ;;  %2990 = vperm.xlu1 %5796, %v7640_v24  }
 0x4b4   : > { %10000 = vst [vmem:[#allocation242_spill] sm:$0xff] %v7888_v27  ;;  %5797 = vset.pattern.permute.xlu2 %v10001_v10  ;;  %v3799_v54 = vpop.permute.xlu0 %3798 }
 0x4b5   : > { %v3812_v50 = vadd.f32 %v5936_v53, %v3799_v54  ;;  %3020 = vperm.xlu2 %5797, %v7577_v22   ;;  %v9638_v54 = vmov 66  }
 0x4b7   : > { %v3820_v12 = vmax.f32 %v3812_v50, 0.0 }
 0x4b9   : > { %v3828_v59 = vsub.f32 %v3770_v31, %v3820_v12  ;;  %4204 = vperm.xlu0 %5858, %v7647_v16   ;;  %v7894_v62 = vpop.permute.xlu1 %2746 }
 0x4ba   : > { %10002 = vst [vmem:[#allocation243_spill] sm:$0xff] %v7894_v62 }
 0x4bb   : > { %v7897_v11 = vpop.permute.xlu2 %2808  ;;  %5799 = vset.pattern.permute.xlu1 %v10001_v10 }
 0x4bc   : > { %10003 = vst [vmem:[#allocation244_spill] sm:$0xff] %v7897_v11  ;;  %3028 = vperm.xlu1 %5799, %v7597_v57  }
 0x4bd   : > { %3032 = vperm.xlu2 %5797, %v7602_v38   ;;  %v3837_v27 = vpop.permute.xlu0 %3836 }
 0x4be   : > { %v3865_v47 = vadd.f32 %v5937_v25, %v3837_v27 }
 0x4c0   : > { %v3873_v53 = vmax.f32 %v3865_v47, 0.0 }
 0x4c1   : > { %5861 = vset.pattern.permute.xlu0 %v9638_v54  ;;  %v7903_v31 = vpop.permute.xlu1 %2758  ;;  %v5938_v54 = vld [vmem:[%s6421_s12 + $0x3c] ss:$0 sm:$0xff] }
 0x4c2   : > { %10004 = vst [vmem:[#allocation245_spill] sm:$0xff] %v7903_v31  ;;  %v3881_v50 = vsub.f32 %v3823_v56, %v3873_v53  ;;  %4242 = vperm.xlu0 %5861, %v7581_v13   ;;  %v10008_v56 = vmov 46  }
 0x4c4   : > { %v7906_v12 = vpop.permute.xlu2 %2846  ;;  %3036 = vperm.xlu1 %5799, %v7618_v5  }
 0x4c5   : > { %10005 = vst [vmem:[#allocation246_spill] sm:$0xff] %v7906_v12  ;;  %3040 = vperm.xlu2 %5797, %v7623_v0   ;;  %v3857_v10 = vpop.permute.xlu0 %3856 }
 0x4c6   : > { %v3870_v11 = vadd.f32 %v5937_v25, %v3857_v10  ;;  %v9640_v25 = vmov 67  }
 0x4c8   : > { %v3878_v62 = vmax.f32 %v3870_v11, 0.0 }
 0x4ca   : > { %v3886_v27 = vsub.f32 %v3828_v59, %v3878_v62  ;;  %4262 = vperm.xlu0 %5861, %v7647_v16   ;;  %v7911_v47 = vpop.permute.xlu1 %2796 }
 0x4cb   : > { %10006 = vst [vmem:[#allocation247_spill] sm:$0xff] %v7911_v47 }
 0x4cc   : > { %v7914_v36 = vpop.permute.xlu2 %2858  ;;  %3048 = vperm.xlu1 %5799, %v7640_v24  }
 0x4cd   : > { %10007 = vst [vmem:[#allocation248_spill] sm:$0xff] %v7914_v36  ;;  %5800 = vset.pattern.permute.xlu2 %v10008_v56 }
 0x4ce   : > { %3078 = vperm.xlu2 %5800, %v7577_v22   ;;  %v3895_v53 = vpop.permute.xlu0 %3894 }
 0x4cf   : > { %v3923_v12 = vadd.f32 %v5938_v54, %v3895_v53 }
 0x4d1   : > { %v3931_v31 = vmax.f32 %v3923_v12, 0.0 }
 0x4d2   : > { %5864 = vset.pattern.permute.xlu0 %v9640_v25  ;;  %v7920_v62 = vpop.permute.xlu1 %2804  ;;  %v5939_v25 = vld [vmem:[%s6421_s12 + $0x3d] ss:$0 sm:$0xff] }
 0x4d3   : > { %10009 = vst [vmem:[#allocation249_spill] sm:$0xff] %v7920_v62  ;;  %v3939_v59 = vsub.f32 %v3881_v50, %v3931_v31  ;;  %4300 = vperm.xlu0 %5864, %v7581_v13   ;;  %v9642_v62 = vmov 68  }
 0x4d4   : > { %v7923_v11 = vpop.permute.xlu2 %2866  ;;  %5802 = vset.pattern.permute.xlu1 %v10008_v56 }
 0x4d5   : > { %10010 = vst [vmem:[#allocation250_spill] sm:$0xff] %v7923_v11  ;;  %3086 = vperm.xlu1 %5802, %v7597_v57  }
 0x4d6   : > { %3090 = vperm.xlu2 %5800, %v7602_v38   ;;  %v3915_v10 = vpop.permute.xlu0 %3914 }
 0x4d7   : > { %v3928_v53 = vadd.f32 %v5938_v54, %v3915_v10 }
 0x4d9   : > { %v3936_v12 = vmax.f32 %v3928_v53, 0.0  ;;  %v10015_v53 = vmov 47  }
 0x4da   : > { %v7928_v36 = vpop.permute.xlu1 %2816 }
 0x4db   : > { %10011 = vst [vmem:[#allocation251_spill] sm:$0xff] %v7928_v36  ;;  %v3944_v47 = vsub.f32 %v3886_v27, %v3936_v12  ;;  %4320 = vperm.xlu0 %5864, %v7647_v16  }
 0x4dd   : > { %v7932_v31 = vpop.permute.xlu2 %2904  ;;  %3094 = vperm.xlu1 %5802, %v7618_v5  }
 0x4de   : > { %10012 = vst [vmem:[#allocation252_spill] sm:$0xff] %v7932_v31  ;;  %3098 = vperm.xlu2 %5800, %v7623_v0  }
 0x4df   : > { %v3953_v50 = vpop.permute.xlu0 %3952 }
 0x4e0   : > { %v3981_v56 = vadd.f32 %v5939_v25, %v3953_v50 }
 0x4e2   : > { %v3989_v11 = vmax.f32 %v3981_v56, 0.0 }
 0x4e3   : > { %5867 = vset.pattern.permute.xlu0 %v9642_v62  ;;  %v7937_v54 = vpop.permute.xlu1 %2854 }
 0x4e4   : > { %10013 = vst [vmem:[#allocation253_spill] sm:$0xff] %v7937_v54  ;;  %v3997_v10 = vsub.f32 %v3939_v59, %v3989_v11  ;;  %4358 = vperm.xlu0 %5867, %v7581_v13   ;;  %v5940_v59 = vld [vmem:[%s6421_s12 + $0x3e] ss:$0 sm:$0xff] }
 0x4e5   : > { %v7940_v27 = vpop.permute.xlu2 %2916  ;;  %3106 = vperm.xlu1 %5802, %v7640_v24  }
 0x4e6   : > { %10014 = vst [vmem:[#allocation254_spill] sm:$0xff] %v7940_v27  ;;  %5803 = vset.pattern.permute.xlu2 %v10015_v53 }
 0x4e7   : > { %3136 = vperm.xlu2 %5803, %v7577_v22   ;;  %v3973_v12 = vpop.permute.xlu0 %3972 }
 0x4e8   : > { %v3986_v50 = vadd.f32 %v5939_v25, %v3973_v12  ;;  %v9644_v25 = vmov 69  }
 0x4ea   : > { %v3994_v56 = vmax.f32 %v3986_v50, 0.0 }
 0x4eb   : > { %v7945_v31 = vpop.permute.xlu1 %2862 }
 0x4ec   : > { %10016 = vst [vmem:[#allocation255_spill] sm:$0xff] %v7945_v31  ;;  %v4002_v62 = vsub.f32 %v3944_v47, %v3994_v56  ;;  %4378 = vperm.xlu0 %5867, %v7647_v16  }
 0x4ed   : > { %v7948_v54 = vpop.permute.xlu2 %2924  ;;  %5805 = vset.pattern.permute.xlu1 %v10015_v53 }
 0x4ee   : > { %10017 = vst [vmem:[#allocation256_spill] sm:$0xff] %v7948_v54  ;;  %3144 = vperm.xlu1 %5805, %v7597_v57   ;;  %v10045_v54 = vmov 51  }
 0x4ef   : > { %3148 = vperm.xlu2 %5803, %v7602_v38  }
 0x4f0   : > { %v4011_v11 = vpop.permute.xlu0 %4010 }
 0x4f1   : > { %v4039_v27 = vadd.f32 %v5940_v59, %v4011_v11 }
 0x4f3   : > { %v4047_v22 = vmax.f32 %v4039_v27, 0.0  ;;  %v7954_v36 = vpop.permute.xlu1 %2874 }
 0x4f4   : > { %10018 = vst [vmem:[#allocation257_spill] sm:$0xff] %v7954_v36  ;;  %5870 = vset.pattern.permute.xlu0 %v9644_v25 }
 0x4f5   : > { %v4055_v47 = vsub.f32 %v3997_v10, %v4047_v22  ;;  %4416 = vperm.xlu0 %5870, %v7581_v13   ;;  %v5941_v13 = vld [vmem:[%s6421_s12 + $0x3f] ss:$0 sm:$0xff]  ;;  %v10022_v10 = vmov 48  }
 0x4f6   : > { %v7958_v12 = vpop.permute.xlu2 %2962  ;;  %3152 = vperm.xlu1 %5805, %v7618_v5   ;;  %v7971_v22 = vld [vmem:[%s6404_s19] sm:$0xff] }
 0x4f7   : > { %10019 = vst [vmem:[#allocation258_spill] sm:$0xff] %v7958_v12  ;;  %3156 = vperm.xlu2 %5803, %v7623_v0  }
 0x4f8   : > { %v4031_v53 = vpop.permute.xlu0 %4030 }
 0x4f9   : > { %v4044_v50 = vadd.f32 %v5940_v59, %v4031_v53 }
 0x4fb   : > { %v4052_v56 = vmax.f32 %v4044_v50, 0.0 }
 0x4fc   : > { %v7962_v27 = vpop.permute.xlu1 %2912 }
 0x4fd   : > { %10020 = vst [vmem:[#allocation259_spill] sm:$0xff] %v7962_v27  ;;  %v4060_v11 = vsub.f32 %v4002_v62, %v4052_v56  ;;  %4436 = vperm.xlu0 %5870, %v7647_v16   ;;  %v9646_v62 = vmov 70   ;;  %v5999_v27 = vld [vmem:[%s6404_s19 + $0x8] sm:$0xff] }
 0x4fe   : > { %v7965_v25 = vpop.permute.xlu2 %2974  ;;  %3164 = vperm.xlu1 %5805, %v7640_v24  }
 0x4ff   : > { %10021 = vst [vmem:[#allocation260_spill] sm:$0xff] %v7965_v25  ;;  %5806 = vset.pattern.permute.xlu2 %v10022_v10 }
 0x500   : > { %3194 = vperm.xlu2 %5806, %v7971_v22  }
 0x501   : > { %v4069_v12 = vpop.permute.xlu0 %4068 }
 0x502   : > { %v4097_v59 = vadd.f32 %v5941_v13, %v4069_v12 }
 0x504   : > { %v4105_v53 = vmax.f32 %v4097_v59, 0.0  ;;  %v7974_v50 = vpop.permute.xlu1 %2920 }
 0x505   : > { %10023 = vst [vmem:[#allocation261_spill] sm:$0xff] %v7974_v50  ;;  %5873 = vset.pattern.permute.xlu0 %v9646_v62 }
 0x506   : > { %v4113_v56 = vsub.f32 %v4055_v47, %v4105_v53  ;;  %v7977_v25 = vpop.permute.xlu2 %2982  ;;  %4474 = vperm.xlu0 %5873, %v5999_v27   ;;  %5808 = vset.pattern.permute.xlu1 %v10022_v10  ;;  %v5942_v47 = vld [vmem:[%s6421_s12 + $0x40] ss:$0 sm:$0xff] }
 0x507   : > { %10024 = vst [vmem:[#allocation262_spill] sm:$0xff] %v7977_v25  ;;  %3202 = vperm.xlu1 %5808, %v7597_v57  }
 0x508   : > { %3206 = vperm.xlu2 %5806, %v7602_v38   ;;  %v9648_v38 = vmov 71  }
 0x509   : > { %v4089_v36 = vpop.permute.xlu0 %4088 }
 0x50a   : > { %v4102_v12 = vadd.f32 %v5941_v13, %v4089_v36 }
 0x50c   : > { %v4110_v59 = vmax.f32 %v4102_v12, 0.0  ;;  %v7983_v31 = vpop.permute.xlu1 %2932 }
 0x50d   : > { %10025 = vst [vmem:[#allocation263_spill] sm:$0xff] %v7983_v31 }
 0x50e   : > { %v4118_v50 = vsub.f32 %v4060_v11, %v4110_v59  ;;  %4494 = vperm.xlu0 %5873, %v7647_v16  }
 0x50f   : > { %v7986_v62 = vpop.permute.xlu2 %3020  ;;  %3210 = vperm.xlu1 %5808, %v7618_v5   ;;  %v10029_v5 = vmov 49  }
 0x510   : > { %10026 = vst [vmem:[#allocation264_spill] sm:$0xff] %v7986_v62  ;;  %3214 = vperm.xlu2 %5806, %v7623_v0  }
 0x512   : > { %v4127_v10 = vpop.permute.xlu0 %4126 }
 0x513   : > { %v4155_v53 = vadd.f32 %v5942_v47, %v4127_v10 }
 0x515   : > { %v4163_v57 = vmax.f32 %v4155_v53, 0.0  ;;  %v7991_v25 = vpop.permute.xlu1 %2970 }
 0x516   : > { %10027 = vst [vmem:[#allocation265_spill] sm:$0xff] %v7991_v25  ;;  %5876 = vset.pattern.permute.xlu0 %v9648_v38 }
 0x517   : > { %v4171_v36 = vsub.f32 %v4113_v56, %v4163_v57  ;;  %v7994_v11 = vpop.permute.xlu2 %3032  ;;  %4532 = vperm.xlu0 %5876, %v5999_v27   ;;  %3222 = vperm.xlu1 %5808, %v7640_v24   ;;  %v8006_v27 = vld [vmem:[%s6404_s19 + $0x10] sm:$0xff]  ;;  %v5943_v24 = vld [vmem:[%s6421_s12 + $0x41] ss:$0 sm:$0xff]  ;;  %v8011_v56 = vld [vmem:[%s6404_s19 + $0x18] sm:$0xff] }
 0x518   : > { %10028 = vst [vmem:[#allocation266_spill] sm:$0xff] %v7994_v11  ;;  %5809 = vset.pattern.permute.xlu2 %v10029_v5 }
 0x519   : > { %3252 = vperm.xlu2 %5809, %v7971_v22  }
 0x51a   : > { %v4147_v0 = vpop.permute.xlu0 %4146 }
 0x51b   : > { %v4160_v13 = vadd.f32 %v5942_v47, %v4147_v0 }
 0x51d   : > { %v4168_v12 = vmax.f32 %v4160_v13, 0.0  ;;  %v7999_v59 = vpop.permute.xlu1 %2978 }
 0x51e   : > { %10030 = vst [vmem:[#allocation267_spill] sm:$0xff] %v7999_v59 }
 0x51f   : > { %v4176_v10 = vsub.f32 %v4118_v50, %v4168_v12  ;;  %v8001_v53 = vpop.permute.xlu2 %3040  ;;  %4552 = vperm.xlu0 %5876, %v7647_v16   ;;  %5811 = vset.pattern.permute.xlu1 %v10029_v5  ;;  %v8019_v5 = vld [vmem:[%s6404_s19 + $0x20] sm:$0xff]  ;;  %v8023_v12 = vld [vmem:[%s6404_s19 + $0x28] sm:$0xff] }
 0x520   : > { %10031 = vst [vmem:[#allocation268_spill] sm:$0xff] %v8001_v53  ;;  %3260 = vperm.xlu1 %5811, %v8006_v27  }
 0x521   : > { %3264 = vperm.xlu2 %5809, %v8011_v56  }
 0x523   : > { %v4185_v47 = vpop.permute.xlu0 %4184 }
 0x524   : > { %v4213_v57 = vadd.f32 %v5943_v24, %v4185_v47 }
 0x525   : > { %v8014_v50 = vpop.permute.xlu1 %2990 }
 0x526   : > { %10032 = vst [vmem:[#allocation269_spill] sm:$0xff] %v8014_v50  ;;  %v4221_v0 = vmax.f32 %v4213_v57, 0.0  ;;  %v8031_v57 = vld [vmem:[%s6404_s19 + $0x38] sm:$0xff] }
 0x528   : > { %v4229_v13 = vsub.f32 %v4171_v36, %v4221_v0  ;;  %v8016_v16 = vpop.permute.xlu2 %3078  ;;  %3268 = vperm.xlu1 %5811, %v8019_v5   ;;  %v10036_v36 = vmov 50   ;;  %v5944_v0 = vld [vmem:[%s6421_s12 + $0x42] ss:$0 sm:$0xff] }
 0x529   : > { %10033 = vst [vmem:[#allocation270_spill] sm:$0xff] %v8016_v16  ;;  %3272 = vperm.xlu2 %5809, %v8023_v12  }
 0x52b   : > { %v4205_v38 = vpop.permute.xlu0 %4204 }
 0x52c   : > { %v4218_v59 = vadd.f32 %v5943_v24, %v4205_v38 }
 0x52e   : > { %v4226_v11 = vmax.f32 %v4218_v59, 0.0  ;;  %v8026_v25 = vpop.permute.xlu1 %3028 }
 0x52f   : > { %10034 = vst [vmem:[#allocation271_spill] sm:$0xff] %v8026_v25 }
 0x530   : > { %v4234_v47 = vsub.f32 %v4176_v10, %v4226_v11  ;;  %v8028_v50 = vpop.permute.xlu2 %3090  ;;  %3280 = vperm.xlu1 %5811, %v8031_v57  }
 0x531   : > { %10035 = vst [vmem:[#allocation272_spill] sm:$0xff] %v8028_v50  ;;  %5812 = vset.pattern.permute.xlu2 %v10036_v36 }
 0x532   : > { %3310 = vperm.xlu2 %5812, %v7971_v22  }
 0x534   : > { %v4243_v16 = vpop.permute.xlu0 %4242 }
 0x535   : > { %v4271_v31 = vadd.f32 %v5944_v0, %v4243_v16 }
 0x536   : > { %v8037_v62 = vpop.permute.xlu1 %3036 }
 0x537   : > { %10037 = vst [vmem:[#allocation273_spill] sm:$0xff] %v8037_v62  ;;  %v4279_v38 = vmax.f32 %v4271_v31, 0.0  ;;  %v8053_v31 = vld [vmem:[%s6421_s12 + $0x43] ss:$0 sm:$0xff] }
 0x538   : > { %v8039_v59 = vpop.permute.xlu2 %3098  ;;  %5814 = vset.pattern.permute.xlu1 %v10036_v36 }
 0x539   : > { %10038 = vst [vmem:[#allocation274_spill] sm:$0xff] %v8039_v59  ;;  %v4287_v11 = vsub.f32 %v4229_v13, %v4279_v38  ;;  %3318 = vperm.xlu1 %5814, %v8006_v27  }
 0x53a   : > { %3322 = vperm.xlu2 %5812, %v8011_v56  }
 0x53c   : > { %v4263_v10 = vpop.permute.xlu0 %4262 }
 0x53d   : > { %v4276_v24 = vadd.f32 %v5944_v0, %v4263_v10 }
 0x53e   : > { %v8044_v25 = vpop.permute.xlu1 %3048 }
 0x53f   : > { %10039 = vst [vmem:[#allocation275_spill] sm:$0xff] %v8044_v25  ;;  %v4284_v16 = vmax.f32 %v4276_v24, 0.0  ;;  %v10043_v24 = vld [vmem:[#allocation10_spill] sm:$0xff] }
 0x540   : > { %v6006_v25 = vld [vmem:[%s6421_s12] ss:$0 sm:$0xff] }
 0x541   : > { %v8046_v50 = vsub.f32 %v4234_v47, %v4284_v16  ;;  %v8048_v62 = vpop.permute.xlu2 %3136  ;;  %3326 = vperm.xlu1 %5814, %v8019_v5   ;;  %v6005_v47 = vld [vmem:[%s6421_s12 + $0x1] ss:$0 sm:$0xff]  ;;  %v445_v49 = vadd.f32 %v6006_v25, %v10049_v34  ;;  %v444_v15 = vadd.f32 %v6006_v25, %v10050_v32 }
 0x542   : > { %10040 = vst [vmem:[#allocation276_spill] sm:$0xff] %v8048_v62  ;;  %3330 = vperm.xlu2 %5812, %v8023_v12   ;;  %v500_v16 = vadd.f32 %v6005_v47, %v10043_v24  ;;  %v10044_v62 = vld [vmem:[#allocation13_spill] sm:$0xff]  ;;  %v10051_v24 = vld [vmem:[#allocation15_spill] sm:$0xff]  ;;  %v502_v40 = vadd.f32 %v6005_v47, %v10053_v33  ;;  %v507_v45 = vadd.f32 %v6005_v47, %v10058_v3 }
 0x543   : > { %v442_v59 = vadd.f32 %v6006_v25, %v10044_v62  ;;  %v505_v51 = vadd.f32 %v6005_v47, %v10051_v24  ;;  %v453_v32 = vmax.f32 %v445_v49, 0.0  ;;  %v504_v24 = vadd.f32 %v6005_v47, %v10056_v8  ;;  %v10062_v49 = vld [vmem:[#allocation24_spill] sm:$0xff] }
 0x544   : > { %v508_v62 = vmax.f32 %v500_v16, 0.0  ;;  %v452_v16 = vmax.f32 %v444_v15, 0.0  ;;  %v10064_v15 = vld [vmem:[#allocation26_spill] sm:$0xff] }
 0x545   : > { %v4301_v13 = vpop.permute.xlu0 %4300  ;;  %v513_v18 = vmax.f32 %v505_v51, 0.0  ;;  %v10063_v51 = vld [vmem:[#allocation25_spill] sm:$0xff] }
 0x546   : > { %v4329_v36 = vadd.f32 %v8053_v31, %v4301_v13  ;;  %v446_v13 = vadd.f32 %v6006_v25, %v10046_v19  ;;  %v450_v19 = vmax.f32 %v442_v59, 0.0  ;;  %v10059_v59 = vld [vmem:[#allocation23_spill] sm:$0xff] }
 0x547   : > { %v8056_v38 = vpop.permute.xlu1 %3086 }
 0x548   : > { %10041 = vst [vmem:[#allocation277_spill] sm:$0xff] %v8056_v38  ;;  %v4337_v0 = vmax.f32 %v4329_v36, 0.0  ;;  %v447_v38 = vadd.f32 %v6006_v25, %v10047_v6  ;;  %v10048_v36 = vld [vmem:[#allocation12_spill] sm:$0xff]  ;;  %v454_v61 = vmax.f32 %v446_v13, 0.0 }
 0x549   : > { %v8058_v10 = vpop.permute.xlu2 %3148  ;;  %3338 = vperm.xlu1 %5814, %v8031_v57  }
 0x54a   : > { %10042 = vst [vmem:[#allocation278_spill] sm:$0xff] %v8058_v10  ;;  %v8065_v53 = vsub.f32 %v4287_v11, %v4337_v0  ;;  %5815 = vset.pattern.permute.xlu2 %v10045_v54  ;;  %v503_v10 = vadd.f32 %v6005_v47, %v10048_v36  ;;  %v6007_v11 = vld [vmem:[%s6421_s12 + $0x2] ss:$0 sm:$0xff]  ;;  %v10052_v0 = vld [vmem:[#allocation17_spill] sm:$0xff]  ;;  %v455_v6 = vmax.f32 %v447_v38, 0.0 }
 0x54b   : > { %3368 = vperm.xlu2 %5815, %v7971_v22   ;;  %v558_v21 = vadd.f32 %v6007_v11, %v10052_v0  ;;  %v561_v36 = vadd.f32 %v6007_v11, %v10054_v4  ;;  %v563_v46 = vadd.f32 %v6007_v11, %v10057_v20  ;;  %v6008_v0 = vld [vmem:[%s6421_s12 + $0x3] ss:$0 sm:$0xff]  ;;  %v10061_v4 = vld [vmem:[#allocation16_spill] sm:$0xff]  ;;  %v560_v23 = vadd.f32 %v6007_v11, %v10062_v49 }
 0x54c   : > { %v511_v34 = vmax.f32 %v503_v10, 0.0  ;;  %v616_v13 = vadd.f32 %v6008_v0, %v10059_v59  ;;  %v449_v33 = vadd.f32 %v6006_v25, %v10061_v4  ;;  %v516_v10 = vadd.f32 %v508_v62, %v450_v19  ;;  %v10066_v4 = vld [vmem:[#allocation28_spill] sm:$0xff] }
 0x54d   : > { %v8075_v55 = vpop.permute.xlu0 %4320  ;;  %v510_v20 = vmax.f32 %v502_v40, 0.0  ;;  %v569_v8 = vmax.f32 %v561_v36, 0.0  ;;  %v619_v3 = vadd.f32 %v6008_v0, %v10063_v51  ;;  %v562_v47 = vadd.f32 %v6007_v11, %v10064_v15  ;;  %v6009_v36 = vld [vmem:[%s6421_s12 + $0x4] ss:$0 sm:$0xff] }
 0x54e   : > { %v519_v59 = vadd.f32 %v511_v34, %v453_v32  ;;  %v621_v25 = vadd.f32 %v6008_v0, %v10065_v42  ;;  %v515_v62 = vmax.f32 %v507_v45, 0.0  ;;  %v624_v19 = vmax.f32 %v616_v13, 0.0  ;;  %v10070_v13 = vld [vmem:[#allocation31_spill] sm:$0xff] }
 0x54f   : > { %v8081_v41 = vpop.permute.xlu1 %3094  ;;  %v565_v49 = vadd.f32 %v6007_v11, %v10066_v4  ;;  %v457_v7 = vmax.f32 %v449_v33, 0.0  ;;  %v568_v37 = vmax.f32 %v560_v23, 0.0  ;;  %v674_v51 = vadd.f32 %v6009_v36, %v10067_v29  ;;  %v10071_v4 = vld [vmem:[#allocation32_spill] sm:$0xff] }
 0x550   : > { %10055 = vst [vmem:[#allocation10_spill] sm:$0xff] %v8081_v41  ;;  %v566_v41 = vmax.f32 %v558_v21, 0.0  ;;  %v521_v21 = vadd.f32 %v513_v18, %v455_v6  ;;  %v518_v15 = vadd.f32 %v510_v20, %v452_v16  ;;  %v577_v63 = vadd.f32 %v569_v8, %v519_v59  ;;  %v10069_v6 = vld [vmem:[#allocation30_spill] sm:$0xff]  ;;  %v10072_v20 = vld [vmem:[#allocation33_spill] sm:$0xff] }
 0x551   : > { %v8088_v38 = vpop.permute.xlu2 %3156  ;;  %5817 = vset.pattern.permute.xlu1 %v10045_v54  ;;  %v571_v54 = vmax.f32 %v563_v46, 0.0  ;;  %v627_v34 = vmax.f32 %v619_v3, 0.0  ;;  %v570_v32 = vmax.f32 %v562_v47, 0.0  ;;  %v629_v45 = vmax.f32 %v621_v25, 0.0  ;;  %v10074_v47 = vld [vmem:[#allocation34_spill] sm:$0xff] }
 0x552   : > { %10060 = vst [vmem:[#allocation13_spill] sm:$0xff] %v8088_v38  ;;  %3376 = vperm.xlu1 %5817, %v8006_v27   ;;  %v512_v38 = vmax.f32 %v504_v24, 0.0  ;;  %v574_v40 = vadd.f32 %v566_v41, %v516_v10  ;;  %v618_v11 = vadd.f32 %v6008_v0, %v10069_v6  ;;  %v523_v24 = vadd.f32 %v515_v62, %v457_v7  ;;  %v10075_v7 = vld [vmem:[#allocation35_spill] sm:$0xff]  ;;  %v10076_v62 = vld [vmem:[#allocation36_spill] sm:$0xff]  ;;  %v10078_v6 = vld [vmem:[#allocation38_spill] sm:$0xff] }
 0x553   : > { %3380 = vperm.xlu2 %5815, %v8011_v56   ;;  %v579_v18 = vadd.f32 %v571_v54, %v521_v21  ;;  %v573_v23 = vmax.f32 %v565_v49, 0.0  ;;  %v677_v33 = vadd.f32 %v6009_v36, %v10070_v13  ;;  %v576_v29 = vadd.f32 %v568_v37, %v518_v15  ;;  %v6010_v54 = vld [vmem:[%s6421_s12 + $0x5] ss:$0 sm:$0xff]  ;;  %v10077_v49 = vld [vmem:[#allocation37_spill] sm:$0xff] }
 0x554   : > { %v520_v42 = vadd.f32 %v512_v38, %v454_v61  ;;  %v632_v41 = vadd.f32 %v624_v19, %v574_v40  ;;  %v682_v10 = vmax.f32 %v674_v51, 0.0  ;;  %v620_v16 = vadd.f32 %v6008_v0, %v10071_v4  ;;  %v10080_v4 = vld [vmem:[#allocation40_spill] sm:$0xff] }
 0x555   : > { %v679_v8 = vadd.f32 %v6009_v36, %v10072_v20  ;;  %v635_v61 = vadd.f32 %v627_v34, %v577_v63  ;;  %v623_v59 = vadd.f32 %v6008_v0, %v10074_v47  ;;  %v732_v25 = vadd.f32 %v6010_v54, %v10075_v7  ;;  %v10079_v63 = vld [vmem:[#allocation39_spill] sm:$0xff] }
 0x556   : > { %v8101_v43 = vpop.permute.xlu0 %4358  ;;  %v578_v38 = vadd.f32 %v570_v32, %v520_v42  ;;  %v637_v37 = vadd.f32 %v629_v45, %v579_v18  ;;  %v626_v21 = vmax.f32 %v618_v11, 0.0  ;;  %v676_v19 = vadd.f32 %v6009_v36, %v10076_v62  ;;  %v6011_v45 = vld [vmem:[%s6421_s12 + $0x6] ss:$0 sm:$0xff]  ;;  %v10081_v11 = vld [vmem:[#allocation41_spill] sm:$0xff] }
 0x557   : > { %v8103_v46 = vpop.permute.xlu1 %3106  ;;  %v735_v40 = vadd.f32 %v6010_v54, %v10077_v49  ;;  %v581_v51 = vadd.f32 %v573_v23, %v523_v24  ;;  %v685_v15 = vmax.f32 %v677_v33, 0.0  ;;  %v678_v13 = vadd.f32 %v6009_v36, %v10078_v6  ;;  %v10083_v6 = vld [vmem:[#allocation43_spill] sm:$0xff] }
 0x558   : > { %10068 = vst [vmem:[#allocation8_spill] sm:$0xff] %v8103_v46  ;;  %v737_v34 = vadd.f32 %v6010_v54, %v10079_v63  ;;  %v690_v32 = vadd.f32 %v682_v10, %v632_v41  ;;  %v628_v0 = vmax.f32 %v620_v16, 0.0  ;;  %v687_v42 = vmax.f32 %v679_v8, 0.0  ;;  %v10082_v46 = vld [vmem:[#allocation42_spill] sm:$0xff] }
 0x559   : > { %v681_v20 = vadd.f32 %v6009_v36, %v10080_v4  ;;  %v631_v7 = vmax.f32 %v623_v59, 0.0  ;;  %v740_v18 = vmax.f32 %v732_v25, 0.0  ;;  %v790_v62 = vadd.f32 %v6011_v45, %v10081_v11  ;;  %v10085_v36 = vld [vmem:[#allocation44_spill] sm:$0xff] }
 0x55a   : > { %v8109_v3 = vpop.permute.xlu2 %3194  ;;  %3384 = vperm.xlu1 %5817, %v8019_v5   ;;  %v734_v49 = vadd.f32 %v6010_v54, %v10082_v46  ;;  %v634_v24 = vadd.f32 %v626_v21, %v576_v29  ;;  %v684_v23 = vmax.f32 %v676_v19, 0.0  ;;  %v743_v33 = vmax.f32 %v735_v40, 0.0 }
 0x55b   : > { %10073 = vst [vmem:[#allocation9_spill] sm:$0xff] %v8109_v3  ;;  %3388 = vperm.xlu2 %5815, %v8023_v12   ;;  %v793_v3 = vadd.f32 %v6011_v45, %v10083_v6  ;;  %v693_v41 = vadd.f32 %v685_v15, %v635_v61  ;;  %v686_v10 = vmax.f32 %v678_v13, 0.0  ;;  %v745_v16 = vmax.f32 %v737_v34, 0.0  ;;  %v10089_v34 = vld [vmem:[#allocation46_spill] sm:$0xff] }
 0x55c   : > { %v736_v8 = vadd.f32 %v6010_v54, %v10085_v36  ;;  %v636_v4 = vadd.f32 %v628_v0, %v578_v38  ;;  %v695_v59 = vadd.f32 %v687_v42, %v637_v37  ;;  %v689_v25 = vmax.f32 %v681_v20, 0.0  ;;  %v6012_v42 = vld [vmem:[%s6421_s12 + $0x7] ss:$0 sm:$0xff] }
 0x55d   : > { %v795_v58 = vadd.f32 %v6011_v45, %v10086_v28  ;;  %v639_v46 = vadd.f32 %v631_v7, %v581_v51  ;;  %v748_v29 = vadd.f32 %v740_v18, %v690_v32  ;;  %v798_v21 = vmax.f32 %v790_v62, 0.0  ;;  %v10090_v20 = vld [vmem:[#allocation47_spill] sm:$0xff]  ;;  %v10091_v7 = vld [vmem:[#allocation48_spill] sm:$0xff]  ;;  %v10092_v62 = vld [vmem:[#allocation49_spill] sm:$0xff] }
 0x55e   : > { %v8121_v47 = vpop.permute.xlu0 %4378  ;;  %v742_v19 = vmax.f32 %v734_v49, 0.0  ;;  %v10088_v40 = vmov 52   ;;  %v692_v61 = vadd.f32 %v684_v23, %v634_v24  ;;  %v751_v15 = vadd.f32 %v743_v33, %v693_v41 }
 0x55f   : > { %v801_v13 = vmax.f32 %v793_v3, 0.0  ;;  %v739_v38 = vadd.f32 %v6010_v54, %v10089_v34  ;;  %v694_v37 = vadd.f32 %v686_v10, %v636_v4  ;;  %v753_v28 = vadd.f32 %v745_v16, %v695_v59  ;;  %v10093_v3 = vld [vmem:[#allocation50_spill] sm:$0xff]  ;;  %v10094_v54 = vld [vmem:[#allocation51_spill] sm:$0xff]  ;;  %v10096_v34 = vld [vmem:[#allocation53_spill] sm:$0xff] }
 0x560   : > { %v8127_v63 = vpop.permute.xlu1 %3144  ;;  %v744_v0 = vmax.f32 %v736_v8, 0.0  ;;  %v848_v6 = vadd.f32 %v6012_v42, %v10090_v20  ;;  %v697_v51 = vadd.f32 %v689_v25, %v639_v46  ;;  %v803_v32 = vmax.f32 %v795_v58, 0.0  ;;  %v10095_v8 = vld [vmem:[#allocation52_spill] sm:$0xff] }
 0x561   : > { %10084 = vst [vmem:[#allocation12_spill] sm:$0xff] %v8127_v63  ;;  %v792_v18 = vadd.f32 %v6011_v45, %v10091_v7  ;;  %v851_v49 = vadd.f32 %v6012_v42, %v10092_v62  ;;  %v806_v24 = vadd.f32 %v798_v21, %v748_v29  ;;  %v750_v23 = vadd.f32 %v742_v19, %v692_v61  ;;  %v6013_v59 = vld [vmem:[%s6421_s12 + $0x8] ss:$0 sm:$0xff]  ;;  %v10098_v7 = vld [vmem:[#allocation54_spill] sm:$0xff] }
 0x562   : > { %v8131_v11 = vpop.permute.xlu2 %3206  ;;  %3396 = vperm.xlu1 %5817, %v8031_v57   ;;  %v794_v33 = vadd.f32 %v6011_v45, %v10093_v3  ;;  %v853_v41 = vadd.f32 %v6012_v42, %v10094_v54  ;;  %v809_v10 = vadd.f32 %v801_v13, %v751_v15  ;;  %v747_v16 = vmax.f32 %v739_v38, 0.0  ;;  %v10099_v21 = vld [vmem:[#allocation55_spill] sm:$0xff]  ;;  %v10100_v54 = vld [vmem:[#allocation56_spill] sm:$0xff] }
 0x563   : > { %10087 = vst [vmem:[#allocation14_spill] sm:$0xff] %v8131_v11  ;;  %5818 = vset.pattern.permute.xlu2 %v10088_v40  ;;  %v797_v4 = vadd.f32 %v6011_v45, %v10095_v8  ;;  %v906_v25 = vadd.f32 %v6013_v59, %v10096_v34  ;;  %v752_v46 = vadd.f32 %v744_v0, %v694_v37  ;;  %v856_v20 = vmax.f32 %v848_v6, 0.0  ;;  %v10102_v8 = vld [vmem:[#allocation57_spill] sm:$0xff]  ;;  %v10103_v37 = vld [vmem:[#allocation58_spill] sm:$0xff] }
 0x564   : > { %3426 = vperm.xlu2 %5818, %v7971_v22   ;;  %v850_v29 = vadd.f32 %v6012_v42, %v10098_v7  ;;  %v909_v19 = vadd.f32 %v6013_v59, %v10099_v21  ;;  %v811_v61 = vadd.f32 %v803_v32, %v753_v28  ;;  %v800_v62 = vmax.f32 %v792_v18, 0.0  ;;  %v6014_v28 = vld [vmem:[%s6421_s12 + $0x9] ss:$0 sm:$0xff]  ;;  %v10106_v11 = vld [vmem:[#allocation61_spill] sm:$0xff] }
 0x565   : > { %v859_v3 = vmax.f32 %v851_v49, 0.0  ;;  %v852_v15 = vadd.f32 %v6012_v42, %v10100_v54  ;;  %v802_v45 = vmax.f32 %v794_v33, 0.0  ;;  %v861_v38 = vmax.f32 %v853_v41, 0.0  ;;  %v10104_v32 = vld [vmem:[#allocation59_spill] sm:$0xff] }
 0x566   : > { %v911_v34 = vadd.f32 %v6013_v59, %v10102_v8  ;;  %v855_v0 = vadd.f32 %v6012_v42, %v10103_v37  ;;  %v755_v6 = vadd.f32 %v747_v16, %v697_v51  ;;  %v805_v7 = vmax.f32 %v797_v4, 0.0 }
 0x567   : > { %v8143_v36 = vpop.permute.xlu0 %4416  ;;  %v914_v21 = vmax.f32 %v906_v25, 0.0  ;;  %v964_v18 = vadd.f32 %v6014_v28, %v10104_v32  ;;  %v864_v49 = vadd.f32 %v856_v20, %v806_v24  ;;  %v858_v54 = vmax.f32 %v850_v29, 0.0  ;;  %v10107_v24 = vld [vmem:[#allocation62_spill] sm:$0xff] }
 0x568   : > { %v8148_v58 = vpop.permute.xlu1 %3152  ;;  %v808_v41 = vadd.f32 %v800_v62, %v750_v23  ;;  %v867_v63 = vadd.f32 %v859_v3, %v809_v10  ;;  %v860_v8 = vmax.f32 %v852_v15, 0.0  ;;  %v967_v42 = vadd.f32 %v6014_v28, %v10106_v11  ;;  %v10109_v62 = vld [vmem:[#allocation63_spill] sm:$0xff] }
 0x569   : > { %10097 = vst [vmem:[#allocation11_spill] sm:$0xff] %v8148_v58  ;;  %v917_v58 = vmax.f32 %v909_v19, 0.0  ;;  %v810_v37 = vadd.f32 %v802_v45, %v752_v46  ;;  %v919_v51 = vmax.f32 %v911_v34, 0.0  ;;  %v863_v16 = vmax.f32 %v855_v0, 0.0  ;;  %v6015_v45 = vld [vmem:[%s6421_s12 + $0xa] ss:$0 sm:$0xff] }
 0x56a   : > { %v8153_v13 = vpop.permute.xlu2 %3214  ;;  %5820 = vset.pattern.permute.xlu1 %v10088_v40  ;;  %v10105_v40 = vld [vmem:[#allocation60_spill] sm:$0xff]  ;;  %v813_v25 = vadd.f32 %v805_v7, %v755_v6  ;;  %v922_v32 = vadd.f32 %v914_v21, %v864_v49  ;;  %v972_v39 = vmax.f32 %v964_v18, 0.0  ;;  %v910_v20 = vadd.f32 %v6013_v59, %v10107_v24  ;;  %v10112_v7 = vld [vmem:[#allocation66_spill] sm:$0xff]  ;;  %v10113_v18 = vld [vmem:[#allocation67_spill] sm:$0xff] }
 0x56b   : > { %10101 = vst [vmem:[#allocation15_spill] sm:$0xff] %v8153_v13  ;;  %3434 = vperm.xlu1 %5820, %v8006_v27   ;;  %v908_v33 = vadd.f32 %v6013_v59, %v10105_v40  ;;  %v869_v13 = vadd.f32 %v861_v38, %v811_v61  ;;  %v866_v19 = vadd.f32 %v858_v54, %v808_v41  ;;  %v975_v46 = vmax.f32 %v967_v42, 0.0  ;;  %v10110_v61 = vld [vmem:[#allocation64_spill] sm:$0xff]  ;;  %v10111_v38 = vld [vmem:[#allocation65_spill] sm:$0xff] }
 0x56c   : > { %3438 = vperm.xlu2 %5818, %v8011_v56   ;;  %v925_v23 = vadd.f32 %v917_v58, %v867_v63  ;;  %v969_v3 = vadd.f32 %v6014_v28, %v10109_v62  ;;  %v868_v11 = vadd.f32 %v860_v8, %v810_v37  ;;  %v913_v15 = vadd.f32 %v6013_v59, %v10110_v61  ;;  %v10115_v54 = vld [vmem:[#allocation68_spill] sm:$0xff]  ;;  %v10116_v41 = vld [vmem:[#allocation69_spill] sm:$0xff] }
 0x56d   : > { %v916_v10 = vmax.f32 %v908_v33, 0.0  ;;  %v1022_v34 = vadd.f32 %v6015_v45, %v10111_v38  ;;  %v927_v0 = vadd.f32 %v919_v51, %v869_v13  ;;  %v871_v6 = vadd.f32 %v863_v16, %v813_v25  ;;  %v10117_v13 = vld [vmem:[#allocation70_spill] sm:$0xff]  ;;  %v6016_v51 = vld [vmem:[%s6421_s12 + $0xb] ss:$0 sm:$0xff] }
 0x56e   : > { %v966_v21 = vadd.f32 %v6014_v28, %v10112_v7  ;;  %v1025_v49 = vadd.f32 %v6015_v45, %v10113_v18  ;;  %v980_v63 = vadd.f32 %v972_v39, %v922_v32  ;;  %v918_v58 = vmax.f32 %v910_v20, 0.0  ;;  %v10118_v16 = vld [vmem:[#allocation71_spill] sm:$0xff]  ;;  %v10119_v38 = vld [vmem:[#allocation72_spill] sm:$0xff]  ;;  %v10120_v20 = vld [vmem:[#allocation73_spill] sm:$0xff] }
 0x56f   : > { %v8164_v4 = vpop.permute.xlu0 %4436  ;;  %v968_v33 = vadd.f32 %v6014_v28, %v10115_v54  ;;  %v1027_v59 = vadd.f32 %v6015_v45, %v10116_v41  ;;  %v924_v8 = vadd.f32 %v916_v10, %v866_v19  ;;  %v977_v42 = vmax.f32 %v969_v3, 0.0  ;;  %v10121_v54 = vld [vmem:[#allocation74_spill] sm:$0xff]  ;;  %v10122_v3 = vld [vmem:[#allocation75_spill] sm:$0xff] }
 0x570   : > { %v8167_v29 = vpop.permute.xlu1 %3164  ;;  %v971_v37 = vadd.f32 %v6014_v28, %v10117_v13  ;;  %v1080_v25 = vadd.f32 %v6016_v51, %v10118_v16  ;;  %v983_v24 = vadd.f32 %v975_v46, %v925_v23  ;;  %v921_v62 = vmax.f32 %v913_v15, 0.0  ;;  %v10123_v46 = vld [vmem:[#allocation76_spill] sm:$0xff] }
 0x571   : > { %10108 = vst [vmem:[#allocation17_spill] sm:$0xff] %v8167_v29  ;;  %v1030_v61 = vmax.f32 %v1022_v34, 0.0  ;;  %v1024_v7 = vadd.f32 %v6015_v45, %v10119_v38  ;;  %v974_v39 = vmax.f32 %v966_v21, 0.0  ;;  %v1033_v32 = vmax.f32 %v1025_v49, 0.0 }
 0x572   : > { %v1083_v18 = vadd.f32 %v6016_v51, %v10120_v20  ;;  %v1026_v41 = vadd.f32 %v6015_v45, %v10121_v54  ;;  %v926_v29 = vadd.f32 %v918_v58, %v868_v11  ;;  %v976_v19 = vmax.f32 %v968_v33, 0.0  ;;  %v6017_v20 = vld [vmem:[%s6421_s12 + $0xc] ss:$0 sm:$0xff] }
 0x573   : > { %v8175_v40 = vpop.permute.xlu2 %3252  ;;  %3442 = vperm.xlu1 %5820, %v8019_v5   ;;  %v1035_v10 = vmax.f32 %v1027_v59, 0.0  ;;  %v1085_v28 = vadd.f32 %v6016_v51, %v10122_v3  ;;  %v979_v16 = vmax.f32 %v971_v37, 0.0  ;;  %v1088_v23 = vmax.f32 %v1080_v25, 0.0  ;;  %v10127_v37 = vld [vmem:[#allocation78_spill] sm:$0xff] }
 0x574   : > { %10114 = vst [vmem:[#allocation18_spill] sm:$0xff] %v8175_v40  ;;  %3446 = vperm.xlu2 %5818, %v8023_v12   ;;  %v985_v40 = vadd.f32 %v977_v42, %v927_v0  ;;  %v1029_v15 = vadd.f32 %v6015_v45, %v10123_v46  ;;  %v929_v21 = vadd.f32 %v921_v62, %v871_v6  ;;  %v1032_v38 = vmax.f32 %v1024_v7, 0.0  ;;  %v5946_v6 = vld [vmem:[%s6421_s12 + $0x44] ss:$0 sm:$0xff] }
 0x575   : > { %v1038_v49 = vadd.f32 %v1030_v61, %v980_v63  ;;  %v1138_v54 = vadd.f32 %v6017_v20, %v10125_v1  ;;  %v982_v11 = vadd.f32 %v974_v39, %v924_v8  ;;  %v1041_v58 = vadd.f32 %v1033_v32, %v983_v24  ;;  %v10129_v24 = vld [vmem:[#allocation79_spill] sm:$0xff]  ;;  %v10130_v32 = vld [vmem:[#allocation80_spill] sm:$0xff] }
 0x576   : > { %v1091_v33 = vmax.f32 %v1083_v18, 0.0  ;;  %v1034_v59 = vmax.f32 %v1026_v41, 0.0  ;;  %v984_v0 = vadd.f32 %v976_v19, %v926_v29  ;;  %v1043_v45 = vadd.f32 %v1035_v10, %v985_v40  ;;  %v10131_v40 = vld [vmem:[#allocation81_spill] sm:$0xff]  ;;  %v5947_v41 = vld [vmem:[%s6421_s12 + $0x45] ss:$0 sm:$0xff] }
 0x577   : > { %v1093_v42 = vmax.f32 %v1085_v28, 0.0  ;;  %v1082_v25 = vadd.f32 %v6016_v51, %v10127_v37  ;;  %v10128_v63 = vmov 53   ;;  %v987_v62 = vadd.f32 %v979_v16, %v929_v21  ;;  %v10132_v28 = vld [vmem:[#allocation82_spill] sm:$0xff]  ;;  %v8206_v37 = vld [vmem:[%s6421_s12 + $0xd] ss:$0 sm:$0xff] }
 0x578   : > { %v4475_v13 = vpop.permute.xlu0 %4474  ;;  %v1096_v1 = vadd.f32 %v1088_v23, %v1038_v49  ;;  %v1037_v8 = vmax.f32 %v1029_v15, 0.0  ;;  %v1141_v61 = vadd.f32 %v6017_v20, %v10129_v24  ;;  %v1040_v7 = vadd.f32 %v1032_v38, %v982_v11  ;;  %v10133_v16 = vld [vmem:[#allocation83_spill] sm:$0xff]  ;;  %v10134_v49 = vld [vmem:[#allocation84_spill] sm:$0xff] }
 0x579   : > { %v8189_v34 = vpop.permute.xlu1 %3202  ;;  %v1146_v39 = vmax.f32 %v1138_v54, 0.0  ;;  %v1084_v29 = vadd.f32 %v6016_v51, %v10130_v32  ;;  %v1143_v18 = vadd.f32 %v6017_v20, %v10131_v40  ;;  %v1099_v19 = vadd.f32 %v1091_v33, %v1041_v58  ;;  %v5948_v54 = vld [vmem:[%s6421_s12 + $0x46] ss:$0 sm:$0xff] }
 0x57a   : > { %10124 = vst [vmem:[#allocation19_spill] sm:$0xff] %v8189_v34  ;;  %v1042_v10 = vadd.f32 %v1034_v59, %v984_v0  ;;  %v1087_v46 = vadd.f32 %v6016_v51, %v10132_v28  ;;  %v1196_v23 = vadd.f32 %v8206_v37, %v10133_v16  ;;  %v1101_v15 = vadd.f32 %v1093_v42, %v1043_v45  ;;  %v10135_v34 = vld [vmem:[#allocation85_spill] sm:$0xff]  ;;  %v10136_v33 = vld [vmem:[#allocation86_spill] sm:$0xff] }
 0x57b   : > { %v8193_v3 = vpop.permute.xlu2 %3264  ;;  %3454 = vperm.xlu1 %5820, %v8031_v57   ;;  %v1090_v21 = vmax.f32 %v1082_v25, 0.0  ;;  %v1140_v24 = vadd.f32 %v6017_v20, %v10134_v49  ;;  %v4387_v38 = vadd.f32 %v5946_v6, %v8101_v43  ;;  %v1045_v32 = vadd.f32 %v1037_v8, %v987_v62  ;;  %v10138_v43 = vld [vmem:[#allocation87_spill] sm:$0xff]  ;;  %v10139_v62 = vld [vmem:[#allocation88_spill] sm:$0xff] }
 0x57c   : > { %10126 = vst [vmem:[#allocation20_spill] sm:$0xff] %v8193_v3  ;;  %5821 = vset.pattern.permute.xlu2 %v10128_v63  ;;  %v1149_v40 = vmax.f32 %v1141_v61, 0.0  ;;  %v1199_v58 = vadd.f32 %v8206_v37, %v10135_v34  ;;  %v1142_v51 = vadd.f32 %v6017_v20, %v10136_v33  ;;  %v1154_v0 = vadd.f32 %v1146_v39, %v1096_v1 }
 0x57d   : > { %3484 = vperm.xlu2 %5821, %v7971_v22   ;;  %v1092_v28 = vmax.f32 %v1084_v29, 0.0  ;;  %v1151_v16 = vmax.f32 %v1143_v18, 0.0  ;;  %v4445_v45 = vadd.f32 %v5947_v41, %v8143_v36  ;;  %v1095_v42 = vmax.f32 %v1087_v46, 0.0  ;;  %v8227_v46 = vld [vmem:[%s6421_s12 + $0xe] ss:$0 sm:$0xff] }
 0x57e   : > { %v1204_v25 = vmax.f32 %v1196_v23, 0.0  ;;  %v1201_v49 = vadd.f32 %v8206_v37, %v10138_v43  ;;  %v1145_v8 = vadd.f32 %v6017_v20, %v10139_v62  ;;  %v1098_v34 = vadd.f32 %v1090_v21, %v1040_v7  ;;  %v10141_v23 = vld [vmem:[#allocation89_spill] sm:$0xff]  ;;  %v5949_v21 = vld [vmem:[%s6421_s12 + $0x47] ss:$0 sm:$0xff] }
 0x57f   : > { %v1148_v33 = vmax.f32 %v1140_v24, 0.0  ;;  %v4395_v1 = vmax.f32 %v4387_v38, 0.0  ;;  %v4503_v39 = vadd.f32 %v5948_v54, %v4475_v13  ;;  %v1157_v29 = vadd.f32 %v1149_v40, %v1099_v19 }
 0x580   : > { %v4495_v11 = vpop.permute.xlu0 %4494  ;;  %v1207_v36 = vmax.f32 %v1199_v58, 0.0  ;;  %v1150_v18 = vmax.f32 %v1142_v51, 0.0  ;;  %v1254_v43 = vadd.f32 %v8227_v46, %v10141_v23  ;;  %v1100_v20 = vadd.f32 %v1092_v28, %v1042_v10  ;;  %v10142_v10 = vld [vmem:[#allocation90_spill] sm:$0xff] }
 0x581   : > { %v8216_v59 = vpop.permute.xlu1 %3210  ;;  %v4334_v7 = vadd.f32 %v8053_v31, %v8075_v55  ;;  %v4453_v13 = vmax.f32 %v4445_v45, 0.0  ;;  %v1103_v24 = vadd.f32 %v1095_v42, %v1045_v32  ;;  %v1212_v19 = vadd.f32 %v1204_v25, %v1154_v0  ;;  %v10144_v42 = vld [vmem:[#allocation91_spill] sm:$0xff] }
 0x582   : > { %10137 = vst [vmem:[#allocation21_spill] sm:$0xff] %v8216_v59  ;;  %v1209_v38 = vmax.f32 %v1201_v49, 0.0  ;;  %v1153_v40 = vmax.f32 %v1145_v8, 0.0  ;;  %v1156_v58 = vadd.f32 %v1148_v33, %v1098_v34  ;;  %v4403_v51 = vsub.f32 %v8065_v53, %v4395_v1 }
 0x583   : > { %v8222_v61 = vpop.permute.xlu2 %3272  ;;  %5823 = vset.pattern.permute.xlu1 %v10128_v63  ;;  %v1159_v63 = vadd.f32 %v1151_v16, %v1101_v15  ;;  %v4392_v62 = vadd.f32 %v5946_v6, %v8121_v47  ;;  %v4511_v23 = vmax.f32 %v4503_v39, 0.0  ;;  %v1215_v59 = vadd.f32 %v1207_v36, %v1157_v29  ;;  %v10145_v6 = vld [vmem:[#allocation93_spill] sm:$0xff]  ;;  %v10147_v29 = vld [vmem:[#allocation95_spill] sm:$0xff] }
 0x584   : > { %10140 = vst [vmem:[#allocation22_spill] sm:$0xff] %v8222_v61  ;;  %3492 = vperm.xlu1 %5823, %v8006_v27   ;;  %v1158_v3 = vadd.f32 %v1150_v18, %v1100_v20  ;;  %v1262_v61 = vmax.f32 %v1254_v43, 0.0  ;;  %v1198_v15 = vadd.f32 %v8206_v37, %v10142_v10  ;;  %v4342_v31 = vmax.f32 %v4334_v7, 0.0 }
 0x585   : > { %3496 = vperm.xlu2 %5821, %v8011_v56   ;;  %v4461_v32 = vsub.f32 %v4403_v51, %v4453_v13  ;;  %v4450_v0 = vadd.f32 %v5947_v41, %v8164_v4  ;;  %v1217_v45 = vadd.f32 %v1209_v38, %v1159_v63  ;;  %v1161_v53 = vadd.f32 %v1153_v40, %v1103_v24  ;;  %v10146_v4 = vld [vmem:[#allocation94_spill] sm:$0xff]  ;;  %v6020_v13 = vld [vmem:[%s6421_s12 + $0xf] ss:$0 sm:$0xff] }
 0x586   : > { %v1257_v47 = vadd.f32 %v8227_v46, %v10144_v42  ;;  %v1200_v25 = vadd.f32 %v8206_v37, %v10145_v6  ;;  %v4400_v49 = vmax.f32 %v4392_v62, 0.0  ;;  %v4508_v34 = vadd.f32 %v5948_v54, %v4495_v11  ;;  %v10149_v24 = vld [vmem:[#allocation96_spill] sm:$0xff]  ;;  %v10150_v40 = vld [vmem:[#allocation98_spill] sm:$0xff]  ;;  %v10151_v62 = vld [vmem:[#allocation99_spill] sm:$0xff] }
 0x587   : > { %v4519_v8 = vsub.f32 %v4461_v32, %v4511_v23  ;;  %v1206_v39 = vmax.f32 %v1198_v15, 0.0  ;;  %v1259_v41 = vadd.f32 %v8227_v46, %v10146_v4  ;;  %v1203_v36 = vadd.f32 %v8206_v37, %v10147_v29 }
 0x588   : > { %v8256_v18 = vstv %s8232_s13  ;;  %v1270_v43 = vadd.f32 %v1262_v61, %v1212_v19  ;;  %v4350_v20 = vsub.f32 %v8046_v50, %v4342_v31  ;;  %v4458_v54 = vmax.f32 %v4450_v0, 0.0  ;;  %v10153_v0 = vld [vmem:[#allocation101_spill] sm:$0xff] }
 0x589   : > { %v4533_v28 = vpop.permute.xlu0 %4532  ;;  %v8241_v55 = vpop.permute.xlu1 %3222  ;;  %10148 = vst [vmem:[#allocation16_spill] sm:$0xff] %v8256_v18  ;;  %v1265_v63 = vmax.f32 %v1257_v47, 0.0  ;;  %v1208_v7 = vmax.f32 %v1200_v25, 0.0  ;;  %v1312_v38 = vadd.f32 %v6020_v13, %v10149_v24  ;;  %v1256_v51 = vadd.f32 %v8227_v46, %v10150_v40  ;;  %v10156_v24 = vld [vmem:[#allocation104_spill] sm:$0xff] }
 0x58a   : > { %10143 = vst [vmem:[#allocation23_spill] sm:$0xff] %v8241_v55  ;;  %v4561_v16 = vadd.f32 %v5949_v21, %v4533_v28  ;;  %v1315_v23 = vadd.f32 %v6020_v13, %v10151_v62  ;;  %v4408_v37 = vsub.f32 %v4350_v20, %v4400_v49  ;;  %v4516_v10 = vmax.f32 %v4508_v34, 0.0  ;;  %v10152_v28 = vld [vmem:[#allocation100_spill] sm:$0xff] }
 0x58b   : > { %v1214_v61 = vadd.f32 %v1206_v39, %v1156_v58  ;;  %v1267_v19 = vmax.f32 %v1259_v41, 0.0  ;;  %v1211_v50 = vmax.f32 %v1203_v36, 0.0  ;;  %v1258_v31 = vadd.f32 %v8227_v46, %v10152_v28  ;;  %v10161_v28 = vld [vmem:[#allocation110_spill] sm:$0xff] }
 0x58c   : > { %v4569_v33 = vmax.f32 %v4561_v16, 0.0  ;;  %v8248_v1 = vpop.permute.xlu2 %3310  ;;  %3500 = vperm.xlu1 %5823, %v8019_v5   ;;  %v1317_v16 = vadd.f32 %v6020_v13, %v10153_v0  ;;  %v4466_v42 = vsub.f32 %v4408_v37, %v4458_v54  ;;  %v1273_v49 = vadd.f32 %v1265_v63, %v1215_v59  ;;  %v10155_v54 = vld [vmem:[#allocation102_spill] sm:$0xff]  ;;  %v10160_v37 = vld [vmem:[#allocation108_spill] sm:$0xff] }
 0x58d   : > { %3504 = vperm.xlu2 %5821, %v8023_v12   ;;  %v1320_v34 = vmax.f32 %v1312_v38, 0.0  ;;  %v1323_v58 = vmax.f32 %v1315_v23, 0.0  ;;  %v1275_v36 = vadd.f32 %v1267_v19, %v1217_v45  ;;  %v1266_v20 = vmax.f32 %v1258_v31, 0.0  ;;  %v10159_v45 = vld [vmem:[#allocation107_spill] sm:$0xff] }
 0x58e   : > { %v4577_v11 = vsub.f32 %v4519_v8, %v4569_v33  ;;  %v1216_v8 = vadd.f32 %v1208_v7, %v1158_v3  ;;  %v1264_v33 = vmax.f32 %v1256_v51, 0.0  ;;  %v4524_v39 = vsub.f32 %v4466_v42, %v4516_v10  ;;  %v10158_v51 = vld [vmem:[#allocation106_spill] sm:$0xff] }
 0x58f   : > { %v10157_v59 = vmov 54   ;;  %v1219_v3 = vadd.f32 %v1211_v50, %v1161_v53  ;;  %v1325_v63 = vmax.f32 %v1317_v16, 0.0  ;;  %v1328_v38 = vadd.f32 %v1320_v34, %v1270_v43  ;;  %v10162_v16 = vld [vmem:[#allocation111_spill] sm:$0xff]  ;;  %v6022_v43 = vld [vmem:[%s6421_s12 + $0x11] ss:$0 sm:$0xff]  ;;  %v10164_v34 = vld [vmem:[#allocation114_spill] sm:$0xff] }
 0x590   : > { %v8266_v15 = vadd.f32 %v8256_v18, %v4577_v11  ;;  %v1261_v11 = vadd.f32 %v8227_v46, %v10155_v54  ;;  %v1314_v62 = vadd.f32 %v6020_v13, %v10158_v51  ;;  %v1316_v10 = vadd.f32 %v6020_v13, %v10160_v37 }
 0x591   : > { %v4553_v32 = vpop.permute.xlu0 %4552  ;;  %v1272_v46 = vadd.f32 %v1264_v33, %v1214_v61  ;;  %v1331_v19 = vadd.f32 %v1323_v58, %v1273_v49  ;;  %v1274_v53 = vadd.f32 %v1266_v20, %v1216_v8  ;;  %v1319_v42 = vadd.f32 %v6020_v13, %v10162_v16  ;;  %v10168_v13 = vld [vmem:[#allocation119_spill] sm:$0xff] }
 0x592   : > { %v4603_v47 = vmin.f32 %v8266_v15, 20.0  ;;  %v4566_v6 = vadd.f32 %v5949_v21, %v4553_v32  ;;  %v8272_v25 = vpop.permute.xlu1 %3260  ;;  %v6021_v21 = vld [vmem:[%s6421_s12 + $0x10] ss:$0 sm:$0xff]  ;;  %v1269_v50 = vmax.f32 %v1261_v11, 0.0  ;;  %v1322_v49 = vmax.f32 %v1314_v62, 0.0 }
 0x593   : > { %10154 = vst [vmem:[#allocation24_spill] sm:$0xff] %v8272_v25  ;;  %v1370_v40 = vadd.f32 %v6021_v21, %v10156_v24  ;;  %v1373_v23 = vadd.f32 %v6021_v21, %v10159_v45  ;;  %v1375_v31 = vadd.f32 %v6021_v21, %v10161_v28  ;;  %v1324_v58 = vmax.f32 %v1316_v10, 0.0  ;;  %v10167_v11 = vld [vmem:[#allocation117_spill] sm:$0xff] }
 0x594   : > { %v4612_v4 = vmul.f32 1.442695, %v4603_v47  ;;  %v4574_v41 = vmax.f32 %v4566_v6, 0.0  ;;  %v8274_v29 = vpop.permute.xlu2 %3322  ;;  %3512 = vperm.xlu1 %5823, %v8031_v57   ;;  %v10163_v47 = vld [vmem:[#allocation113_spill] sm:$0xff]  ;;  %v1374_v24 = vadd.f32 %v6021_v21, %v10167_v11  ;;  %v1327_v45 = vmax.f32 %v1319_v42, 0.0 }
 0x595   : > { %5824 = vset.pattern.permute.xlu2 %v10157_v59  ;;  %v1378_v0 = vmax.f32 %v1370_v40, 0.0  ;;  %v1428_v6 = vadd.f32 %v6022_v43, %v10163_v47  ;;  %v1381_v33 = vmax.f32 %v1373_v23, 0.0  ;;  %v1383_v20 = vmax.f32 %v1375_v31, 0.0  ;;  %v6023_v42 = vld [vmem:[%s6421_s12 + $0x12] ss:$0 sm:$0xff] }
 0x596   : > { %5950 = vpow2.f32 %v4612_v4  ;;  %v4582_v7 = vsub.f32 %v4524_v39, %v4574_v41  ;;  %3542 = vperm.xlu2 %5824, %v7971_v22   ;;  %v1333_v22 = vadd.f32 %v1325_v63, %v1275_v36  ;;  %v1372_v39 = vadd.f32 %v6021_v21, %v10164_v34  ;;  %v10166_v41 = vld [vmem:[#allocation116_spill] sm:$0xff] }
 0x597   : > { %v1431_v54 = vadd.f32 %v6022_v43, %v10166_v41  ;;  %v1433_v36 = vadd.f32 %v6022_v43, %v10168_v13  ;;  %v1386_v51 = vadd.f32 %v1378_v0, %v1328_v38  ;;  %v1436_v62 = vmax.f32 %v1428_v6, 0.0 }
 0x598   : > { %v8288_v32 = vadd.f32 %v8256_v18, %v4582_v7  ;;  %v1277_v7 = vadd.f32 %v1269_v50, %v1219_v3  ;;  %v1380_v23 = vmax.f32 %v1372_v39, 0.0  ;;  %v1330_v28 = vadd.f32 %v1322_v49, %v1272_v46  ;;  %v10169_v50 = vld [vmem:[#allocation120_spill] sm:$0xff]  ;;  %v10171_v39 = vld [vmem:[#allocation123_spill] sm:$0xff]  ;;  %v8390_v18 = vld [vmem:[%s6404_s19 + $0x20] sm:$0xff] }
 0x599   : > { %v1389_v31 = vadd.f32 %v1381_v33, %v1331_v19  ;;  %v1439_v16 = vmax.f32 %v1431_v54, 0.0  ;;  %v1332_v47 = vadd.f32 %v1324_v58, %v1274_v53  ;;  %v1391_v34 = vadd.f32 %v1383_v20, %v1333_v22  ;;  %v10174_v22 = vld [vmem:[#allocation126_spill] sm:$0xff]  ;;  %v10175_v58 = vld [vmem:[#allocation128_spill] sm:$0xff] }
 0x59a   : > { %v4608_v4 = vmin.f32 %v8288_v32, 20.0  ;;  %v8295_v61 = vpop.permute.xlu1 %3268  ;;  %v1441_v3 = vmax.f32 %v1433_v36, 0.0  ;;  %v1335_v38 = vadd.f32 %v1327_v45, %v1277_v7  ;;  %v1377_v0 = vadd.f32 %v6021_v21, %v10169_v50  ;;  %v10176_v36 = vld [vmem:[#allocation129_spill] sm:$0xff]  ;;  %v10177_v45 = vld [vmem:[#allocation131_spill] sm:$0xff] }
 0x59b   : > { %10165 = vst [vmem:[#allocation25_spill] sm:$0xff] %v8295_v61  ;;  %v1444_v41 = vadd.f32 %v1436_v62, %v1386_v51  ;;  %v1388_v11 = vadd.f32 %v1380_v23, %v1330_v28  ;;  %v1447_v53 = vadd.f32 %v1439_v16, %v1389_v31  ;;  %v1432_v33 = vadd.f32 %v6022_v43, %v10174_v22  ;;  %v6024_v7 = vld [vmem:[%s6421_s12 + $0x13] ss:$0 sm:$0xff] }
 0x59c   : > { %v5951_v8 = vpop.eup %5950  ;;  %v4622_v40 = vmul.f32 1.442695, %v4608_v4  ;;  %v8300_v63 = vpop.permute.xlu2 %3330  ;;  %5826 = vset.pattern.permute.xlu1 %v10157_v59  ;;  %v1382_v59 = vmax.f32 %v1374_v24, 0.0  ;;  %v1430_v4 = vadd.f32 %v6022_v43, %v10171_v39  ;;  %v1491_v54 = vadd.f32 %v6023_v42, %v10175_v58 }
 0x59d   : > { %v4635_v37 = vadd.f32 1.0, %v5951_v8  ;;  %3550 = vperm.xlu1 %5826, %v8006_v27   ;;  %v4638_v10 = vmul.f32 -0.5, %v5951_v8  ;;  %v10170_v27 = vld [vmem:[#allocation122_spill] sm:$0xff]  ;;  %v4641_v20 = vand.u32 2147483647, %v5951_v8  ;;  %v1449_v13 = vadd.f32 %v1441_v3, %v1391_v34 }
 0x59e   : > { %5952 = vpow2.f32 %v4622_v40  ;;  %3554 = vperm.xlu2 %5824, %v8011_v56   ;;  %v1486_v6 = vadd.f32 %v6023_v42, %v10170_v27  ;;  %v10172_v56 = vld [vmem:[#allocation125_spill] sm:$0xff]  ;;  %v1390_v24 = vadd.f32 %v1382_v59, %v1332_v47  ;;  %v1435_v40 = vadd.f32 %v6022_v43, %v10176_v36 }
 0x59f   : > { %5954 = vlog2.f32 %v4635_v37  ;;  %v1489_v46 = vadd.f32 %v6023_v42, %v10172_v56  ;;  %v4639_v19 = vadd.f32 1.0, %v4638_v10  ;;  %v1544_v51 = vadd.f32 %v6024_v7, %v10177_v45  ;;  %v10179_v56 = vld [vmem:[#allocation134_spill] sm:$0xff] }
 0x5a0   : > { %v1385_v62 = vmax.f32 %v1377_v0, 0.0  ;;  %v1494_v23 = vmax.f32 %v1486_v6, 0.0  ;;  %v1438_v10 = vmax.f32 %v1430_v4, 0.0  ;;  %v1440_v47 = vmax.f32 %v1432_v33, 0.0  ;;  %v10178_v6 = vld [vmem:[#allocation132_spill] sm:$0xff] }
 0x5a1   : > { %v1497_v31 = vmax.f32 %v1489_v46, 0.0  ;;  %v4640_v27 = vmul.f32 %v5951_v8, %v4639_v19  ;;  %v1499_v43 = vmax.f32 %v1491_v54, 0.0  ;;  %vm4642_vm1 = vcmp.lt.f32.partialorder %v4641_v20, 0.0004427343  ;;  %v10181_v19 = vld [vmem:[#allocation135_spill] sm:$0xff]  ;;  %v10182_v20 = vld [vmem:[#allocation137_spill] sm:$0xff] }
 0x5a2   : > { %v8310_v49 = vpop.permute.xlu1 %3280  ;;  %v1443_v34 = vmax.f32 %v1435_v40, 0.0  ;;  %v1552_v59 = vmax.f32 %v1544_v51, 0.0  ;;  %vm4595_vm2 = vcmp.gt.f32.partialorder %v8266_v15, 20.0  ;;  %v1393_v0 = vadd.f32 %v1385_v62, %v1335_v38  ;;  %v10184_v62 = vld [vmem:[#allocation138_spill] sm:$0xff] }
 0x5a3   : > { %10173 = vst [vmem:[#allocation26_spill] sm:$0xff] %v8310_v49  ;;  %v1488_v4 = vadd.f32 %v6023_v42, %v10178_v6  ;;  %v1502_v8 = vadd.f32 %v1494_v23, %v1444_v41  ;;  %v1490_v22 = vadd.f32 %v6023_v42, %v10181_v19  ;;  %v1505_v58 = vadd.f32 %v1497_v31, %v1447_v53  ;;  %v10185_v23 = vld [vmem:[#allocation140_spill] sm:$0xff] }
 0x5a4   : > { %v5953_v21 = vpop.eup %5952  ;;  %v1448_v54 = vadd.f32 %v1440_v47, %v1390_v24  ;;  %v1549_v36 = vadd.f32 %v6024_v7, %v10182_v20  ;;  %v1507_v38 = vadd.f32 %v1499_v43, %v1449_v13  ;;  %v1451_v51 = vadd.f32 %v1443_v34, %v1393_v0  ;;  %v10190_v0 = vld [vmem:[#allocation145_spill] sm:$0xff] }
 0x5a5   : > { %v5955_v37 = vpop.eup %5954  ;;  %v4680_v28 = vadd.f32 1.0, %v5953_v21  ;;  %v8317_v50 = vpop.permute.xlu2 %3368  ;;  %3558 = vperm.xlu1 %5826, %v8019_v5   ;;  %v4683_v39 = vmul.f32 -0.5, %v5953_v21  ;;  %v1547_v5 = vadd.f32 %v6024_v7, %v10179_v56  ;;  %v4686_v40 = vand.u32 2147483647, %v5953_v21 }
 0x5a6   : > { %v4637_v16 = vmul.f32 0.6931472, %v5955_v37  ;;  %3562 = vperm.xlu2 %5824, %v8023_v12   ;;  %v1446_v12 = vadd.f32 %v1438_v10, %v1388_v11  ;;  %v1560_v37 = vadd.f32 %v1552_v59, %v1502_v8  ;;  %v6025_v11 = vld [vmem:[%s6421_s12 + $0x14] ss:$0 sm:$0xff]  ;;  %v1498_v31 = vmax.f32 %v1490_v22, 0.0 }
 0x5a7   : > { %5956 = vlog2.f32 %v4680_v28  ;;  %v4684_v33 = vadd.f32 1.0, %v4683_v39  ;;  %v1493_v28 = vadd.f32 %v6023_v42, %v10184_v62  ;;  %v1555_v41 = vmax.f32 %v1547_v5, 0.0  ;;  %v10187_v39 = vld [vmem:[#allocation143_spill] sm:$0xff]  ;;  %v10189_v59 = vld [vmem:[#allocation144_spill] sm:$0xff] }
 0x5a8   : > { %v4643_v3 = vsel %vm4642_vm1, %v4640_v27, %v4637_v16  ;;  %v1496_v16 = vmax.f32 %v1488_v4, 0.0  ;;  %v1602_v10 = vadd.f32 %v6025_v11, %v10185_v23  ;;  %v10186_v27 = vld [vmem:[#allocation141_spill] sm:$0xff]  ;;  %v1605_v13 = vadd.f32 %v6025_v11, %v10187_v39  ;;  %v8343_v4 = vld [vmem:[%s6404_s19] sm:$0xff] }
 0x5a9   : > { %v8325_v46 = vsel %vm4595_vm2, %v8266_v15, %v4643_v3  ;;  %v1546_v53 = vadd.f32 %v6024_v7, %v10186_v27  ;;  %v4685_v43 = vmul.f32 %v5953_v21, %v4684_v33  ;;  %v10188_v42 = vmov 55   ;;  %v6027_v22 = vld [vmem:[%s6421_s12 + $0x15] ss:$0 sm:$0xff]  ;;  %v10194_v23 = vld [vmem:[#allocation150_spill] sm:$0xff] }
 0x5aa   : > { %10180 = vst [vmem:[#allocation27_spill] sm:$0xff] %v8325_v46  ;;  %v1557_v34 = vmax.f32 %v1549_v36, 0.0  ;;  %v1548_v3 = vadd.f32 %v6024_v7, %v10189_v59  ;;  %v1607_v6 = vadd.f32 %v6025_v11, %v10190_v0  ;;  %vm4687_vm3 = vcmp.lt.f32.partialorder %v4686_v40, 0.0004427343  ;;  %v10192_v33 = vld [vmem:[#allocation149_spill] sm:$0xff] }
 0x5ab   : > { %v8329_v45 = vpop.permute.xlu1 %3318  ;;  %v1501_v56 = vmax.f32 %v1493_v28, 0.0  ;;  %vm4600_vm4 = vcmp.gt.f32.partialorder %v8288_v32, 20.0  ;;  %v1610_v19 = vmax.f32 %v1602_v10, 0.0  ;;  %v1554_v21 = vmax.f32 %v1546_v53, 0.0 }
 0x5ac   : > { %10183 = vst [vmem:[#allocation28_spill] sm:$0xff] %v8329_v45  ;;  %v1660_v20 = vadd.f32 %v6027_v22, %v10192_v33  ;;  %v1504_v62 = vadd.f32 %v1496_v16, %v1446_v12  ;;  %v1563_v40 = vadd.f32 %v1555_v41, %v1505_v58  ;;  %v1604_v27 = vadd.f32 %v6025_v11, %v10194_v23  ;;  %v10198_v16 = vld [vmem:[#allocation154_spill] sm:$0xff]  ;;  %v6028_v33 = vld [vmem:[%s6421_s12 + $0x16] ss:$0 sm:$0xff] }
 0x5ad   : > { %v5957_v15 = vpop.eup %5956  ;;  %v8335_v24 = vpop.permute.xlu2 %3380  ;;  %3570 = vperm.xlu1 %5826, %v8031_v57   ;;  %v10191_v57 = vld [vmem:[#allocation147_spill] sm:$0xff]  ;;  %v1506_v39 = vadd.f32 %v1498_v31, %v1448_v54  ;;  %v1556_v28 = vmax.f32 %v1548_v3, 0.0  ;;  %v1615_v59 = vmax.f32 %v1607_v6, 0.0  ;;  %v1565_v10 = vadd.f32 %v1557_v34, %v1507_v38  ;;  %v10199_v3 = vld [vmem:[#allocation156_spill] sm:$0xff]  ;;  %v10200_v38 = vld [vmem:[#allocation157_spill] sm:$0xff] }
 0x5ae   : > { %v4682_v47 = vmul.f32 0.6931472, %v5957_v15  ;;  %5827 = vset.pattern.permute.xlu2 %v10188_v42  ;;  %v1551_v5 = vadd.f32 %v6024_v7, %v10191_v57  ;;  %v1613_v15 = vmax.f32 %v1605_v13, 0.0  ;;  %v10195_v7 = vld [vmem:[#allocation151_spill] sm:$0xff]  ;;  %v1509_v53 = vadd.f32 %v1501_v56, %v1451_v51  ;;  %v10197_v57 = vld [vmem:[#allocation153_spill] sm:$0xff]  ;;  %v8366_v34 = vld [vmem:[%s6404_s19 + $0x10] sm:$0xff] }
 0x5af   : > { %3600 = vperm.xlu2 %5827, %v8343_v4   ;;  %v1663_v0 = vadd.f32 %v6027_v22, %v10195_v7  ;;  %v1562_v12 = vadd.f32 %v1554_v21, %v1504_v62  ;;  %v1668_v58 = vmax.f32 %v1660_v20, 0.0  ;;  %v1665_v41 = vadd.f32 %v6027_v22, %v10198_v16  ;;  %v8371_v20 = vld [vmem:[%s6404_s19 + $0x18] sm:$0xff] }
 0x5b0   : > { %v4688_v8 = vsel %vm4687_vm3, %v4685_v43, %v4682_v47  ;;  %v1559_v43 = vmax.f32 %v1551_v5, 0.0  ;;  %v1621_v31 = vadd.f32 %v1613_v15, %v1563_v40  ;;  %v1612_v13 = vmax.f32 %v1604_v27, 0.0  ;;  %v10203_v15 = vld [vmem:[#allocation162_spill] sm:$0xff] }
 0x5b1   : > { %v8351_v36 = vsel %vm4600_vm4, %v8288_v32, %v4688_v8  ;;  %v1606_v32 = vadd.f32 %v6025_v11, %v10197_v57  ;;  %v1618_v8 = vadd.f32 %v1610_v19, %v1560_v37  ;;  %v1609_v6 = vadd.f32 %v6025_v11, %v10199_v3  ;;  %v10201_v19 = vld [vmem:[#allocation159_spill] sm:$0xff]  ;;  %v10202_v11 = vld [vmem:[#allocation160_spill] sm:$0xff] }
 0x5b2   : > { %10193 = vst [vmem:[#allocation29_spill] sm:$0xff] %v8351_v36  ;;  %v1718_v51 = vadd.f32 %v6028_v33, %v10200_v38  ;;  %v1564_v37 = vadd.f32 %v1556_v28, %v1506_v39  ;;  %v1623_v56 = vadd.f32 %v1615_v59, %v1565_v10  ;;  %v1671_v5 = vmax.f32 %v1663_v0, 0.0  ;;  %v10204_v57 = vld [vmem:[#allocation163_spill] sm:$0xff]  ;;  %v10205_v39 = vld [vmem:[#allocation165_spill] sm:$0xff]  ;;  %v10206_v38 = vld [vmem:[#allocation166_spill] sm:$0xff] }
 0x5b3   : > { %v8355_v47 = vpop.permute.xlu1 %3326  ;;  %v1662_v21 = vadd.f32 %v6027_v22, %v10201_v19  ;;  %v1614_v62 = vmax.f32 %v1606_v32, 0.0  ;;  %v1721_v40 = vadd.f32 %v6028_v33, %v10202_v11  ;;  %v1664_v23 = vadd.f32 %v6027_v22, %v10203_v15  ;;  %v6031_v3 = vld [vmem:[%s6421_s12 + $0x17] ss:$0 sm:$0xff] }
 0x5b4   : > { %10196 = vst [vmem:[#allocation30_spill] sm:$0xff] %v8355_v47  ;;  %v1676_v27 = vadd.f32 %v1668_v58, %v1618_v8  ;;  %v1673_v7 = vmax.f32 %v1665_v41, 0.0  ;;  %v1723_v16 = vadd.f32 %v6028_v33, %v10204_v57  ;;  %v1667_v28 = vadd.f32 %v6027_v22, %v10205_v39  ;;  %v10208_v32 = vld [vmem:[#allocation169_spill] sm:$0xff]  ;;  %v10210_v57 = vld [vmem:[#allocation171_spill] sm:$0xff] }
 0x5b5   : > { %v8359_v54 = vpop.permute.xlu2 %3388  ;;  %5829 = vset.pattern.permute.xlu1 %v10188_v42  ;;  %v1567_v42 = vadd.f32 %v1559_v43, %v1509_v53  ;;  %v1620_v59 = vadd.f32 %v1612_v13, %v1562_v12  ;;  %v1617_v0 = vmax.f32 %v1609_v6, 0.0  ;;  %v1726_v10 = vmax.f32 %v1718_v51, 0.0  ;;  %v10207_v53 = vld [vmem:[#allocation168_spill] sm:$0xff] }
 0x5b6   : > { %3608 = vperm.xlu1 %5829, %v8366_v34   ;;  %v1776_v19 = vadd.f32 %v6031_v3, %v10206_v38  ;;  %v1679_v36 = vadd.f32 %v1671_v5, %v1621_v31  ;;  %v1670_v46 = vmax.f32 %v1662_v21, 0.0  ;;  %v1720_v43 = vadd.f32 %v6028_v33, %v10207_v53  ;;  %v10211_v51 = vld [vmem:[#allocation172_spill] sm:$0xff]  ;;  %v10212_v38 = vld [vmem:[#allocation174_spill] sm:$0xff] }
 0x5b7   : > { %3612 = vperm.xlu2 %5827, %v8371_v20   ;;  %v1779_v11 = vadd.f32 %v6031_v3, %v10208_v32  ;;  %v1622_v8 = vadd.f32 %v1614_v62, %v1564_v37  ;;  %v1729_v58 = vmax.f32 %v1721_v40, 0.0  ;;  %v1672_v41 = vmax.f32 %v1664_v23, 0.0  ;;  %v10213_v23 = vld [vmem:[#allocation175_spill] sm:$0xff] }
 0x5b8   : > { %v1722_v22 = vadd.f32 %v6028_v33, %v10210_v57  ;;  %v1681_v12 = vadd.f32 %v1673_v7, %v1623_v56  ;;  %v1731_v13 = vmax.f32 %v1723_v16, 0.0  ;;  %v1675_v6 = vmax.f32 %v1667_v28, 0.0  ;;  %v6033_v56 = vld [vmem:[%s6421_s12 + $0x18] ss:$0 sm:$0xff]  ;;  %v8396_v16 = vld [vmem:[%s6404_s19 + $0x28] sm:$0xff] }
 0x5b9   : > { %v1781_v31 = vadd.f32 %v6031_v3, %v10211_v51  ;;  %v1625_v5 = vadd.f32 %v1617_v0, %v1567_v42  ;;  %v1734_v21 = vadd.f32 %v1726_v10, %v1676_v27  ;;  %v1784_v39 = vmax.f32 %v1776_v19, 0.0  ;;  %v10215_v51 = vld [vmem:[#allocation178_spill] sm:$0xff] }
 0x5ba   : > { %v1725_v53 = vadd.f32 %v6028_v33, %v10212_v38  ;;  %v1678_v37 = vadd.f32 %v1670_v46, %v1620_v59  ;;  %v1728_v62 = vmax.f32 %v1720_v43, 0.0  ;;  %v1787_v40 = vmax.f32 %v1779_v11, 0.0  ;;  %v10214_v33 = vld [vmem:[#allocation177_spill] sm:$0xff]  ;;  %v10216_v11 = vld [vmem:[#allocation180_spill] sm:$0xff] }
 0x5bb   : > { %v8382_v15 = vpop.permute.xlu1 %3338  ;;  %v1834_v7 = vadd.f32 %v6033_v56, %v10213_v23  ;;  %v1737_v42 = vadd.f32 %v1729_v58, %v1679_v36  ;;  %v1680_v27 = vadd.f32 %v1672_v41, %v1622_v8  ;;  %v1730_v28 = vmax.f32 %v1722_v22, 0.0  ;;  %v10217_v23 = vld [vmem:[#allocation181_spill] sm:$0xff]  ;;  %v10218_v36 = vld [vmem:[#allocation183_spill] sm:$0xff] }
 0x5bc   : > { %10209 = vst [vmem:[#allocation31_spill] sm:$0xff] %v8382_v15  ;;  %v1778_v0 = vadd.f32 %v6031_v3, %v10214_v33  ;;  %v1739_v10 = vadd.f32 %v1731_v13, %v1681_v12  ;;  %v1683_v19 = vadd.f32 %v1675_v6, %v1625_v5  ;;  %v1789_v57 = vmax.f32 %v1781_v31, 0.0  ;;  %v6035_v22 = vld [vmem:[%s6421_s12 + $0x19] ss:$0 sm:$0xff]  ;;  %v10219_v12 = vld [vmem:[#allocation184_spill] sm:$0xff] }
 0x5bd   : > { %v1837_v46 = vadd.f32 %v6033_v56, %v10215_v51  ;;  %v1792_v59 = vadd.f32 %v1784_v39, %v1734_v21  ;;  %v1733_v43 = vmax.f32 %v1725_v53, 0.0  ;;  %v1780_v38 = vadd.f32 %v6031_v3, %v10216_v11  ;;  %v10220_v6 = vld [vmem:[#allocation186_spill] sm:$0xff]  ;;  %v10222_v53 = vld [vmem:[#allocation187_spill] sm:$0xff] }
 0x5be   : > { %v8387_v32 = vpop.permute.xlu2 %3426  ;;  %3616 = vperm.xlu1 %5829, %v8390_v18   ;;  %v1839_v47 = vadd.f32 %v6033_v56, %v10217_v23  ;;  %v1736_v61 = vadd.f32 %v1728_v62, %v1678_v37  ;;  %v1795_v45 = vadd.f32 %v1787_v40, %v1737_v42  ;;  %v1842_v25 = vmax.f32 %v1834_v7, 0.0  ;;  %v10223_v37 = vld [vmem:[#allocation189_spill] sm:$0xff]  ;;  %v10224_v42 = vld [vmem:[#allocation190_spill] sm:$0xff]  ;;  %v10226_v23 = vld [vmem:[#allocation192_spill] sm:$0xff] }
 0x5bf   : > { %3620 = vperm.xlu2 %5827, %v8396_v16   ;;  %v1783_v8 = vadd.f32 %v6031_v3, %v10218_v36  ;;  %v1738_v58 = vadd.f32 %v1730_v28, %v1680_v27  ;;  %v1786_v41 = vmax.f32 %v1778_v0, 0.0  ;;  %v1892_v13 = vadd.f32 %v6035_v22, %v10219_v12  ;;  %v8415_v0 = vld [vmem:[%s6404_s19 + $0x38] sm:$0xff] }
 0x5c0   : > { %v1836_v31 = vadd.f32 %v6033_v56, %v10220_v6  ;;  %v1797_v21 = vadd.f32 %v1789_v57, %v1739_v10  ;;  %v1845_v39 = vmax.f32 %v1837_v46, 0.0  ;;  %v1895_v33 = vadd.f32 %v6035_v22, %v10222_v53  ;;  %v6037_v57 = vld [vmem:[%s6421_s12 + $0x1a] ss:$0 sm:$0xff] }
 0x5c1   : > { %v1838_v62 = vadd.f32 %v6033_v56, %v10223_v37  ;;  %v1741_v40 = vadd.f32 %v1733_v43, %v1683_v19  ;;  %v1788_v7 = vmax.f32 %v1780_v38, 0.0  ;;  %v1847_v3 = vmax.f32 %v1839_v47, 0.0  ;;  %v10227_v46 = vld [vmem:[#allocation193_spill] sm:$0xff]  ;;  %v10229_v38 = vld [vmem:[#allocation195_spill] sm:$0xff] }
 0x5c2   : > { %v1897_v27 = vadd.f32 %v6035_v22, %v10224_v42  ;;  %v1850_v51 = vadd.f32 %v1842_v25, %v1792_v59  ;;  %v1791_v11 = vmax.f32 %v1783_v8, 0.0  ;;  %v1841_v10 = vadd.f32 %v6033_v56, %v10226_v23  ;;  %v10231_v23 = vld [vmem:[#allocation198_spill] sm:$0xff] }
 0x5c3   : > { %v1950_v36 = vadd.f32 %v6037_v57, %v10227_v46  ;;  %v10228_v12 = vmov 56   ;;  %v1794_v19 = vadd.f32 %v1786_v41, %v1736_v61  ;;  %v1900_v43 = vmax.f32 %v1892_v13, 0.0  ;;  %v10232_v41 = vld [vmem:[#allocation199_spill] sm:$0xff] }
 0x5c4   : > { %v8407_v5 = vpop.permute.xlu1 %3376  ;;  %v1844_v47 = vmax.f32 %v1836_v31, 0.0  ;;  %v1894_v6 = vadd.f32 %v6035_v22, %v10229_v38  ;;  %v1853_v53 = vadd.f32 %v1845_v39, %v1795_v45  ;;  %v1903_v37 = vmax.f32 %v1895_v33, 0.0 }
 0x5c5   : > { %10221 = vst [vmem:[#allocation32_spill] sm:$0xff] %v8407_v5  ;;  %v1846_v42 = vmax.f32 %v1838_v62, 0.0  ;;  %v10230_v5 = vld [vmem:[#allocation196_spill] sm:$0xff]  ;;  %v1796_v59 = vadd.f32 %v1788_v7, %v1738_v58  ;;  %v1855_v56 = vadd.f32 %v1847_v3, %v1797_v21  ;;  %v1905_v8 = vmax.f32 %v1897_v27, 0.0  ;;  %v6038_v62 = vld [vmem:[%s6421_s12 + $0x1b] ss:$0 sm:$0xff] }
 0x5c6   : > { %v8412_v28 = vpop.permute.xlu2 %3438  ;;  %3628 = vperm.xlu1 %5829, %v8415_v0   ;;  %v1953_v25 = vadd.f32 %v6037_v57, %v10230_v5  ;;  %v1896_v46 = vadd.f32 %v6035_v22, %v10231_v23  ;;  %v1799_v15 = vadd.f32 %v1791_v11, %v1741_v40  ;;  %v1849_v49 = vmax.f32 %v1841_v10, 0.0  ;;  %v10235_v21 = vld [vmem:[#allocation202_spill] sm:$0xff]  ;;  %v10236_v40 = vld [vmem:[#allocation204_spill] sm:$0xff]  ;;  %v10237_v10 = vld [vmem:[#allocation205_spill] sm:$0xff] }
 0x5c7   : > { %10225 = vst [vmem:[#allocation33_spill] sm:$0xff] %v8412_v28  ;;  %5830 = vset.pattern.permute.xlu2 %v10228_v12  ;;  %v1958_v61 = vmax.f32 %v1950_v36, 0.0  ;;  %v1955_v13 = vadd.f32 %v6037_v57, %v10232_v41  ;;  %v1908_v31 = vadd.f32 %v1900_v43, %v1850_v51  ;;  %v1852_v38 = vadd.f32 %v1844_v47, %v1794_v19  ;;  %v10233_v28 = vld [vmem:[#allocation201_spill] sm:$0xff]  ;;  %v10238_v43 = vld [vmem:[#allocation207_spill] sm:$0xff] }
 0x5c8   : > { %3658 = vperm.xlu2 %5830, %v8343_v4   ;;  %v1902_v55 = vmax.f32 %v1894_v6, 0.0  ;;  %v1899_v45 = vadd.f32 %v6035_v22, %v10233_v28  ;;  %v1911_v33 = vadd.f32 %v1903_v37, %v1853_v53  ;;  %v1854_v5 = vadd.f32 %v1846_v42, %v1796_v59  ;;  %v10239_v37 = vld [vmem:[#allocation208_spill] sm:$0xff]  ;;  %v6039_v23 = vld [vmem:[%s6421_s12 + $0x1c] ss:$0 sm:$0xff] }
 0x5c9   : > { %v1961_v58 = vmax.f32 %v1953_v25, 0.0  ;;  %v2008_v7 = vadd.f32 %v6038_v62, %v10235_v21  ;;  %v1913_v3 = vadd.f32 %v1905_v8, %v1855_v56  ;;  %v1904_v27 = vmax.f32 %v1896_v46, 0.0  ;;  %v10240_v25 = vld [vmem:[#allocation210_spill] sm:$0xff]  ;;  %v10241_v46 = vld [vmem:[#allocation211_spill] sm:$0xff] }
 0x5ca   : > { %v1952_v11 = vadd.f32 %v6037_v57, %v10236_v40  ;;  %v2011_v36 = vadd.f32 %v6038_v62, %v10237_v10  ;;  %v1857_v22 = vadd.f32 %v1849_v49, %v1799_v15  ;;  %v1966_v28 = vadd.f32 %v1958_v61, %v1908_v31  ;;  %v6040_v40 = vld [vmem:[%s6421_s12 + $0x1d] ss:$0 sm:$0xff] }
 0x5cb   : > { %v1963_v19 = vmax.f32 %v1955_v13, 0.0  ;;  %v1954_v47 = vadd.f32 %v6037_v57, %v10238_v43  ;;  %v1910_v6 = vadd.f32 %v1902_v55, %v1852_v38  ;;  %v1907_v53 = vmax.f32 %v1899_v45, 0.0 }
 0x5cc   : > { %v8428_v39 = vpop.permute.xlu1 %3384  ;;  %v2013_v42 = vadd.f32 %v6038_v62, %v10239_v37  ;;  %v1957_v59 = vadd.f32 %v6037_v57, %v10240_v25  ;;  %v1969_v56 = vadd.f32 %v1961_v58, %v1911_v33  ;;  %v2016_v8 = vmax.f32 %v2008_v7, 0.0  ;;  %v6041_v25 = vld [vmem:[%s6421_s12 + $0x1e] ss:$0 sm:$0xff] }
 0x5cd   : > { %10234 = vst [vmem:[#allocation34_spill] sm:$0xff] %v8428_v39  ;;  %v2010_v49 = vadd.f32 %v6038_v62, %v7368_v44  ;;  %v1912_v15 = vadd.f32 %v1904_v27, %v1854_v5  ;;  %v1960_v61 = vmax.f32 %v1952_v11, 0.0  ;;  %v2019_v41 = vmax.f32 %v2011_v36, 0.0 }
 0x5ce   : > { %v8434_v51 = vpop.permute.xlu2 %3446  ;;  %5832 = vset.pattern.permute.xlu1 %v10228_v12  ;;  %v2066_v12 = vadd.f32 %v6039_v23, %v10241_v46  ;;  %v2069_v55 = vadd.f32 %v6039_v23, %v7372_v35  ;;  %v1971_v13 = vadd.f32 %v1963_v19, %v1913_v3  ;;  %v1962_v31 = vmax.f32 %v1954_v47, 0.0 }
 0x5cf   : > { %3666 = vperm.xlu1 %5832, %v8366_v34   ;;  %v2012_v38 = vadd.f32 %v6038_v62, %v7385_v2  ;;  %v2071_v57 = vadd.f32 %v6039_v23, %v7388_v60  ;;  %v1915_v45 = vadd.f32 %v1907_v53, %v1857_v22  ;;  %v2021_v33 = vmax.f32 %v2013_v42, 0.0 }
 0x5d0   : > { %3670 = vperm.xlu2 %5830, %v8371_v20   ;;  %v1965_v58 = vmax.f32 %v1957_v59, 0.0  ;;  %v2015_v21 = vadd.f32 %v6038_v62, %v7401_v17  ;;  %v2024_v44 = vadd.f32 %v2016_v8, %v1966_v28  ;;  %v2074_v5 = vmax.f32 %v2066_v12, 0.0  ;;  %v10242_v59 = vld [vmem:[#allocation212_spill] sm:$0xff] }
 0x5d1   : > { %v2018_v27 = vmax.f32 %v2010_v49, 0.0  ;;  %v2124_v11 = vadd.f32 %v6040_v40, %v7406_v30  ;;  %v1968_v35 = vadd.f32 %v1960_v61, %v1910_v6  ;;  %v2027_v3 = vadd.f32 %v2019_v41, %v1969_v56  ;;  %v10243_v49 = vld [vmem:[#allocation213_spill] sm:$0xff]  ;;  %v10244_v41 = vld [vmem:[#allocation214_spill] sm:$0xff] }
 0x5d2   : > { %v2077_v10 = vmax.f32 %v2069_v55, 0.0  ;;  %v2068_v2 = vadd.f32 %v6039_v23, %v7418_v48  ;;  %v1970_v36 = vadd.f32 %v1962_v31, %v1912_v15  ;;  %v2020_v60 = vmax.f32 %v2012_v38, 0.0 }
 0x5d3   : > { %v2079_v22 = vmax.f32 %v2071_v57, 0.0  ;;  %v2127_v19 = vadd.f32 %v6040_v40, %v7421_v52  ;;  %v2029_v62 = vadd.f32 %v2021_v33, %v1971_v13  ;;  %v1973_v28 = vadd.f32 %v1965_v58, %v1915_v45  ;;  %v10245_v13 = vld [vmem:[#allocation215_spill] sm:$0xff]  ;;  %v10246_v57 = vld [vmem:[#allocation216_spill] sm:$0xff] }
 0x5d4   : > { %v8449_v7 = vpop.permute.xlu1 %3396  ;;  %v2023_v43 = vmax.f32 %v2015_v21, 0.0  ;;  %v2070_v30 = vadd.f32 %v6039_v23, %v7434_v26  ;;  %v2082_v47 = vadd.f32 %v2074_v5, %v2024_v44  ;;  %v2026_v6 = vadd.f32 %v2018_v27, %v1968_v35  ;;  %v6042_v5 = vld [vmem:[%s6421_s12 + $0x1f] ss:$0 sm:$0xff]  ;;  %v10248_v27 = vld [vmem:[#allocation92_spill] sm:$0xff] }
 0x5d5   : > { %v2132_v48 = vmax.f32 %v2124_v11, 0.0  ;;  %v2129_v53 = vadd.f32 %v6040_v40, %v7437_v9  ;;  %v2085_v37 = vadd.f32 %v2077_v10, %v2027_v3  ;;  %v2076_v42 = vmax.f32 %v2068_v2, 0.0  ;;  %v10249_v10 = vld [vmem:[#allocation105_spill] sm:$0xff] }
 0x5d6   : > { %v2073_v52 = vadd.f32 %v6039_v23, %v7451_v14  ;;  %v2182_v56 = vadd.f32 %v6041_v25, %v10242_v59  ;;  %v2028_v8 = vadd.f32 %v2020_v60, %v1970_v36  ;;  %v2087_v46 = vadd.f32 %v2079_v22, %v2029_v62  ;;  %v10247_v14 = vld [vmem:[#allocation217_spill] sm:$0xff] }
 0x5d7   : > { %v8455_v17 = vpop.permute.xlu2 %3484  ;;  %3674 = vperm.xlu1 %5832, %v8390_v18   ;;  %v2135_v12 = vmax.f32 %v2127_v19, 0.0  ;;  %v2126_v26 = vadd.f32 %v6040_v40, %v10243_v49  ;;  %v2031_v15 = vadd.f32 %v2023_v43, %v1973_v28  ;;  %v2078_v61 = vmax.f32 %v2070_v30, 0.0  ;;  %v10250_v36 = vld [vmem:[#allocation97_spill] sm:$0xff]  ;;  %v10251_v28 = vld [vmem:[#allocation112_spill] sm:$0xff] }
 0x5d8   : > { %3678 = vperm.xlu2 %5830, %v8396_v16   ;;  %v2185_v55 = vadd.f32 %v6041_v25, %v10244_v41  ;;  %v2128_v31 = vadd.f32 %v6040_v40, %v10245_v13  ;;  %v2140_v9 = vsub.f32 %v2082_v47, %v2132_v48  ;;  %v2137_v38 = vmax.f32 %v2129_v53, 0.0  ;;  %v10253_v53 = vld [vmem:[#allocation103_spill] sm:$0xff]  ;;  %v10255_v41 = vld [vmem:[#allocation109_spill] sm:$0xff] }
 0x5d9   : > { %v2187_v45 = vadd.f32 %v6041_v25, %v10246_v57  ;;  %v2131_v23 = vadd.f32 %v6040_v40, %v10247_v14  ;;  %v2084_v58 = vadd.f32 %v2076_v42, %v2026_v6  ;;  %v2081_v21 = vmax.f32 %v2073_v52, 0.0 }
 0x5da   : > { %v2190_v44 = vmax.f32 %v2182_v56, 0.0  ;;  %v2240_v11 = vadd.f32 %v6042_v5, %v10248_v27  ;;  %v2143_v35 = vsub.f32 %v2085_v37, %v2135_v12  ;;  %v2134_v3 = vmax.f32 %v2126_v26, 0.0  ;;  %v10254_v56 = vld [vmem:[#allocation118_spill] sm:$0xff] }
 0x5db   : > { %v2184_v2 = vadd.f32 %v6041_v25, %v10249_v10  ;;  %v2243_v60 = vadd.f32 %v6042_v5, %v10250_v36  ;;  %v2086_v19 = vadd.f32 %v2078_v61, %v2028_v8  ;;  %v2193_v40 = vmax.f32 %v2185_v55, 0.0  ;;  %v6043_v61 = vld [vmem:[%s6421_s12 + $0x20] ss:$0 sm:$0xff]  ;;  %v10261_v36 = vld [vmem:[#allocation136_spill] sm:$0xff] }
 0x5dc   : > { %v2136_v62 = vmax.f32 %v2128_v31, 0.0  ;;  %v2186_v43 = vadd.f32 %v6041_v25, %v10251_v28  ;;  %v10252_v30 = vmov 57   ;;  %v2145_v47 = vsub.f32 %v2087_v46, %v2137_v38  ;;  %v10256_v38 = vld [vmem:[#allocation124_spill] sm:$0xff]  ;;  %v6044_v28 = vld [vmem:[%s6421_s12 + $0x21] ss:$0 sm:$0xff] }
 0x5dd   : > { %v8469_v33 = vpop.permute.xlu1 %3434  ;;  %v2195_v6 = vmax.f32 %v2187_v45, 0.0  ;;  %v2139_v48 = vmax.f32 %v2131_v23, 0.0  ;;  %v2245_v37 = vadd.f32 %v6042_v5, %v10253_v53  ;;  %v2089_v42 = vadd.f32 %v2081_v21, %v2031_v15  ;;  %v10257_v15 = vld [vmem:[#allocation115_spill] sm:$0xff] }
 0x5de   : > { %v2198_v52 = vsub.f32 %v2140_v9, %v2190_v44  ;;  %v2248_v59 = vmax.f32 %v2240_v11, 0.0  ;;  %v2189_v12 = vadd.f32 %v6041_v25, %v10254_v56  ;;  %v2142_v8 = vsub.f32 %v2084_v58, %v2134_v3  ;;  %v10259_v44 = vld [vmem:[#allocation130_spill] sm:$0xff]  ;;  %v10260_v11 = vld [vmem:[#allocation121_spill] sm:$0xff] }
 0x5df   : > { %v8475_v22 = vpop.permute.xlu2 %3496  ;;  %3686 = vperm.xlu1 %5832, %v8415_v0   ;;  %v2192_v49 = vmax.f32 %v2184_v2, 0.0  ;;  %v2251_v26 = vmax.f32 %v2243_v60, 0.0  ;;  %v2298_v55 = vadd.f32 %v6043_v61, %v10255_v41  ;;  %v2201_v13 = vsub.f32 %v2143_v35, %v2193_v40 }
 0x5e0   : > { %5833 = vset.pattern.permute.xlu2 %v10252_v30  ;;  %v2144_v31 = vsub.f32 %v2086_v19, %v2136_v62  ;;  %v2194_v46 = vmax.f32 %v2186_v43, 0.0  ;;  %v2242_v57 = vadd.f32 %v6042_v5, %v10256_v38  ;;  %v2203_v45 = vsub.f32 %v2145_v47, %v2195_v6  ;;  %v10262_v43 = vld [vmem:[#allocation127_spill] sm:$0xff]  ;;  %v10263_v6 = vld [vmem:[#allocation142_spill] sm:$0xff] }
 0x5e1   : > { %3716 = vperm.xlu2 %5833, %v8343_v4   ;;  %v2147_v14 = vsub.f32 %v2089_v42, %v2139_v48  ;;  %v2253_v23 = vmax.f32 %v2245_v37, 0.0  ;;  %v2301_v9 = vadd.f32 %v6043_v61, %v10257_v15  ;;  %v2256_v25 = vsub.f32 %v2198_v52, %v2248_v59  ;;  %v10264_v42 = vld [vmem:[#allocation133_spill] sm:$0xff]  ;;  %v10265_v59 = vld [vmem:[#allocation148_spill] sm:$0xff] }
 0x5e2   : > { %v2197_v58 = vmax.f32 %v2189_v12, 0.0  ;;  %v2244_v27 = vadd.f32 %v6042_v5, %v10259_v44  ;;  %v2303_v3 = vadd.f32 %v6043_v61, %v10260_v11  ;;  %v2200_v10 = vsub.f32 %v2142_v8, %v2192_v49  ;;  %v10266_v8 = vld [vmem:[#allocation139_spill] sm:$0xff]  ;;  %v10269_v15 = vld [vmem:[#allocation161_spill] sm:$0xff] }
 0x5e3   : > { %v2259_v35 = vsub.f32 %v2201_v13, %v2251_v26  ;;  %v2306_v2 = vmax.f32 %v2298_v55, 0.0  ;;  %v2247_v60 = vadd.f32 %v6042_v5, %v10261_v36  ;;  %v2202_v40 = vsub.f32 %v2144_v31, %v2194_v46  ;;  %v10267_v55 = vld [vmem:[#allocation155_spill] sm:$0xff]  ;;  %v10268_v46 = vld [vmem:[#allocation146_spill] sm:$0xff] }
 0x5e4   : > { %v2250_v62 = vmax.f32 %v2242_v57, 0.0  ;;  %v2356_v47 = vadd.f32 %v6044_v28, %v10262_v43  ;;  %v2300_v48 = vadd.f32 %v6043_v61, %v10263_v6  ;;  %v2261_v53 = vsub.f32 %v2203_v45, %v2253_v23  ;;  %v6045_v31 = vld [vmem:[%s6421_s12 + $0x22] ss:$0 sm:$0xff] }
 0x5e5   : > { %v8487_v21 = vpop.permute.xlu1 %3442  ;;  %v2309_v37 = vmax.f32 %v2301_v9, 0.0  ;;  %v2359_v52 = vadd.f32 %v6044_v28, %v10264_v42  ;;  %v2302_v5 = vadd.f32 %v6043_v61, %v10265_v59  ;;  %v2205_v56 = vsub.f32 %v2147_v14, %v2197_v58  ;;  %v10270_v14 = vld [vmem:[#allocation152_spill] sm:$0xff] }
 0x5e6   : > { %10258 = vst [vmem:[#allocation35_spill] sm:$0xff] %v8487_v21  ;;  %v2311_v12 = vmax.f32 %v2303_v3, 0.0  ;;  %v2361_v49 = vadd.f32 %v6044_v28, %v10266_v8  ;;  %v2314_v26 = vsub.f32 %v2256_v25, %v2306_v2  ;;  %v2255_v41 = vmax.f32 %v2247_v60, 0.0  ;;  %v6049_v21 = vld [vmem:[%s6421_s12 + $0x26] ss:$0 sm:$0xff] }
 0x5e7   : > { %v8492_v19 = vpop.permute.xlu2 %3504  ;;  %5835 = vset.pattern.permute.xlu1 %v10252_v30  ;;  %v2252_v30 = vmax.f32 %v2244_v27, 0.0  ;;  %v2305_v13 = vadd.f32 %v6043_v61, %v10267_v55  ;;  %v2414_v38 = vadd.f32 %v6045_v31, %v10268_v46  ;;  %v2258_v57 = vsub.f32 %v2200_v10, %v2250_v62  ;;  %v10271_v61 = vld [vmem:[#allocation167_spill] sm:$0xff]  ;;  %v10272_v62 = vld [vmem:[#allocation158_spill] sm:$0xff] }
 0x5e8   : > { %3724 = vperm.xlu1 %5835, %v8366_v34   ;;  %v2364_v45 = vmax.f32 %v2356_v47, 0.0  ;;  %v2308_v23 = vmax.f32 %v2300_v48, 0.0  ;;  %v2358_v9 = vadd.f32 %v6044_v28, %v10269_v15  ;;  %v2317_v44 = vsub.f32 %v2259_v35, %v2309_v37  ;;  %v10273_v37 = vld [vmem:[#allocation173_spill] sm:$0xff]  ;;  %v10276_v55 = vld [vmem:[#allocation170_spill] sm:$0xff] }
 0x5e9   : > { %3728 = vperm.xlu2 %5833, %v8371_v20   ;;  %v2367_v11 = vmax.f32 %v2359_v52, 0.0  ;;  %v2310_v36 = vmax.f32 %v2302_v5, 0.0  ;;  %v2417_v58 = vadd.f32 %v6045_v31, %v10270_v14  ;;  %v2260_v3 = vsub.f32 %v2202_v40, %v2252_v30  ;;  %v6046_v30 = vld [vmem:[%s6421_s12 + $0x23] ss:$0 sm:$0xff] }
 0x5ea   : > { %v2319_v25 = vsub.f32 %v2261_v53, %v2311_v12  ;;  %v2369_v2 = vmax.f32 %v2361_v49, 0.0  ;;  %v2360_v60 = vadd.f32 %v6044_v28, %v10271_v61  ;;  %v2263_v43 = vsub.f32 %v2205_v56, %v2255_v41  ;;  %v10274_v12 = vld [vmem:[#allocation164_spill] sm:$0xff]  ;;  %v10281_v61 = vld [vmem:[#allocation197_spill] sm:$0xff] }
 0x5eb   : > { %v2313_v6 = vmax.f32 %v2305_v13, 0.0  ;;  %v2422_v10 = vmax.f32 %v2414_v38, 0.0  ;;  %v2419_v47 = vadd.f32 %v6045_v31, %v10272_v62  ;;  %v2372_v48 = vsub.f32 %v2314_v26, %v2364_v45  ;;  %v10275_v26 = vld [vmem:[#allocation179_spill] sm:$0xff] }
 0x5ec   : > { %v2316_v42 = vsub.f32 %v2258_v57, %v2308_v23  ;;  %v2366_v35 = vmax.f32 %v2358_v9, 0.0  ;;  %v2363_v52 = vadd.f32 %v6044_v28, %v10273_v37  ;;  %v2375_v40 = vsub.f32 %v2317_v44, %v2367_v11  ;;  %v10277_v57 = vld [vmem:[#allocation185_spill] sm:$0xff]  ;;  %v10278_v9 = vld [vmem:[#allocation176_spill] sm:$0xff]  ;;  %v10279_v11 = vld [vmem:[#allocation191_spill] sm:$0xff] }
 0x5ed   : > { %v8508_v27 = vpop.permute.xlu1 %3454  ;;  %v2318_v53 = vsub.f32 %v2260_v3, %v2310_v36  ;;  %v2425_v5 = vmax.f32 %v2417_v58, 0.0  ;;  %v2472_v8 = vadd.f32 %v6046_v30, %v10274_v12  ;;  %v2377_v56 = vsub.f32 %v2319_v25, %v2369_v2  ;;  %v6047_v3 = vld [vmem:[%s6421_s12 + $0x24] ss:$0 sm:$0xff] }
 0x5ee   : > { %v2368_v49 = vmax.f32 %v2360_v60, 0.0  ;;  %v2416_v41 = vadd.f32 %v6045_v31, %v10275_v26  ;;  %v2475_v13 = vadd.f32 %v6046_v30, %v10276_v55  ;;  %v2321_v28 = vsub.f32 %v2263_v43, %v2313_v6  ;;  %v10280_v25 = vld [vmem:[#allocation182_spill] sm:$0xff]  ;;  %v10282_v6 = vld [vmem:[#allocation188_spill] sm:$0xff] }
 0x5ef   : > { %v2430_v46 = vsub.f32 %v2372_v48, %v2422_v10  ;;  %v2427_v38 = vmax.f32 %v2419_v47, 0.0  ;;  %v2418_v45 = vadd.f32 %v6045_v31, %v10277_v57  ;;  %v2374_v23 = vsub.f32 %v2316_v42, %v2366_v35  ;;  %v10284_v35 = vld [vmem:[#allocation203_spill] sm:$0xff]  ;;  %v10286_v26 = vld [vmem:[#allocation194_spill] sm:$0xff] }
 0x5f0   : > { %v8513_v59 = vpop.permute.xlu2 %3542  ;;  %3732 = vperm.xlu1 %5835, %v8390_v18   ;;  %v2371_v15 = vmax.f32 %v2363_v52, 0.0  ;;  %v2477_v44 = vadd.f32 %v6046_v30, %v10278_v9  ;;  %v2421_v36 = vadd.f32 %v6045_v31, %v10279_v11  ;;  %v2433_v14 = vsub.f32 %v2375_v40, %v2425_v5  ;;  %v10285_v31 = vld [vmem:[#allocation209_spill] sm:$0xff]  ;;  %v10287_v9 = vld [vmem:[#allocation200_spill] sm:$0xff] }
 0x5f1   : > { %3736 = vperm.xlu2 %5833, %v8396_v16   ;;  %v2480_v58 = vmax.f32 %v2472_v8, 0.0  ;;  %v2530_v2 = vadd.f32 %v6047_v3, %v10280_v25  ;;  %v2474_v60 = vadd.f32 %v6046_v30, %v10281_v61  ;;  %v2376_v62 = vsub.f32 %v2318_v53, %v2368_v49  ;;  %v10290_v61 = vld [vmem:[#allocation218_spill] sm:$0xff] }
 0x5f2   : > { %v2424_v37 = vmax.f32 %v2416_v41, 0.0  ;;  %v2483_v43 = vmax.f32 %v2475_v13, 0.0  ;;  %v2533_v10 = vadd.f32 %v6047_v3, %v10282_v6  ;;  %v2435_v48 = vsub.f32 %v2377_v56, %v2427_v38  ;;  %v6048_v13 = vld [vmem:[%s6421_s12 + $0x25] ss:$0 sm:$0xff] }
 0x5f3   : > { %v2426_v42 = vmax.f32 %v2418_v45, 0.0  ;;  %v2476_v52 = vadd.f32 %v6046_v30, %v10284_v35  ;;  %v2535_v40 = vadd.f32 %v6047_v3, %v10285_v31  ;;  %v2379_v5 = vsub.f32 %v2321_v28, %v2371_v15  ;;  %v10289_v28 = vld [vmem:[#allocation206_spill] sm:$0xff]  ;;  %v10291_v6 = vld [vmem:[#allocation219_spill] sm:$0xff] }
 0x5f4   : > { %v2485_v12 = vmax.f32 %v2477_v44, 0.0  ;;  %v2429_v8 = vmax.f32 %v2421_v36, 0.0  ;;  %v2479_v55 = vadd.f32 %v6046_v30, %v10286_v26  ;;  %v2488_v53 = vsub.f32 %v2430_v46, %v2480_v58 }
 0x5f5   : > { %v2538_v49 = vmax.f32 %v2530_v2, 0.0  ;;  %v2482_v41 = vmax.f32 %v2474_v60, 0.0  ;;  %v2588_v56 = vadd.f32 %v6048_v13, %v10287_v9  ;;  %v10288_v38 = vmov 58   ;;  %v10293_v9 = vld [vmem:[#allocation221_spill] sm:$0xff] }
 0x5f6   : > { %v8528_v47 = vpop.permute.xlu1 %3492  ;;  %v2432_v45 = vsub.f32 %v2374_v23, %v2424_v37  ;;  %v2491_v11 = vsub.f32 %v2433_v14, %v2483_v43  ;;  %v2541_v25 = vmax.f32 %v2533_v10, 0.0  ;;  %v2532_v15 = vadd.f32 %v6047_v3, %v10289_v28  ;;  %v10292_v14 = vld [vmem:[#allocation220_spill] sm:$0xff] }
 0x5f7   : > { %10283 = vst [vmem:[#allocation36_spill] sm:$0xff] %v8528_v47  ;;  %v2434_v30 = vsub.f32 %v2376_v62, %v2426_v42  ;;  %v2484_v44 = vmax.f32 %v2476_v52, 0.0  ;;  %v2543_v36 = vmax.f32 %v2535_v40, 0.0  ;;  %v2591_v46 = vadd.f32 %v6048_v13, %v10290_v61  ;;  %v10294_v62 = vld [vmem:[#allocation222_spill] sm:$0xff] }
 0x5f8   : > { %v8533_v57 = vpop.permute.xlu2 %3554  ;;  %3744 = vperm.xlu1 %5835, %v8415_v0   ;;  %v2493_v58 = vsub.f32 %v2435_v48, %v2485_v12  ;;  %v2437_v2 = vsub.f32 %v2379_v5, %v2429_v8  ;;  %v2487_v60 = vmax.f32 %v2479_v55, 0.0  ;;  %v2534_v35 = vadd.f32 %v6047_v3, %v10291_v6  ;;  %v10296_v12 = vld [vmem:[#allocation223_spill] sm:$0xff] }
 0x5f9   : > { %5836 = vset.pattern.permute.xlu2 %v10288_v38  ;;  %v2546_v31 = vsub.f32 %v2488_v53, %v2538_v49  ;;  %v2490_v26 = vsub.f32 %v2432_v45, %v2482_v41  ;;  %v2596_v23 = vmax.f32 %v2588_v56, 0.0  ;;  %v2593_v37 = vadd.f32 %v6048_v13, %v10292_v14  ;;  %v10297_v49 = vld [vmem:[#allocation224_spill] sm:$0xff]  ;;  %v10298_v56 = vld [vmem:[#allocation225_spill] sm:$0xff] }
 0x5fa   : > { %3774 = vperm.xlu2 %5836, %v8343_v4   ;;  %v2549_v43 = vsub.f32 %v2491_v11, %v2541_v25  ;;  %v2540_v10 = vmax.f32 %v2532_v15, 0.0  ;;  %v2537_v28 = vadd.f32 %v6047_v3, %v10293_v9  ;;  %v2646_v42 = vadd.f32 %v6049_v21, %v10294_v62  ;;  %v10299_v15 = vld [vmem:[#allocation226_spill] sm:$0xff]  ;;  %v10302_v9 = vld [vmem:[#allocation229_spill] sm:$0xff] }
 0x5fb   : > { %v2492_v40 = vsub.f32 %v2434_v30, %v2484_v44  ;;  %v2551_v48 = vsub.f32 %v2493_v58, %v2543_v36  ;;  %v2599_v5 = vmax.f32 %v2591_v46, 0.0  ;;  %v2590_v8 = vadd.f32 %v6048_v13, %v10296_v12  ;;  %v10300_v30 = vld [vmem:[#allocation227_spill] sm:$0xff] }
 0x5fc   : > { %v2495_v55 = vsub.f32 %v2437_v2, %v2487_v60  ;;  %v2542_v53 = vmax.f32 %v2534_v35, 0.0  ;;  %v2649_v41 = vadd.f32 %v6049_v21, %v10297_v49  ;;  %v2592_v45 = vadd.f32 %v6048_v13, %v10298_v56  ;;  %v6050_v2 = vld [vmem:[%s6421_s12 + $0x27] ss:$0 sm:$0xff]  ;;  %v10301_v60 = vld [vmem:[#allocation228_spill] sm:$0xff] }
 0x5fd   : > { %v2604_v3 = vsub.f32 %v2546_v31, %v2596_v23  ;;  %v2601_v25 = vmax.f32 %v2593_v37, 0.0  ;;  %v2651_v61 = vadd.f32 %v6049_v21, %v10299_v15  ;;  %v2595_v44 = vadd.f32 %v6048_v13, %v10300_v30  ;;  %v10303_v31 = vld [vmem:[#allocation230_spill] sm:$0xff]  ;;  %v10304_v12 = vld [vmem:[#allocation231_spill] sm:$0xff] }
 0x5fe   : > { %v8547_v52 = vpop.permute.xlu1 %3500  ;;  %v2548_v36 = vsub.f32 %v2490_v26, %v2540_v10  ;;  %v2545_v46 = vmax.f32 %v2537_v28, 0.0  ;;  %v2654_v58 = vmax.f32 %v2646_v42, 0.0  ;;  %v2704_v6 = vadd.f32 %v6050_v2, %v10301_v60  ;;  %v10305_v42 = vld [vmem:[#allocation232_spill] sm:$0xff] }
 0x5ff   : > { %10295 = vst [vmem:[#allocation37_spill] sm:$0xff] %v8547_v52  ;;  %v2607_v35 = vsub.f32 %v2549_v43, %v2599_v5  ;;  %v2598_v14 = vmax.f32 %v2590_v8, 0.0  ;;  %v2707_v23 = vadd.f32 %v6050_v2, %v10303_v31  ;;  %v2550_v37 = vsub.f32 %v2492_v40, %v2542_v53  ;;  %v10306_v43 = vld [vmem:[#allocation233_spill] sm:$0xff]  ;;  %v6051_v53 = vld [vmem:[%s6421_s12 + $0x28] ss:$0 sm:$0xff] }
 0x600   : > { %v8552_v11 = vpop.permute.xlu2 %3562  ;;  %5838 = vset.pattern.permute.xlu1 %v10288_v38  ;;  %v2648_v38 = vadd.f32 %v6049_v21, %v10302_v9  ;;  %v2657_v62 = vmax.f32 %v2649_v41, 0.0  ;;  %v2600_v13 = vmax.f32 %v2592_v45, 0.0  ;;  %v2650_v49 = vadd.f32 %v6049_v21, %v10304_v12  ;;  %v10307_v41 = vld [vmem:[#allocation234_spill] sm:$0xff] }
 0x601   : > { %3782 = vperm.xlu1 %5838, %v8366_v34   ;;  %v2609_v26 = vsub.f32 %v2551_v48, %v2601_v25  ;;  %v2659_v10 = vmax.f32 %v2651_v61, 0.0  ;;  %v2603_v28 = vmax.f32 %v2595_v44, 0.0  ;;  %v2709_v56 = vadd.f32 %v6050_v2, %v10305_v42  ;;  %v10308_v25 = vld [vmem:[#allocation235_spill] sm:$0xff] }
 0x602   : > { %3786 = vperm.xlu2 %5836, %v8371_v20   ;;  %v2553_v15 = vsub.f32 %v2495_v55, %v2545_v46  ;;  %v2662_v30 = vsub.f32 %v2604_v3, %v2654_v58  ;;  %v2712_v60 = vmax.f32 %v2704_v6, 0.0  ;;  %v2653_v5 = vadd.f32 %v6049_v21, %v10306_v43  ;;  %v10309_v3 = vld [vmem:[#allocation236_spill] sm:$0xff]  ;;  %v10310_v6 = vld [vmem:[#allocation237_spill] sm:$0xff] }
 0x603   : > { %v2606_v9 = vsub.f32 %v2548_v36, %v2598_v14  ;;  %v2656_v31 = vmax.f32 %v2648_v38, 0.0  ;;  %v2715_v40 = vmax.f32 %v2707_v23, 0.0  ;;  %v2762_v45 = vadd.f32 %v6051_v53, %v10307_v41  ;;  %v10311_v38 = vld [vmem:[#allocation238_spill] sm:$0xff]  ;;  %v10314_v43 = vld [vmem:[#allocation241_spill] sm:$0xff] }
 0x604   : > { %v2665_v52 = vsub.f32 %v2607_v35, %v2657_v62  ;;  %v2608_v12 = vsub.f32 %v2550_v37, %v2600_v13  ;;  %v2658_v48 = vmax.f32 %v2650_v49, 0.0  ;;  %v2706_v61 = vadd.f32 %v6050_v2, %v10308_v25  ;;  %v10312_v13 = vld [vmem:[#allocation239_spill] sm:$0xff]  ;;  %v10315_v41 = vld [vmem:[#allocation242_spill] sm:$0xff] }
 0x605   : > { %v2667_v44 = vsub.f32 %v2609_v26, %v2659_v10  ;;  %v2611_v42 = vsub.f32 %v2553_v15, %v2603_v28  ;;  %v2717_v55 = vmax.f32 %v2709_v56, 0.0  ;;  %v2765_v46 = vadd.f32 %v6051_v53, %v10309_v3  ;;  %v6052_v28 = vld [vmem:[%s6421_s12 + $0x29] ss:$0 sm:$0xff] }
 0x606   : > { %v8566_v8 = vpop.permute.xlu1 %3512  ;;  %v2720_v36 = vsub.f32 %v2662_v30, %v2712_v60  ;;  %v2661_v58 = vmax.f32 %v2653_v5, 0.0  ;;  %v2708_v14 = vadd.f32 %v6050_v2, %v10310_v6  ;;  %v2767_v35 = vadd.f32 %v6051_v53, %v10311_v38  ;;  %v10313_v56 = vld [vmem:[#allocation240_spill] sm:$0xff]  ;;  %v10316_v3 = vld [vmem:[#allocation243_spill] sm:$0xff] }
 0x607   : > { %v2664_v23 = vsub.f32 %v2606_v9, %v2656_v31  ;;  %v2723_v37 = vsub.f32 %v2665_v52, %v2715_v40  ;;  %v2770_v62 = vmax.f32 %v2762_v45, 0.0  ;;  %v2711_v49 = vadd.f32 %v6050_v2, %v10312_v13  ;;  %v10317_v31 = vld [vmem:[#allocation244_spill] sm:$0xff]  ;;  %v10319_v13 = vld [vmem:[#allocation246_spill] sm:$0xff] }
 0x608   : > { %v2666_v26 = vsub.f32 %v2608_v12, %v2658_v48  ;;  %v2714_v10 = vmax.f32 %v2706_v61, 0.0  ;;  %v2820_v15 = vadd.f32 %v6052_v28, %v10313_v56  ;;  %v2764_v30 = vadd.f32 %v6051_v53, %v10314_v43  ;;  %v10318_v12 = vld [vmem:[#allocation245_spill] sm:$0xff]  ;;  %v6053_v61 = vld [vmem:[%s6421_s12 + $0x2a] ss:$0 sm:$0xff] }
 0x609   : > { %v8572_v21 = vpop.permute.xlu2 %3600  ;;  %3790 = vperm.xlu1 %5838, %v8390_v18   ;;  %v2725_v60 = vsub.f32 %v2667_v44, %v2717_v55  ;;  %v2773_v5 = vmax.f32 %v2765_v46, 0.0  ;;  %v2823_v25 = vadd.f32 %v6052_v28, %v10315_v41  ;;  %v2766_v6 = vadd.f32 %v6051_v53, %v10316_v3  ;;  %v10321_v43 = vld [vmem:[#allocation247_spill] sm:$0xff] }
 0x60a   : > { %3794 = vperm.xlu2 %5836, %v8396_v16   ;;  %v2669_v38 = vsub.f32 %v2611_v42, %v2661_v58  ;;  %v2716_v9 = vmax.f32 %v2708_v14, 0.0  ;;  %v2775_v52 = vmax.f32 %v2767_v35, 0.0  ;;  %v2825_v40 = vadd.f32 %v6052_v28, %v10317_v31  ;;  %v10322_v14 = vld [vmem:[#allocation248_spill] sm:$0xff] }
 0x60b   : > { %v2778_v2 = vsub.f32 %v2720_v36, %v2770_v62  ;;  %v2719_v45 = vmax.f32 %v2711_v49, 0.0  ;;  %v2769_v48 = vadd.f32 %v6051_v53, %v10318_v12  ;;  %v2878_v56 = vadd.f32 %v6053_v61, %v10319_v13  ;;  %v10323_v49 = vld [vmem:[#allocation249_spill] sm:$0xff] }
 0x60c   : > { %v2722_v44 = vsub.f32 %v2664_v23, %v2714_v10  ;;  %v2828_v55 = vmax.f32 %v2820_v15, 0.0  ;;  %v2772_v46 = vmax.f32 %v2764_v30, 0.0  ;;  %v2822_v41 = vadd.f32 %v6052_v28, %v10321_v43  ;;  %v10326_v43 = vld [vmem:[#allocation251_spill] sm:$0xff] }
 0x60d   : > { %v2781_v3 = vsub.f32 %v2723_v37, %v2773_v5  ;;  %v2831_v42 = vmax.f32 %v2823_v25, 0.0  ;;  %v2774_v58 = vmax.f32 %v2766_v6, 0.0  ;;  %v2881_v35 = vadd.f32 %v6053_v61, %v10322_v14  ;;  %v10325_v37 = vld [vmem:[#allocation250_spill] sm:$0xff]  ;;  %v10327_v14 = vld [vmem:[#allocation256_spill] sm:$0xff] }
 0x60e   : > { %v2724_v53 = vsub.f32 %v2666_v26, %v2716_v9  ;;  %v2783_v36 = vsub.f32 %v2725_v60, %v2775_v52  ;;  %v2833_v62 = vmax.f32 %v2825_v40, 0.0  ;;  %v2824_v12 = vadd.f32 %v6052_v28, %v10323_v49  ;;  %v8601_v40 = vld [vmem:[%s6421_s12 + $0x2b] ss:$0 sm:$0xff] }
 0x60f   : > { %v8588_v39 = vpop.permute.xlu1 %3550  ;;  %v10324_v23 = vmov 59   ;;  %v2727_v10 = vsub.f32 %v2669_v38, %v2719_v45  ;;  %v2777_v15 = vmax.f32 %v2769_v48, 0.0  ;;  %v2886_v30 = vmax.f32 %v2878_v56, 0.0  ;;  %v10328_v56 = vld [vmem:[#allocation252_spill] sm:$0xff]  ;;  %v10333_v49 = vld [vmem:[#allocation255_spill] sm:$0xff] }
 0x610   : > { %10320 = vst [vmem:[#allocation38_spill] sm:$0xff] %v8588_v39  ;;  %v2883_v5 = vadd.f32 %v6053_v61, %v10325_v37  ;;  %v2836_v25 = vsub.f32 %v2778_v2, %v2828_v55  ;;  %v2780_v6 = vsub.f32 %v2722_v44, %v2772_v46  ;;  %v2830_v13 = vmax.f32 %v2822_v41, 0.0  ;;  %v10329_v2 = vld [vmem:[#allocation253_spill] sm:$0xff] }
 0x611   : > { %v8592_v31 = vpop.permute.xlu2 %3612  ;;  %3802 = vperm.xlu1 %5838, %v8415_v0   ;;  %v2827_v26 = vadd.f32 %v6052_v28, %v10326_v43  ;;  %v2839_v60 = vsub.f32 %v2781_v3, %v2831_v42  ;;  %v2782_v9 = vsub.f32 %v2724_v53, %v2774_v58  ;;  %v2889_v52 = vmax.f32 %v2881_v35, 0.0  ;;  %v8609_v28 = vld [vmem:[%s6421_s12 + $0x2c] ss:$0 sm:$0xff]  ;;  %v10330_v3 = vld [vmem:[#allocation262_spill] sm:$0xff] }
 0x612   : > { %5839 = vset.pattern.permute.xlu2 %v10324_v23  ;;  %v2941_v38 = vadd.f32 %v8601_v40, %v10327_v14  ;;  %v2841_v45 = vsub.f32 %v2783_v36, %v2833_v62  ;;  %v2832_v48 = vmax.f32 %v2824_v12, 0.0  ;;  %v2880_v55 = vadd.f32 %v6053_v61, %v10329_v2  ;;  %v10332_v36 = vld [vmem:[#allocation254_spill] sm:$0xff] }
 0x613   : > { %3832 = vperm.xlu2 %5839, %v8343_v4   ;;  %v2936_v4 = vadd.f32 %v8601_v40, %v10328_v56  ;;  %v2785_v44 = vsub.f32 %v2727_v10, %v2777_v15  ;;  %v2894_v46 = vsub.f32 %v2836_v25, %v2886_v30  ;;  %v2891_v41 = vmax.f32 %v2883_v5, 0.0  ;;  %v10334_v10 = vld [vmem:[#allocation257_spill] sm:$0xff]  ;;  %v8620_v30 = vld [vmem:[%s6421_s12 + $0x2d] ss:$0 sm:$0xff]  ;;  %v10336_v56 = vld [vmem:[#allocation258_spill] sm:$0xff] }
 0x614   : > { %v2999_v42 = vadd.f32 %v8609_v28, %v10330_v3  ;;  %v2838_v35 = vsub.f32 %v2780_v6, %v2830_v13  ;;  %v2835_v53 = vmax.f32 %v2827_v26, 0.0  ;;  %v2939_v62 = vadd.f32 %v8601_v40, %v10332_v36  ;;  %v10335_v5 = vld [vmem:[#allocation268_spill] sm:$0xff]  ;;  %v10338_v36 = vld [vmem:[#allocation274_spill] sm:$0xff] }
 0x615   : > { %v2882_v12 = vadd.f32 %v6053_v61, %v10333_v49  ;;  %v2897_v37 = vsub.f32 %v2839_v60, %v2889_v52  ;;  %v2949_v43 = vmax.f32 %v2941_v38, 0.0  ;;  %v2885_v15 = vadd.f32 %v6053_v61, %v10334_v10  ;;  %v10337_v61 = vld [vmem:[#allocation259_spill] sm:$0xff] }
 0x616   : > { %v3057_v25 = vadd.f32 %v8620_v30, %v10335_v5  ;;  %v2840_v6 = vsub.f32 %v2782_v9, %v2832_v48  ;;  %v2944_v13 = vmax.f32 %v2936_v4, 0.0  ;;  %v2888_v26 = vmax.f32 %v2880_v55, 0.0  ;;  %v8633_v3 = vld [vmem:[%s6421_s12 + $0x2e] ss:$0 sm:$0xff]  ;;  %v8641_v10 = vld [vmem:[%s6421_s12 + $0x2f] ss:$0 sm:$0xff] }
 0x617   : > { %v8613_v58 = vpop.permute.xlu1 %3558  ;;  %v2994_v2 = vadd.f32 %v8609_v28, %v10336_v56  ;;  %v2899_v60 = vsub.f32 %v2841_v45, %v2891_v41  ;;  %v2938_v52 = vadd.f32 %v8601_v40, %v10337_v61  ;;  %v3007_v38 = vmax.f32 %v2999_v42, 0.0  ;;  %v10339_v4 = vld [vmem:[#allocation260_spill] sm:$0xff]  ;;  %v10340_v42 = vld [vmem:[#allocation13_spill] sm:$0xff] }
 0x618   : > { %10331 = vst [vmem:[#allocation39_spill] sm:$0xff] %v8613_v58  ;;  %v3115_v49 = vadd.f32 %v8633_v3, %v10338_v36  ;;  %v2947_v9 = vmax.f32 %v2939_v62, 0.0  ;;  %v2890_v48 = vmax.f32 %v2882_v12, 0.0  ;;  %v2997_v55 = vadd.f32 %v8609_v28, %v10339_v4  ;;  %v8648_v58 = vld [vmem:[%s6421_s12 + $0x30] ss:$0 sm:$0xff] }
 0x619   : > { %v8624_v14 = vpop.permute.xlu2 %3620  ;;  %5841 = vset.pattern.permute.xlu1 %v10324_v23  ;;  %v2843_v23 = vsub.f32 %v2785_v44, %v2835_v53  ;;  %v2893_v45 = vmax.f32 %v2885_v15, 0.0  ;;  %v3065_v41 = vmax.f32 %v3057_v25, 0.0  ;;  %v3173_v5 = vadd.f32 %v8641_v10, %v10340_v42 }
 0x61a   : > { %3840 = vperm.xlu1 %5841, %v8366_v34   ;;  %v2957_v34 = vsub.f32 %v2899_v60, %v2949_v43  ;;  %v2952_v56 = vsub.f32 %v2894_v46, %v2944_v13  ;;  %v2896_v61 = vsub.f32 %v2838_v35, %v2888_v26  ;;  %v3002_v36 = vmax.f32 %v2994_v2, 0.0  ;;  %v10342_v43 = vld [vmem:[#allocation15_spill] sm:$0xff]  ;;  %v10343_v46 = vld [vmem:[#allocation264_spill] sm:$0xff] }
 0x61b   : > { %3844 = vperm.xlu2 %5839, %v8371_v20   ;;  %v10341_v20 = vld [vmem:[#allocation261_spill] sm:$0xff]  ;;  %v2946_v53 = vmax.f32 %v2938_v52, 0.0  ;;  %v3123_v12 = vmax.f32 %v3115_v49, 0.0  ;;  %v3231_v15 = vadd.f32 %v8648_v58, %v10342_v43  ;;  %v2955_v60 = vsub.f32 %v2897_v37, %v2947_v9  ;;  %v10345_v43 = vld [vmem:[#allocation263_spill] sm:$0xff] }
 0x61c   : > { %v2940_v44 = vadd.f32 %v8601_v40, %v10341_v20  ;;  %v3015_v62 = vsub.f32 %v2957_v34, %v3007_v38  ;;  %v2898_v4 = vsub.f32 %v2840_v6, %v2890_v48  ;;  %v3005_v42 = vmax.f32 %v2997_v55, 0.0  ;;  %v8659_v52 = vld [vmem:[%s6421_s12 + $0x31] ss:$0 sm:$0xff]  ;;  %v10344_v38 = vld [vmem:[#allocation22_spill] sm:$0xff] }
 0x61d   : > { %v3052_v35 = vadd.f32 %v8620_v30, %v10343_v46  ;;  %v8656_v13 = vsub.f32 %v2843_v23, %v2893_v45  ;;  %v3181_v2 = vmax.f32 %v3173_v5, 0.0  ;;  %v3289_v49 = vadd.f32 %v8659_v52, %v10344_v38  ;;  %v10346_v6 = vld [vmem:[#allocation270_spill] sm:$0xff]  ;;  %v8689_v46 = vld [vmem:[%s6421_s12 + $0x33] ss:$0 sm:$0xff] }
 0x61e   : > { %v3073_v26 = vsub.f32 %v3015_v62, %v3065_v41  ;;  %v3010_v34 = vsub.f32 %v2952_v56, %v3002_v36  ;;  %v2948_v20 = vmax.f32 %v2940_v44, 0.0  ;;  %v8665_v37 = vadd.f32 %v8601_v40, %v10345_v43  ;;  %v8675_v41 = vld [vmem:[%s6421_s12 + $0x32] ss:$0 sm:$0xff] }
 0x61f   : > { %v8652_v25 = vpop.permute.xlu1 %3570  ;;  %v3110_v9 = vadd.f32 %v8633_v3, %v10346_v6  ;;  %v8672_v23 = vsub.f32 %v2896_v61, %v2946_v53  ;;  %v3239_v45 = vmax.f32 %v3231_v15, 0.0  ;;  %v3347_v5 = vadd.f32 %v8675_v41, %v8300_v63  ;;  %v10347_v36 = vld [vmem:[#allocation265_spill] sm:$0xff]  ;;  %v10348_v62 = vld [vmem:[#allocation276_spill] sm:$0xff]  ;;  %v10349_v61 = vld [vmem:[#allocation266_spill] sm:$0xff] }
 0x620   : > { %v3131_v55 = vsub.f32 %v3073_v26, %v3123_v12  ;;  %v3013_v40 = vsub.f32 %v2955_v60, %v3005_v42  ;;  %v3060_v56 = vmax.f32 %v3052_v35, 0.0  ;;  %v8682_v44 = vadd.f32 %v8609_v28, %v10347_v36  ;;  %v10350_v35 = vld [vmem:[#allocation9_spill] sm:$0xff]  ;;  %v10351_v38 = vld [vmem:[#allocation272_spill] sm:$0xff]  ;;  %v10352_v36 = vld [vmem:[#allocation18_spill] sm:$0xff] }
 0x621   : > { %v3055_v53 = vadd.f32 %v8620_v30, %v10349_v61  ;;  %v3297_v15 = vmax.f32 %v3289_v49, 0.0  ;;  %v3405_v63 = vadd.f32 %v8689_v46, %v8359_v54  ;;  %v3118_v42 = vmax.f32 %v3110_v9, 0.0  ;;  %v8701_v49 = vld [vmem:[%s6421_s12 + $0x34] ss:$0 sm:$0xff] }
 0x622   : > { %v8669_v48 = vpop.permute.xlu2 %3658  ;;  %3848 = vperm.xlu1 %5841, %v8390_v18   ;;  %v3168_v18 = vadd.f32 %v8641_v10, %v10348_v62  ;;  %v3189_v12 = vsub.f32 %v3131_v55, %v3181_v2  ;;  %v3226_v26 = vadd.f32 %v8648_v58, %v10350_v35  ;;  %v3113_v43 = vadd.f32 %v8633_v3, %v10351_v38 }
 0x623   : > { %3852 = vperm.xlu2 %5839, %v8396_v16   ;;  %v8693_v16 = vsub.f32 %v2898_v4, %v2948_v20  ;;  %v3355_v2 = vmax.f32 %v3347_v5, 0.0  ;;  %v3463_v55 = vadd.f32 %v8701_v49, %v8434_v51  ;;  %v3068_v54 = vsub.f32 %v3010_v34, %v3060_v56  ;;  %v10354_v51 = vld [vmem:[#allocation278_spill] sm:$0xff] }
 0x624   : > { %v3247_v6 = vsub.f32 %v3189_v12, %v3239_v45  ;;  %v3176_v20 = vmax.f32 %v3168_v18, 0.0  ;;  %v3284_v9 = vadd.f32 %v8659_v52, %v10352_v36  ;;  %v3063_v61 = vmax.f32 %v3055_v53, 0.0  ;;  %v8711_v45 = vld [vmem:[%s6421_s12 + $0x35] ss:$0 sm:$0xff] }
 0x625   : > { %v3413_v38 = vmax.f32 %v3405_v63, 0.0  ;;  %v3521_v5 = vadd.f32 %v8711_v45, %v8492_v19  ;;  %v3126_v12 = vsub.f32 %v3068_v54, %v3118_v42  ;;  %v3171_v34 = vadd.f32 %v8641_v10, %v10354_v51 }
 0x626   : > { %v3305_v35 = vsub.f32 %v3247_v6, %v3297_v15  ;;  %v3234_v56 = vmax.f32 %v3226_v26, 0.0  ;;  %v3342_v18 = vadd.f32 %v8675_v41, %v8248_v1  ;;  %v3121_v53 = vmax.f32 %v3113_v43, 0.0  ;;  %v8723_v6 = vld [vmem:[%s6421_s12 + $0x36] ss:$0 sm:$0xff]  ;;  %v10356_v26 = vld [vmem:[#allocation14_spill] sm:$0xff] }
 0x627   : > { %v3471_v63 = vmax.f32 %v3463_v55, 0.0  ;;  %v3579_v19 = vadd.f32 %v8723_v6, %v8552_v11  ;;  %v10355_v42 = vmov 60   ;;  %v3184_v54 = vsub.f32 %v3126_v12, %v3176_v20 }
 0x628   : > { %v8708_v62 = vpop.permute.xlu1 %3608  ;;  %v3363_v15 = vsub.f32 %v3305_v35, %v3355_v2  ;;  %v3229_v51 = vadd.f32 %v8648_v58, %v10356_v26  ;;  %v3292_v1 = vmax.f32 %v3284_v9, 0.0  ;;  %v3400_v4 = vadd.f32 %v8689_v46, %v8317_v50  ;;  %v8737_v35 = vld [vmem:[%s6421_s12 + $0x37] ss:$0 sm:$0xff] }
 0x629   : > { %10353 = vst [vmem:[#allocation40_spill] sm:$0xff] %v8708_v62  ;;  %v3071_v43 = vsub.f32 %v3013_v40, %v3063_v61  ;;  %v3529_v55 = vmax.f32 %v3521_v5, 0.0  ;;  %v3637_v11 = vadd.f32 %v8737_v35, %v8624_v14  ;;  %v3179_v20 = vmax.f32 %v3171_v34, 0.0  ;;  %v10357_v50 = vld [vmem:[#allocation20_spill] sm:$0xff]  ;;  %v10358_v34 = vld [vmem:[#allocation269_spill] sm:$0xff] }
 0x62a   : > { %v8719_v36 = vpop.permute.xlu2 %3670  ;;  %3860 = vperm.xlu1 %5841, %v8415_v0   ;;  %v8733_v0 = vld [vmem:[%s6404_s19] sm:$0xff]  ;;  %v3421_v2 = vsub.f32 %v3363_v15, %v3413_v38  ;;  %v3242_v12 = vsub.f32 %v3184_v54, %v3234_v56  ;;  %v3350_v60 = vmax.f32 %v3342_v18, 0.0  ;;  %v3458_v9 = vadd.f32 %v8701_v49, %v8387_v32 }
 0x62b   : > { %5842 = vset.pattern.permute.xlu2 %v10355_v42  ;;  %v3129_v26 = vsub.f32 %v3071_v43, %v3121_v53  ;;  %v3287_v62 = vadd.f32 %v8659_v52, %v10357_v50  ;;  %v3587_v47 = vmax.f32 %v3579_v19, 0.0  ;;  %v3237_v40 = vmax.f32 %v3229_v51, 0.0  ;;  %v8761_v43 = vld [vmem:[%s6421_s12 + $0x38] ss:$0 sm:$0xff] }
 0x62c   : > { %3890 = vperm.xlu2 %5842, %v8733_v0   ;;  %v3479_v39 = vsub.f32 %v3421_v2, %v3471_v63  ;;  %v3300_v61 = vsub.f32 %v3242_v12, %v3292_v1  ;;  %v3408_v38 = vmax.f32 %v3400_v4, 0.0  ;;  %v3516_v5 = vadd.f32 %v8711_v45, %v8455_v17  ;;  %v10360_v12 = vld [vmem:[#allocation267_spill] sm:$0xff] }
 0x62d   : > { %v8751_v56 = vadd.f32 %v8609_v28, %v10358_v34  ;;  %v3345_v32 = vadd.f32 %v8675_v41, %v8274_v29  ;;  %v3645_v53 = vmax.f32 %v3637_v11, 0.0  ;;  %v3187_v15 = vsub.f32 %v3129_v26, %v3179_v20 }
 0x62e   : > { %v3537_v18 = vsub.f32 %v3479_v39, %v3529_v55  ;;  %v3358_v63 = vsub.f32 %v3300_v61, %v3350_v60  ;;  %v3466_v4 = vmax.f32 %v3458_v9, 0.0  ;;  %v3574_v19 = vadd.f32 %v8723_v6, %v8513_v59  ;;  %v8765_v39 = vld [vmem:[%s6404_s19 + $0x10] sm:$0xff]  ;;  %v10361_v61 = vld [vmem:[#allocation275_spill] sm:$0xff] }
 0x62f   : > { %v3295_v54 = vmax.f32 %v3287_v62, 0.0  ;;  %v3403_v51 = vadd.f32 %v8689_v46, %v8335_v24  ;;  %v3245_v60 = vsub.f32 %v3187_v15, %v3237_v40  ;;  %v3524_v55 = vmax.f32 %v3516_v5, 0.0 }
 0x630   : > { %v8747_v14 = vpop.permute.xlu1 %3616  ;;  %v3595_v1 = vsub.f32 %v3537_v18, %v3587_v47  ;;  %v3416_v2 = vsub.f32 %v3358_v63, %v3408_v38  ;;  %v3632_v59 = vadd.f32 %v8737_v35, %v8572_v21  ;;  %v3353_v24 = vmax.f32 %v3345_v32, 0.0  ;;  %v10359_v47 = vld [vmem:[#allocation33_spill] sm:$0xff] }
 0x631   : > { %v3461_v62 = vadd.f32 %v8701_v49, %v10359_v47  ;;  %v2998_v9 = vadd.f32 %v8609_v28, %v10360_v12  ;;  %v3582_v50 = vmax.f32 %v3574_v19, 0.0  ;;  %v3690_v40 = vadd.f32 %v8761_v43, %v8669_v48 }
 0x632   : > { %v3679_v17 = vpop.permute.xlu2 %3678  ;;  %5844 = vset.pattern.permute.xlu1 %v10355_v42  ;;  %v8771_v42 = vld [vmem:[%s6404_s19 + $0x18] sm:$0xff]  ;;  %v3653_v11 = vsub.f32 %v3595_v1, %v3645_v53  ;;  %v3474_v26 = vsub.f32 %v3416_v2, %v3466_v4  ;;  %v3059_v21 = vadd.f32 %v8620_v30, %v10361_v61  ;;  %v3303_v38 = vsub.f32 %v3245_v60, %v3295_v54  ;;  %v10363_v4 = vld [vmem:[#allocation8_spill] sm:$0xff] }
 0x633   : > { %v3695_v29 = vadd.f32 %v8761_v43, %v3679_v17  ;;  %3898 = vperm.xlu1 %5844, %v8765_v39   ;;  %v3411_v5 = vmax.f32 %v3403_v51, 0.0  ;;  %v10362_v32 = vmax.f32 %v8665_v37, 0.0  ;;  %v3519_v28 = vadd.f32 %v8711_v45, %v8475_v22 }
 0x634   : > { %3902 = vperm.xlu2 %5842, %v8771_v42   ;;  %v3532_v53 = vsub.f32 %v3474_v26, %v3524_v55  ;;  %v3640_v15 = vmax.f32 %v3632_v59, 0.0  ;;  %v3009_v48 = vmax.f32 %v8751_v56, 0.0  ;;  %v3117_v19 = vadd.f32 %v8633_v3, %v10363_v4  ;;  %v10365_v56 = vld [vmem:[#allocation17_spill] sm:$0xff] }
 0x635   : > { %v3703_v20 = vmax.f32 %v3695_v29, 0.0  ;;  %v2959_v18 = vsub.f32 %v8656_v13, %v10362_v32  ;;  %v3361_v17 = vsub.f32 %v3303_v38, %v3353_v24  ;;  %v3469_v54 = vmax.f32 %v3461_v62, 0.0  ;;  %v8804_v24 = vld [vmem:[%s6404_s19 + $0x20] sm:$0xff]  ;;  %v10367_v38 = vld [vmem:[#allocation271_spill] sm:$0xff]  ;;  %v10368_v32 = vld [vmem:[#allocation273_spill] sm:$0xff] }
 0x636   : > { %v10364_v37 = vmax.f32 %v8682_v44, 0.0  ;;  %v3590_v51 = vsub.f32 %v3532_v53, %v3582_v50  ;;  %v3577_v22 = vadd.f32 %v8723_v6, %v8533_v57  ;;  %v3698_v1 = vmax.f32 %v3690_v40, 0.0  ;;  %v8810_v62 = vld [vmem:[%s6421_s12 + $0x39] ss:$0 sm:$0xff] }
 0x637   : > { %v8782_v34 = vsub.f32 %v3653_v11, %v3703_v20  ;;  %v3006_v29 = vmax.f32 %v2998_v9, 0.0  ;;  %v3067_v60 = vmax.f32 %v3059_v21, 0.0  ;;  %v3175_v2 = vadd.f32 %v8641_v10, %v10365_v56  ;;  %v8814_v11 = vld [vmem:[%s6404_s19 + $0x28] sm:$0xff] }
 0x638   : > { %v8789_v63 = vpop.permute.xlu1 %3628  ;;  %v8797_v13 = vsub.f32 %v8672_v23, %v10364_v37  ;;  %v3419_v55 = vsub.f32 %v3361_v17, %v3411_v5  ;;  %v3527_v44 = vmax.f32 %v3519_v28, 0.0  ;;  %v3648_v23 = vsub.f32 %v3590_v51, %v3640_v15  ;;  %v10366_v9 = vld [vmem:[#allocation23_spill] sm:$0xff]  ;;  %v10371_v37 = vld [vmem:[#allocation10_spill] sm:$0xff] }
 0x639   : > { %v3635_v47 = vadd.f32 %v8737_v35, %v8592_v31  ;;  %v3017_v20 = vsub.f32 %v2959_v18, %v3009_v48  ;;  %v3125_v12 = vmax.f32 %v3117_v19, 0.0  ;;  %v3233_v26 = vadd.f32 %v8648_v58, %v10366_v9  ;;  %v10369_v18 = vld [vmem:[#allocation26_spill] sm:$0xff] }
 0x63a   : > { %v3477_v50 = vsub.f32 %v3419_v55, %v3469_v54  ;;  %v3585_v40 = vmax.f32 %v3577_v22, 0.0  ;;  %v3706_v61 = vsub.f32 %v3648_v23, %v3698_v1  ;;  %v3693_v21 = vadd.f32 %v8761_v43, %v8719_v36  ;;  %v10370_v54 = vld [vmem:[#allocation277_spill] sm:$0xff] }
 0x63b   : > { %v3717_v59 = vpop.permute.xlu2 %3716  ;;  %3906 = vperm.xlu1 %5844, %v8804_v24   ;;  %v3054_v5 = vadd.f32 %v8620_v30, %v10367_v38  ;;  %v3056_v53 = vadd.f32 %v8620_v30, %v10368_v32  ;;  %v3075_v28 = vsub.f32 %v3017_v20, %v3067_v60  ;;  %v3183_v15 = vmax.f32 %v3175_v2, 0.0  ;;  %v10372_v60 = vld [vmem:[#allocation31_spill] sm:$0xff] }
 0x63c   : > { %v3748_v57 = vadd.f32 %v8810_v62, %v3717_v59  ;;  %3910 = vperm.xlu2 %5842, %v8814_v11   ;;  %v3291_v48 = vadd.f32 %v8659_v52, %v10369_v18  ;;  %v3535_v4 = vsub.f32 %v3477_v50, %v3527_v44  ;;  %v3643_v19 = vmax.f32 %v3635_v47, 0.0  ;;  %v10373_v47 = vld [vmem:[#allocation12_spill] sm:$0xff]  ;;  %v8841_v50 = vld [vmem:[%s6404_s19 + $0x38] sm:$0xff] }
 0x63d   : > { %v3112_v36 = vadd.f32 %v8633_v3, %v10370_v54  ;;  %v3114_v51 = vadd.f32 %v8633_v3, %v10371_v37  ;;  %v3133_v22 = vsub.f32 %v3075_v28, %v3125_v12  ;;  %v3241_v1 = vmax.f32 %v3233_v26, 0.0 }
 0x63e   : > { %v3756_v31 = vmax.f32 %v3748_v57, 0.0  ;;  %v3014_v30 = vsub.f32 %v8693_v16, %v3006_v29  ;;  %v3349_v2 = vadd.f32 %v8675_v41, %v10372_v60  ;;  %v3593_v55 = vsub.f32 %v3535_v4, %v3585_v40  ;;  %v10378_v60 = vld [vmem:[#allocation28_spill] sm:$0xff] }
 0x63f   : > { %v3701_v59 = vmax.f32 %v3693_v21, 0.0  ;;  %v3062_v44 = vmax.f32 %v3054_v5, 0.0  ;;  %v3064_v23 = vmax.f32 %v3056_v53, 0.0  ;;  %v3170_v57 = vadd.f32 %v8641_v10, %v10373_v47  ;;  %v10375_v21 = vld [vmem:[#allocation19_spill] sm:$0xff] }
 0x640   : > { %v8827_v17 = vsub.f32 %v3706_v61, %v3756_v31  ;;  %v3191_v20 = vsub.f32 %v3133_v22, %v3183_v15  ;;  %v3299_v3 = vmax.f32 %v3291_v48, 0.0  ;;  %v3407_v16 = vadd.f32 %v8689_v46, %v8449_v7  ;;  %v10376_v48 = vld [vmem:[#allocation24_spill] sm:$0xff]  ;;  %v10377_v22 = vld [vmem:[#allocation11_spill] sm:$0xff] }
 0x641   : > { %v8833_v56 = vpop.permute.xlu1 %3666  ;;  %v3651_v29 = vsub.f32 %v3593_v55, %v3643_v19  ;;  %v10374_v26 = vmov 61   ;;  %v3120_v40 = vmax.f32 %v3112_v36, 0.0  ;;  %v3122_v61 = vmax.f32 %v3114_v51, 0.0 }
 0x642   : > { %v3228_v31 = vadd.f32 %v8648_v58, %v10375_v21  ;;  %v3249_v38 = vsub.f32 %v3191_v20, %v3241_v1  ;;  %v3357_v5 = vmax.f32 %v3349_v2, 0.0  ;;  %v3465_v32 = vadd.f32 %v8701_v49, %v8508_v27  ;;  %v10380_v20 = vld [vmem:[#allocation32_spill] sm:$0xff]  ;;  %v10381_v21 = vld [vmem:[#allocation25_spill] sm:$0xff] }
 0x643   : > { %v3729_v9 = vpop.permute.xlu2 %3728  ;;  %3918 = vperm.xlu1 %5844, %v8841_v50   ;;  %v3709_v53 = vsub.f32 %v3651_v29, %v3701_v59  ;;  %v3070_v7 = vsub.f32 %v8797_v13, %v3062_v44  ;;  %v3072_v15 = vsub.f32 %v3014_v30, %v3064_v23  ;;  %v3178_v18 = vmax.f32 %v3170_v57, 0.0 }
 0x644   : > { %v3751_v12 = vadd.f32 %v8810_v62, %v3729_v9  ;;  %5845 = vset.pattern.permute.xlu2 %v10374_v26  ;;  %v3286_v4 = vadd.f32 %v8659_v52, %v10376_v48  ;;  %v3307_v19 = vsub.f32 %v3249_v38, %v3299_v3  ;;  %v3415_v54 = vmax.f32 %v3407_v16, 0.0 }
 0x645   : > { %3948 = vperm.xlu2 %5845, %v8733_v0   ;;  %v3523_v36 = vadd.f32 %v8711_v45, %v8566_v8  ;;  %v3128_v51 = vsub.f32 %v3070_v7, %v3120_v40  ;;  %v3172_v27 = vadd.f32 %v8641_v10, %v10377_v22  ;;  %v3236_v1 = vmax.f32 %v3228_v31, 0.0  ;;  %v10379_v8 = vld [vmem:[#allocation21_spill] sm:$0xff] }
 0x646   : > { %v3759_v28 = vmax.f32 %v3751_v12, 0.0  ;;  %v3344_v13 = vadd.f32 %v8675_v41, %v10378_v60  ;;  %v3130_v2 = vsub.f32 %v3072_v15, %v3122_v61  ;;  %v3365_v55 = vsub.f32 %v3307_v19, %v3357_v5  ;;  %v10383_v15 = vld [vmem:[#allocation30_spill] sm:$0xff] }
 0x647   : > { %v3473_v59 = vmax.f32 %v3465_v32, 0.0  ;;  %v3581_v44 = vadd.f32 %v8723_v6, %v8652_v25  ;;  %v3186_v23 = vsub.f32 %v3128_v51, %v3178_v18  ;;  %v3230_v47 = vadd.f32 %v8648_v58, %v10379_v8  ;;  %v10387_v8 = vld [vmem:[#allocation35_spill] sm:$0xff] }
 0x648   : > { %v8858_v37 = vsub.f32 %v3709_v53, %v3759_v28  ;;  %v3294_v57 = vmax.f32 %v3286_v4, 0.0  ;;  %v3402_v10 = vadd.f32 %v8689_v46, %v10380_v20  ;;  %v3423_v3 = vsub.f32 %v3365_v55, %v3415_v54  ;;  %v10382_v28 = vld [vmem:[#allocation36_spill] sm:$0xff] }
 0x649   : > { %v8864_v30 = vpop.permute.xlu1 %3674  ;;  %v3531_v16 = vmax.f32 %v3523_v36, 0.0  ;;  %v3639_v29 = vadd.f32 %v8737_v35, %v8789_v63  ;;  %v3180_v25 = vmax.f32 %v3172_v27, 0.0  ;;  %v3244_v40 = vsub.f32 %v3186_v23, %v3236_v1  ;;  %v10384_v36 = vld [vmem:[#allocation38_spill] sm:$0xff] }
 0x64a   : > { %v3352_v61 = vmax.f32 %v3344_v13, 0.0  ;;  %v3460_v58 = vadd.f32 %v8701_v49, %v8469_v33  ;;  %v3481_v31 = vsub.f32 %v3423_v3, %v3473_v59  ;;  %v3589_v38 = vmax.f32 %v3581_v44, 0.0  ;;  %v10385_v1 = vld [vmem:[#allocation34_spill] sm:$0xff] }
 0x64b   : > { %v3737_v9 = vpop.permute.xlu2 %3736  ;;  %5847 = vset.pattern.permute.xlu1 %v10374_v26  ;;  %v3288_v26 = vadd.f32 %v8659_v52, %v10381_v21  ;;  %v3238_v32 = vmax.f32 %v3230_v47, 0.0  ;;  %v3302_v63 = vsub.f32 %v3244_v40, %v3294_v57  ;;  %v3410_v53 = vmax.f32 %v3402_v10, 0.0 }
 0x64c   : > { %v3753_v12 = vadd.f32 %v8810_v62, %v3737_v9  ;;  %3956 = vperm.xlu1 %5847, %v8765_v39   ;;  %v3518_v7 = vadd.f32 %v8711_v45, %v10382_v28  ;;  %v3346_v18 = vadd.f32 %v8675_v41, %v10383_v15  ;;  %v3539_v48 = vsub.f32 %v3481_v31, %v3531_v16  ;;  %v8902_v16 = vld [vmem:[%s6421_s12 + $0x3a] ss:$0 sm:$0xff] }
 0x64d   : > { %3960 = vperm.xlu2 %5845, %v8771_v42   ;;  %v3647_v4 = vmax.f32 %v3639_v29, 0.0  ;;  %v3188_v19 = vsub.f32 %v3130_v2, %v3180_v25  ;;  %v3360_v54 = vsub.f32 %v3302_v63, %v3352_v61  ;;  %v3468_v52 = vmax.f32 %v3460_v58, 0.0  ;;  %v10388_v61 = vld [vmem:[#allocation37_spill] sm:$0xff] }
 0x64e   : > { %v3761_v5 = vmax.f32 %v3753_v12, 0.0  ;;  %v3576_v51 = vadd.f32 %v8723_v6, %v10384_v36  ;;  %v3296_v27 = vmax.f32 %v3288_v26, 0.0  ;;  %v3404_v60 = vadd.f32 %v8689_v46, %v10385_v1 }
 0x64f   : > { %v3597_v13 = vsub.f32 %v3539_v48, %v3589_v38  ;;  %v3246_v55 = vsub.f32 %v3188_v19, %v3238_v32  ;;  %v3418_v59 = vsub.f32 %v3360_v54, %v3410_v53  ;;  %v3526_v44 = vmax.f32 %v3518_v7, 0.0 }
 0x650   : > { %v8887_v33 = vsub.f32 %v8782_v34, %v3761_v5  ;;  %v10386_v34 = vld [vmem:[#allocation40_spill] sm:$0xff]  ;;  %v3354_v23 = vmax.f32 %v3346_v18, 0.0  ;;  %v3462_v47 = vadd.f32 %v8701_v49, %v10387_v8  ;;  %v3584_v9 = vmax.f32 %v3576_v51, 0.0  ;;  %v10389_v5 = vld [vmem:[#allocation39_spill] sm:$0xff] }
 0x651   : > { %v3687_v22 = vpop.permute.xlu1 %3686  ;;  %v3634_v2 = vadd.f32 %v8737_v35, %v10386_v34  ;;  %v3655_v57 = vsub.f32 %v3597_v13, %v3647_v4  ;;  %v3476_v46 = vsub.f32 %v3418_v59, %v3468_v52  ;;  %v3692_v3 = vadd.f32 %v8761_v43, %v8833_v56 }
 0x652   : > { %v3697_v41 = vadd.f32 %v8761_v43, %v3687_v22  ;;  %v3304_v12 = vsub.f32 %v3246_v55, %v3296_v27  ;;  %v3412_v25 = vmax.f32 %v3404_v60, 0.0  ;;  %v3520_v58 = vadd.f32 %v8711_v45, %v10388_v61 }
 0x653   : > { %v3534_v49 = vsub.f32 %v3476_v46, %v3526_v44  ;;  %v3642_v21 = vmax.f32 %v3634_v2, 0.0  ;;  %v3470_v38 = vmax.f32 %v3462_v47, 0.0  ;;  %v3578_v56 = vadd.f32 %v8723_v6, %v10389_v5 }
 0x654   : > { %v3705_v20 = vmax.f32 %v3697_v41, 0.0  ;;  %v3775_v10 = vpop.permute.xlu2 %3774  ;;  %3964 = vperm.xlu1 %5847, %v8804_v24   ;;  %v3362_v31 = vsub.f32 %v3304_v12, %v3354_v23  ;;  %v3700_v63 = vmax.f32 %v3692_v3, 0.0  ;;  %v3528_v15 = vmax.f32 %v3520_v58, 0.0 }
 0x655   : > { %v3806_v29 = vadd.f32 %v8902_v16, %v3775_v10  ;;  %3968 = vperm.xlu2 %5845, %v8814_v11   ;;  %v3592_v32 = vsub.f32 %v3534_v49, %v3584_v9  ;;  %v3636_v48 = vadd.f32 %v8737_v35, %v8747_v14  ;;  %v3586_v19 = vmax.f32 %v3578_v56, 0.0  ;;  %v6076_v10 = vld [vmem:[%s6421_s12 + $0x3b] ss:$0 sm:$0xff] }
 0x656   : > { %v3713_v40 = vsub.f32 %v3655_v57, %v3705_v20  ;;  %v3420_v28 = vsub.f32 %v3362_v31, %v3412_v25  ;;  %v3694_v6 = vadd.f32 %v8761_v43, %v8864_v30  ;;  %v10390_v51 = vmov 62  }
 0x657   : > { %v3814_v26 = vmax.f32 %v3806_v29, 0.0  ;;  %v3650_v18 = vsub.f32 %v3592_v32, %v3642_v21  ;;  %v3644_v35 = vmax.f32 %v3636_v48, 0.0  ;;  %v6077_v48 = vld [vmem:[%s6421_s12 + $0x3c] ss:$0 sm:$0xff] }
 0x658   : > { %v3478_v4 = vsub.f32 %v3420_v28, %v3470_v38  ;;  %v3702_v60 = vmax.f32 %v3694_v6, 0.0 }
 0x659   : > { %v3822_v53 = vsub.f32 %v8827_v17, %v3814_v26  ;;  %v3708_v52 = vsub.f32 %v3650_v18, %v3700_v63 }
 0x65a   : > { %v3725_v7 = vpop.permute.xlu1 %3724  ;;  %v3536_v22 = vsub.f32 %v3478_v4, %v3528_v15 }
 0x65b   : > { %v3750_v45 = vadd.f32 %v8810_v62, %v3725_v7 }
 0x65c   : > { %v3787_v54 = vpop.permute.xlu2 %3786  ;;  %3976 = vperm.xlu1 %5847, %v8841_v50   ;;  %v3594_v1 = vsub.f32 %v3536_v22, %v3586_v19  ;;  %v10392_v22 = vmov 64  }
 0x65d   : > { %v3758_v36 = vmax.f32 %v3750_v45, 0.0  ;;  %v3809_v17 = vadd.f32 %v8902_v16, %v3787_v54  ;;  %5848 = vset.pattern.permute.xlu2 %v10390_v51 }
 0x65e   : > { %4006 = vperm.xlu2 %5848, %v8733_v0   ;;  %v3652_v55 = vsub.f32 %v3594_v1, %v3644_v35 }
 0x65f   : > { %v3766_v14 = vsub.f32 %v3708_v52, %v3758_v36  ;;  %v3817_v27 = vmax.f32 %v3809_v17, 0.0 }
 0x660   : > { %v3710_v30 = vsub.f32 %v3652_v55, %v3702_v60 }
 0x661   : > { %v3825_v13 = vsub.f32 %v8858_v37, %v3817_v27 }
 0x662   : > { %v3733_v41 = vpop.permute.xlu1 %3732 }
 0x663   : > { %v3752_v59 = vadd.f32 %v8810_v62, %v3733_v41 }
 0x664   : > { %v3795_v43 = vpop.permute.xlu2 %3794  ;;  %5850 = vset.pattern.permute.xlu1 %v10390_v51 }
 0x665   : > { %v3760_v44 = vmax.f32 %v3752_v59, 0.0  ;;  %v3811_v34 = vadd.f32 %v8902_v16, %v3795_v43  ;;  %4014 = vperm.xlu1 %5850, %v8765_v39  }
 0x666   : > { %4018 = vperm.xlu2 %5848, %v8771_v42  }
 0x667   : > { %v3768_v2 = vsub.f32 %v3710_v30, %v3760_v44  ;;  %v3819_v23 = vmax.f32 %v3811_v34, 0.0 }
 0x669   : > { %v3827_v37 = vsub.f32 %v8887_v33, %v3819_v23  ;;  %v6078_v23 = vld [vmem:[%s6421_s12 + $0x3d] ss:$0 sm:$0xff] }
 0x66a   : > { %v3745_v8 = vpop.permute.xlu1 %3744 }
 0x66b   : > { %v3755_v47 = vadd.f32 %v8810_v62, %v3745_v8  ;;  %v10391_v62 = vmov 63  }
 0x66d   : > { %v3763_v57 = vmax.f32 %v3755_v47, 0.0  ;;  %v3833_v20 = vpop.permute.xlu2 %3832  ;;  %4022 = vperm.xlu1 %5850, %v8804_v24  }
 0x66e   : > { %v3864_v46 = vadd.f32 %v6076_v10, %v3833_v20  ;;  %4026 = vperm.xlu2 %5848, %v8814_v11  }
 0x66f   : > { %v3771_v9 = vsub.f32 %v3713_v40, %v3763_v57 }
 0x670   : > { %v3872_v3 = vmax.f32 %v3864_v46, 0.0 }
 0x672   : > { %v3880_v29 = vsub.f32 %v3822_v53, %v3872_v3 }
 0x673   : > { %v3783_v12 = vpop.permute.xlu1 %3782 }
 0x674   : > { %v3808_v25 = vadd.f32 %v8902_v16, %v3783_v12  ;;  %v10393_v12 = vmov 65  }
 0x675   : > { %v3845_v49 = vpop.permute.xlu2 %3844  ;;  %4034 = vperm.xlu1 %5850, %v8841_v50  }
 0x676   : > { %v3816_v33 = vmax.f32 %v3808_v25, 0.0  ;;  %v3867_v61 = vadd.f32 %v6076_v10, %v3845_v49  ;;  %5851 = vset.pattern.permute.xlu2 %v10391_v62 }
 0x677   : > { %4064 = vperm.xlu2 %5851, %v8733_v0  }
 0x678   : > { %v3824_v58 = vsub.f32 %v3766_v14, %v3816_v33  ;;  %v3875_v21 = vmax.f32 %v3867_v61, 0.0 }
 0x67a   : > { %v3883_v26 = vsub.f32 %v3825_v13, %v3875_v21 }
 0x67b   : > { %v3791_v31 = vpop.permute.xlu1 %3790 }
 0x67c   : > { %v3810_v40 = vadd.f32 %v8902_v16, %v3791_v31 }
 0x67d   : > { %v3853_v38 = vpop.permute.xlu2 %3852  ;;  %5853 = vset.pattern.permute.xlu1 %v10391_v62 }
 0x67e   : > { %v3818_v5 = vmax.f32 %v3810_v40, 0.0  ;;  %v3869_v56 = vadd.f32 %v6076_v10, %v3853_v38  ;;  %4072 = vperm.xlu1 %5853, %v8765_v39  }
 0x67f   : > { %4076 = vperm.xlu2 %5851, %v8771_v42  }
 0x680   : > { %v3826_v32 = vsub.f32 %v3768_v2, %v3818_v5  ;;  %v3877_v63 = vmax.f32 %v3869_v56, 0.0 }
 0x682   : > { %v3885_v53 = vsub.f32 %v3827_v37, %v3877_v63  ;;  %v6079_v63 = vld [vmem:[%s6421_s12 + $0x3e] ss:$0 sm:$0xff] }
 0x683   : > { %v3803_v28 = vpop.permute.xlu1 %3802 }
 0x684   : > { %v3813_v7 = vadd.f32 %v8902_v16, %v3803_v28 }
 0x686   : > { %v3821_v15 = vmax.f32 %v3813_v7, 0.0  ;;  %v3891_v18 = vpop.permute.xlu2 %3890  ;;  %4080 = vperm.xlu1 %5853, %v8804_v24  }
 0x687   : > { %v3922_v45 = vadd.f32 %v6077_v48, %v3891_v18  ;;  %4084 = vperm.xlu2 %5851, %v8814_v11  }
 0x688   : > { %v3829_v4 = vsub.f32 %v3771_v9, %v3821_v15 }
 0x689   : > { %v3930_v19 = vmax.f32 %v3922_v45, 0.0 }
 0x68b   : > { %v3938_v54 = vsub.f32 %v3880_v29, %v3930_v19 }
 0x68c   : > { %v3841_v52 = vpop.permute.xlu1 %3840 }
 0x68d   : > { %v3866_v6 = vadd.f32 %v6076_v10, %v3841_v52  ;;  %v10394_v52 = vmov 66  }
 0x68e   : > { %v3903_v36 = vpop.permute.xlu2 %3902  ;;  %4092 = vperm.xlu1 %5853, %v8841_v50  }
 0x68f   : > { %v3874_v17 = vmax.f32 %v3866_v6, 0.0  ;;  %v3925_v51 = vadd.f32 %v6077_v48, %v3903_v36  ;;  %5854 = vset.pattern.permute.xlu2 %v10392_v22 }
 0x690   : > { %4122 = vperm.xlu2 %5854, %v8733_v0  }
 0x691   : > { %v3882_v16 = vsub.f32 %v3824_v58, %v3874_v17  ;;  %v3933_v35 = vmax.f32 %v3925_v51, 0.0 }
 0x693   : > { %v3941_v14 = vsub.f32 %v3883_v26, %v3933_v35 }
 0x694   : > { %v3849_v27 = vpop.permute.xlu1 %3848 }
 0x695   : > { %v3868_v1 = vadd.f32 %v6076_v10, %v3849_v27 }
 0x696   : > { %v3911_v60 = vpop.permute.xlu2 %3910  ;;  %5856 = vset.pattern.permute.xlu1 %v10392_v22 }
 0x697   : > { %v3876_v13 = vmax.f32 %v3868_v1, 0.0  ;;  %v3927_v41 = vadd.f32 %v6077_v48, %v3911_v60  ;;  %4130 = vperm.xlu1 %5856, %v8765_v39  }
 0x698   : > { %4134 = vperm.xlu2 %5854, %v8771_v42  }
 0x699   : > { %v3884_v55 = vsub.f32 %v3826_v32, %v3876_v13  ;;  %v3935_v59 = vmax.f32 %v3927_v41, 0.0 }
 0x69b   : > { %v3943_v43 = vsub.f32 %v3885_v53, %v3935_v59  ;;  %v6080_v59 = vld [vmem:[%s6421_s12 + $0x3f] ss:$0 sm:$0xff] }
 0x69c   : > { %v3861_v30 = vpop.permute.xlu1 %3860 }
 0x69d   : > { %v3871_v44 = vadd.f32 %v6076_v10, %v3861_v30 }
 0x69f   : > { %v3879_v34 = vmax.f32 %v3871_v44, 0.0  ;;  %v3949_v2 = vpop.permute.xlu2 %3948  ;;  %4138 = vperm.xlu1 %5856, %v8804_v24  }
 0x6a0   : > { %v3980_v37 = vadd.f32 %v6078_v23, %v3949_v2  ;;  %4142 = vperm.xlu2 %5854, %v8814_v11  }
 0x6a1   : > { %v3887_v8 = vsub.f32 %v3829_v4, %v3879_v34 }
 0x6a2   : > { %v3988_v47 = vmax.f32 %v3980_v37, 0.0 }
 0x6a4   : > { %v3996_v57 = vsub.f32 %v3938_v54, %v3988_v47 }
 0x6a5   : > { %v3899_v20 = vpop.permute.xlu1 %3898 }
 0x6a6   : > { %v3924_v46 = vadd.f32 %v6077_v48, %v3899_v20  ;;  %v10395_v20 = vmov 67  }
 0x6a7   : > { %v3961_v9 = vpop.permute.xlu2 %3960  ;;  %4150 = vperm.xlu1 %5856, %v8841_v50  }
 0x6a8   : > { %v3932_v3 = vmax.f32 %v3924_v46, 0.0  ;;  %v3983_v29 = vadd.f32 %v6078_v23, %v3961_v9  ;;  %5857 = vset.pattern.permute.xlu2 %v10393_v12 }
 0x6a9   : > { %4180 = vperm.xlu2 %5857, %v8733_v0  }
 0x6aa   : > { %v3940_v10 = vsub.f32 %v3882_v16, %v3932_v3  ;;  %v3991_v25 = vmax.f32 %v3983_v29, 0.0 }
 0x6ac   : > { %v3999_v49 = vsub.f32 %v3941_v14, %v3991_v25 }
 0x6ad   : > { %v3907_v33 = vpop.permute.xlu1 %3906 }
 0x6ae   : > { %v3926_v61 = vadd.f32 %v6077_v48, %v3907_v33 }
 0x6af   : > { %v3969_v62 = vpop.permute.xlu2 %3968  ;;  %5859 = vset.pattern.permute.xlu1 %v10393_v12 }
 0x6b0   : > { %v3934_v58 = vmax.f32 %v3926_v61, 0.0  ;;  %v3985_v21 = vadd.f32 %v6078_v23, %v3969_v62  ;;  %4188 = vperm.xlu1 %5859, %v8765_v39  }
 0x6b1   : > { %4192 = vperm.xlu2 %5857, %v8771_v42  }
 0x6b2   : > { %v3942_v26 = vsub.f32 %v3884_v55, %v3934_v58  ;;  %v3993_v31 = vmax.f32 %v3985_v21, 0.0 }
 0x6b4   : > { %v4001_v40 = vsub.f32 %v3943_v43, %v3993_v31  ;;  %v6081_v31 = vld [vmem:[%s6421_s12 + $0x40] ss:$0 sm:$0xff] }
 0x6b5   : > { %v3919_v38 = vpop.permute.xlu1 %3918 }
 0x6b6   : > { %v3929_v5 = vadd.f32 %v6077_v48, %v3919_v38 }
 0x6b8   : > { %v3937_v56 = vmax.f32 %v3929_v5, 0.0  ;;  %v4007_v32 = vpop.permute.xlu2 %4006  ;;  %4196 = vperm.xlu1 %5859, %v8804_v24  }
 0x6b9   : > { %v4038_v53 = vadd.f32 %v6079_v63, %v4007_v32  ;;  %4200 = vperm.xlu2 %5857, %v8814_v11  }
 0x6ba   : > { %v3945_v28 = vsub.f32 %v3887_v8, %v3937_v56 }
 0x6bb   : > { %v4046_v7 = vmax.f32 %v4038_v53, 0.0 }
 0x6bd   : > { %v4054_v15 = vsub.f32 %v3996_v57, %v4046_v7 }
 0x6be   : > { %v3957_v18 = vpop.permute.xlu1 %3956 }
 0x6bf   : > { %v3982_v45 = vadd.f32 %v6078_v23, %v3957_v18  ;;  %v10396_v18 = vmov 68  }
 0x6c0   : > { %v4019_v4 = vpop.permute.xlu2 %4018  ;;  %4208 = vperm.xlu1 %5859, %v8841_v50  }
 0x6c1   : > { %v3990_v19 = vmax.f32 %v3982_v45, 0.0  ;;  %v4041_v54 = vadd.f32 %v6079_v63, %v4019_v4  ;;  %5860 = vset.pattern.permute.xlu2 %v10394_v52 }
 0x6c2   : > { %4238 = vperm.xlu2 %5860, %v8733_v0  }
 0x6c3   : > { %v3998_v48 = vsub.f32 %v3940_v10, %v3990_v19  ;;  %v4049_v6 = vmax.f32 %v4041_v54, 0.0 }
 0x6c5   : > { %v4057_v36 = vsub.f32 %v3999_v49, %v4049_v6 }
 0x6c6   : > { %v3965_v17 = vpop.permute.xlu1 %3964 }
 0x6c7   : > { %v3984_v51 = vadd.f32 %v6078_v23, %v3965_v17 }
 0x6c8   : > { %v4027_v22 = vpop.permute.xlu2 %4026  ;;  %5862 = vset.pattern.permute.xlu1 %v10394_v52 }
 0x6c9   : > { %v3992_v16 = vmax.f32 %v3984_v51, 0.0  ;;  %v4043_v35 = vadd.f32 %v6079_v63, %v4027_v22  ;;  %4246 = vperm.xlu1 %5862, %v8765_v39  }
 0x6ca   : > { %4250 = vperm.xlu2 %5860, %v8771_v42  }
 0x6cb   : > { %v4000_v14 = vsub.f32 %v3942_v26, %v3992_v16  ;;  %v4051_v27 = vmax.f32 %v4043_v35, 0.0 }
 0x6cd   : > { %v4059_v1 = vsub.f32 %v4001_v40, %v4051_v27  ;;  %v6082_v27 = vld [vmem:[%s6421_s12 + $0x41] ss:$0 sm:$0xff] }
 0x6ce   : > { %v3977_v60 = vpop.permute.xlu1 %3976 }
 0x6cf   : > { %v3987_v13 = vadd.f32 %v6078_v23, %v3977_v60 }
 0x6d1   : > { %v3995_v41 = vmax.f32 %v3987_v13, 0.0  ;;  %v4065_v55 = vpop.permute.xlu2 %4064  ;;  %4254 = vperm.xlu1 %5862, %v8804_v24  }
 0x6d2   : > { %v4096_v43 = vadd.f32 %v6080_v59, %v4065_v55  ;;  %4258 = vperm.xlu2 %5860, %v8814_v11  }
 0x6d3   : > { %v4003_v30 = vsub.f32 %v3945_v28, %v3995_v41 }
 0x6d4   : > { %v4104_v44 = vmax.f32 %v4096_v43, 0.0 }
 0x6d6   : > { %v4112_v34 = vsub.f32 %v4054_v15, %v4104_v44 }
 0x6d7   : > { %v4015_v2 = vpop.permute.xlu1 %4014 }
 0x6d8   : > { %v4040_v37 = vadd.f32 %v6079_v63, %v4015_v2  ;;  %v10397_v2 = vmov 69  }
 0x6d9   : > { %v4077_v8 = vpop.permute.xlu2 %4076  ;;  %4266 = vperm.xlu1 %5862, %v8841_v50  }
 0x6da   : > { %v4048_v47 = vmax.f32 %v4040_v37, 0.0  ;;  %v4099_v57 = vadd.f32 %v6080_v59, %v4077_v8  ;;  %5863 = vset.pattern.permute.xlu2 %v10395_v20 }
 0x6db   : > { %4296 = vperm.xlu2 %5863, %v8733_v0  }
 0x6dc   : > { %v4056_v23 = vsub.f32 %v3998_v48, %v4048_v47  ;;  %v4107_v46 = vmax.f32 %v4099_v57, 0.0 }
 0x6de   : > { %v4115_v9 = vsub.f32 %v4057_v36, %v4107_v46 }
 0x6df   : > { %v4023_v3 = vpop.permute.xlu1 %4022 }
 0x6e0   : > { %v4042_v29 = vadd.f32 %v6079_v63, %v4023_v3 }
 0x6e1   : > { %v4085_v12 = vpop.permute.xlu2 %4084  ;;  %5865 = vset.pattern.permute.xlu1 %v10395_v20 }
 0x6e2   : > { %v4050_v10 = vmax.f32 %v4042_v29, 0.0  ;;  %v4101_v25 = vadd.f32 %v6080_v59, %v4085_v12  ;;  %4304 = vperm.xlu1 %5865, %v8765_v39  }
 0x6e3   : > { %4308 = vperm.xlu2 %5863, %v8771_v42  }
 0x6e4   : > { %v4058_v49 = vsub.f32 %v4000_v14, %v4050_v10  ;;  %v4109_v33 = vmax.f32 %v4101_v25, 0.0 }
 0x6e6   : > { %v4117_v61 = vsub.f32 %v4059_v1, %v4109_v33  ;;  %v6083_v33 = vld [vmem:[%s6421_s12 + $0x42] ss:$0 sm:$0xff] }
 0x6e7   : > { %v4035_v62 = vpop.permute.xlu1 %4034 }
 0x6e8   : > { %v4045_v58 = vadd.f32 %v6079_v63, %v4035_v62 }
 0x6ea   : > { %v4053_v21 = vmax.f32 %v4045_v58, 0.0  ;;  %v4123_v26 = vpop.permute.xlu2 %4122  ;;  %4312 = vperm.xlu1 %5865, %v8804_v24  }
 0x6eb   : > { %v4154_v40 = vadd.f32 %v6081_v31, %v4123_v26  ;;  %4316 = vperm.xlu2 %5863, %v8814_v11  }
 0x6ec   : > { %v4061_v38 = vsub.f32 %v4003_v30, %v4053_v21 }
 0x6ed   : > { %v4162_v5 = vmax.f32 %v4154_v40, 0.0 }
 0x6ef   : > { %v4170_v56 = vsub.f32 %v4112_v34, %v4162_v5 }
 0x6f0   : > { %v4073_v32 = vpop.permute.xlu1 %4072 }
 0x6f1   : > { %v4098_v53 = vadd.f32 %v6080_v59, %v4073_v32  ;;  %v10398_v32 = vmov 70  }
 0x6f2   : > { %v4135_v28 = vpop.permute.xlu2 %4134  ;;  %4324 = vperm.xlu1 %5865, %v8841_v50  }
 0x6f3   : > { %v4106_v7 = vmax.f32 %v4098_v53, 0.0  ;;  %v4157_v15 = vadd.f32 %v6081_v31, %v4135_v28  ;;  %5866 = vset.pattern.permute.xlu2 %v10396_v18 }
 0x6f4   : > { %4354 = vperm.xlu2 %5866, %v8733_v0  }
 0x6f5   : > { %v4114_v63 = vsub.f32 %v4056_v23, %v4106_v7  ;;  %v4165_v45 = vmax.f32 %v4157_v15, 0.0 }
 0x6f7   : > { %v4173_v4 = vsub.f32 %v4115_v9, %v4165_v45 }
 0x6f8   : > { %v4081_v19 = vpop.permute.xlu1 %4080 }
 0x6f9   : > { %v4100_v54 = vadd.f32 %v6080_v59, %v4081_v19 }
 0x6fa   : > { %v4143_v52 = vpop.permute.xlu2 %4142  ;;  %5868 = vset.pattern.permute.xlu1 %v10396_v18 }
 0x6fb   : > { %v4108_v48 = vmax.f32 %v4100_v54, 0.0  ;;  %v4159_v6 = vadd.f32 %v6081_v31, %v4143_v52  ;;  %4362 = vperm.xlu1 %5868, %v8765_v39  }
 0x6fc   : > { %4366 = vperm.xlu2 %5866, %v8771_v42  }
 0x6fd   : > { %v4116_v36 = vsub.f32 %v4058_v49, %v4108_v48  ;;  %v4167_v17 = vmax.f32 %v4159_v6, 0.0 }
 0x6ff   : > { %v4175_v51 = vsub.f32 %v4117_v61, %v4167_v17  ;;  %v6084_v17 = vld [vmem:[%s6421_s12 + $0x43] ss:$0 sm:$0xff] }
 0x700   : > { %v4093_v22 = vpop.permute.xlu1 %4092 }
 0x701   : > { %v4103_v16 = vadd.f32 %v6080_v59, %v4093_v22 }
 0x703   : > { %v4111_v35 = vmax.f32 %v4103_v16, 0.0  ;;  %v4181_v14 = vpop.permute.xlu2 %4180  ;;  %4370 = vperm.xlu1 %5868, %v8804_v24  }
 0x704   : > { %v4212_v1 = vadd.f32 %v6082_v27, %v4181_v14  ;;  %4374 = vperm.xlu2 %5866, %v8814_v11  }
 0x705   : > { %v4119_v60 = vsub.f32 %v4061_v38, %v4111_v35 }
 0x706   : > { %v4220_v13 = vmax.f32 %v4212_v1, 0.0 }
 0x708   : > { %v4228_v41 = vsub.f32 %v4170_v56, %v4220_v13 }
 0x709   : > { %v4131_v55 = vpop.permute.xlu1 %4130 }
 0x70a   : > { %v4156_v43 = vadd.f32 %v6081_v31, %v4131_v55  ;;  %v10399_v55 = vmov 71  }
 0x70b   : > { %v4193_v30 = vpop.permute.xlu2 %4192  ;;  %4382 = vperm.xlu1 %5868, %v8841_v50  }
 0x70c   : > { %v4164_v44 = vmax.f32 %v4156_v43, 0.0  ;;  %v4215_v34 = vadd.f32 %v6082_v27, %v4193_v30  ;;  %5869 = vset.pattern.permute.xlu2 %v10397_v2 }
 0x70d   : > { %4412 = vperm.xlu2 %5869, %v8733_v0  }
 0x70e   : > { %v4172_v59 = vsub.f32 %v4114_v63, %v4164_v44  ;;  %v4223_v37 = vmax.f32 %v4215_v34, 0.0 }
 0x710   : > { %v4231_v8 = vsub.f32 %v4173_v4, %v4223_v37 }
 0x711   : > { %v4139_v47 = vpop.permute.xlu1 %4138 }
 0x712   : > { %v4158_v57 = vadd.f32 %v6081_v31, %v4139_v47 }
 0x713   : > { %v4201_v20 = vpop.permute.xlu2 %4200  ;;  %5871 = vset.pattern.permute.xlu1 %v10397_v2 }
 0x714   : > { %v4166_v23 = vmax.f32 %v4158_v57, 0.0  ;;  %v4217_v46 = vadd.f32 %v6082_v27, %v4201_v20  ;;  %4420 = vperm.xlu1 %5871, %v8765_v39  }
 0x715   : > { %4424 = vperm.xlu2 %5869, %v8771_v42  }
 0x716   : > { %v4174_v9 = vsub.f32 %v4116_v36, %v4166_v23  ;;  %v4225_v3 = vmax.f32 %v4217_v46, 0.0 }
 0x718   : > { %v4233_v29 = vsub.f32 %v4175_v51, %v4225_v3 }
 0x719   : > { %v4151_v12 = vpop.permute.xlu1 %4150 }
 0x71a   : > { %v4161_v10 = vadd.f32 %v6081_v31, %v4151_v12 }
 0x71c   : > { %v4169_v25 = vmax.f32 %v4161_v10, 0.0  ;;  %v4239_v49 = vpop.permute.xlu2 %4238  ;;  %4428 = vperm.xlu1 %5871, %v8804_v24  }
 0x71d   : > { %v4270_v61 = vadd.f32 %v6083_v33, %v4239_v49  ;;  %4432 = vperm.xlu2 %5869, %v8814_v11  }
 0x71e   : > { %v4177_v62 = vsub.f32 %v4119_v60, %v4169_v25 }
 0x71f   : > { %v4278_v58 = vmax.f32 %v4270_v61, 0.0 }
 0x721   : > { %v4286_v21 = vsub.f32 %v4228_v41, %v4278_v58 }
 0x722   : > { %v4189_v26 = vpop.permute.xlu1 %4188 }
 0x723   : > { %v4214_v40 = vadd.f32 %v6082_v27, %v4189_v26 }
 0x724   : > { %v4251_v38 = vpop.permute.xlu2 %4250  ;;  %4440 = vperm.xlu1 %5871, %v8841_v50  }
 0x725   : > { %v4222_v5 = vmax.f32 %v4214_v40, 0.0  ;;  %v4273_v56 = vadd.f32 %v6083_v33, %v4251_v38  ;;  %5872 = vset.pattern.permute.xlu2 %v10398_v32 }
 0x726   : > { %4470 = vperm.xlu2 %5872, %v8733_v0  }
 0x727   : > { %v4230_v31 = vsub.f32 %v4172_v59, %v4222_v5  ;;  %v4281_v53 = vmax.f32 %v4273_v56, 0.0 }
 0x729   : > { %v4289_v28 = vsub.f32 %v4231_v8, %v4281_v53 }
 0x72a   : > { %v4197_v7 = vpop.permute.xlu1 %4196 }
 0x72b   : > { %v4216_v15 = vadd.f32 %v6082_v27, %v4197_v7 }
 0x72c   : > { %v4259_v18 = vpop.permute.xlu2 %4258  ;;  %5874 = vset.pattern.permute.xlu1 %v10398_v32 }
 0x72d   : > { %v4224_v63 = vmax.f32 %v4216_v15, 0.0  ;;  %v4275_v45 = vadd.f32 %v6083_v33, %v4259_v18  ;;  %4478 = vperm.xlu1 %5874, %v8765_v39  }
 0x72e   : > { %4482 = vperm.xlu2 %5872, %v8771_v42  }
 0x72f   : > { %v4232_v4 = vsub.f32 %v4174_v9, %v4224_v63  ;;  %v4283_v19 = vmax.f32 %v4275_v45, 0.0  ;;  %v6085_v9 = vld [vmem:[%s6421_s12 + $0x44] ss:$0 sm:$0xff] }
 0x731   : > { %v4291_v54 = vsub.f32 %v4233_v29, %v4283_v19 }
 0x732   : > { %v4209_v52 = vpop.permute.xlu1 %4208 }
 0x733   : > { %v4219_v48 = vadd.f32 %v6082_v27, %v4209_v52 }
 0x735   : > { %v4227_v6 = vmax.f32 %v4219_v48, 0.0  ;;  %v4297_v36 = vpop.permute.xlu2 %4296  ;;  %4486 = vperm.xlu1 %5874, %v8804_v24  }
 0x736   : > { %v4328_v51 = vadd.f32 %v6084_v17, %v4297_v36  ;;  %4490 = vperm.xlu2 %5872, %v8814_v11  }
 0x737   : > { %v4235_v22 = vsub.f32 %v4177_v62, %v4227_v6 }
 0x738   : > { %v4336_v16 = vmax.f32 %v4328_v51, 0.0 }
 0x73a   : > { %v4344_v35 = vsub.f32 %v4286_v21, %v4336_v16 }
 0x73b   : > { %v4247_v14 = vpop.permute.xlu1 %4246 }
 0x73c   : > { %v4272_v1 = vadd.f32 %v6083_v33, %v4247_v14 }
 0x73d   : > { %v4309_v60 = vpop.permute.xlu2 %4308  ;;  %4498 = vperm.xlu1 %5874, %v8841_v50  }
 0x73e   : > { %v4280_v13 = vmax.f32 %v4272_v1, 0.0  ;;  %v4331_v41 = vadd.f32 %v6084_v17, %v4309_v60  ;;  %5875 = vset.pattern.permute.xlu2 %v10399_v55  ;;  %v9025_v60 = vld [vmem:[%s6421_s12 + $0x45] ss:$0 sm:$0xff] }
 0x73f   : > { %4528 = vperm.xlu2 %5875, %v8733_v0  }
 0x740   : > { %v4288_v27 = vsub.f32 %v4230_v31, %v4280_v13  ;;  %v4339_v43 = vmax.f32 %v4331_v41, 0.0  ;;  %v9029_v41 = vld [vmem:[%s6421_s12 + $0x46] ss:$0 sm:$0xff] }
 0x742   : > { %v4347_v30 = vsub.f32 %v4289_v28, %v4339_v43 }
 0x743   : > { %v4255_v44 = vpop.permute.xlu1 %4254 }
 0x744   : > { %v4274_v34 = vadd.f32 %v6083_v33, %v4255_v44 }
 0x745   : > { %v4317_v2 = vpop.permute.xlu2 %4316  ;;  %5877 = vset.pattern.permute.xlu1 %v10399_v55 }
 0x746   : > { %v4282_v59 = vmax.f32 %v4274_v34, 0.0  ;;  %v4333_v37 = vadd.f32 %v6084_v17, %v4317_v2  ;;  %4536 = vperm.xlu1 %5877, %v8765_v39  }
 0x747   : > { %4540 = vperm.xlu2 %5875, %v8771_v42  }
 0x748   : > { %v4290_v8 = vsub.f32 %v4232_v4, %v4282_v59  ;;  %v4341_v47 = vmax.f32 %v4333_v37, 0.0  ;;  %v9036_v59 = vld [vmem:[%s6421_s12 + $0x47] ss:$0 sm:$0xff] }
 0x74a   : > { %v4349_v57 = vsub.f32 %v4291_v54, %v4341_v47 }
 0x74b   : > { %v4267_v20 = vpop.permute.xlu1 %4266 }
 0x74c   : > { %v4277_v0 = vadd.f32 %v6083_v33, %v4267_v20 }
 0x74e   : > { %v4285_v23 = vmax.f32 %v4277_v0, 0.0  ;;  %v4355_v46 = vpop.permute.xlu2 %4354  ;;  %4544 = vperm.xlu1 %5877, %v8804_v24  }
 0x74f   : > { %v4386_v3 = vadd.f32 %v6085_v9, %v4355_v46  ;;  %4548 = vperm.xlu2 %5875, %v8814_v11  }
 0x750   : > { %v4293_v29 = vsub.f32 %v4235_v22, %v4285_v23 }
 0x751   : > { %v4394_v12 = vmax.f32 %v4386_v3, 0.0 }
 0x753   : > { %v4402_v10 = vsub.f32 %v4344_v35, %v4394_v12 }
 0x754   : > { %v4305_v25 = vpop.permute.xlu1 %4304 }
 0x755   : > { %v4330_v39 = vadd.f32 %v6084_v17, %v4305_v25 }
 0x756   : > { %v4367_v49 = vpop.permute.xlu2 %4366  ;;  %4556 = vperm.xlu1 %5877, %v8841_v50  }
 0x757   : > { %v4338_v42 = vmax.f32 %v4330_v39, 0.0  ;;  %v4389_v61 = vadd.f32 %v6085_v9, %v4367_v49 }
 0x759   : > { %v4346_v62 = vsub.f32 %v4288_v27, %v4338_v42  ;;  %v4397_v33 = vmax.f32 %v4389_v61, 0.0 }
 0x75b   : > { %v4405_v58 = vsub.f32 %v4347_v30, %v4397_v33 }
 0x75c   : > { %v4313_v21 = vpop.permute.xlu1 %4312 }
 0x75d   : > { %v4332_v26 = vadd.f32 %v6084_v17, %v4313_v21 }
 0x75e   : > { %v4375_v24 = vpop.permute.xlu2 %4374 }
 0x75f   : > { %v4340_v40 = vmax.f32 %v4332_v26, 0.0  ;;  %v4391_v38 = vadd.f32 %v6085_v9, %v4375_v24 }
 0x761   : > { %v4348_v5 = vsub.f32 %v4290_v8, %v4340_v40  ;;  %v4399_v11 = vmax.f32 %v4391_v38, 0.0 }
 0x763   : > { %v4407_v56 = vsub.f32 %v4349_v57, %v4399_v11 }
 0x764   : > { %v4325_v32 = vpop.permute.xlu1 %4324 }
 0x765   : > { %v4335_v31 = vadd.f32 %v6084_v17, %v4325_v32 }
 0x767   : > { %v4343_v53 = vmax.f32 %v4335_v31, 0.0  ;;  %v4413_v28 = vpop.permute.xlu2 %4412 }
 0x768   : > { %v4444_v13 = vadd.f32 %v9025_v60, %v4413_v28 }
 0x769   : > { %v4351_v7 = vsub.f32 %v4293_v29, %v4343_v53 }
 0x76a   : > { %v4452_v27 = vmax.f32 %v4444_v13, 0.0 }
 0x76c   : > { %v4460_v34 = vsub.f32 %v4402_v10, %v4452_v27 }
 0x76d   : > { %v4363_v15 = vpop.permute.xlu1 %4362 }
 0x76e   : > { %v4388_v50 = vadd.f32 %v6085_v9, %v4363_v15 }
 0x76f   : > { %v4425_v18 = vpop.permute.xlu2 %4424 }
 0x770   : > { %v4396_v63 = vmax.f32 %v4388_v50, 0.0  ;;  %v4447_v2 = vadd.f32 %v9025_v60, %v4425_v18 }
 0x772   : > { %v9016_v45 = vsub.f32 %v4346_v62, %v4396_v63  ;;  %v4455_v20 = vmax.f32 %v4447_v2, 0.0 }
 0x774   : > { %v4463_v12 = vsub.f32 %v4405_v58, %v4455_v20 }
 0x775   : > { %v4371_v4 = vpop.permute.xlu1 %4370 }
 0x776   : > { %v4390_v19 = vadd.f32 %v6085_v9, %v4371_v4 }
 0x777   : > { %v4433_v54 = vpop.permute.xlu2 %4432 }
 0x778   : > { %v4398_v52 = vmax.f32 %v4390_v19, 0.0  ;;  %v4449_v10 = vadd.f32 %v9025_v60, %v4433_v54 }
 0x77a   : > { %v9018_v48 = vsub.f32 %v4348_v5, %v4398_v52  ;;  %v4457_v33 = vmax.f32 %v4449_v10, 0.0 }
 0x77c   : > { %v4465_v5 = vsub.f32 %v4407_v56, %v4457_v33 }
 0x77d   : > { %v4383_v6 = vpop.permute.xlu1 %4382 }
 0x77e   : > { %v4393_v36 = vadd.f32 %v6085_v9, %v4383_v6  ;;  %v10400_v9 = vld [vmem:[#allocation16_spill] sm:$0xff] }
 0x780   : > { %v4401_v17 = vmax.f32 %v4393_v36, 0.0  ;;  %v4471_v51 = vpop.permute.xlu2 %4470 }
 0x781   : > { %v4502_v55 = vadd.f32 %v9029_v41, %v4471_v51 }
 0x782   : > { %v9020_v22 = vsub.f32 %v4351_v7, %v4401_v17 }
 0x783   : > { %v4510_v30 = vmax.f32 %v4502_v55, 0.0 }
 0x785   : > { %v4518_v8 = vsub.f32 %v4460_v34, %v4510_v30 }
 0x786   : > { %v4421_v16 = vpop.permute.xlu1 %4420 }
 0x787   : > { %v4446_v4 = vadd.f32 %v9025_v60, %v4421_v16 }
 0x788   : > { %v4483_v35 = vpop.permute.xlu2 %4482 }
 0x789   : > { %v4505_v47 = vadd.f32 %v9029_v41, %v4483_v35  ;;  %v4454_v51 = vmax.f32 %v4446_v4, 0.0 }
 0x78b   : > { %v4513_v46 = vmax.f32 %v4505_v47, 0.0 }
 0x78d   : > { %v4521_v49 = vsub.f32 %v4463_v12, %v4513_v46 }
 0x78e   : > { %v9022_v14 = vpop.permute.xlu1 %4428 }
 0x790   : > { %v4491_v1 = vpop.permute.xlu2 %4490 }
 0x791   : > { %v4507_v42 = vadd.f32 %v9029_v41, %v4491_v1 }
 0x793   : > { %v4515_v24 = vmax.f32 %v4507_v42, 0.0 }
 0x795   : > { %v4523_v31 = vsub.f32 %v4465_v5, %v4515_v24 }
 0x796   : > { %v9032_v43 = vpop.permute.xlu1 %4440 }
 0x799   : > { %v4529_v44 = vpop.permute.xlu2 %4528 }
 0x79a   : > { %v4560_v37 = vadd.f32 %v9036_v59, %v4529_v44  ;;  %v4462_v44 = vsub.f32 %v9016_v45, %v4454_v51 }
 0x79c   : > { %v4568_v57 = vmax.f32 %v4560_v37, 0.0  ;;  %v4448_v37 = vadd.f32 %v9025_v60, %v9022_v14 }
 0x79e   : > { %v4576_v0 = vsub.f32 %v4518_v8, %v4568_v57  ;;  %v4456_v10 = vmax.f32 %v4448_v37, 0.0 }
 0x79f   : > { %v4479_v23 = vpop.permute.xlu1 %4478 }
 0x7a0   : > { %v4586_v3 = vadd.f32 %v10400_v9, %v4576_v0  ;;  %v4504_v52 = vadd.f32 %v9029_v41, %v4479_v23 }
 0x7a1   : > { %v4541_v29 = vpop.permute.xlu2 %4540 }
 0x7a2   : > { %v4602_v25 = vmin.f32 %v4586_v3, 20.0  ;;  %v4563_v39 = vadd.f32 %v9036_v59, %v4541_v29  ;;  %v4512_v27 = vmax.f32 %v4504_v52, 0.0  ;;  %vm4594_vm6 = vcmp.gt.f32.partialorder %v4586_v3, 20.0 }
 0x7a4   : > { %v4610_v61 = vmul.f32 1.442695, %v4602_v25  ;;  %v4571_v62 = vmax.f32 %v4563_v39, 0.0  ;;  %v4520_v47 = vsub.f32 %v4462_v44, %v4512_v27 }
 0x7a6   : > { %5958 = vpow2.f32 %v4610_v61  ;;  %v4579_v21 = vsub.f32 %v4521_v49, %v4571_v62  ;;  %v4451_v61 = vadd.f32 %v9025_v60, %v9032_v43 }
 0x7a7   : > { %v4487_v26 = vpop.permute.xlu1 %4486 }
 0x7a8   : > { %v4589_v40 = vadd.f32 %v10400_v9, %v4579_v21  ;;  %v4506_v23 = vadd.f32 %v9029_v41, %v4487_v26  ;;  %v4464_v21 = vsub.f32 %v9018_v48, %v4456_v10 }
 0x7a9   : > { %v4549_v38 = vpop.permute.xlu2 %4548 }
 0x7aa   : > { %v4605_v58 = vmin.f32 %v4589_v40, 20.0  ;;  %v4565_v11 = vadd.f32 %v9036_v59, %v4549_v38  ;;  %vm4597_vm8 = vcmp.gt.f32.partialorder %v4589_v40, 20.0  ;;  %v4514_v49 = vmax.f32 %v4506_v23, 0.0 }
 0x7ac   : > { %v5959_v32 = vpop.eup %5958  ;;  %v4616_v53 = vmul.f32 1.442695, %v4605_v58  ;;  %v4573_v28 = vmax.f32 %v4565_v11, 0.0  ;;  %v4522_v11 = vsub.f32 %v4464_v21, %v4514_v49 }
 0x7ad   : > { %v4626_v7 = vadd.f32 1.0, %v5959_v32  ;;  %v4629_v15 = vmul.f32 -0.5, %v5959_v32  ;;  %v4632_v54 = vand.u32 2147483647, %v5959_v32 }
 0x7ae   : > { %5960 = vpow2.f32 %v4616_v53  ;;  %v4581_v50 = vsub.f32 %v4523_v31, %v4573_v28  ;;  %v4459_v53 = vmax.f32 %v4451_v61, 0.0 }
 0x7af   : > { %5962 = vlog2.f32 %v4626_v7  ;;  %v4499_v18 = vpop.permute.xlu1 %4498  ;;  %v4630_v19 = vadd.f32 1.0, %v4629_v15  ;;  %vm4633_vm5 = vcmp.lt.f32.partialorder %v4632_v54, 0.0004427343 }
 0x7b0   : > { %v9047_v63 = vadd.f32 %v10400_v9, %v4581_v50  ;;  %v4509_v5 = vadd.f32 %v9029_v41, %v4499_v18  ;;  %v4467_v50 = vsub.f32 %v9020_v22, %v4459_v53 }
 0x7b1   : > { %v4631_v13 = vmul.f32 %v5959_v32, %v4630_v19 }
 0x7b2   : > { %v4607_v56 = vmin.f32 %v9047_v63, 20.0  ;;  %v4517_v43 = vmax.f32 %v4509_v5, 0.0  ;;  %vm4599_vm10 = vcmp.gt.f32.partialorder %v9047_v63, 20.0 }
 0x7b4   : > { %v5961_v6 = vpop.eup %5960  ;;  %v4620_v36 = vmul.f32 1.442695, %v4607_v56  ;;  %v4525_v56 = vsub.f32 %v4467_v50, %v4517_v43 }
 0x7b5   : > { %v5963_v17 = vpop.eup %5962  ;;  %v4653_v35 = vadd.f32 1.0, %v5961_v6  ;;  %v4656_v55 = vmul.f32 -0.5, %v5961_v6  ;;  %v4659_v57 = vand.u32 2147483647, %v5961_v6 }
 0x7b6   : > { %v4628_v1 = vmul.f32 0.6931472, %v5963_v17  ;;  %5964 = vpow2.f32 %v4620_v36 }
 0x7b7   : > { %5966 = vlog2.f32 %v4653_v35  ;;  %v4657_v8 = vadd.f32 1.0, %v4656_v55  ;;  %vm4660_vm7 = vcmp.lt.f32.partialorder %v4659_v57, 0.0004427343 }
 0x7b8   : > { %v4634_v16 = vsel %vm4633_vm5, %v4631_v13, %v4628_v1  ;;  %v4537_v30 = vpop.permute.xlu1 %4536 }
 0x7b9   : > { %v9053_v34 = vsel %vm4594_vm6, %v4586_v3, %v4634_v16  ;;  %v4562_v2 = vadd.f32 %v9036_v59, %v4537_v30  ;;  %v4658_v45 = vmul.f32 %v5961_v6, %v4657_v8 }
 0x7bb   : > { %v4570_v20 = vmax.f32 %v4562_v2, 0.0 }
 0x7bc   : > { %v5965_v0 = vpop.eup %5964 }
 0x7bd   : > { %v5967_v46 = vpop.eup %5966  ;;  %v4671_v29 = vadd.f32 1.0, %v5965_v0  ;;  %v4578_v12 = vsub.f32 %v4520_v47, %v4570_v20  ;;  %v4674_v3 = vmul.f32 -0.5, %v5965_v0  ;;  %v4677_v38 = vand.u32 2147483647, %v5965_v0 }
 0x7be   : > { %v4655_v25 = vmul.f32 0.6931472, %v5967_v46 }
 0x7bf   : > { %5968 = vlog2.f32 %v4671_v29  ;;  %v4588_v39 = vadd.f32 %v10400_v9, %v4578_v12  ;;  %v4675_v26 = vadd.f32 1.0, %v4674_v3  ;;  %vm4678_vm9 = vcmp.lt.f32.partialorder %v4677_v38, 0.0004427343 }
 0x7c0   : > { %v4661_v14 = vsel %vm4660_vm7, %v4658_v45, %v4655_v25  ;;  %v4545_v42 = vpop.permute.xlu1 %4544 }
 0x7c1   : > { %v9062_v62 = vsel %vm4597_vm8, %v4589_v40, %v4661_v14  ;;  %v4604_v33 = vmin.f32 %v4588_v39, 20.0  ;;  %v4564_v24 = vadd.f32 %v9036_v59, %v4545_v42  ;;  %v4676_v7 = vmul.f32 %v5965_v0, %v4675_v26 }
 0x7c2   : > { %vm4596_vm12 = vcmp.gt.f32.partialorder %v4588_v39, 20.0 }
 0x7c3   : > { %v4614_v58 = vmul.f32 1.442695, %v4604_v33  ;;  %v4572_v32 = vmax.f32 %v4564_v24, 0.0 }
 0x7c5   : > { %v5969_v31 = vpop.eup %5968  ;;  %5970 = vpow2.f32 %v4614_v58  ;;  %v4580_v60 = vsub.f32 %v4522_v11, %v4572_v32 }
 0x7c6   : > { %v4673_v28 = vmul.f32 0.6931472, %v5969_v31 }
 0x7c7   : > { %v4590_v40 = vadd.f32 %v10400_v9, %v4580_v60 }
 0x7c8   : > { %v4679_v48 = vsel %vm4678_vm9, %v4676_v7, %v4673_v28  ;;  %v4557_v15 = vpop.permute.xlu1 %4556 }
 0x7c9   : > { %v9071_v41 = vsel %vm4599_vm10, %v9047_v63, %v4679_v48  ;;  %v4567_v18 = vadd.f32 %v9036_v59, %v4557_v15  ;;  %v4606_v4 = vmin.f32 %v4590_v40, 20.0  ;;  %vm4598_vm14 = vcmp.gt.f32.partialorder %v4590_v40, 20.0 }
 0x7cb   : > { %v5971_v19 = vpop.eup %5970  ;;  %v4575_v54 = vmax.f32 %v4567_v18, 0.0  ;;  %v4618_v6 = vmul.f32 1.442695, %v4606_v4 }
 0x7cc   : > { %v4644_v52 = vadd.f32 1.0, %v5971_v19  ;;  %v4647_v36 = vmul.f32 -0.5, %v5971_v19  ;;  %v4650_v22 = vand.u32 2147483647, %v5971_v19 }
 0x7cd   : > { %v4583_v17 = vsub.f32 %v4525_v56, %v4575_v54 }
 0x7ce   : > { %5972 = vlog2.f32 %v4644_v52  ;;  %v4648_v35 = vadd.f32 1.0, %v4647_v36  ;;  %vm4651_vm11 = vcmp.lt.f32.partialorder %v4650_v22, 0.0004427343 }
 0x7cf   : > { %5974 = vpow2.f32 %v4618_v6  ;;  %v4593_v51 = vadd.f32 %v10400_v9, %v4583_v17 }
 0x7d0   : > { %v4649_v59 = vmul.f32 %v5971_v19, %v4648_v35 }
 0x7d1   : > { %v4609_v1 = vmin.f32 %v4593_v51, 20.0  ;;  %vm4601_vm0 = vcmp.gt.f32.partialorder %v4593_v51, 20.0 }
 0x7d3   : > { %v4624_v13 = vmul.f32 1.442695, %v4609_v1 }
 0x7d4   : > { %v5973_v63 = vpop.eup %5972 }
 0x7d5   : > { %v5975_v55 = vpop.eup %5974  ;;  %v4646_v27 = vmul.f32 0.6931472, %v5973_v63  ;;  %5976 = vpow2.f32 %v4624_v13 }
 0x7d6   : > { %v4662_v16 = vadd.f32 1.0, %v5975_v55  ;;  %v4665_v44 = vmul.f32 -0.5, %v5975_v55  ;;  %v4668_v9 = vand.u32 2147483647, %v5975_v55 }
 0x7d7   : > { %v4652_v30 = vsel %vm4651_vm11, %v4649_v59, %v4646_v27 }
 0x7d8   : > { %v9075_v2 = vsel %vm4596_vm12, %v4588_v39, %v4652_v30  ;;  %5978 = vlog2.f32 %v4662_v16  ;;  %v4666_v8 = vadd.f32 1.0, %v4665_v44  ;;  %vm4669_vm13 = vcmp.lt.f32.partialorder %v4668_v9, 0.0004427343 }
 0x7da   : > { %v4667_v23 = vmul.f32 %v5975_v55, %v4666_v8 }
 0x7db   : > { %v5977_v37 = vpop.eup %5976 }
 0x7dc   : > { %v4689_v47 = vadd.f32 1.0, %v5977_v37  ;;  %v4692_v57 = vmul.f32 -0.5, %v5977_v37  ;;  %v4695_v10 = vand.u32 2147483647, %v5977_v37 }
 0x7de   : > { %v5979_v20 = vpop.eup %5978  ;;  %5980 = vlog2.f32 %v4689_v47  ;;  %v4693_v29 = vadd.f32 1.0, %v4692_v57  ;;  %vm4696_vm15 = vcmp.lt.f32.partialorder %v4695_v10, 0.0004427343 }
 0x7df   : > { %v4664_v0 = vmul.f32 0.6931472, %v5979_v20 }
 0x7e0   : > { %v4694_v3 = vmul.f32 %v5977_v37, %v4693_v29 }
 0x7e1   : > { %v4670_v46 = vsel %vm4669_vm13, %v4667_v23, %v4664_v0 }
 0x7e2   : > { %v9077_v12 = vsel %vm4598_vm14, %v4590_v40, %v4670_v46 }
 0x7e4   : > { %v5981_v25 = vpop.eup %5980  ;;  %4709 = sbr.rel (%p5514_p12) target bundleno = 2421 (0x975), region = 78 }
 0x7e5   : > { %v4691_v45 = vmul.f32 0.6931472, %v5981_v25 }
 0x7e7   : > { %v4697_v39 = vsel %vm4696_vm15, %v4694_v3, %v4691_v45 }
 0x7e8   : > { %v9079_v14 = vsel %vm4601_vm0, %v4593_v51, %v4697_v39 }
 0x7e9   : > { %4726 = vmax.xlane.f32.xlu2 %v9077_v12  ;;  %4722 = vmax.xlane.f32.xlu1 %v9075_v2  ;;  %v10401_v49 = vld [vmem:[#allocation27_spill] sm:$0xff]  ;;  %v10402_v42 = vld [vmem:[#allocation29_spill] sm:$0xff]  ;;  %v6305_v61 = vmov 0   ;;  %v9090_v33 = vld [vmem:[#allocation2 + $0x20] sm:$0xff]  ;;  %vm4870_vm1 = vcmask 7168  }
 0x7ea   : > { %4718 = vmax.xlane.f32.xlu0 %v9053_v34  ;;  %6091 = vset.pattern.permute.xlu1 %v6305_v61  ;;  %v9092_v21 = vld [vmem:[#allocation2 + $0x10] sm:$0xff]  ;;  %v9094_v26 = vld [vmem:[#allocation2] sm:$0xff]  ;;  %v9119_v7 = vld [vmem:[#allocation2 + $0x28] sm:$0xff] }
 0x7eb   : > { %6089 = vset.pattern.permute.xlu2 %v6305_v61  ;;  %6090 = vset.pattern.permute.xlu0 %v6305_v61  ;;  %v9121_v60 = vld [vmem:[#allocation2 + $0x18] sm:$0xff]  ;;  %v9123_v43 = vld [vmem:[#allocation2 + $0x8] sm:$0xff]  ;;  %v9151_v6 = vld [vmem:[#allocation2 + $0x30] sm:$0xff] }
 0x7ec   : > { %v9149_v52 = vld [vmem:[#allocation2 + $0x38] sm:$0xff] }
 0x7f1   : > { %4728 = vmax.xlane.f32.xlu2 %v9071_v41  ;;  %4724 = vmax.xlane.f32.xlu1 %v9062_v62 }
 0x7f2   : > { %4720 = vmax.xlane.f32.xlu0 %v10401_v49 }
 0x7f9   : > { %4732 = vmax.xlane.f32.xlu1 %v9079_v14 }
 0x7fa   : > { %4730 = vmax.xlane.f32.xlu0 %v10402_v42 }
 0x85c   : > { %v4727_v24 = vpop.xlane.xlu2 %4726  ;;  %v4723_v38 = vpop.xlane.xlu1 %4722 }
 0x85d   : > { %v9097_v5 = vmax.f32 %v9090_v33, %v4727_v24  ;;  %v9100_v58 = vmax.f32 %v9092_v21, %v4723_v38  ;;  %v4719_v11 = vpop.xlane.xlu0 %4718 }
 0x85e   : > { %v9103_v32 = vmax.f32 %v9094_v26, %v4719_v11 }
 0x85f   : > { %v4746_v31 = vsub.f32 %v9090_v33, %v9097_v5  ;;  %4883 = vst.msk [vmem:[#allocation2 + $0x20] sm:$0xff] %vm4870_vm1, %v9097_v5  ;;  %v4744_v53 = vsub.f32 %v9092_v21, %v9100_v58  ;;  %4794 = vperm.xlu1 %6091, %v9100_v58  }
 0x860   : > { %4881 = vst.msk [vmem:[#allocation2 + $0x10] sm:$0xff] %vm4870_vm1, %v9100_v58  ;;  %v4742_v28 = vsub.f32 %v9094_v26, %v9103_v32  ;;  %4784 = vperm.xlu2 %6089, %v9103_v32  }
 0x861   : > { %4879 = vst.msk [vmem:[#allocation2] sm:$0xff] %vm4870_vm1, %v9103_v32  ;;  %v4754_v26 = vmul.f32 1.442695, %v4744_v53 }
 0x864   : > { %v4729_v48 = vpop.xlane.xlu2 %4728  ;;  %v4725_v40 = vpop.xlane.xlu1 %4724 }
 0x865   : > { %v9126_v15 = vmax.f32 %v9119_v7, %v4729_v48  ;;  %v9129_v50 = vmax.f32 %v9121_v60, %v4725_v40  ;;  %v4721_v18 = vpop.xlane.xlu0 %4720 }
 0x866   : > { %v9132_v4 = vmax.f32 %v9123_v43, %v4721_v18 }
 0x867   : > { %v4747_v19 = vsub.f32 %v9119_v7, %v9126_v15  ;;  %4884 = vst.msk [vmem:[#allocation2 + $0x28] sm:$0xff] %vm4870_vm1, %v9126_v15  ;;  %v4745_v56 = vsub.f32 %v9121_v60, %v9129_v50  ;;  %4809 = vperm.xlu1 %6091, %v9126_v15   ;;  %v4771_v15 = vld [vmem:[#allocation3 + $0x28] sm:$0xff] }
 0x868   : > { %4882 = vst.msk [vmem:[#allocation2 + $0x18] sm:$0xff] %vm4870_vm1, %v9129_v50  ;;  %v4743_v54 = vsub.f32 %v9123_v43, %v9132_v4  ;;  %4789 = vperm.xlu0 %6090, %v9132_v4   ;;  %4799 = vperm.xlu2 %6089, %v9129_v50   ;;  %v4773_v50 = vld [vmem:[#allocation3 + $0x38] sm:$0xff] }
 0x869   : > { %4880 = vst.msk [vmem:[#allocation2 + $0x8] sm:$0xff] %vm4870_vm1, %v9132_v4  ;;  %v4756_v7 = vmul.f32 1.442695, %v4745_v56 }
 0x86a   : > { %v4752_v33 = vmul.f32 1.442695, %v4743_v54 }
 0x86c   : > { %v4733_v36 = vpop.xlane.xlu1 %4732 }
 0x86d   : > { %v9154_v17 = vmax.f32 %v9149_v52, %v4733_v36  ;;  %v4731_v51 = vpop.xlane.xlu0 %4730 }
 0x86e   : > { %v9157_v35 = vmax.f32 %v9151_v6, %v4731_v51  ;;  %v4889_v51 = vld [vmem:[#allocation4 + $0x10] sm:$0xff] }
 0x86f   : > { %v4749_v1 = vsub.f32 %v9149_v52, %v9154_v17  ;;  %4886 = vst.msk [vmem:[#allocation2 + $0x38] sm:$0xff] %vm4870_vm1, %v9154_v17  ;;  %4819 = vperm.xlu1 %6091, %v9154_v17   ;;  %v4769_v17 = vld [vmem:[#allocation3 + $0x18] sm:$0xff] }
 0x870   : > { %4804 = vperm.xlu2 %6089, %v9097_v5   ;;  %v4748_v22 = vsub.f32 %v9151_v6, %v9157_v35  ;;  %4885 = vst.msk [vmem:[#allocation2 + $0x30] sm:$0xff] %vm4870_vm1, %v9157_v35 }
 0x872   : > { %v4762_v52 = vmul.f32 1.442695, %v4748_v22  ;;  %v4892_v22 = vld [vmem:[#allocation4 + $0x28] sm:$0xff] }
 0x878   : > { %4814 = vperm.xlu2 %6089, %v9157_v35   ;;  %v4772_v35 = vld [vmem:[#allocation3 + $0x30] sm:$0xff] }
 0x892   : > { %4899 = vadd.xlane.f32.xlu0 %v9075_v2 }
 0x899   : > { %4895 = vadd.xlane.f32.xlu1 %v9053_v34 }
 0x8a1   : > { %4901 = vadd.xlane.f32.xlu1 %v9062_v62  ;;  %4897 = vadd.xlane.f32.xlu2 %v10401_v49 }
 0x8a9   : > { %4903 = vadd.xlane.f32.xlu2 %v9077_v12 }
 0x8ba   : > { %v4785_v13 = vpop.permute.xlu2 %4784 }
 0x8bb   : > { %v4822_v63 = vsub.f32 %v9053_v34, %v4785_v13 }
 0x8bd   : > { %v4830_v55 = vmul.f32 1.442695, %v4822_v63 }
 0x8bf   : > { %6092 = vpow2.f32 %v4830_v55  ;;  %v4887_v55 = vld [vmem:[#allocation4] sm:$0xff] }
 0x8c2   : > { %v4800_v27 = vpop.permute.xlu2 %4799 }
 0x8c3   : > { %v4825_v25 = vsub.f32 %v9062_v62, %v4800_v27 }
 0x8c5   : > { %v6093_v59 = vpop.eup %6092  ;;  %v4836_v39 = vmul.f32 1.442695, %v4825_v25  ;;  %v4758_v25 = vmul.f32 1.442695, %v4746_v31  ;;  %v4768_v31 = vld [vmem:[#allocation3 + $0x10] sm:$0xff] }
 0x8c6   : > { %4846 = vadd.xlane.f32.xlu0 %v6093_v59 }
 0x8ca   : > { %v4805_v16 = vpop.permute.xlu2 %4804 }
 0x8cb   : > { %v4826_v30 = vsub.f32 %v9077_v12, %v4805_v16  ;;  %v4890_v16 = vld [vmem:[#allocation4 + $0x18] sm:$0xff] }
 0x8cd   : > { %v4838_v44 = vmul.f32 1.442695, %v4826_v30 }
 0x8cf   : > { %6094 = vpow2.f32 %v4838_v44  ;;  %v4888_v44 = vld [vmem:[#allocation4 + $0x8] sm:$0xff] }
 0x8d1   : > { %v4795_v37 = vpop.permute.xlu1 %4794 }
 0x8d2   : > { %v4824_v8 = vsub.f32 %v9075_v2, %v4795_v37  ;;  %v4815_v24 = vpop.permute.xlu2 %4814 }
 0x8d4   : > { %v4834_v9 = vmul.f32 1.442695, %v4824_v8  ;;  %v4750_v8 = vmul.f32 1.442695, %v4742_v28  ;;  %v4770_v28 = vld [vmem:[#allocation3 + $0x20] sm:$0xff] }
 0x8d5   : > { %v6095_v47 = vpop.eup %6094 }
 0x8d6   : > { %6096 = vpow2.f32 %v4834_v9  ;;  %4854 = vadd.xlane.f32.xlu0 %v6095_v47  ;;  %v4891_v47 = vld [vmem:[#allocation4 + $0x20] sm:$0xff] }
 0x8d9   : > { %v4810_v57 = vpop.permute.xlu1 %4809 }
 0x8da   : > { %v4827_v20 = vsub.f32 %v9071_v41, %v4810_v57  ;;  %v4790_v0 = vpop.permute.xlu0 %4789 }
 0x8db   : > { %v4823_v23 = vsub.f32 %v10401_v49, %v4790_v0  ;;  %v4828_v49 = vsub.f32 %v10402_v42, %v4815_v24  ;;  %v4764_v24 = vmul.f32 1.442695, %v4749_v1  ;;  %v4893_v1 = vld [vmem:[#allocation4 + $0x30] sm:$0xff] }
 0x8dc   : > { %v6097_v46 = vpop.eup %6096  ;;  %v4840_v29 = vmul.f32 1.442695, %v4827_v20 }
 0x8dd   : > { %v4832_v10 = vmul.f32 1.442695, %v4823_v23  ;;  %4850 = vadd.xlane.f32.xlu1 %v6097_v46  ;;  %v4842_v48 = vmul.f32 1.442695, %v4828_v49  ;;  %v4766_v23 = vld [vmem:[#allocation3] sm:$0xff] }
 0x8de   : > { %6098 = vpow2.f32 %v4840_v29 }
 0x8df   : > { %6100 = vpow2.f32 %v4832_v10 }
 0x8e1   : > { %v4820_v45 = vpop.permute.xlu1 %4819 }
 0x8e2   : > { %v4829_v3 = vsub.f32 %v9079_v14, %v4820_v45 }
 0x8e4   : > { %v6099_v61 = vpop.eup %6098  ;;  %v4844_v38 = vmul.f32 1.442695, %v4829_v3 }
 0x8e5   : > { %v6101_v11 = vpop.eup %6100  ;;  %4856 = vadd.xlane.f32.xlu1 %v6099_v61 }
 0x8e6   : > { %6102 = vpow2.f32 %v4844_v38  ;;  %4848 = vadd.xlane.f32.xlu2 %v6101_v11 }
 0x8e7   : > { %6104 = vpow2.f32 %v4836_v39  ;;  %v4760_v39 = vmul.f32 1.442695, %v4747_v19  ;;  %v4767_v19 = vld [vmem:[#allocation3 + $0x8] sm:$0xff] }
 0x8e8   : > { %6106 = vpow2.f32 %v4842_v48 }
 0x8e9   : > { %6108 = vpow2.f32 %v4750_v8  ;;  %v4894_v8 = vld [vmem:[#allocation4 + $0x38] sm:$0xff] }
 0x8ea   : > { %6110 = vpow2.f32 %v4758_v25 }
 0x8eb   : > { %6112 = vpow2.f32 %v4754_v26 }
 0x8ec   : > { %v6103_v40 = vpop.eup %6102  ;;  %6114 = vpow2.f32 %v4760_v39 }
 0x8ed   : > { %v6105_v18 = vpop.eup %6104  ;;  %4860 = vadd.xlane.f32.xlu0 %v6103_v40  ;;  %4907 = vadd.xlane.f32.xlu1 %v10402_v42  ;;  %6116 = vpow2.f32 %v4752_v33 }
 0x8ee   : > { %4852 = vadd.xlane.f32.xlu2 %v6105_v18  ;;  %v6107_v36 = vpop.eup %6106  ;;  %6118 = vpow2.f32 %v4764_v24 }
 0x8ef   : > { %v6109_v0 = vpop.eup %6108  ;;  %6120 = vpow2.f32 %v4756_v7 }
 0x8f0   : > { %v4774_v46 = vmul.f32 %v6109_v0, %v4766_v23  ;;  %v6111_v32 = vpop.eup %6110  ;;  %6122 = vpow2.f32 %v4762_v52 }
 0x8f1   : > { %v4778_v45 = vmul.f32 %v6111_v32, %v4770_v28  ;;  %v6113_v5 = vpop.eup %6112 }
 0x8f2   : > { %v4776_v21 = vmul.f32 %v6113_v5, %v4768_v31  ;;  %v6115_v43 = vpop.eup %6114 }
 0x8f3   : > { %v6117_v4 = vpop.eup %6116  ;;  %v4779_v54 = vmul.f32 %v6115_v43, %v4771_v15 }
 0x8f4   : > { %v4775_v11 = vmul.f32 %v6117_v4, %v4767_v19  ;;  %v6119_v60 = vpop.eup %6118 }
 0x8f5   : > { %4905 = vadd.xlane.f32.xlu0 %v9071_v41  ;;  %v6121_v56 = vpop.eup %6120  ;;  %v4781_v18 = vmul.f32 %v6119_v60, %v4773_v50 }
 0x8f6   : > { %4858 = vadd.xlane.f32.xlu2 %v6107_v36  ;;  %v6123_v6 = vpop.eup %6122 }
 0x8fe   : > { %4909 = vadd.xlane.f32.xlu2 %v9079_v14 }
 0x905   : > { %v4900_v13 = vpop.xlane.xlu0 %4899 }
 0x906   : > { %v4913_v63 = vadd.f32 %v4900_v13, %v4889_v51  ;;  %v4777_v51 = vmul.f32 %v6121_v56, %v4769_v17 }
 0x908   : > { %4921 = vst.msk [vmem:[#allocation4 + $0x10] sm:$0xff] %vm4870_vm1, %v4913_v63 }
 0x90c   : > { %v4896_v27 = vpop.xlane.xlu1 %4895 }
 0x90d   : > { %v4911_v59 = vadd.f32 %v4896_v27, %v4887_v55 }
 0x90f   : > { %4919 = vst.msk [vmem:[#allocation4] sm:$0xff] %vm4870_vm1, %v4911_v59 }
 0x914   : > { %v4902_v42 = vpop.xlane.xlu1 %4901  ;;  %v4898_v37 = vpop.xlane.xlu2 %4897 }
 0x915   : > { %v4914_v30 = vadd.f32 %v4902_v42, %v4890_v16  ;;  %v4912_v9 = vadd.f32 %v4898_v37, %v4888_v44  ;;  %v4780_v16 = vmul.f32 %v6123_v6, %v4772_v35 }
 0x917   : > { %4922 = vst.msk [vmem:[#allocation4 + $0x18] sm:$0xff] %vm4870_vm1, %v4914_v30 }
 0x918   : > { %4920 = vst.msk [vmem:[#allocation4 + $0x8] sm:$0xff] %vm4870_vm1, %v4912_v9 }
 0x91c   : > { %v4904_v57 = vpop.xlane.xlu2 %4903 }
 0x91d   : > { %v4915_v20 = vadd.f32 %v4904_v57, %v4891_v47 }
 0x91f   : > { %4923 = vst.msk [vmem:[#allocation4 + $0x20] sm:$0xff] %vm4870_vm1, %v4915_v20 }
 0x939   : > { %v4847_v29 = vpop.xlane.xlu0 %4846 }
 0x93a   : > { %v4862_v10 = vadd.f32 %v4847_v29, %v4774_v46 }
 0x93c   : > { %4871 = vst.msk [vmem:[#allocation3] sm:$0xff] %vm4870_vm1, %v4862_v10 }
 0x949   : > { %v4855_v3 = vpop.xlane.xlu0 %4854 }
 0x94a   : > { %v4866_v61 = vadd.f32 %v4855_v3, %v4778_v45 }
 0x94c   : > { %4875 = vst.msk [vmem:[#allocation3 + $0x20] sm:$0xff] %vm4870_vm1, %v4866_v61 }
 0x950   : > { %v4851_v58 = vpop.xlane.xlu1 %4850 }
 0x951   : > { %v4864_v53 = vadd.f32 %v4851_v58, %v4776_v21 }
 0x953   : > { %4873 = vst.msk [vmem:[#allocation3 + $0x10] sm:$0xff] %vm4870_vm1, %v4864_v53 }
 0x958   : > { %v4857_v38 = vpop.xlane.xlu1 %4856 }
 0x959   : > { %v4867_v49 = vadd.f32 %v4857_v38, %v4779_v54  ;;  %v4849_v48 = vpop.xlane.xlu2 %4848 }
 0x95a   : > { %v4863_v40 = vadd.f32 %v4849_v48, %v4775_v11 }
 0x95b   : > { %4876 = vst.msk [vmem:[#allocation3 + $0x28] sm:$0xff] %vm4870_vm1, %v4867_v49 }
 0x95c   : > { %4872 = vst.msk [vmem:[#allocation3 + $0x8] sm:$0xff] %vm4870_vm1, %v4863_v40 }
 0x960   : > { %v4861_v36 = vpop.xlane.xlu0 %4860  ;;  %v4908_v13 = vpop.xlane.xlu1 %4907 }
 0x961   : > { %v4869_v63 = vadd.f32 %v4861_v36, %v4781_v18  ;;  %v4853_v55 = vpop.xlane.xlu2 %4852  ;;  %v4917_v27 = vadd.f32 %v4908_v13, %v4893_v1 }
 0x962   : > { %v4865_v59 = vadd.f32 %v4853_v55, %v4777_v51 }
 0x963   : > { %4878 = vst.msk [vmem:[#allocation3 + $0x38] sm:$0xff] %vm4870_vm1, %v4869_v63 }
 0x964   : > { %4874 = vst.msk [vmem:[#allocation3 + $0x18] sm:$0xff] %vm4870_vm1, %v4865_v59 }
 0x965   : > { %4925 = vst.msk [vmem:[#allocation4 + $0x30] sm:$0xff] %vm4870_vm1, %v4917_v27 }
 0x968   : > { %v4906_v42 = vpop.xlane.xlu0 %4905 }
 0x969   : > { %v4859_v30 = vpop.xlane.xlu2 %4858  ;;  %v4916_v44 = vadd.f32 %v4906_v42, %v4892_v22 }
 0x96a   : > { %v4868_v37 = vadd.f32 %v4859_v30, %v4780_v16 }
 0x96b   : > { %4924 = vst.msk [vmem:[#allocation4 + $0x28] sm:$0xff] %vm4870_vm1, %v4916_v44 }
 0x96c   : > { %4877 = vst.msk [vmem:[#allocation3 + $0x30] sm:$0xff] %vm4870_vm1, %v4868_v37 }
 0x971   : > { %v4910_v9 = vpop.xlane.xlu2 %4909 }
 0x972   : > { %v4918_v47 = vadd.f32 %v4910_v9, %v4894_v8 }
 0x974   : > { %4926 = vst.msk [vmem:[#allocation4 + $0x38] sm:$0xff] %vm4870_vm1, %v4918_v47 }
 0x975 PF: > { %p5515_p13 = scmp.ne.s32.totalorder %s6213_s22, 1 }
 0x976   : > { %s5516_s14 = sshll.u32 (!%p5515_p13), %s6213_s22, 7 }
 0x977   : > { %4930 = sbr.rel (%p5515_p13) target bundleno = 2832 (0xb10), region = 82 }
 0x97c   : > { %v4932_v57 = vlaneseq  ;;  %v4934_v20 = vstv %s5516_s14  ;;  %v10403_v32 = vld [vmem:[#allocation27_spill] sm:$0xff]  ;;  %v10404_v3 = vld [vmem:[#allocation29_spill] sm:$0xff]  ;;  %v6306_v61 = vmov 0   ;;  %v9281_v33 = vld [vmem:[#allocation2 + $0x20] sm:$0xff]  ;;  %vm5113_vm3 = vcmask 7168  }
 0x97d   : > { %6126 = vset.pattern.permute.xlu1 %v6306_v61  ;;  %6124 = vset.pattern.permute.xlu2 %v6306_v61  ;;  %v9283_v5 = vld [vmem:[#allocation2 + $0x10] sm:$0xff]  ;;  %v9285_v31 = vld [vmem:[#allocation2] sm:$0xff]  ;;  %v9310_v54 = vld [vmem:[#allocation2 + $0x28] sm:$0xff] }
 0x97e   : > { %v4933_v0 = vand.u32 127, %v4932_v57  ;;  %6125 = vset.pattern.permute.xlu0 %v6306_v61  ;;  %v9312_v38 = vld [vmem:[#allocation2 + $0x18] sm:$0xff]  ;;  %v9314_v11 = vld [vmem:[#allocation2 + $0x8] sm:$0xff]  ;;  %v9342_v36 = vld [vmem:[#allocation2 + $0x30] sm:$0xff] }
 0x97f   : > { %v9340_v18 = vld [vmem:[#allocation2 + $0x38] sm:$0xff] }
 0x980   : > { %v9230_v23 = vadd.s32 %v4934_v20, %v4933_v0 }
 0x982   : > { %vm4936_vm2 = vcmp.lt.s32.totalorder %v9230_v23, 160 }
 0x983   : > { %v9236_v46 = vsel %vm4936_vm2, %v9077_v12, -inf  ;;  %v9241_v29 = vsel %vm4936_vm2, %v9075_v2, -inf  ;;  %v9246_v10 = vsel %vm4936_vm2, %v9053_v34, -inf  ;;  %v9254_v25 = vsel %vm4936_vm2, %v9071_v41, -inf }
 0x984   : > { %4969 = vmax.xlane.f32.xlu2 %v9236_v46  ;;  %4965 = vmax.xlane.f32.xlu1 %v9241_v29  ;;  %v9259_v26 = vsel %vm4936_vm2, %v9062_v62, -inf  ;;  %v9264_v28 = vsel %vm4936_vm2, %v10403_v32, -inf  ;;  %v9272_v45 = vsel %vm4936_vm2, %v9079_v14, -inf  ;;  %v9277_v39 = vsel %vm4936_vm2, %v10404_v3, -inf }
 0x985   : > { %4961 = vmax.xlane.f32.xlu0 %v9246_v10  ;;  %v4947_v6 = vsel %vm4936_vm2, %v9075_v2, 0.0  ;;  %v4945_v35 = vsel %vm4936_vm2, %v9053_v34, 0.0  ;;  %v4948_v22 = vsel %vm4936_vm2, %v9062_v62, 0.0  ;;  %v4946_v16 = vsel %vm4936_vm2, %v10403_v32, 0.0 }
 0x986   : > { %v4949_v37 = vsel %vm4936_vm2, %v9077_v12, 0.0 }
 0x98c   : > { %4971 = vmax.xlane.f32.xlu2 %v9254_v25  ;;  %4967 = vmax.xlane.f32.xlu1 %v9259_v26 }
 0x98d   : > { %4963 = vmax.xlane.f32.xlu0 %v9264_v28 }
 0x994   : > { %4975 = vmax.xlane.f32.xlu1 %v9272_v45 }
 0x995   : > { %4973 = vmax.xlane.f32.xlu0 %v9277_v39 }
 0x9f7   : > { %v4970_v21 = vpop.xlane.xlu2 %4969  ;;  %v4966_v58 = vpop.xlane.xlu1 %4965 }
 0x9f8   : > { %v9288_v53 = vmax.f32 %v9281_v33, %v4970_v21  ;;  %v9291_v24 = vmax.f32 %v9283_v5, %v4966_v58  ;;  %v4962_v7 = vpop.xlane.xlu0 %4961 }
 0x9f9   : > { %v9294_v43 = vmax.f32 %v9285_v31, %v4962_v7 }
 0x9fa   : > { %v4989_v15 = vsub.f32 %v9281_v33, %v9288_v53  ;;  %5126 = vst.msk [vmem:[#allocation2 + $0x20] sm:$0xff] %vm5113_vm3, %v9288_v53  ;;  %v4987_v4 = vsub.f32 %v9283_v5, %v9291_v24  ;;  %5037 = vperm.xlu1 %6126, %v9291_v24  }
 0x9fb   : > { %5124 = vst.msk [vmem:[#allocation2 + $0x10] sm:$0xff] %vm5113_vm3, %v9291_v24  ;;  %v4985_v19 = vsub.f32 %v9285_v31, %v9294_v43  ;;  %5027 = vperm.xlu2 %6124, %v9294_v43  }
 0x9fc   : > { %5122 = vst.msk [vmem:[#allocation2] sm:$0xff] %vm5113_vm3, %v9294_v43  ;;  %v5001_v31 = vmul.f32 1.442695, %v4989_v15  ;;  %v4997_v43 = vmul.f32 1.442695, %v4987_v4  ;;  %v5011_v15 = vld [vmem:[#allocation3 + $0x10] sm:$0xff] }
 0x9fd   : > { %v4993_v23 = vmul.f32 1.442695, %v4985_v19 }
 0x9ff   : > { %v4972_v49 = vpop.xlane.xlu2 %4971  ;;  %v4968_v48 = vpop.xlane.xlu1 %4967 }
 0xa00   : > { %v9317_v40 = vmax.f32 %v9310_v54, %v4972_v49  ;;  %v9320_v52 = vmax.f32 %v9312_v38, %v4968_v48  ;;  %v4964_v60 = vpop.xlane.xlu0 %4963 }
 0xa01   : > { %v9323_v50 = vmax.f32 %v9314_v11, %v4964_v60 }
 0xa02   : > { %v4990_v56 = vsub.f32 %v9310_v54, %v9317_v40  ;;  %5127 = vst.msk [vmem:[#allocation2 + $0x28] sm:$0xff] %vm5113_vm3, %v9317_v40  ;;  %v4988_v17 = vsub.f32 %v9312_v38, %v9320_v52  ;;  %5052 = vperm.xlu1 %6126, %v9317_v40   ;;  %v5014_v40 = vld [vmem:[#allocation3 + $0x28] sm:$0xff] }
 0xa03   : > { %5125 = vst.msk [vmem:[#allocation2 + $0x18] sm:$0xff] %vm5113_vm3, %v9320_v52  ;;  %v4986_v1 = vsub.f32 %v9314_v11, %v9323_v50  ;;  %5042 = vperm.xlu2 %6124, %v9320_v52   ;;  %5032 = vperm.xlu0 %6125, %v9323_v50   ;;  %v5016_v52 = vld [vmem:[#allocation3 + $0x38] sm:$0xff] }
 0xa04   : > { %5123 = vst.msk [vmem:[#allocation2 + $0x8] sm:$0xff] %vm5113_vm3, %v9323_v50  ;;  %v4999_v54 = vmul.f32 1.442695, %v4988_v17 }
 0xa05   : > { %v4995_v33 = vmul.f32 1.442695, %v4986_v1 }
 0xa07   : > { %v4976_v51 = vpop.xlane.xlu1 %4975 }
 0xa08   : > { %v9345_v13 = vmax.f32 %v9340_v18, %v4976_v51  ;;  %v4974_v63 = vpop.xlane.xlu0 %4973 }
 0xa09   : > { %v9348_v55 = vmax.f32 %v9342_v36, %v4974_v63 }
 0xa0a   : > { %v4992_v27 = vsub.f32 %v9340_v18, %v9345_v13  ;;  %5129 = vst.msk [vmem:[#allocation2 + $0x38] sm:$0xff] %vm5113_vm3, %v9345_v13  ;;  %5062 = vperm.xlu1 %6126, %v9345_v13   ;;  %v5012_v13 = vld [vmem:[#allocation3 + $0x18] sm:$0xff] }
 0xa0b   : > { %5047 = vperm.xlu2 %6124, %v9288_v53   ;;  %v4991_v59 = vsub.f32 %v9342_v36, %v9348_v55  ;;  %5128 = vst.msk [vmem:[#allocation2 + $0x30] sm:$0xff] %vm5113_vm3, %v9348_v55 }
 0xa0d   : > { %v5005_v18 = vmul.f32 1.442695, %v4991_v59  ;;  %v5135_v59 = vld [vmem:[#allocation4 + $0x28] sm:$0xff] }
 0xa13   : > { %5057 = vperm.xlu2 %6124, %v9348_v55   ;;  %v5015_v55 = vld [vmem:[#allocation3 + $0x30] sm:$0xff] }
 0xa2d   : > { %5142 = vadd.xlane.f32.xlu0 %v4947_v6 }
 0xa34   : > { %5138 = vadd.xlane.f32.xlu1 %v4945_v35 }
 0xa3c   : > { %5144 = vadd.xlane.f32.xlu1 %v4948_v22  ;;  %5140 = vadd.xlane.f32.xlu2 %v4946_v16 }
 0xa44   : > { %5146 = vadd.xlane.f32.xlu2 %v4949_v37 }
 0xa55   : > { %v5028_v42 = vpop.permute.xlu2 %5027 }
 0xa56   : > { %v5065_v30 = vsub.f32 %v9246_v10, %v5028_v42 }
 0xa58   : > { %v5073_v44 = vmul.f32 1.442695, %v5065_v30 }
 0xa5a   : > { %6127 = vpow2.f32 %v5073_v44 }
 0xa5d   : > { %v5043_v8 = vpop.permute.xlu2 %5042 }
 0xa60   : > { %v6128_v9 = vpop.eup %6127 }
 0xa61   : > { %5089 = vadd.xlane.f32.xlu0 %v6128_v9 }
 0xa65   : > { %v5048_v47 = vpop.permute.xlu2 %5047 }
 0xa66   : > { %v5069_v57 = vsub.f32 %v9236_v46, %v5048_v47  ;;  %v5068_v46 = vsub.f32 %v9259_v26, %v5043_v8  ;;  %v5130_v47 = vld [vmem:[#allocation4] sm:$0xff] }
 0xa68   : > { %v5081_v20 = vmul.f32 1.442695, %v5069_v57  ;;  %v5079_v6 = vmul.f32 1.442695, %v5068_v46 }
 0xa6a   : > { %6129 = vpow2.f32 %v5081_v20 }
 0xa6c   : > { %v5038_v0 = vpop.permute.xlu1 %5037 }
 0xa6d   : > { %v5067_v32 = vsub.f32 %v9241_v29, %v5038_v0  ;;  %v5058_v22 = vpop.permute.xlu2 %5057  ;;  %v5133_v0 = vld [vmem:[#allocation4 + $0x18] sm:$0xff] }
 0xa6f   : > { %v5077_v61 = vmul.f32 1.442695, %v5067_v32  ;;  %v5131_v32 = vld [vmem:[#allocation4 + $0x8] sm:$0xff] }
 0xa70   : > { %v6130_v10 = vpop.eup %6129 }
 0xa71   : > { %6131 = vpow2.f32 %v5077_v61  ;;  %5097 = vadd.xlane.f32.xlu0 %v6130_v10 }
 0xa74   : > { %v5053_v21 = vpop.permute.xlu1 %5052 }
 0xa75   : > { %v5070_v58 = vsub.f32 %v9254_v25, %v5053_v21  ;;  %v5033_v7 = vpop.permute.xlu0 %5032  ;;  %v5071_v25 = vsub.f32 %v9277_v39, %v5058_v22  ;;  %v4952_v39 = vsel %vm4936_vm2, %v9079_v14, 0.0 }
 0xa76   : > { %v5066_v49 = vsub.f32 %v9264_v28, %v5033_v7  ;;  %v4951_v28 = vsel %vm4936_vm2, %v10404_v3, 0.0  ;;  %v5132_v3 = vld [vmem:[#allocation4 + $0x10] sm:$0xff]  ;;  %v5134_v7 = vld [vmem:[#allocation4 + $0x20] sm:$0xff] }
 0xa77   : > { %v6132_v48 = vpop.eup %6131  ;;  %v5083_v60 = vmul.f32 1.442695, %v5070_v58  ;;  %v5085_v26 = vmul.f32 1.442695, %v5071_v25  ;;  %v5007_v25 = vmul.f32 1.442695, %v4992_v27 }
 0xa78   : > { %v5075_v51 = vmul.f32 1.442695, %v5066_v49  ;;  %5093 = vadd.xlane.f32.xlu1 %v6132_v48  ;;  %v5136_v27 = vld [vmem:[#allocation4 + $0x30] sm:$0xff] }
 0xa79   : > { %6133 = vpow2.f32 %v5083_v60 }
 0xa7a   : > { %6135 = vpow2.f32 %v5075_v51  ;;  %v5009_v51 = vld [vmem:[#allocation3] sm:$0xff] }
 0xa7c   : > { %v5063_v63 = vpop.permute.xlu1 %5062 }
 0xa7d   : > { %v5072_v29 = vsub.f32 %v9272_v45, %v5063_v63  ;;  %v4950_v45 = vsel %vm4936_vm2, %v9071_v41, 0.0 }
 0xa7f   : > { %v6134_v35 = vpop.eup %6133  ;;  %v5087_v16 = vmul.f32 1.442695, %v5072_v29 }
 0xa80   : > { %v6136_v42 = vpop.eup %6135  ;;  %5099 = vadd.xlane.f32.xlu1 %v6134_v35 }
 0xa81   : > { %6137 = vpow2.f32 %v5087_v16  ;;  %5091 = vadd.xlane.f32.xlu2 %v6136_v42  ;;  %v5003_v16 = vmul.f32 1.442695, %v4990_v56  ;;  %v5010_v56 = vld [vmem:[#allocation3 + $0x8] sm:$0xff] }
 0xa82   : > { %6139 = vpow2.f32 %v5079_v6  ;;  %v5013_v6 = vld [vmem:[#allocation3 + $0x20] sm:$0xff] }
 0xa83   : > { %6141 = vpow2.f32 %v5085_v26 }
 0xa84   : > { %6143 = vpow2.f32 %v4993_v23 }
 0xa85   : > { %6145 = vpow2.f32 %v5001_v31 }
 0xa86   : > { %6147 = vpow2.f32 %v4997_v43 }
 0xa87   : > { %v6138_v30 = vpop.eup %6137  ;;  %6149 = vpow2.f32 %v5003_v16 }
 0xa88   : > { %v6140_v44 = vpop.eup %6139  ;;  %5103 = vadd.xlane.f32.xlu0 %v6138_v30  ;;  %5150 = vadd.xlane.f32.xlu1 %v4951_v28  ;;  %6151 = vpow2.f32 %v4995_v33 }
 0xa89   : > { %5095 = vadd.xlane.f32.xlu2 %v6140_v44  ;;  %v6142_v37 = vpop.eup %6141  ;;  %6153 = vpow2.f32 %v5007_v25 }
 0xa8a   : > { %v6144_v60 = vpop.eup %6143  ;;  %6155 = vpow2.f32 %v4999_v54 }
 0xa8b   : > { %v5017_v46 = vmul.f32 %v6144_v60, %v5009_v51  ;;  %v6146_v19 = vpop.eup %6145  ;;  %6157 = vpow2.f32 %v5005_v18 }
 0xa8c   : > { %v5021_v35 = vmul.f32 %v6146_v19, %v5013_v6  ;;  %v6148_v53 = vpop.eup %6147 }
 0xa8d   : > { %v5019_v5 = vmul.f32 %v6148_v53, %v5011_v15  ;;  %v6150_v11 = vpop.eup %6149 }
 0xa8e   : > { %v6152_v50 = vpop.eup %6151  ;;  %v5022_v1 = vmul.f32 %v6150_v11, %v5014_v40 }
 0xa8f   : > { %v5018_v26 = vmul.f32 %v6152_v50, %v5010_v56  ;;  %v6154_v38 = vpop.eup %6153 }
 0xa90   : > { %5148 = vadd.xlane.f32.xlu0 %v4950_v45  ;;  %v6156_v17 = vpop.eup %6155 }
 0xa91   : > { %5101 = vadd.xlane.f32.xlu2 %v6142_v37  ;;  %v5024_v37 = vmul.f32 %v6154_v38, %v5016_v52  ;;  %v6158_v36 = vpop.eup %6157 }
 0xa99   : > { %5152 = vadd.xlane.f32.xlu2 %v4952_v39  ;;  %v5020_v39 = vmul.f32 %v6156_v17, %v5012_v13 }
 0xaa0   : > { %v5143_v8 = vpop.xlane.xlu0 %5142 }
 0xaa1   : > { %v5156_v9 = vadd.f32 %v5143_v8, %v5132_v3 }
 0xaa3   : > { %5164 = vst.msk [vmem:[#allocation4 + $0x10] sm:$0xff] %vm5113_vm3, %v5156_v9 }
 0xaa7   : > { %v5139_v57 = vpop.xlane.xlu1 %5138 }
 0xaa8   : > { %v5154_v20 = vadd.f32 %v5139_v57, %v5130_v47 }
 0xaaa   : > { %5162 = vst.msk [vmem:[#allocation4] sm:$0xff] %vm5113_vm3, %v5154_v20 }
 0xaaf   : > { %v5145_v61 = vpop.xlane.xlu1 %5144  ;;  %v5141_v10 = vpop.xlane.xlu2 %5140 }
 0xab0   : > { %v5157_v21 = vadd.f32 %v5145_v61, %v5133_v0  ;;  %v5155_v58 = vadd.f32 %v5141_v10, %v5131_v32  ;;  %v5023_v0 = vmul.f32 %v6158_v36, %v5015_v55 }
 0xab2   : > { %5165 = vst.msk [vmem:[#allocation4 + $0x18] sm:$0xff] %vm5113_vm3, %v5157_v21  ;;  %v5137_v21 = vld [vmem:[#allocation4 + $0x38] sm:$0xff] }
 0xab3   : > { %5163 = vst.msk [vmem:[#allocation4 + $0x8] sm:$0xff] %vm5113_vm3, %v5155_v58 }
 0xab7   : > { %v5147_v49 = vpop.xlane.xlu2 %5146 }
 0xab8   : > { %v5158_v48 = vadd.f32 %v5147_v49, %v5134_v7 }
 0xaba   : > { %5166 = vst.msk [vmem:[#allocation4 + $0x20] sm:$0xff] %vm5113_vm3, %v5158_v48 }
 0xad4   : > { %v5090_v63 = vpop.xlane.xlu0 %5089 }
 0xad5   : > { %v5105_v29 = vadd.f32 %v5090_v63, %v5017_v46 }
 0xad7   : > { %5114 = vst.msk [vmem:[#allocation3] sm:$0xff] %vm5113_vm3, %v5105_v29 }
 0xae4   : > { %v5098_v22 = vpop.xlane.xlu0 %5097 }
 0xae5   : > { %v5109_v42 = vadd.f32 %v5098_v22, %v5021_v35 }
 0xae7   : > { %5118 = vst.msk [vmem:[#allocation3 + $0x20] sm:$0xff] %vm5113_vm3, %v5109_v42 }
 0xaeb   : > { %v5094_v24 = vpop.xlane.xlu1 %5093 }
 0xaec   : > { %v5107_v4 = vadd.f32 %v5094_v24, %v5019_v5 }
 0xaee   : > { %5116 = vst.msk [vmem:[#allocation3 + $0x10] sm:$0xff] %vm5113_vm3, %v5107_v4 }
 0xaf3   : > { %v5100_v28 = vpop.xlane.xlu1 %5099 }
 0xaf4   : > { %v5110_v30 = vadd.f32 %v5100_v28, %v5022_v1  ;;  %v5092_v44 = vpop.xlane.xlu2 %5091 }
 0xaf5   : > { %v5106_v45 = vadd.f32 %v5092_v44, %v5018_v26 }
 0xaf6   : > { %5119 = vst.msk [vmem:[#allocation3 + $0x28] sm:$0xff] %vm5113_vm3, %v5110_v30 }
 0xaf7   : > { %5115 = vst.msk [vmem:[#allocation3 + $0x8] sm:$0xff] %vm5113_vm3, %v5106_v45 }
 0xafb   : > { %v5104_v3 = vpop.xlane.xlu0 %5103  ;;  %v5151_v8 = vpop.xlane.xlu1 %5150 }
 0xafc   : > { %v5096_v9 = vpop.xlane.xlu2 %5095  ;;  %v5112_v47 = vadd.f32 %v5104_v3, %v5024_v37  ;;  %v5160_v57 = vadd.f32 %v5151_v8, %v5136_v27 }
 0xafd   : > { %v5108_v20 = vadd.f32 %v5096_v9, %v5020_v39 }
 0xafe   : > { %5121 = vst.msk [vmem:[#allocation3 + $0x38] sm:$0xff] %vm5113_vm3, %v5112_v47 }
 0xaff   : > { %5117 = vst.msk [vmem:[#allocation3 + $0x18] sm:$0xff] %vm5113_vm3, %v5108_v20 }
 0xb00   : > { %5168 = vst.msk [vmem:[#allocation4 + $0x30] sm:$0xff] %vm5113_vm3, %v5160_v57 }
 0xb03   : > { %v5149_v32 = vpop.xlane.xlu0 %5148 }
 0xb04   : > { %v5102_v61 = vpop.xlane.xlu2 %5101  ;;  %v5159_v10 = vadd.f32 %v5149_v32, %v5135_v59 }
 0xb05   : > { %v5111_v23 = vadd.f32 %v5102_v61, %v5023_v0 }
 0xb06   : > { %5167 = vst.msk [vmem:[#allocation4 + $0x28] sm:$0xff] %vm5113_vm3, %v5159_v10 }
 0xb07   : > { %5120 = vst.msk [vmem:[#allocation3 + $0x30] sm:$0xff] %vm5113_vm3, %v5111_v23 }
 0xb0c   : > { %v5153_v58 = vpop.xlane.xlu2 %5152 }
 0xb0d   : > { %v5161_v7 = vadd.f32 %v5153_v58, %v5137_v21 }
 0xb0f   : > { %5169 = vst.msk [vmem:[#allocation4 + $0x38] sm:$0xff] %vm5113_vm3, %v5161_v7 }
 0xb10 PF: > { %s5517_s15 = sshll.u32 %s6217_s23, 6  ;;  %s5524_s16 = sshll.u32 %s6213_s22, 7 }
 0xb11   : > { %s5525_s17 = sadd.s32 128, %s5524_s16  ;;  %s5527_s18 = sadd.s32 64, %s5517_s15 }
 0xb12   : > { %p5173_p0 = scmp.lt.s32.totalorder %s5517_s15, %s5525_s17  ;;  %p5177_p1 = scmp.lt.s32.totalorder %s5524_s16, %s5527_s18 }
 0xb14   : > { %p5178_p2 = pnand %p5177_p1, %p5173_p0 }
 0xb16   : > { %5181 = sbr.rel (%p5178_p2) target bundleno = 2988 (0xbac), region = 86 }
 0xb1b   : > { %v5182_v49 = vlaneseq  ;;  %v5191_v48 = vstv %s5517_s15  ;;  %v5202_v60 = vstv %s5524_s16  ;;  %v10405_v54 = vld [vmem:[#allocation27_spill] sm:$0xff]  ;;  %v5204_v28 = vld [vmem:[#allocation5] sm:$0xff]  ;;  %vm5252_vm12 = vcmask 7168   ;;  %v5206_v30 = vld [vmem:[#allocation5 + $0x10] sm:$0xff] }
 0xb1c   : > { %v5208_v44 = vld [vmem:[#allocation5 + $0x20] sm:$0xff]  ;;  %v5205_v52 = vld [vmem:[#allocation5 + $0x8] sm:$0xff]  ;;  %v5210_v9 = vld [vmem:[#allocation5 + $0x30] sm:$0xff] }
 0xb1d   : > { %v5183_v51 = vshrl.u32 %v5182_v49, 7  ;;  %v5201_v46 = vand.u32 127, %v5182_v49  ;;  %v5209_v13 = vld [vmem:[#allocation5 + $0x28] sm:$0xff]  ;;  %v5211_v47 = vld [vmem:[#allocation5 + $0x38] sm:$0xff] }
 0xb1f   : > { %v5192_v63 = vadd.s32 %v5191_v48, %v5183_v51  ;;  %v5203_v29 = vadd.s32 %v5202_v60, %v5201_v46  ;;  %v5185_v31 = vadd.s32 16, %v5183_v51  ;;  %v5187_v43 = vadd.s32 32, %v5183_v51 }
 0xb20   : > { %v5186_v19 = vadd.s32 24, %v5183_v51  ;;  %v5184_v6 = vadd.s32 8, %v5183_v51  ;;  %v5188_v35 = vadd.s32 40, %v5183_v51  ;;  %v5189_v4 = vadd.s32 48, %v5183_v51 }
 0xb21   : > { %vm5212_vm4 = vcmp.eq.s32.totalorder %v5192_v63, %v5203_v29  ;;  %v5194_v22 = vadd.s32 %v5191_v48, %v5185_v31  ;;  %v5196_v16 = vadd.s32 %v5191_v48, %v5187_v43  ;;  %v5190_v25 = vadd.s32 56, %v5183_v51 }
 0xb22   : > { %v5220_v42 = vsel %vm5212_vm4, %v9053_v34, 0.0  ;;  %v5193_v33 = vadd.s32 %v5191_v48, %v5184_v6  ;;  %v5195_v53 = vadd.s32 %v5191_v48, %v5186_v19  ;;  %v5197_v15 = vadd.s32 %v5191_v48, %v5188_v35 }
 0xb23   : > { %5228 = vadd.xlane.f32.xlu0 %v5220_v42  ;;  %vm5214_vm5 = vcmp.eq.s32.totalorder %v5194_v22, %v5203_v29  ;;  %vm5216_vm6 = vcmp.eq.s32.totalorder %v5196_v16, %v5203_v29  ;;  %v5198_v34 = vadd.s32 %v5191_v48, %v5189_v4  ;;  %v5199_v56 = vadd.s32 %v5191_v48, %v5190_v25 }
 0xb24   : > { %v5222_v5 = vsel %vm5214_vm5, %v9075_v2, 0.0  ;;  %v5224_v24 = vsel %vm5216_vm6, %v9077_v12, 0.0  ;;  %vm5213_vm7 = vcmp.eq.s32.totalorder %v5193_v33, %v5203_v29  ;;  %vm5215_vm8 = vcmp.eq.s32.totalorder %v5195_v53, %v5203_v29  ;;  %v10406_v2 = vld [vmem:[#allocation29_spill] sm:$0xff] }
 0xb25   : > { %5232 = vadd.xlane.f32.xlu1 %v5222_v5  ;;  %5236 = vadd.xlane.f32.xlu2 %v5224_v24  ;;  %vm5217_vm9 = vcmp.eq.s32.totalorder %v5197_v15, %v5203_v29  ;;  %v5221_v11 = vsel %vm5213_vm7, %v10405_v54, 0.0  ;;  %v5223_v40 = vsel %vm5215_vm8, %v9062_v62, 0.0  ;;  %vm5218_vm10 = vcmp.eq.s32.totalorder %v5198_v34, %v5203_v29 }
 0xb26   : > { %v5225_v50 = vsel %vm5217_vm9, %v9071_v41, 0.0  ;;  %vm5219_vm11 = vcmp.eq.s32.totalorder %v5199_v56, %v5203_v29  ;;  %v5226_v12 = vsel %vm5218_vm10, %v10406_v2, 0.0 }
 0xb27   : > { %v5227_v1 = vsel %vm5219_vm11, %v9079_v14, 0.0  ;;  %v5207_v14 = vld [vmem:[#allocation5 + $0x18] sm:$0xff] }
 0xb2b   : > { %5230 = vadd.xlane.f32.xlu0 %v5221_v11 }
 0xb2d   : > { %5234 = vadd.xlane.f32.xlu1 %v5223_v40  ;;  %5238 = vadd.xlane.f32.xlu2 %v5225_v50 }
 0xb33   : > { %5240 = vadd.xlane.f32.xlu0 %v5226_v12 }
 0xb35   : > { %5242 = vadd.xlane.f32.xlu1 %v5227_v1 }
 0xb96   : > { %v5229_v26 = vpop.xlane.xlu0 %5228 }
 0xb97   : > { %v5244_v62 = vadd.f32 %v5229_v26, %v5204_v28 }
 0xb98   : > { %v5233_v45 = vpop.xlane.xlu1 %5232  ;;  %v5237_v41 = vpop.xlane.xlu2 %5236 }
 0xb99   : > { %5253 = vst.msk [vmem:[#allocation5] sm:$0xff] %vm5252_vm12, %v5244_v62  ;;  %v5246_v18 = vadd.f32 %v5233_v45, %v5206_v30  ;;  %v5248_v38 = vadd.f32 %v5237_v41, %v5208_v44 }
 0xb9b   : > { %5255 = vst.msk [vmem:[#allocation5 + $0x10] sm:$0xff] %vm5252_vm12, %v5246_v18 }
 0xb9c   : > { %5257 = vst.msk [vmem:[#allocation5 + $0x20] sm:$0xff] %vm5252_vm12, %v5248_v38 }
 0xb9e   : > { %v5231_v17 = vpop.xlane.xlu0 %5230 }
 0xb9f   : > { %v5245_v27 = vadd.f32 %v5231_v17, %v5205_v52 }
 0xba0   : > { %v5235_v37 = vpop.xlane.xlu1 %5234  ;;  %v5239_v39 = vpop.xlane.xlu2 %5238 }
 0xba1   : > { %v5247_v3 = vadd.f32 %v5235_v37, %v5207_v14  ;;  %5254 = vst.msk [vmem:[#allocation5 + $0x8] sm:$0xff] %vm5252_vm12, %v5245_v27  ;;  %v5249_v8 = vadd.f32 %v5239_v39, %v5209_v13 }
 0xba3   : > { %5256 = vst.msk [vmem:[#allocation5 + $0x18] sm:$0xff] %vm5252_vm12, %v5247_v3 }
 0xba4   : > { %5258 = vst.msk [vmem:[#allocation5 + $0x28] sm:$0xff] %vm5252_vm12, %v5249_v8 }
 0xba6   : > { %v5241_v57 = vpop.xlane.xlu0 %5240 }
 0xba7   : > { %v5250_v20 = vadd.f32 %v5241_v57, %v5210_v9 }
 0xba8   : > { %v5243_v36 = vpop.xlane.xlu1 %5242 }
 0xba9   : > { %v5251_v55 = vadd.f32 %v5243_v36, %v5211_v47  ;;  %5259 = vst.msk [vmem:[#allocation5 + $0x30] sm:$0xff] %vm5252_vm12, %v5250_v20 }
 0xbab   : > { %5260 = vst.msk [vmem:[#allocation5 + $0x38] sm:$0xff] %vm5252_vm12, %v5251_v55 }
 0xbac PF: > { %5263 = sbr.rel (%p5515_p13) target bundleno = 3020 (0xbcc), region = 90 }
 0xbb1   : > { %v5272_v59 = vld [vmem:[#allocation3] sm:$0xff]  ;;  %v5273_v0 = vld [vmem:[#allocation3 + $0x8] sm:$0xff]  ;;  %v5274_v32 = vld [vmem:[#allocation3 + $0x10] sm:$0xff]  ;;  %vm5304_vm13 = vcmask 7168  }
 0xbb2   : > { %6159 = vlog2.f32 %v5272_v59  ;;  %v5275_v61 = vld [vmem:[#allocation3 + $0x18] sm:$0xff]  ;;  %v5276_v10 = vld [vmem:[#allocation3 + $0x20] sm:$0xff]  ;;  %v5277_v23 = vld [vmem:[#allocation3 + $0x28] sm:$0xff] }
 0xbb3   : > { %6161 = vlog2.f32 %v5273_v0  ;;  %v5278_v21 = vld [vmem:[#allocation3 + $0x30] sm:$0xff]  ;;  %v5279_v58 = vld [vmem:[#allocation3 + $0x38] sm:$0xff]  ;;  %v5313_v7 = vld [vmem:[#allocation4] sm:$0xff] }
 0xbb4   : > { %6163 = vlog2.f32 %v5274_v32  ;;  %v5314_v49 = vld [vmem:[#allocation4 + $0x8] sm:$0xff]  ;;  %5321 = vst.msk [vmem:[%s6414_s9] sm:$0xff] %vm5304_vm13, %v5313_v7  ;;  %v5315_v48 = vld [vmem:[#allocation4 + $0x10] sm:$0xff]  ;;  %v5316_v60 = vld [vmem:[#allocation4 + $0x18] sm:$0xff] }
 0xbb5   : > { %6165 = vlog2.f32 %v5275_v61  ;;  %v5264_v46 = vld [vmem:[#allocation2] sm:$0xff]  ;;  %5322 = vst.msk [vmem:[%s6414_s9 + $0x8] sm:$0xff] %vm5304_vm13, %v5314_v49  ;;  %v5265_v43 = vld [vmem:[#allocation2 + $0x8] sm:$0xff]  ;;  %v5266_v22 = vld [vmem:[#allocation2 + $0x10] sm:$0xff] }
 0xbb6   : > { %6167 = vlog2.f32 %v5276_v10  ;;  %v5317_v63 = vld [vmem:[#allocation4 + $0x20] sm:$0xff]  ;;  %5323 = vst.msk [vmem:[%s6414_s9 + $0x10] sm:$0xff] %vm5304_vm13, %v5315_v48  ;;  %v5318_v19 = vld [vmem:[#allocation4 + $0x28] sm:$0xff]  ;;  %v5267_v53 = vld [vmem:[#allocation2 + $0x18] sm:$0xff] }
 0xbb7   : > { %6169 = vlog2.f32 %v5277_v23  ;;  %5324 = vst.msk [vmem:[%s6414_s9 + $0x18] sm:$0xff] %vm5304_vm13, %v5316_v60  ;;  %v5268_v4 = vld [vmem:[#allocation2 + $0x20] sm:$0xff]  ;;  %v5269_v34 = vld [vmem:[#allocation2 + $0x28] sm:$0xff]  ;;  %v5270_v2 = vld [vmem:[#allocation2 + $0x30] sm:$0xff] }
 0xbb8   : > { %v6160_v51 = vpop.eup %6159  ;;  %6171 = vlog2.f32 %v5278_v21  ;;  %5325 = vst.msk [vmem:[%s6414_s9 + $0x20] sm:$0xff] %vm5304_vm13, %v5317_v63  ;;  %v5271_v26 = vld [vmem:[#allocation2 + $0x38] sm:$0xff]  ;;  %v5319_v41 = vld [vmem:[#allocation4 + $0x30] sm:$0xff]  ;;  %v5329_v38 = vld [vmem:[#allocation5] sm:$0xff] }
 0xbb9   : > { %v6162_v29 = vpop.eup %6161  ;;  %v5281_v31 = vmul.f32 0.6931472, %v6160_v51  ;;  %6173 = vlog2.f32 %v5279_v58  ;;  %5326 = vst.msk [vmem:[%s6414_s9 + $0x28] sm:$0xff] %vm5304_vm13, %v5318_v19  ;;  %v5320_v18 = vld [vmem:[#allocation4 + $0x38] sm:$0xff]  ;;  %v5330_v52 = vld [vmem:[#allocation5 + $0x8] sm:$0xff]  ;;  %v5331_v14 = vld [vmem:[#allocation5 + $0x10] sm:$0xff] }
 0xbba   : > { %v6164_v6 = vpop.eup %6163  ;;  %v5283_v35 = vmul.f32 0.6931472, %v6162_v29  ;;  %5327 = vst.msk [vmem:[%s6414_s9 + $0x30] sm:$0xff] %vm5304_vm13, %v5319_v41  ;;  %v5332_v17 = vld [vmem:[#allocation5 + $0x18] sm:$0xff]  ;;  %v5333_v13 = vld [vmem:[#allocation5 + $0x20] sm:$0xff]  ;;  %v5334_v27 = vld [vmem:[#allocation5 + $0x28] sm:$0xff] }
 0xbbb   : > { %v6166_v16 = vpop.eup %6165  ;;  %v5296_v42 = vadd.f32 %v5281_v31, %v5264_v46  ;;  %v5285_v33 = vmul.f32 0.6931472, %v6164_v6  ;;  %5328 = vst.msk [vmem:[%s6414_s9 + $0x38] sm:$0xff] %vm5304_vm13, %v5320_v18  ;;  %v5335_v37 = vld [vmem:[#allocation5 + $0x30] sm:$0xff]  ;;  %v5336_v39 = vld [vmem:[#allocation5 + $0x38] sm:$0xff] }
 0xbbc   : > { %v6168_v15 = vpop.eup %6167  ;;  %v5297_v5 = vadd.f32 %v5283_v35, %v5265_v43  ;;  %v5287_v24 = vmul.f32 0.6931472, %v6166_v16  ;;  %5337 = vst.msk [vmem:[%s6419_s11] sm:$0xff] %vm5304_vm13, %v5329_v38 }
 0xbbd   : > { %v6170_v25 = vpop.eup %6169  ;;  %5305 = vst.msk [vmem:[%s6409_s6] sm:$0xff] %vm5304_vm13, %v5296_v42  ;;  %v5298_v54 = vadd.f32 %v5285_v33, %v5266_v22  ;;  %v5289_v11 = vmul.f32 0.6931472, %v6168_v15 }
 0xbbe   : > { %v6172_v40 = vpop.eup %6171  ;;  %5306 = vst.msk [vmem:[%s6409_s6 + $0x8] sm:$0xff] %vm5304_vm13, %v5297_v5  ;;  %v5299_v50 = vadd.f32 %v5287_v24, %v5267_v53  ;;  %v5291_v56 = vmul.f32 0.6931472, %v6170_v25 }
 0xbbf   : > { %v6174_v12 = vpop.eup %6173  ;;  %5307 = vst.msk [vmem:[%s6409_s6 + $0x10] sm:$0xff] %vm5304_vm13, %v5298_v54  ;;  %v5300_v1 = vadd.f32 %v5289_v11, %v5268_v4  ;;  %v5293_v28 = vmul.f32 0.6931472, %v6172_v40 }
 0xbc0   : > { %5308 = vst.msk [vmem:[%s6409_s6 + $0x18] sm:$0xff] %vm5304_vm13, %v5299_v50  ;;  %v5301_v30 = vadd.f32 %v5291_v56, %v5269_v34  ;;  %v5295_v44 = vmul.f32 0.6931472, %v6174_v12 }
 0xbc1   : > { %5309 = vst.msk [vmem:[%s6409_s6 + $0x20] sm:$0xff] %vm5304_vm13, %v5300_v1  ;;  %v5302_v62 = vadd.f32 %v5293_v28, %v5270_v2 }
 0xbc2   : > { %5310 = vst.msk [vmem:[%s6409_s6 + $0x28] sm:$0xff] %vm5304_vm13, %v5301_v30  ;;  %v5303_v45 = vadd.f32 %v5295_v44, %v5271_v26 }
 0xbc3   : > { %5311 = vst.msk [vmem:[%s6409_s6 + $0x30] sm:$0xff] %vm5304_vm13, %v5302_v62 }
 0xbc4   : > { %5312 = vst.msk [vmem:[%s6409_s6 + $0x38] sm:$0xff] %vm5304_vm13, %v5303_v45 }
 0xbc5   : > { %5338 = vst.msk [vmem:[%s6419_s11 + $0x8] sm:$0xff] %vm5304_vm13, %v5330_v52 }
 0xbc6   : > { %5339 = vst.msk [vmem:[%s6419_s11 + $0x10] sm:$0xff] %vm5304_vm13, %v5331_v14 }
 0xbc7   : > { %5340 = vst.msk [vmem:[%s6419_s11 + $0x18] sm:$0xff] %vm5304_vm13, %v5332_v17 }
 0xbc8   : > { %5341 = vst.msk [vmem:[%s6419_s11 + $0x20] sm:$0xff] %vm5304_vm13, %v5333_v13 }
 0xbc9   : > { %5342 = vst.msk [vmem:[%s6419_s11 + $0x28] sm:$0xff] %vm5304_vm13, %v5334_v27 }
 0xbca   : > { %5343 = vst.msk [vmem:[%s6419_s11 + $0x30] sm:$0xff] %vm5304_vm13, %v5335_v37 }
 0xbcb   : > { %5344 = vst.msk [vmem:[%s6419_s11 + $0x38] sm:$0xff] %vm5304_vm13, %v5336_v39 }
 0xbcc PF: > { %s17_s26 = sadd.s32 1, %s6229_s26   ;;  %s10407_s20 = smov %s6209_s21 }
 0xbcd   : > { %p14_p3 = scmp.ge.s32.totalorder %s17_s26, 8   ;;  %s10408_s21 = smov %s6389_s30 }
 0xbce   : > { %s10409_s22 = smov %s6221_s24  ;;  %s10410_s23 = smov %s6225_s25 }
 0xbcf   : > { %s10411_s24 = smov %s10414_s2  ;;  %s10412_s25 = smov %s10418_s27 }
 0xbd0   :  { %16 = sbr.rel (!%p14_p3) target bundleno = 6 (0x6), region = 152 }

</bundles_post_ra>
